<compile_context>
chip_gen: v5e
topology: v5e:2x2
jax: 0.10.0
libtpu: 0.0.40
codegen_flags: <defaults>
</compile_context>

<pallas_src>
import jax
import jax.numpy as jnp
from jax.experimental import pallas as pl
from jax.experimental.pallas import tpu as pltpu

CHANNELS = [2048, 1024, 512, 256, 128, 64, 32]   # 6 conv blocks
NUM_CLASSES = 4
BN_EPS = 1e-5
AUX_ROWS = 16          # sublane-padded; rows 0..11 = gamma/beta pairs, row 12 = linear bias
AUX_COLS = 1024        # = max Cout


def domainnet_kernel(x_ref, w0, w1, w2, w3, w4, w5, lin_w_ref, aux_ref, out_ref):
    w_refs = (w0, w1, w2, w3, w4, w5)
    h = x_ref[...]                                           # (N, 2048) f32

    for i in range(6):                                       # unrolled at trace time
        cout = CHANNELS[i + 1]
        w = w_refs[i][...]                                   # (Cin, Cout) bf16 center-tap weight

        # Conv1d(k=3, s=2, p=1) on L=1  ==  center-tap matmul. Conv bias omitted:
        # exactly cancelled by the BN mean subtraction below.
        z = jnp.dot(h.astype(jnp.bfloat16), w,
                    preferred_element_type=jnp.float32)      # (N, Cout) f32 accum

        # BatchNorm1d, training mode: biased per-channel batch stats.
        mean = jnp.mean(z, axis=0, keepdims=True)            # (1, Cout)
        zc = z - mean                                        # centered, reused below
        var = jnp.mean(zc * zc, axis=0, keepdims=True)       # (1, Cout)
        gamma = aux_ref[2 * i:2 * i + 1, 0:cout]             # (1, Cout)
        beta = aux_ref[2 * i + 1:2 * i + 2, 0:cout]          # (1, Cout)
        scale = gamma * jax.lax.rsqrt(var + BN_EPS)          # tiny (1, Cout) mul
        # ReLU fused in.
        h = jnp.maximum(zc * scale + beta, 0.0)

    lin_w = lin_w_ref[...]                                   # (32, 4) f32
    lin_b = aux_ref[12:13, 0:NUM_CLASSES]                    # (1, 4)
    out_ref[...] = jnp.dot(h, lin_w, preferred_element_type=jnp.float32) + lin_b


def domainnet_forward(x, weights, lin_w, aux):
    n = x.shape[0]
    flat = [x, *weights, lin_w, aux]
    return pl.pallas_call(
        domainnet_kernel,
        out_shape=jax.ShapeDtypeStruct((n, NUM_CLASSES), jnp.float32),
        in_specs=[pl.BlockSpec(memory_space=pltpu.MemorySpace.VMEM)] * len(flat),
        out_specs=pl.BlockSpec(memory_space=pltpu.MemorySpace.VMEM),
        compiler_params=pltpu.CompilerParams(vmem_limit_bytes=40 * 1024 * 1024),
    )(*flat)


domainnet_forward_jit = jax.jit(domainnet_forward)


def domainnet_ref(x, weights, gammas, betas, lin_w, lin_b):
    """Pure-JAX reference of the same (mixed-precision) forward, for correctness."""
    h = x
    for i in range(6):
        z = jnp.dot(h.astype(jnp.bfloat16), weights[i],
                    preferred_element_type=jnp.float32)
        mean = z.mean(0, keepdims=True)
        zc = z - mean
        var = (zc * zc).mean(0, keepdims=True)
        scale = gammas[i] * jax.lax.rsqrt(var + BN_EPS)
        h = jnp.maximum(zc * scale + betas[i], 0.0)
    return jnp.dot(h, lin_w, preferred_element_type=jnp.float32) + lin_b


def init_params(key):
    """Deterministic synthetic parameters (shapes follow the PyTorch __init__)."""
    weights, gammas, betas = [], [], []
    for i in range(6):
        cin, cout = CHANNELS[i], CHANNELS[i + 1]
        key, kw = jax.random.split(key)
        # PyTorch Conv1d default init bound: 1/sqrt(fan_in), fan_in = cin * kernel_size.
        scale = 1.0 / float(jnp.sqrt(jnp.float32(cin * 3)))
        # Only the center tap of the (cout, cin, 3) weight matters; materialize it
        # directly in (cin, cout) matmul layout, stored bf16 (f32 accumulation in-kernel).
        w = jax.random.uniform(kw, (cin, cout), jnp.float32, -scale, scale)
        weights.append(w.astype(jnp.bfloat16))
        gammas.append(jnp.ones((cout,), jnp.float32))    # BatchNorm1d default weight
        betas.append(jnp.zeros((cout,), jnp.float32))    # BatchNorm1d default bias
        # Conv bias intentionally not materialized: cancelled exactly by BN mean subtraction.

    key, kw, kb = jax.random.split(key, 3)
    lscale = 1.0 / float(jnp.sqrt(jnp.float32(CHANNELS[-1])))
    lin_w = jax.random.uniform(kw, (CHANNELS[-1], NUM_CLASSES), jnp.float32, -lscale, lscale)
    lin_b = jax.random.uniform(kb, (NUM_CLASSES,), jnp.float32, -lscale, lscale)
    return weights, gammas, betas, lin_w, lin_b


def pack_aux(gammas, betas, lin_b):
    """Pack all tiny per-channel vectors into one (16, 1024) array (single DMA)."""
    aux = jnp.zeros((AUX_ROWS, AUX_COLS), jnp.float32)
    for i, cout in enumerate(CHANNELS[1:]):
        aux = aux.at[2 * i, :cout].set(gammas[i])
        aux = aux.at[2 * i + 1, :cout].set(betas[i])
    aux = aux.at[12, :NUM_CLASSES].set(lin_b)
    return aux


if __name__ == "__main__":
    key = jax.random.PRNGKey(0)
    kx, kp = jax.random.split(key)

    N = 8                                   # small batch; channel sizes are fixed by the module
    x = jax.random.normal(kx, (N, CHANNELS[0]), jnp.float32)   # latent: (N, 2048)
    weights, gammas, betas, lin_w, lin_b = init_params(kp)
    aux = pack_aux(gammas, betas, lin_b)

    out = domainnet_forward_jit(x, weights, lin_w, aux)
    jax.block_until_ready(out)

    ref = domainnet_ref(x, weights, gammas, betas, lin_w, lin_b)
    assert out.shape == (N, NUM_CLASSES)
    assert jnp.allclose(out, ref, atol=1e-3, rtol=1e-3), "Pallas output mismatch vs reference"

    print("KERNEL_OK")
</pallas_src>

<mosaic_0001>
module attributes {stable_mosaic.version = 11 : i64} {
  func.func @domainnet_kernel(%arg0: memref<8x2048xf32, #tpu.memory_space<vmem>>, %arg1: memref<2048x1024xbf16, #tpu.memory_space<vmem>>, %arg2: memref<1024x512xbf16, #tpu.memory_space<vmem>>, %arg3: memref<512x256xbf16, #tpu.memory_space<vmem>>, %arg4: memref<256x128xbf16, #tpu.memory_space<vmem>>, %arg5: memref<128x64xbf16, #tpu.memory_space<vmem>>, %arg6: memref<64x32xbf16, #tpu.memory_space<vmem>>, %arg7: memref<32x4xf32, #tpu.memory_space<vmem>>, %arg8: memref<16x1024xf32, #tpu.memory_space<vmem>>, %arg9: memref<8x4xf32, #tpu.memory_space<vmem>>) attributes {dimension_semantics = [], scalar_prefetch = 0 : i64, scratch_operands = 0 : i64, tpu.core_type = #tpu.core_type<tc>} {
    %c0 = arith.constant 0 : index
    %c0_0 = arith.constant 0 : index
    %0 = vector.load %arg0[%c0, %c0_0] : memref<8x2048xf32, #tpu.memory_space<vmem>>, vector<8x2048xf32>
    %c0_1 = arith.constant 0 : index
    %c0_2 = arith.constant 0 : index
    %1 = vector.load %arg1[%c0_1, %c0_2] : memref<2048x1024xbf16, #tpu.memory_space<vmem>>, vector<2048x1024xbf16>
    %2 = arith.truncf %0 : vector<8x2048xf32> to vector<8x2048xbf16>
    %cst = arith.constant dense<0.000000e+00> : vector<8x1024xf32>
    %3 = tpu.matmul %2, %1, %cst {dimension_numbers = #tpu.dot_dimension_numbers<[1], [0], [0], [1], [0, 0, 1, 1], [], []>} : vector<8x2048xbf16>, vector<2048x1024xbf16>, vector<8x1024xf32> -> vector<8x1024xf32>
    %cst_3 = arith.constant dense<0.000000e+00> : vector<1024xf32>
    %4 = vector.multi_reduction <add>, %3, %cst_3 [0] : vector<8x1024xf32> to vector<1024xf32>
    %5 = vector.shape_cast %4 : vector<1024xf32> to vector<1x1024xf32>
    %cst_4 = arith.constant 8.000000e+00 : f32
    %6 = vector.broadcast %cst_4 : f32 to vector<1x1024xf32>
    %7 = arith.divf %5, %6 : vector<1x1024xf32>
    %8 = vector.broadcast %7 : vector<1x1024xf32> to vector<8x1024xf32>
    %9 = arith.subf %3, %8 : vector<8x1024xf32>
    %10 = arith.mulf %9, %9 : vector<8x1024xf32>
    %cst_5 = arith.constant dense<0.000000e+00> : vector<1024xf32>
    %11 = vector.multi_reduction <add>, %10, %cst_5 [0] : vector<8x1024xf32> to vector<1024xf32>
    %12 = vector.shape_cast %11 : vector<1024xf32> to vector<1x1024xf32>
    %cst_6 = arith.constant 8.000000e+00 : f32
    %13 = vector.broadcast %cst_6 : f32 to vector<1x1024xf32>
    %14 = arith.divf %12, %13 : vector<1x1024xf32>
    %c0_7 = arith.constant 0 : index
    %c0_8 = arith.constant 0 : index
    %15 = vector.load %arg8[%c0_7, %c0_8] : memref<16x1024xf32, #tpu.memory_space<vmem>>, vector<1x1024xf32>
    %c1 = arith.constant 1 : index
    %c0_9 = arith.constant 0 : index
    %16 = vector.load %arg8[%c1, %c0_9] : memref<16x1024xf32, #tpu.memory_space<vmem>>, vector<1x1024xf32>
    %cst_10 = arith.constant 9.99999974E-6 : f32
    %17 = vector.broadcast %cst_10 : f32 to vector<1x1024xf32>
    %18 = arith.addf %14, %17 : vector<1x1024xf32>
    %19 = math.rsqrt %18 : vector<1x1024xf32>
    %20 = arith.mulf %15, %19 : vector<1x1024xf32>
    %21 = vector.broadcast %20 : vector<1x1024xf32> to vector<8x1024xf32>
    %22 = arith.mulf %9, %21 : vector<8x1024xf32>
    %23 = vector.broadcast %16 : vector<1x1024xf32> to vector<8x1024xf32>
    %24 = arith.addf %22, %23 : vector<8x1024xf32>
    %cst_11 = arith.constant 0.000000e+00 : f32
    %25 = vector.broadcast %cst_11 : f32 to vector<8x1024xf32>
    %26 = arith.maximumf %24, %25 : vector<8x1024xf32>
    %c0_12 = arith.constant 0 : index
    %c0_13 = arith.constant 0 : index
    %27 = vector.load %arg2[%c0_12, %c0_13] : memref<1024x512xbf16, #tpu.memory_space<vmem>>, vector<1024x512xbf16>
    %28 = arith.truncf %26 : vector<8x1024xf32> to vector<8x1024xbf16>
    %cst_14 = arith.constant dense<0.000000e+00> : vector<8x512xf32>
    %29 = tpu.matmul %28, %27, %cst_14 {dimension_numbers = #tpu.dot_dimension_numbers<[1], [0], [0], [1], [0, 0, 1, 1], [], []>} : vector<8x1024xbf16>, vector<1024x512xbf16>, vector<8x512xf32> -> vector<8x512xf32>
    %cst_15 = arith.constant dense<0.000000e+00> : vector<512xf32>
    %30 = vector.multi_reduction <add>, %29, %cst_15 [0] : vector<8x512xf32> to vector<512xf32>
    %31 = vector.shape_cast %30 : vector<512xf32> to vector<1x512xf32>
    %cst_16 = arith.constant 8.000000e+00 : f32
    %32 = vector.broadcast %cst_16 : f32 to vector<1x512xf32>
    %33 = arith.divf %31, %32 : vector<1x512xf32>
    %34 = vector.broadcast %33 : vector<1x512xf32> to vector<8x512xf32>
    %35 = arith.subf %29, %34 : vector<8x512xf32>
    %36 = arith.mulf %35, %35 : vector<8x512xf32>
    %cst_17 = arith.constant dense<0.000000e+00> : vector<512xf32>
    %37 = vector.multi_reduction <add>, %36, %cst_17 [0] : vector<8x512xf32> to vector<512xf32>
    %38 = vector.shape_cast %37 : vector<512xf32> to vector<1x512xf32>
    %cst_18 = arith.constant 8.000000e+00 : f32
    %39 = vector.broadcast %cst_18 : f32 to vector<1x512xf32>
    %40 = arith.divf %38, %39 : vector<1x512xf32>
    %c2 = arith.constant 2 : index
    %c0_19 = arith.constant 0 : index
    %41 = vector.load %arg8[%c2, %c0_19] : memref<16x1024xf32, #tpu.memory_space<vmem>>, vector<1x512xf32>
    %c3 = arith.constant 3 : index
    %c0_20 = arith.constant 0 : index
    %42 = vector.load %arg8[%c3, %c0_20] : memref<16x1024xf32, #tpu.memory_space<vmem>>, vector<1x512xf32>
    %cst_21 = arith.constant 9.99999974E-6 : f32
    %43 = vector.broadcast %cst_21 : f32 to vector<1x512xf32>
    %44 = arith.addf %40, %43 : vector<1x512xf32>
    %45 = math.rsqrt %44 : vector<1x512xf32>
    %46 = arith.mulf %41, %45 : vector<1x512xf32>
    %47 = vector.broadcast %46 : vector<1x512xf32> to vector<8x512xf32>
    %48 = arith.mulf %35, %47 : vector<8x512xf32>
    %49 = vector.broadcast %42 : vector<1x512xf32> to vector<8x512xf32>
    %50 = arith.addf %48, %49 : vector<8x512xf32>
    %cst_22 = arith.constant 0.000000e+00 : f32
    %51 = vector.broadcast %cst_22 : f32 to vector<8x512xf32>
    %52 = arith.maximumf %50, %51 : vector<8x512xf32>
    %c0_23 = arith.constant 0 : index
    %c0_24 = arith.constant 0 : index
    %53 = vector.load %arg3[%c0_23, %c0_24] : memref<512x256xbf16, #tpu.memory_space<vmem>>, vector<512x256xbf16>
    %54 = arith.truncf %52 : vector<8x512xf32> to vector<8x512xbf16>
    %cst_25 = arith.constant dense<0.000000e+00> : vector<8x256xf32>
    %55 = tpu.matmul %54, %53, %cst_25 {dimension_numbers = #tpu.dot_dimension_numbers<[1], [0], [0], [1], [0, 0, 1, 1], [], []>} : vector<8x512xbf16>, vector<512x256xbf16>, vector<8x256xf32> -> vector<8x256xf32>
    %cst_26 = arith.constant dense<0.000000e+00> : vector<256xf32>
    %56 = vector.multi_reduction <add>, %55, %cst_26 [0] : vector<8x256xf32> to vector<256xf32>
    %57 = vector.shape_cast %56 : vector<256xf32> to vector<1x256xf32>
    %cst_27 = arith.constant 8.000000e+00 : f32
    %58 = vector.broadcast %cst_27 : f32 to vector<1x256xf32>
    %59 = arith.divf %57, %58 : vector<1x256xf32>
    %60 = vector.broadcast %59 : vector<1x256xf32> to vector<8x256xf32>
    %61 = arith.subf %55, %60 : vector<8x256xf32>
    %62 = arith.mulf %61, %61 : vector<8x256xf32>
    %cst_28 = arith.constant dense<0.000000e+00> : vector<256xf32>
    %63 = vector.multi_reduction <add>, %62, %cst_28 [0] : vector<8x256xf32> to vector<256xf32>
    %64 = vector.shape_cast %63 : vector<256xf32> to vector<1x256xf32>
    %cst_29 = arith.constant 8.000000e+00 : f32
    %65 = vector.broadcast %cst_29 : f32 to vector<1x256xf32>
    %66 = arith.divf %64, %65 : vector<1x256xf32>
    %c4 = arith.constant 4 : index
    %c0_30 = arith.constant 0 : index
    %67 = vector.load %arg8[%c4, %c0_30] : memref<16x1024xf32, #tpu.memory_space<vmem>>, vector<1x256xf32>
    %c5 = arith.constant 5 : index
    %c0_31 = arith.constant 0 : index
    %68 = vector.load %arg8[%c5, %c0_31] : memref<16x1024xf32, #tpu.memory_space<vmem>>, vector<1x256xf32>
    %cst_32 = arith.constant 9.99999974E-6 : f32
    %69 = vector.broadcast %cst_32 : f32 to vector<1x256xf32>
    %70 = arith.addf %66, %69 : vector<1x256xf32>
    %71 = math.rsqrt %70 : vector<1x256xf32>
    %72 = arith.mulf %67, %71 : vector<1x256xf32>
    %73 = vector.broadcast %72 : vector<1x256xf32> to vector<8x256xf32>
    %74 = arith.mulf %61, %73 : vector<8x256xf32>
    %75 = vector.broadcast %68 : vector<1x256xf32> to vector<8x256xf32>
    %76 = arith.addf %74, %75 : vector<8x256xf32>
    %cst_33 = arith.constant 0.000000e+00 : f32
    %77 = vector.broadcast %cst_33 : f32 to vector<8x256xf32>
    %78 = arith.maximumf %76, %77 : vector<8x256xf32>
    %c0_34 = arith.constant 0 : index
    %c0_35 = arith.constant 0 : index
    %79 = vector.load %arg4[%c0_34, %c0_35] : memref<256x128xbf16, #tpu.memory_space<vmem>>, vector<256x128xbf16>
    %80 = arith.truncf %78 : vector<8x256xf32> to vector<8x256xbf16>
    %cst_36 = arith.constant dense<0.000000e+00> : vector<8x128xf32>
    %81 = tpu.matmul %80, %79, %cst_36 {dimension_numbers = #tpu.dot_dimension_numbers<[1], [0], [0], [1], [0, 0, 1, 1], [], []>} : vector<8x256xbf16>, vector<256x128xbf16>, vector<8x128xf32> -> vector<8x128xf32>
    %cst_37 = arith.constant dense<0.000000e+00> : vector<128xf32>
    %82 = vector.multi_reduction <add>, %81, %cst_37 [0] : vector<8x128xf32> to vector<128xf32>
    %83 = vector.shape_cast %82 : vector<128xf32> to vector<1x128xf32>
    %cst_38 = arith.constant 8.000000e+00 : f32
    %84 = vector.broadcast %cst_38 : f32 to vector<1x128xf32>
    %85 = arith.divf %83, %84 : vector<1x128xf32>
    %86 = vector.broadcast %85 : vector<1x128xf32> to vector<8x128xf32>
    %87 = arith.subf %81, %86 : vector<8x128xf32>
    %88 = arith.mulf %87, %87 : vector<8x128xf32>
    %cst_39 = arith.constant dense<0.000000e+00> : vector<128xf32>
    %89 = vector.multi_reduction <add>, %88, %cst_39 [0] : vector<8x128xf32> to vector<128xf32>
    %90 = vector.shape_cast %89 : vector<128xf32> to vector<1x128xf32>
    %cst_40 = arith.constant 8.000000e+00 : f32
    %91 = vector.broadcast %cst_40 : f32 to vector<1x128xf32>
    %92 = arith.divf %90, %91 : vector<1x128xf32>
    %c6 = arith.constant 6 : index
    %c0_41 = arith.constant 0 : index
    %93 = vector.load %arg8[%c6, %c0_41] : memref<16x1024xf32, #tpu.memory_space<vmem>>, vector<1x128xf32>
    %c7 = arith.constant 7 : index
    %c0_42 = arith.constant 0 : index
    %94 = vector.load %arg8[%c7, %c0_42] : memref<16x1024xf32, #tpu.memory_space<vmem>>, vector<1x128xf32>
    %cst_43 = arith.constant 9.99999974E-6 : f32
    %95 = vector.broadcast %cst_43 : f32 to vector<1x128xf32>
    %96 = arith.addf %92, %95 : vector<1x128xf32>
    %97 = math.rsqrt %96 : vector<1x128xf32>
    %98 = arith.mulf %93, %97 : vector<1x128xf32>
    %99 = vector.broadcast %98 : vector<1x128xf32> to vector<8x128xf32>
    %100 = arith.mulf %87, %99 : vector<8x128xf32>
    %101 = vector.broadcast %94 : vector<1x128xf32> to vector<8x128xf32>
    %102 = arith.addf %100, %101 : vector<8x128xf32>
    %cst_44 = arith.constant 0.000000e+00 : f32
    %103 = vector.broadcast %cst_44 : f32 to vector<8x128xf32>
    %104 = arith.maximumf %102, %103 : vector<8x128xf32>
    %c0_45 = arith.constant 0 : index
    %c0_46 = arith.constant 0 : index
    %105 = vector.load %arg5[%c0_45, %c0_46] : memref<128x64xbf16, #tpu.memory_space<vmem>>, vector<128x64xbf16>
    %106 = arith.truncf %104 : vector<8x128xf32> to vector<8x128xbf16>
    %cst_47 = arith.constant dense<0.000000e+00> : vector<8x64xf32>
    %107 = tpu.matmul %106, %105, %cst_47 {dimension_numbers = #tpu.dot_dimension_numbers<[1], [0], [0], [1], [0, 0, 1, 1], [], []>} : vector<8x128xbf16>, vector<128x64xbf16>, vector<8x64xf32> -> vector<8x64xf32>
    %cst_48 = arith.constant dense<0.000000e+00> : vector<64xf32>
    %108 = vector.multi_reduction <add>, %107, %cst_48 [0] : vector<8x64xf32> to vector<64xf32>
    %109 = vector.shape_cast %108 : vector<64xf32> to vector<1x64xf32>
    %cst_49 = arith.constant 8.000000e+00 : f32
    %110 = vector.broadcast %cst_49 : f32 to vector<1x64xf32>
    %111 = arith.divf %109, %110 : vector<1x64xf32>
    %112 = vector.broadcast %111 : vector<1x64xf32> to vector<8x64xf32>
    %113 = arith.subf %107, %112 : vector<8x64xf32>
    %114 = arith.mulf %113, %113 : vector<8x64xf32>
    %cst_50 = arith.constant dense<0.000000e+00> : vector<64xf32>
    %115 = vector.multi_reduction <add>, %114, %cst_50 [0] : vector<8x64xf32> to vector<64xf32>
    %116 = vector.shape_cast %115 : vector<64xf32> to vector<1x64xf32>
    %cst_51 = arith.constant 8.000000e+00 : f32
    %117 = vector.broadcast %cst_51 : f32 to vector<1x64xf32>
    %118 = arith.divf %116, %117 : vector<1x64xf32>
    %c8 = arith.constant 8 : index
    %c0_52 = arith.constant 0 : index
    %119 = vector.load %arg8[%c8, %c0_52] : memref<16x1024xf32, #tpu.memory_space<vmem>>, vector<1x64xf32>
    %c9 = arith.constant 9 : index
    %c0_53 = arith.constant 0 : index
    %120 = vector.load %arg8[%c9, %c0_53] : memref<16x1024xf32, #tpu.memory_space<vmem>>, vector<1x64xf32>
    %cst_54 = arith.constant 9.99999974E-6 : f32
    %121 = vector.broadcast %cst_54 : f32 to vector<1x64xf32>
    %122 = arith.addf %118, %121 : vector<1x64xf32>
    %123 = math.rsqrt %122 : vector<1x64xf32>
    %124 = arith.mulf %119, %123 : vector<1x64xf32>
    %125 = vector.broadcast %124 : vector<1x64xf32> to vector<8x64xf32>
    %126 = arith.mulf %113, %125 : vector<8x64xf32>
    %127 = vector.broadcast %120 : vector<1x64xf32> to vector<8x64xf32>
    %128 = arith.addf %126, %127 : vector<8x64xf32>
    %cst_55 = arith.constant 0.000000e+00 : f32
    %129 = vector.broadcast %cst_55 : f32 to vector<8x64xf32>
    %130 = arith.maximumf %128, %129 : vector<8x64xf32>
    %c0_56 = arith.constant 0 : index
    %c0_57 = arith.constant 0 : index
    %131 = vector.load %arg6[%c0_56, %c0_57] : memref<64x32xbf16, #tpu.memory_space<vmem>>, vector<64x32xbf16>
    %132 = arith.truncf %130 : vector<8x64xf32> to vector<8x64xbf16>
    %cst_58 = arith.constant dense<0.000000e+00> : vector<8x32xf32>
    %133 = tpu.matmul %132, %131, %cst_58 {dimension_numbers = #tpu.dot_dimension_numbers<[1], [0], [0], [1], [0, 0, 1, 1], [], []>} : vector<8x64xbf16>, vector<64x32xbf16>, vector<8x32xf32> -> vector<8x32xf32>
    %cst_59 = arith.constant dense<0.000000e+00> : vector<32xf32>
    %134 = vector.multi_reduction <add>, %133, %cst_59 [0] : vector<8x32xf32> to vector<32xf32>
    %135 = vector.shape_cast %134 : vector<32xf32> to vector<1x32xf32>
    %cst_60 = arith.constant 8.000000e+00 : f32
    %136 = vector.broadcast %cst_60 : f32 to vector<1x32xf32>
    %137 = arith.divf %135, %136 : vector<1x32xf32>
    %138 = vector.broadcast %137 : vector<1x32xf32> to vector<8x32xf32>
    %139 = arith.subf %133, %138 : vector<8x32xf32>
    %140 = arith.mulf %139, %139 : vector<8x32xf32>
    %cst_61 = arith.constant dense<0.000000e+00> : vector<32xf32>
    %141 = vector.multi_reduction <add>, %140, %cst_61 [0] : vector<8x32xf32> to vector<32xf32>
    %142 = vector.shape_cast %141 : vector<32xf32> to vector<1x32xf32>
    %cst_62 = arith.constant 8.000000e+00 : f32
    %143 = vector.broadcast %cst_62 : f32 to vector<1x32xf32>
    %144 = arith.divf %142, %143 : vector<1x32xf32>
    %c10 = arith.constant 10 : index
    %c0_63 = arith.constant 0 : index
    %145 = vector.load %arg8[%c10, %c0_63] : memref<16x1024xf32, #tpu.memory_space<vmem>>, vector<1x32xf32>
    %c11 = arith.constant 11 : index
    %c0_64 = arith.constant 0 : index
    %146 = vector.load %arg8[%c11, %c0_64] : memref<16x1024xf32, #tpu.memory_space<vmem>>, vector<1x32xf32>
    %cst_65 = arith.constant 9.99999974E-6 : f32
    %147 = vector.broadcast %cst_65 : f32 to vector<1x32xf32>
    %148 = arith.addf %144, %147 : vector<1x32xf32>
    %149 = math.rsqrt %148 : vector<1x32xf32>
    %150 = arith.mulf %145, %149 : vector<1x32xf32>
    %151 = vector.broadcast %150 : vector<1x32xf32> to vector<8x32xf32>
    %152 = arith.mulf %139, %151 : vector<8x32xf32>
    %153 = vector.broadcast %146 : vector<1x32xf32> to vector<8x32xf32>
    %154 = arith.addf %152, %153 : vector<8x32xf32>
    %cst_66 = arith.constant 0.000000e+00 : f32
    %155 = vector.broadcast %cst_66 : f32 to vector<8x32xf32>
    %156 = arith.maximumf %154, %155 : vector<8x32xf32>
    %c0_67 = arith.constant 0 : index
    %c0_68 = arith.constant 0 : index
    %157 = vector.load %arg7[%c0_67, %c0_68] : memref<32x4xf32, #tpu.memory_space<vmem>>, vector<32x4xf32>
    %c12 = arith.constant 12 : index
    %c0_69 = arith.constant 0 : index
    %158 = vector.load %arg8[%c12, %c0_69] : memref<16x1024xf32, #tpu.memory_space<vmem>>, vector<1x4xf32>
    %cst_70 = arith.constant dense<0.000000e+00> : vector<8x4xf32>
    %159 = tpu.matmul %156, %157, %cst_70 {dimension_numbers = #tpu.dot_dimension_numbers<[1], [0], [0], [1], [0, 0, 1, 1], [], []>} : vector<8x32xf32>, vector<32x4xf32>, vector<8x4xf32> -> vector<8x4xf32>
    %160 = vector.broadcast %158 : vector<1x4xf32> to vector<8x4xf32>
    %161 = arith.addf %159, %160 : vector<8x4xf32>
    %c0_71 = arith.constant 0 : index
    %c0_72 = arith.constant 0 : index
    %162 = vector.load %arg9[%c0_71, %c0_72] : memref<8x4xf32, #tpu.memory_space<vmem>>, vector<8x4xf32>
    tpu.vector_store %arg9[%c0_71, %c0_72], %161 {strides = array<i32>} : memref<8x4xf32, #tpu.memory_space<vmem>>, vector<8x4xf32>,
    return
  }
}

</mosaic_0001>

<bundles_post_ra>
// kernel: domainnet_forward.1
= control target key start
LH: loop header
LB: loop body
LE: loop exit
PB: predicated region body
PF: predicated region fallthrough
CT: control target
= control target key end

     0   :  { %14 = vsyncpa [#allocation3], 0  ;;  %s19217_s0 = inlined_call_operand.hbm [shape: f32[8,2048], index: 0, kind: input, shape index: {}]   ;;  %s19218_s1 = inlined_call_operand.hbm [shape: bf16[2048,1024], index: 1, kind: input, shape index: {}]   ;;  %s19219_s2 = inlined_call_operand.hbm [shape: bf16[1024,512], index: 2, kind: input, shape index: {}]   ;;  %s19220_s3 = inlined_call_operand.hbm [shape: bf16[512,256], index: 3, kind: input, shape index: {}]   ;;  %s19221_s4 = inlined_call_operand.hbm [shape: bf16[256,128], index: 4, kind: input, shape index: {}]   ;;  %s19222_s5 = inlined_call_operand.vmem [shape: bf16[128,64], index: 5, kind: input, shape index: {}]   ;;  %s19223_s6 = inlined_call_operand.vmem [shape: bf16[64,32], index: 6, kind: input, shape index: {}]   ;;  %s19224_s7 = inlined_call_operand.vmem [shape: f32[32,4], index: 7, kind: input, shape index: {}]   ;;  %s19225_s8 = inlined_call_operand.hbm [shape: f32[16,1024], index: 8, kind: input, shape index: {}]   ;;  %s19226_s9 = inlined_call_operand.vmem [shape: f32[8,4], index: 9, kind: output, shape index: {}]  }
   0x1   :  { %15 = vsyncpa [#allocation5], 0 }
   0x2   :  { %16 = vsyncpa [#allocation8], 0  ;;  %s33_s11 = sshll.u32 %s19218_s1, 4  ;;  %s34_s11 = int_to_ptr.hbm [resolvable:$true] %s33_s11 }
   0x3   :  { %17 = vsyncpa [#allocation11], 0  ;;  %s18462_s12 = smov [#allocation4]   ;;  %s59_s16 = sshll.u32 %s19220_s3, 4  ;;  %s60_s16 = int_to_ptr.hbm [resolvable:$true] %s59_s16 }
   0x4   :  { %s35_s13 = sshll.u32 %s18462_s12, 4  ;;  %s18463_s17 = smov 512   ;;  %s36_s13 = int_to_ptr.vmem [resolvable:$true] %s35_s13 }
   0x5   :  { %s18464_s18 = smov 32   ;;  %s18465_s19 = smov [#allocation7]  }
   0x6   :  { %41 = dma.hbm_to_vmem [thread:$0]  %s34_s11, 131072, %s36_s13, [#allocation5], %s18463_s17, %s18463_s17, %s18464_s18  }
   0x7   :  { %s61_s20 = sshll.u32 %s18465_s19, 4  ;;  %s18466_s21 = smov 128   ;;  %s62_s20 = int_to_ptr.vmem [resolvable:$true] %s61_s20 }
   0x8   :  { %s18467_s22 = smov 8   ;;  %s23_s24 = sshll.u32 %s19217_s0, 4  ;;  %s24_s24 = int_to_ptr.hbm [resolvable:$true] %s23_s24 }
   0x9   :  { %67 = dma.hbm_to_vmem [thread:$0]  %s60_s16, 8192, %s62_s20, [#allocation8], %s18466_s21, %s18466_s21, %s18467_s22  }
   0xa   :  { %s18468_s25 = smov [#allocation2]   ;;  %s46_s28 = sshll.u32 %s19219_s2, 4  ;;  %s47_s28 = int_to_ptr.hbm [resolvable:$true] %s46_s28 }
   0xb   :  { %s25_s26 = sshll.u32 %s18468_s25, 4  ;;  %s18469_s29 = smov [#allocation6]   ;;  %s26_s26 = int_to_ptr.vmem [resolvable:$true] %s25_s26 }
   0xc   :  { %28 = dma.hbm_to_vmem [thread:$0]  %s24_s24, 2048, %s26_s26, [#allocation3]  }
   0xd   :  { %s48_s30 = sshll.u32 %s18469_s29, 4  ;;  %s18470_s10 = smov 256   ;;  %s49_s30 = int_to_ptr.vmem [resolvable:$true] %s48_s30 }
   0xe   :  { %s18471_s11 = smov 16   ;;  %s72_s0 = sshll.u32 %s19221_s4, 4  ;;  %s73_s0 = int_to_ptr.hbm [resolvable:$true] %s72_s0 }
   0xf   :  { %54 = dma.hbm_to_vmem [thread:$0]  %s47_s28, 32768, %s49_s30, [#allocation5], %s18470_s10, %s18470_s10, %s18471_s11  }
  0x10   :  { %s18472_s14 = smov [#allocation9]   ;;  %s91_s2 = sshll.u32 %s19225_s8, 4  ;;  %s92_s2 = int_to_ptr.hbm [resolvable:$true] %s91_s2 }
  0x11   :  { %s74_s15 = sshll.u32 %s18472_s14, 4  ;;  %s18473_s18 = smov 64   ;;  %s75_s15 = int_to_ptr.vmem [resolvable:$true] %s74_s15 }
  0x12   :  { %s18474_s19 = smov 4   ;;  %s18475_s20 = smov [#allocation10]  }
  0x13   :  { %80 = dma.hbm_to_vmem [thread:$0]  %s73_s0, 2048, %s75_s15, [#allocation8], %s18473_s18, %s18473_s18, %s18474_s19  }
  0x14   :  { %s93_s21 = sshll.u32 %s18475_s20, 4  ;;  %s18476_s22 = smov 1024   ;;  %s94_s21 = int_to_ptr.vmem [resolvable:$true] %s93_s21 }
  0x15   :  { %99 = dma.hbm_to_vmem [thread:$0]  %s92_s2, 2048, %s94_s21, [#allocation11], %s18476_s22, %s18476_s22, %s18473_s18  }
  0x16   :  { %18454 = dma.done.wait [#allocation3], 2048  }
  0x17   :  { %18455 = vsyncadd [#allocation3], 4294965248 }
  0x18   :  { %18456 = dma.done.wait [#allocation5], 163840  }
  0x19   :  { %18457 = vsyncadd [#allocation5], 4294803456 }
  0x1a   :  { %18458 = dma.done.wait [#allocation8], 10240  }
  0x1b   :  { %18459 = vsyncadd [#allocation8], 4294957056 }
  0x1c   :  { %18460 = dma.done.wait [#allocation11], 2048  }
  0x1d   :  { %18461 = vsyncadd [#allocation11], 4294965248  ;;  %v11622_v0 = vld [vmem:[#allocation4 + $0x1c0] sm:$0xf]  ;;  %vm8210_vm5 = vcmask 1040384   ;;  %vm8212_vm14 = vcmask 1042434  }
  0x1e   :  { %v16946_v1 = vld [vmem:[#allocation4 + $0x1dc] sm:$0xf0]  ;;  %vm8214_vm15 = vcmask 1041408  }
  0x1f   :  { %v11878_v2 = vld [vmem:[#allocation4 + $0x3c0] sm:$0xf]  ;;  %v11623_v3 = vor.u32 %v16946_v1, %v11622_v0 }
  0x20   :  { %v17010_v4 = vld [vmem:[#allocation4 + $0x3dc] sm:$0xf0] }
  0x21   :  { %v12134_v5 = vld [vmem:[#allocation4 + $0x5c0] sm:$0xf]  ;;  %v11879_v7 = vor.u32 %v17010_v4, %v11878_v2  ;;  %6301 = vmatpush.bf16.msra.mxu0 %v11623_v3 }
  0x22   :  { %v17074_v6 = vld [vmem:[#allocation4 + $0x5dc] sm:$0xf0] }
  0x23   :  { %v12135_v8 = vor.u32 %v17074_v6, %v12134_v5  ;;  %v12390_v9 = vld [vmem:[#allocation4 + $0x7c0] sm:$0xf]  ;;  %6314 = vmatpush.bf16.msra.mxu1 %v11879_v7 }
  0x24   :  { %v17138_v10 = vld [vmem:[#allocation4 + $0x7dc] sm:$0xf0] }
  0x25   :  { %v11590_v11 = vld [vmem:[#allocation4 + $0x180] sm:$0xf]  ;;  %v12391_v12 = vor.u32 %v17138_v10, %v12390_v9  ;;  %6327 = vmatpush.bf16.msra.mxu2 %v12135_v8 }
  0x26   :  { %v16938_v13 = vld [vmem:[#allocation4 + $0x19c] sm:$0xf0] }
  0x27   :  { %v11846_v14 = vld [vmem:[#allocation4 + $0x380] sm:$0xf]  ;;  %v11591_v16 = vor.u32 %v16938_v13, %v11590_v11  ;;  %6340 = vmatpush.bf16.msra.mxu3 %v12391_v12 }
  0x28   :  { %v17002_v15 = vld [vmem:[#allocation4 + $0x39c] sm:$0xf0] }
  0x29   :  { %v11847_v17 = vor.u32 %v17002_v15, %v11846_v14  ;;  %v12102_v18 = vld [vmem:[#allocation4 + $0x580] sm:$0xf]  ;;  %6302 = vmatpush.bf16.msra.mxu0 %v11591_v16 }
  0x2a   :  { %v17066_v19 = vld [vmem:[#allocation4 + $0x59c] sm:$0xf0] }
  0x2b   :  { %v12358_v20 = vld [vmem:[#allocation4 + $0x780] sm:$0xf]  ;;  %v12103_v21 = vor.u32 %v17066_v19, %v12102_v18  ;;  %6315 = vmatpush.bf16.msra.mxu1 %v11847_v17 }
  0x2c   :  { %v17130_v22 = vld [vmem:[#allocation4 + $0x79c] sm:$0xf0] }
  0x2d   :  { %v11558_v23 = vld [vmem:[#allocation4 + $0x140] sm:$0xf]  ;;  %v12359_v25 = vor.u32 %v17130_v22, %v12358_v20  ;;  %6328 = vmatpush.bf16.msra.mxu2 %v12103_v21 }
  0x2e   :  { %v16930_v24 = vld [vmem:[#allocation4 + $0x15c] sm:$0xf0] }
  0x2f   :  { %v11814_v26 = vld [vmem:[#allocation4 + $0x340] sm:$0xf]  ;;  %v11559_v29 = vor.u32 %v16930_v24, %v11558_v23  ;;  %6341 = vmatpush.bf16.msra.mxu3 %v12359_v25 }
  0x30   :  { %v16994_v27 = vld [vmem:[#allocation4 + $0x35c] sm:$0xf0] }
  0x31   :  { %v12070_v28 = vld [vmem:[#allocation4 + $0x540] sm:$0xf]  ;;  %v11815_v33 = vor.u32 %v16994_v27, %v11814_v26  ;;  %6303 = vmatpush.bf16.msra.mxu0 %v11559_v29 }
  0x32   :  { %v17058_v30 = vld [vmem:[#allocation4 + $0x55c] sm:$0xf0] }
  0x33   :  { %v12326_v31 = vld [vmem:[#allocation4 + $0x740] sm:$0xf]  ;;  %v12071_v34 = vor.u32 %v17058_v30, %v12070_v28  ;;  %6316 = vmatpush.bf16.msra.mxu1 %v11815_v33 }
  0x34   :  { %v17122_v32 = vld [vmem:[#allocation4 + $0x75c] sm:$0xf0] }
  0x35   :  { %v11526_v35 = vld [vmem:[#allocation4 + $0x100] sm:$0xf]  ;;  %v12327_v38 = vor.u32 %v17122_v32, %v12326_v31  ;;  %6329 = vmatpush.bf16.msra.mxu2 %v12071_v34 }
  0x36   :  { %v16922_v36 = vld [vmem:[#allocation4 + $0x11c] sm:$0xf0] }
  0x37   :  { %v11782_v37 = vld [vmem:[#allocation4 + $0x300] sm:$0xf]  ;;  %v11527_v44 = vor.u32 %v16922_v36, %v11526_v35  ;;  %6342 = vmatpush.bf16.msra.mxu3 %v12327_v38 }
  0x38   :  { %v16986_v39 = vld [vmem:[#allocation4 + $0x31c] sm:$0xf0] }
  0x39   :  { %v12038_v40 = vld [vmem:[#allocation4 + $0x500] sm:$0xf]  ;;  %v11783_v45 = vor.u32 %v16986_v39, %v11782_v37  ;;  %6304 = vmatpush.bf16.msra.mxu0 %v11527_v44 }
  0x3a   :  { %v17050_v41 = vld [vmem:[#allocation4 + $0x51c] sm:$0xf0] }
  0x3b   :  { %v12294_v42 = vld [vmem:[#allocation4 + $0x700] sm:$0xf]  ;;  %v12039_v46 = vor.u32 %v17050_v41, %v12038_v40  ;;  %6317 = vmatpush.bf16.msra.mxu1 %v11783_v45 }
  0x3c   :  { %v17114_v43 = vld [vmem:[#allocation4 + $0x71c] sm:$0xf0] }
  0x3d   :  { %v11494_v47 = vld [vmem:[#allocation4 + $0xc0] sm:$0xf]  ;;  %v12295_v50 = vor.u32 %v17114_v43, %v12294_v42  ;;  %6330 = vmatpush.bf16.msra.mxu2 %v12039_v46 }
  0x3e   :  { %v16914_v48 = vld [vmem:[#allocation4 + $0xdc] sm:$0xf0] }
  0x3f   :  { %v11750_v49 = vld [vmem:[#allocation4 + $0x2c0] sm:$0xf]  ;;  %v11495_v56 = vor.u32 %v16914_v48, %v11494_v47  ;;  %6343 = vmatpush.bf16.msra.mxu3 %v12295_v50 }
  0x40   :  { %v16978_v51 = vld [vmem:[#allocation4 + $0x2dc] sm:$0xf0] }
  0x41   :  { %v12006_v52 = vld [vmem:[#allocation4 + $0x4c0] sm:$0xf]  ;;  %v11751_v57 = vor.u32 %v16978_v51, %v11750_v49  ;;  %6305 = vmatpush.bf16.msra.mxu0 %v11495_v56 }
  0x42   :  { %v17042_v53 = vld [vmem:[#allocation4 + $0x4dc] sm:$0xf0] }
  0x43   :  { %v12262_v54 = vld [vmem:[#allocation4 + $0x6c0] sm:$0xf]  ;;  %v12007_v58 = vor.u32 %v17042_v53, %v12006_v52  ;;  %6318 = vmatpush.bf16.msra.mxu1 %v11751_v57 }
  0x44   :  { %v17106_v55 = vld [vmem:[#allocation4 + $0x6dc] sm:$0xf0] }
  0x45   :  { %v11462_v59 = vld [vmem:[#allocation4 + $0x80] sm:$0xf]  ;;  %v12263_v62 = vor.u32 %v17106_v55, %v12262_v54  ;;  %6331 = vmatpush.bf16.msra.mxu2 %v12007_v58  ;;  %v127_v58 = vld [vmem:[#allocation2 + $0x10] sm:$0xff] }
  0x46   :  { %v16906_v60 = vld [vmem:[#allocation4 + $0x9c] sm:$0xf0] }
  0x47   :  { %v11718_v61 = vld [vmem:[#allocation4 + $0x280] sm:$0xf]  ;;  %v11463_v4 = vor.u32 %v16906_v60, %v11462_v59  ;;  %6344 = vmatpush.bf16.msra.mxu3 %v12263_v62 }
  0x48   :  { %v16970_v63 = vld [vmem:[#allocation4 + $0x29c] sm:$0xf0] }
  0x49   :  { %v11974_v0 = vld [vmem:[#allocation4 + $0x480] sm:$0xf]  ;;  %v11719_v5 = vor.u32 %v16970_v63, %v11718_v61  ;;  %6306 = vmatpush.bf16.msra.mxu0 %v11463_v4  ;;  %v18546_v63 = vpack.c.bf16 %v127_v58, %v127_v58 }
  0x4a   :  { %v17034_v1 = vld [vmem:[#allocation4 + $0x49c] sm:$0xf0] }
  0x4b   :  { %v12230_v2 = vld [vmem:[#allocation4 + $0x680] sm:$0xf]  ;;  %v11975_v6 = vor.u32 %v17034_v1, %v11974_v0  ;;  %6319 = vmatpush.bf16.msra.mxu1 %v11719_v5 }
  0x4c   :  { %v17098_v3 = vld [vmem:[#allocation4 + $0x69c] sm:$0xf0] }
  0x4d   :  { %v11430_v7 = vld [vmem:[#allocation4 + $0x40] sm:$0xf]  ;;  %v12231_v10 = vor.u32 %v17098_v3, %v12230_v2  ;;  %6332 = vmatpush.bf16.msra.mxu2 %v11975_v6 }
  0x4e   :  { %v16898_v8 = vld [vmem:[#allocation4 + $0x5c] sm:$0xf0] }
  0x4f   :  { %v11686_v9 = vld [vmem:[#allocation4 + $0x240] sm:$0xf]  ;;  %v11431_v16 = vor.u32 %v16898_v8, %v11430_v7  ;;  %6345 = vmatpush.bf16.msra.mxu3 %v12231_v10  ;;  %v128_v10 = vld [vmem:[#allocation2 + $0x18] sm:$0xff] }
  0x50   :  { %v16962_v11 = vld [vmem:[#allocation4 + $0x25c] sm:$0xf0] }
  0x51   :  { %v11942_v12 = vld [vmem:[#allocation4 + $0x440] sm:$0xf]  ;;  %v11687_v19 = vor.u32 %v16962_v11, %v11686_v9  ;;  %6307 = vmatpush.bf16.msra.mxu0 %v11431_v16  ;;  %v126_v11 = vld [vmem:[#allocation2 + $0x8] sm:$0xff]  ;;  %v18551_v16 = vpack.c.bf16 %v128_v10, %v128_v10 }
  0x52   :  { %v17026_v13 = vld [vmem:[#allocation4 + $0x45c] sm:$0xf0] }
  0x53   :  { %v12198_v14 = vld [vmem:[#allocation4 + $0x640] sm:$0xf]  ;;  %v11943_v20 = vor.u32 %v17026_v13, %v11942_v12  ;;  %6320 = vmatpush.bf16.msra.mxu1 %v11687_v19 }
  0x54   :  { %v17090_v15 = vld [vmem:[#allocation4 + $0x65c] sm:$0xf0] }
  0x55   :  { %v11398_v17 = vld [vmem:[#allocation4] sm:$0xf]  ;;  %v12199_v24 = vor.u32 %v17090_v15, %v12198_v14  ;;  %6333 = vmatpush.bf16.msra.mxu2 %v11943_v20 }
  0x56   :  { %v16890_v18 = vld [vmem:[#allocation4 + $0x1c] sm:$0xf0] }
  0x57   :  { %v11654_v21 = vld [vmem:[#allocation4 + $0x200] sm:$0xf]  ;;  %v11399_v31 = vor.u32 %v16890_v18, %v11398_v17  ;;  %6346 = vmatpush.bf16.msra.mxu3 %v12199_v24  ;;  %v18553_v17 = vpack.c.bf16 %v126_v11, %v126_v11 }
  0x58   :  { %v16954_v22 = vld [vmem:[#allocation4 + $0x21c] sm:$0xf0] }
  0x59   :  { %v11910_v23 = vld [vmem:[#allocation4 + $0x400] sm:$0xf]  ;;  %v11655_v35 = vor.u32 %v16954_v22, %v11654_v21  ;;  %6308 = vmatpush.bf16.msra.mxu0 %v11399_v31 }
  0x5a   :  { %v17018_v25 = vld [vmem:[#allocation4 + $0x41c] sm:$0xf0] }
  0x5b   :  { %v12166_v26 = vld [vmem:[#allocation4 + $0x600] sm:$0xf]  ;;  %v11911_v36 = vor.u32 %v17018_v25, %v11910_v23  ;;  %6321 = vmatpush.bf16.msra.mxu1 %v11655_v35 }
  0x5c   :  { %v17082_v27 = vld [vmem:[#allocation4 + $0x61c] sm:$0xf0] }
  0x5d   :  { %v12646_v28 = vld [vmem:[#allocation4 + $0x9c0] sm:$0xf]  ;;  %v12167_v39 = vor.u32 %v17082_v27, %v12166_v26  ;;  %6334 = vmatpush.bf16.msra.mxu2 %v11911_v36 }
  0x5e   :  { %v17202_v29 = vld [vmem:[#allocation4 + $0x9dc] sm:$0xf0]  ;;  %6322 = vmatmul.bf16.vlgmr.msra.gmra.mxu1 %v18553_v17 }
  0x5f   :  { %v12902_v30 = vld [vmem:[#allocation4 + $0xbc0] sm:$0xf]  ;;  %v12647_v40 = vor.u32 %v17202_v29, %v12646_v28  ;;  %6347 = vmatpush.bf16.msra.mxu3 %v12167_v39 }
  0x60   :  { %v17266_v32 = vld [vmem:[#allocation4 + $0xbdc] sm:$0xf0]  ;;  %6335 = vmatmul.bf16.vlgmr.msra.gmra.mxu2 %v18546_v63 }
  0x61   :  { %v13158_v33 = vld [vmem:[#allocation4 + $0xdc0] sm:$0xf]  ;;  %v12903_v41 = vor.u32 %v17266_v32, %v12902_v30  ;;  %6353 = vmatpush.bf16.msrb.mxu0 %v12647_v40 }
  0x62   :  { %v17330_v34 = vld [vmem:[#allocation4 + $0xddc] sm:$0xf0]  ;;  %6348 = vmatmul.bf16.vlgmr.msra.gmra.mxu3 %v18551_v16 }
  0x63   :  { %v13414_v37 = vld [vmem:[#allocation4 + $0xfc0] sm:$0xf]  ;;  %v13159_v42 = vor.u32 %v17330_v34, %v13158_v33  ;;  %6366 = vmatpush.bf16.msrb.mxu1 %v12903_v41 }
  0x64   :  { %v17394_v38 = vld [vmem:[#allocation4 + $0xfdc] sm:$0xf0] }
  0x65   :  { %v12614_v43 = vld [vmem:[#allocation4 + $0x980] sm:$0xf]  ;;  %v13415_v46 = vor.u32 %v17394_v38, %v13414_v37  ;;  %6379 = vmatpush.bf16.msrb.mxu2 %v13159_v42 }
  0x66   :  { %v17194_v44 = vld [vmem:[#allocation4 + $0x99c] sm:$0xf0] }
  0x67   :  { %v12870_v45 = vld [vmem:[#allocation4 + $0xb80] sm:$0xf]  ;;  %v12615_v52 = vor.u32 %v17194_v44, %v12614_v43  ;;  %6392 = vmatpush.bf16.msrb.mxu3 %v13415_v46 }
  0x68   :  { %v17258_v47 = vld [vmem:[#allocation4 + $0xb9c] sm:$0xf0] }
  0x69   :  { %v13126_v48 = vld [vmem:[#allocation4 + $0xd80] sm:$0xf]  ;;  %v12871_v54 = vor.u32 %v17258_v47, %v12870_v45  ;;  %6354 = vmatpush.bf16.msrb.mxu0 %v12615_v52 }
  0x6a   :  { %v17322_v49 = vld [vmem:[#allocation4 + $0xd9c] sm:$0xf0] }
  0x6b   :  { %v13382_v50 = vld [vmem:[#allocation4 + $0xf80] sm:$0xf]  ;;  %v13127_v55 = vor.u32 %v17322_v49, %v13126_v48  ;;  %6367 = vmatpush.bf16.msrb.mxu1 %v12871_v54 }
  0x6c   :  { %v17386_v51 = vld [vmem:[#allocation4 + $0xf9c] sm:$0xf0] }
  0x6d   :  { %v12582_v53 = vld [vmem:[#allocation4 + $0x940] sm:$0xf]  ;;  %v13383_v59 = vor.u32 %v17386_v51, %v13382_v50  ;;  %6380 = vmatpush.bf16.msrb.mxu2 %v13127_v55 }
  0x6e   :  { %v17186_v56 = vld [vmem:[#allocation4 + $0x95c] sm:$0xf0] }
  0x6f   :  { %v12838_v57 = vld [vmem:[#allocation4 + $0xb40] sm:$0xf]  ;;  %v12583_v2 = vor.u32 %v17186_v56, %v12582_v53  ;;  %6393 = vmatpush.bf16.msrb.mxu3 %v13383_v59 }
  0x70   :  { %v17250_v60 = vld [vmem:[#allocation4 + $0xb5c] sm:$0xf0] }
  0x71   :  { %v13094_v61 = vld [vmem:[#allocation4 + $0xd40] sm:$0xf]  ;;  %v12839_v6 = vor.u32 %v17250_v60, %v12838_v57  ;;  %6355 = vmatpush.bf16.msrb.mxu0 %v12583_v2 }
  0x72   :  { %v17314_v62 = vld [vmem:[#allocation4 + $0xd5c] sm:$0xf0] }
  0x73   :  { %v13350_v0 = vld [vmem:[#allocation4 + $0xf40] sm:$0xf]  ;;  %v13095_v7 = vor.u32 %v17314_v62, %v13094_v61  ;;  %6368 = vmatpush.bf16.msrb.mxu1 %v12839_v6 }
  0x74   :  { %v17378_v1 = vld [vmem:[#allocation4 + $0xf5c] sm:$0xf0] }
  0x75   :  { %v12550_v3 = vld [vmem:[#allocation4 + $0x900] sm:$0xf]  ;;  %v13351_v12 = vor.u32 %v17378_v1, %v13350_v0  ;;  %6381 = vmatpush.bf16.msrb.mxu2 %v13095_v7 }
  0x76   :  { %v17178_v4 = vld [vmem:[#allocation4 + $0x91c] sm:$0xf0] }
  0x77   :  { %v125_v5 = vld [vmem:[#allocation2] sm:$0xff]  ;;  %v12551_v20 = vor.u32 %v17178_v4, %v12550_v3  ;;  %6394 = vmatpush.bf16.msrb.mxu3 %v13351_v12 }
  0x78   :  { %v12806_v8 = vld [vmem:[#allocation4 + $0xb00] sm:$0xf]  ;;  %v18549_v9 = vpack.c.bf16 %v125_v5, %v125_v5 }
  0x79   :  { %v17242_v13 = vld [vmem:[#allocation4 + $0xb1c] sm:$0xf0]  ;;  %6356 = vmatpush.bf16.msrb.mxu0 %v12551_v20 }
  0x7a   :  { %v13062_v14 = vld [vmem:[#allocation4 + $0xd00] sm:$0xf]  ;;  %6309 = vmatmul.bf16.vlgmr.msra.gmra.mxu0 %v18549_v9  ;;  %v12807_v21 = vor.u32 %v17242_v13, %v12806_v8 }
  0x7b   :  { %v17306_v15 = vld [vmem:[#allocation4 + $0xd1c] sm:$0xf0] }
  0x7c   :  { %v13318_v18 = vld [vmem:[#allocation4 + $0xf00] sm:$0xf]  ;;  %v13063_v22 = vor.u32 %v17306_v15, %v13062_v14  ;;  %6369 = vmatpush.bf16.msrb.mxu1 %v12807_v21 }
  0x7d   :  { %v17370_v19 = vld [vmem:[#allocation4 + $0xf1c] sm:$0xf0] }
  0x7e   :  { %v12518_v23 = vld [vmem:[#allocation4 + $0x8c0] sm:$0xf]  ;;  %v13319_v26 = vor.u32 %v17370_v19, %v13318_v18  ;;  %6382 = vmatpush.bf16.msrb.mxu2 %v13063_v22  ;;  %v131_v19 = vld [vmem:[#allocation2 + $0x30] sm:$0xff] }
  0x7f   :  { %v17170_v24 = vld [vmem:[#allocation4 + $0x8dc] sm:$0xf0] }
  0x80   :  { %v12774_v25 = vld [vmem:[#allocation4 + $0xac0] sm:$0xf]  ;;  %v12519_v32 = vor.u32 %v17170_v24, %v12518_v23  ;;  %6395 = vmatpush.bf16.msrb.mxu3 %v13319_v26  ;;  %v132_v24 = vld [vmem:[#allocation2 + $0x38] sm:$0xff] }
  0x81   :  { %v17234_v27 = vld [vmem:[#allocation4 + $0xadc] sm:$0xf0] }
  0x82   :  { %v13030_v28 = vld [vmem:[#allocation4 + $0xcc0] sm:$0xf]  ;;  %v12775_v33 = vor.u32 %v17234_v27, %v12774_v25  ;;  %6357 = vmatpush.bf16.msrb.mxu0 %v12519_v32 }
  0x83   :  { %v17298_v29 = vld [vmem:[#allocation4 + $0xcdc] sm:$0xf0] }
  0x84   :  { %v13286_v30 = vld [vmem:[#allocation4 + $0xec0] sm:$0xf]  ;;  %v13031_v34 = vor.u32 %v17298_v29, %v13030_v28  ;;  %6370 = vmatpush.bf16.msrb.mxu1 %v12775_v33  ;;  %v130_v29 = vld [vmem:[#allocation2 + $0x28] sm:$0xff] }
  0x85   :  { %v17362_v31 = vld [vmem:[#allocation4 + $0xedc] sm:$0xf0] }
  0x86   :  { %v12486_v35 = vld [vmem:[#allocation4 + $0x880] sm:$0xf]  ;;  %v13287_v38 = vor.u32 %v17362_v31, %v13286_v30  ;;  %6383 = vmatpush.bf16.msrb.mxu2 %v13031_v34  ;;  %v18558_v34 = vpack.c.bf16 %v131_v19, %v131_v19 }
  0x87   :  { %v17162_v36 = vld [vmem:[#allocation4 + $0x89c] sm:$0xf0] }
  0x88   :  { %v12742_v37 = vld [vmem:[#allocation4 + $0xa80] sm:$0xf]  ;;  %v12487_v44 = vor.u32 %v17162_v36, %v12486_v35  ;;  %6396 = vmatpush.bf16.msrb.mxu3 %v13287_v38  ;;  %v18562_v38 = vpack.c.bf16 %v132_v24, %v132_v24 }
  0x89   :  { %v17226_v39 = vld [vmem:[#allocation4 + $0xa9c] sm:$0xf0] }
  0x8a   :  { %v12998_v40 = vld [vmem:[#allocation4 + $0xc80] sm:$0xf]  ;;  %v12743_v45 = vor.u32 %v17226_v39, %v12742_v37  ;;  %6358 = vmatpush.bf16.msrb.mxu0 %v12487_v44 }
  0x8b   :  { %v17290_v41 = vld [vmem:[#allocation4 + $0xc9c] sm:$0xf0] }
  0x8c   :  { %v13254_v42 = vld [vmem:[#allocation4 + $0xe80] sm:$0xf]  ;;  %v12999_v46 = vor.u32 %v17290_v41, %v12998_v40  ;;  %6371 = vmatpush.bf16.msrb.mxu1 %v12743_v45  ;;  %v18564_v40 = vpack.c.bf16 %v130_v29, %v130_v29 }
  0x8d   :  { %v17354_v43 = vld [vmem:[#allocation4 + $0xe9c] sm:$0xf0] }
  0x8e   :  { %v12454_v47 = vld [vmem:[#allocation4 + $0x840] sm:$0xf]  ;;  %v13255_v50 = vor.u32 %v17354_v43, %v13254_v42  ;;  %6384 = vmatpush.bf16.msrb.mxu2 %v12999_v46 }
  0x8f   :  { %v17154_v48 = vld [vmem:[#allocation4 + $0x85c] sm:$0xf0] }
  0x90   :  { %v12710_v49 = vld [vmem:[#allocation4 + $0xa40] sm:$0xf]  ;;  %v12455_v56 = vor.u32 %v17154_v48, %v12454_v47  ;;  %6397 = vmatpush.bf16.msrb.mxu3 %v13255_v50 }
  0x91   :  { %v17218_v51 = vld [vmem:[#allocation4 + $0xa5c] sm:$0xf0] }
  0x92   :  { %v12966_v52 = vld [vmem:[#allocation4 + $0xc40] sm:$0xf]  ;;  %v12711_v59 = vor.u32 %v17218_v51, %v12710_v49  ;;  %6359 = vmatpush.bf16.msrb.mxu0 %v12455_v56 }
  0x93   :  { %v17282_v53 = vld [vmem:[#allocation4 + $0xc5c] sm:$0xf0] }
  0x94   :  { %v13222_v54 = vld [vmem:[#allocation4 + $0xe40] sm:$0xf]  ;;  %v12967_v60 = vor.u32 %v17282_v53, %v12966_v52  ;;  %6372 = vmatpush.bf16.msrb.mxu1 %v12711_v59 }
  0x95   :  { %v17346_v55 = vld [vmem:[#allocation4 + $0xe5c] sm:$0xf0] }
  0x96   :  { %v12422_v57 = vld [vmem:[#allocation4 + $0x800] sm:$0xf]  ;;  %v13223_v1 = vor.u32 %v17346_v55, %v13222_v54  ;;  %6385 = vmatpush.bf16.msrb.mxu2 %v12967_v60 }
  0x97   :  { %v17146_v58 = vld [vmem:[#allocation4 + $0x81c] sm:$0xf0] }
  0x98   :  { %v12678_v61 = vld [vmem:[#allocation4 + $0xa00] sm:$0xf]  ;;  %v12423_v8 = vor.u32 %v17146_v58, %v12422_v57  ;;  %6398 = vmatpush.bf16.msrb.mxu3 %v13223_v1 }
  0x99   :  { %v17210_v62 = vld [vmem:[#allocation4 + $0xa1c] sm:$0xf0] }
  0x9a   :  { %v12934_v0 = vld [vmem:[#allocation4 + $0xc00] sm:$0xf]  ;;  %v12679_v13 = vor.u32 %v17210_v62, %v12678_v61  ;;  %6360 = vmatpush.bf16.msrb.mxu0 %v12423_v8 }
  0x9b   :  { %v17274_v2 = vld [vmem:[#allocation4 + $0xc1c] sm:$0xf0] }
  0x9c   :  { %v13190_v3 = vld [vmem:[#allocation4 + $0xe00] sm:$0xf]  ;;  %v12935_v14 = vor.u32 %v17274_v2, %v12934_v0  ;;  %6373 = vmatpush.bf16.msrb.mxu1 %v12679_v13 }
  0x9d   :  { %v17338_v4 = vld [vmem:[#allocation4 + $0xe1c] sm:$0xf0] }
  0x9e   :  { %v13670_v5 = vld [vmem:[#allocation4 + $0x11c0] sm:$0xf]  ;;  %v13191_v20 = vor.u32 %v17338_v4, %v13190_v3  ;;  %6386 = vmatpush.bf16.msrb.mxu2 %v12935_v14 }
  0x9f   :  { %v17458_v6 = vld [vmem:[#allocation4 + $0x11dc] sm:$0xf0]  ;;  %6374 = vmatmul.bf16.vlgmr.msrb.gmra.mxu1 %v18564_v40 }
  0xa0   :  { %v13926_v7 = vld [vmem:[#allocation4 + $0x13c0] sm:$0xf]  ;;  %v13671_v21 = vor.u32 %v17458_v6, %v13670_v5  ;;  %6399 = vmatpush.bf16.msrb.mxu3 %v13191_v20 }
  0xa1   :  { %v17522_v10 = vld [vmem:[#allocation4 + $0x13dc] sm:$0xf0]  ;;  %6387 = vmatmul.bf16.vlgmr.msrb.gmra.mxu2 %v18558_v34 }
  0xa2   :  { %v14182_v11 = vld [vmem:[#allocation4 + $0x15c0] sm:$0xf]  ;;  %v13927_v25 = vor.u32 %v17522_v10, %v13926_v7  ;;  %6405 = vmatpush.bf16.msra.mxu0 %v13671_v21 }
  0xa3   :  { %v17586_v12 = vld [vmem:[#allocation4 + $0x15dc] sm:$0xf0]  ;;  %6400 = vmatmul.bf16.vlgmr.msrb.gmra.mxu3 %v18562_v38 }
  0xa4   :  { %v14438_v15 = vld [vmem:[#allocation4 + $0x17c0] sm:$0xf]  ;;  %v14183_v26 = vor.u32 %v17586_v12, %v14182_v11  ;;  %6418 = vmatpush.bf16.msra.mxu1 %v13927_v25 }
  0xa5   :  { %v17650_v18 = vld [vmem:[#allocation4 + $0x17dc] sm:$0xf0] }
  0xa6   :  { %v13638_v22 = vld [vmem:[#allocation4 + $0x1180] sm:$0xf]  ;;  %v14439_v30 = vor.u32 %v17650_v18, %v14438_v15  ;;  %6431 = vmatpush.bf16.msra.mxu2 %v14183_v26 }
  0xa7   :  { %v129_v23 = vld [vmem:[#allocation2 + $0x20] sm:$0xff] }
  0xa8   :  { %v17450_v27 = vld [vmem:[#allocation4 + $0x119c] sm:$0xf0]  ;;  %v18560_v37 = vpack.c.bf16 %v129_v23, %v129_v23  ;;  %6444 = vmatpush.bf16.msra.mxu3 %v14439_v30 }
  0xa9   :  { %v13894_v28 = vld [vmem:[#allocation4 + $0x1380] sm:$0xf]  ;;  %v13639_v39 = vor.u32 %v17450_v27, %v13638_v22 }
  0xaa   :  { %v17514_v31 = vld [vmem:[#allocation4 + $0x139c] sm:$0xf0]  ;;  %6361 = vmatmul.bf16.vlgmr.msrb.gmra.mxu0 %v18560_v37 }
  0xab   :  { %v14150_v32 = vld [vmem:[#allocation4 + $0x1580] sm:$0xf]  ;;  %v13895_v41 = vor.u32 %v17514_v31, %v13894_v28  ;;  %6406 = vmatpush.bf16.msra.mxu0 %v13639_v39 }
  0xac   :  { %v17578_v33 = vld [vmem:[#allocation4 + $0x159c] sm:$0xf0] }
  0xad   :  { %v14406_v35 = vld [vmem:[#allocation4 + $0x1780] sm:$0xf]  ;;  %v14151_v42 = vor.u32 %v17578_v33, %v14150_v32  ;;  %6419 = vmatpush.bf16.msra.mxu1 %v13895_v41 }
  0xae   :  { %v17642_v36 = vld [vmem:[#allocation4 + $0x179c] sm:$0xf0] }
  0xaf   :  { %v13606_v43 = vld [vmem:[#allocation4 + $0x1140] sm:$0xf]  ;;  %v14407_v46 = vor.u32 %v17642_v36, %v14406_v35  ;;  %6432 = vmatpush.bf16.msra.mxu2 %v14151_v42 }
  0xb0   :  { %v17442_v44 = vld [vmem:[#allocation4 + $0x115c] sm:$0xf0] }
  0xb1   :  { %v13862_v45 = vld [vmem:[#allocation4 + $0x1340] sm:$0xf]  ;;  %v13607_v52 = vor.u32 %v17442_v44, %v13606_v43  ;;  %6445 = vmatpush.bf16.msra.mxu3 %v14407_v46 }
  0xb2   :  { %v17506_v47 = vld [vmem:[#allocation4 + $0x135c] sm:$0xf0] }
  0xb3   :  { %v14118_v48 = vld [vmem:[#allocation4 + $0x1540] sm:$0xf]  ;;  %v13863_v53 = vor.u32 %v17506_v47, %v13862_v45  ;;  %6407 = vmatpush.bf16.msra.mxu0 %v13607_v52 }
  0xb4   :  { %v17570_v49 = vld [vmem:[#allocation4 + $0x155c] sm:$0xf0] }
  0xb5   :  { %v14374_v50 = vld [vmem:[#allocation4 + $0x1740] sm:$0xf]  ;;  %v14119_v54 = vor.u32 %v17570_v49, %v14118_v48  ;;  %6420 = vmatpush.bf16.msra.mxu1 %v13863_v53 }
  0xb6   :  { %v17634_v51 = vld [vmem:[#allocation4 + $0x175c] sm:$0xf0] }
  0xb7   :  { %v13574_v55 = vld [vmem:[#allocation4 + $0x1100] sm:$0xf]  ;;  %v14375_v58 = vor.u32 %v17634_v51, %v14374_v50  ;;  %6433 = vmatpush.bf16.msra.mxu2 %v14119_v54 }
  0xb8   :  { %v17434_v56 = vld [vmem:[#allocation4 + $0x111c] sm:$0xf0] }
  0xb9   :  { %v13830_v57 = vld [vmem:[#allocation4 + $0x1300] sm:$0xf]  ;;  %v13575_v1 = vor.u32 %v17434_v56, %v13574_v55  ;;  %6446 = vmatpush.bf16.msra.mxu3 %v14375_v58 }
  0xba   :  { %v17498_v59 = vld [vmem:[#allocation4 + $0x131c] sm:$0xf0] }
  0xbb   :  { %v14086_v60 = vld [vmem:[#allocation4 + $0x1500] sm:$0xf]  ;;  %v13831_v2 = vor.u32 %v17498_v59, %v13830_v57  ;;  %6408 = vmatpush.bf16.msra.mxu0 %v13575_v1 }
  0xbc   :  { %v17562_v61 = vld [vmem:[#allocation4 + $0x151c] sm:$0xf0] }
  0xbd   :  { %v14342_v62 = vld [vmem:[#allocation4 + $0x1700] sm:$0xf]  ;;  %v14087_v3 = vor.u32 %v17562_v61, %v14086_v60  ;;  %6421 = vmatpush.bf16.msra.mxu1 %v13831_v2 }
  0xbe   :  { %v17626_v0 = vld [vmem:[#allocation4 + $0x171c] sm:$0xf0] }
  0xbf   :  { %v13542_v4 = vld [vmem:[#allocation4 + $0x10c0] sm:$0xf]  ;;  %v14343_v7 = vor.u32 %v17626_v0, %v14342_v62  ;;  %6434 = vmatpush.bf16.msra.mxu2 %v14087_v3 }
  0xc0   :  { %v17426_v5 = vld [vmem:[#allocation4 + $0x10dc] sm:$0xf0] }
  0xc1   :  { %v13798_v6 = vld [vmem:[#allocation4 + $0x12c0] sm:$0xf]  ;;  %v13543_v14 = vor.u32 %v17426_v5, %v13542_v4  ;;  %6447 = vmatpush.bf16.msra.mxu3 %v14343_v7  ;;  %v135_v7 = vld [vmem:[#allocation2 + $0x50] sm:$0xff] }
  0xc2   :  { %v17490_v8 = vld [vmem:[#allocation4 + $0x12dc] sm:$0xf0] }
  0xc3   :  { %v14054_v10 = vld [vmem:[#allocation4 + $0x14c0] sm:$0xf]  ;;  %v13799_v15 = vor.u32 %v17490_v8, %v13798_v6  ;;  %6409 = vmatpush.bf16.msra.mxu0 %v13543_v14  ;;  %v134_v8 = vld [vmem:[#allocation2 + $0x48] sm:$0xff] }
  0xc4   :  { %v17554_v11 = vld [vmem:[#allocation4 + $0x14dc] sm:$0xf0] }
  0xc5   :  { %v14310_v12 = vld [vmem:[#allocation4 + $0x16c0] sm:$0xf]  ;;  %v14055_v18 = vor.u32 %v17554_v11, %v14054_v10  ;;  %6422 = vmatpush.bf16.msra.mxu1 %v13799_v15  ;;  %v136_v10 = vld [vmem:[#allocation2 + $0x58] sm:$0xff] }
  0xc6   :  { %v17618_v13 = vld [vmem:[#allocation4 + $0x16dc] sm:$0xf0] }
  0xc7   :  { %v13510_v19 = vld [vmem:[#allocation4 + $0x1080] sm:$0xf]  ;;  %v14311_v22 = vor.u32 %v17618_v13, %v14310_v12  ;;  %6435 = vmatpush.bf16.msra.mxu2 %v14055_v18 }
  0xc8   :  { %v17418_v20 = vld [vmem:[#allocation4 + $0x109c] sm:$0xf0] }
  0xc9   :  { %v13766_v21 = vld [vmem:[#allocation4 + $0x1280] sm:$0xf]  ;;  %v13511_v28 = vor.u32 %v17418_v20, %v13510_v19  ;;  %6448 = vmatpush.bf16.msra.mxu3 %v14311_v22 }
  0xca   :  { %v17482_v23 = vld [vmem:[#allocation4 + $0x129c] sm:$0xf0] }
  0xcb   :  { %v14022_v24 = vld [vmem:[#allocation4 + $0x1480] sm:$0xf]  ;;  %v13767_v29 = vor.u32 %v17482_v23, %v13766_v21  ;;  %6410 = vmatpush.bf16.msra.mxu0 %v13511_v28  ;;  %v18572_v23 = vpack.c.bf16 %v135_v7, %v135_v7 }
  0xcc   :  { %v17546_v25 = vld [vmem:[#allocation4 + $0x149c] sm:$0xf0] }
  0xcd   :  { %v14278_v26 = vld [vmem:[#allocation4 + $0x1680] sm:$0xf]  ;;  %v14023_v30 = vor.u32 %v17546_v25, %v14022_v24  ;;  %6423 = vmatpush.bf16.msra.mxu1 %v13767_v29  ;;  %v18574_v24 = vpack.c.bf16 %v134_v8, %v134_v8 }
  0xce   :  { %v17610_v27 = vld [vmem:[#allocation4 + $0x169c] sm:$0xf0] }
  0xcf   :  { %v13478_v31 = vld [vmem:[#allocation4 + $0x1040] sm:$0xf]  ;;  %v14279_v35 = vor.u32 %v17610_v27, %v14278_v26  ;;  %6436 = vmatpush.bf16.msra.mxu2 %v14023_v30  ;;  %v18576_v27 = vpack.c.bf16 %v136_v10, %v136_v10 }
  0xd0   :  { %v17410_v32 = vld [vmem:[#allocation4 + $0x105c] sm:$0xf0] }
  0xd1   :  { %v13734_v33 = vld [vmem:[#allocation4 + $0x1240] sm:$0xf]  ;;  %v13479_v44 = vor.u32 %v17410_v32, %v13478_v31  ;;  %6449 = vmatpush.bf16.msra.mxu3 %v14279_v35 }
  0xd2   :  { %v17474_v36 = vld [vmem:[#allocation4 + $0x125c] sm:$0xf0] }
  0xd3   :  { %v13990_v39 = vld [vmem:[#allocation4 + $0x1440] sm:$0xf]  ;;  %v13735_v47 = vor.u32 %v17474_v36, %v13734_v33  ;;  %6411 = vmatpush.bf16.msra.mxu0 %v13479_v44 }
  0xd4   :  { %v17538_v41 = vld [vmem:[#allocation4 + $0x145c] sm:$0xf0] }
  0xd5   :  { %v14246_v42 = vld [vmem:[#allocation4 + $0x1640] sm:$0xf]  ;;  %v13991_v48 = vor.u32 %v17538_v41, %v13990_v39  ;;  %6424 = vmatpush.bf16.msra.mxu1 %v13735_v47 }
  0xd6   :  { %v17602_v43 = vld [vmem:[#allocation4 + $0x165c] sm:$0xf0] }
  0xd7   :  { %v13446_v45 = vld [vmem:[#allocation4 + $0x1000] sm:$0xf]  ;;  %v14247_v52 = vor.u32 %v17602_v43, %v14246_v42  ;;  %6437 = vmatpush.bf16.msra.mxu2 %v13991_v48 }
  0xd8   :  { %v17402_v46 = vld [vmem:[#allocation4 + $0x101c] sm:$0xf0] }
  0xd9   :  { %v13702_v49 = vld [vmem:[#allocation4 + $0x1200] sm:$0xf]  ;;  %v13447_v59 = vor.u32 %v17402_v46, %v13446_v45  ;;  %6450 = vmatpush.bf16.msra.mxu3 %v14247_v52 }
  0xda   :  { %v17466_v50 = vld [vmem:[#allocation4 + $0x121c] sm:$0xf0] }
  0xdb   :  { %v13958_v51 = vld [vmem:[#allocation4 + $0x1400] sm:$0xf]  ;;  %v13703_v0 = vor.u32 %v17466_v50, %v13702_v49  ;;  %6412 = vmatpush.bf16.msra.mxu0 %v13447_v59 }
  0xdc   :  { %v17530_v53 = vld [vmem:[#allocation4 + $0x141c] sm:$0xf0] }
  0xdd   :  { %v14214_v54 = vld [vmem:[#allocation4 + $0x1600] sm:$0xf]  ;;  %v13959_v1 = vor.u32 %v17530_v53, %v13958_v51  ;;  %6425 = vmatpush.bf16.msra.mxu1 %v13703_v0 }
  0xde   :  { %v17594_v55 = vld [vmem:[#allocation4 + $0x161c] sm:$0xf0] }
  0xdf   :  { %v14694_v56 = vld [vmem:[#allocation4 + $0x19c0] sm:$0xf]  ;;  %v14215_v5 = vor.u32 %v17594_v55, %v14214_v54  ;;  %6438 = vmatpush.bf16.msra.mxu2 %v13959_v1 }
  0xe0   :  { %v17714_v57 = vld [vmem:[#allocation4 + $0x19dc] sm:$0xf0]  ;;  %6426 = vmatmul.bf16.vlgmr.msra.gmra.mxu1 %v18574_v24 }
  0xe1   :  { %v14950_v58 = vld [vmem:[#allocation4 + $0x1bc0] sm:$0xf]  ;;  %v14695_v6 = vor.u32 %v17714_v57, %v14694_v56  ;;  %6451 = vmatpush.bf16.msra.mxu3 %v14215_v5 }
  0xe2   :  { %v17778_v60 = vld [vmem:[#allocation4 + $0x1bdc] sm:$0xf0]  ;;  %6439 = vmatmul.bf16.vlgmr.msra.gmra.mxu2 %v18572_v23 }
  0xe3   :  { %v15206_v61 = vld [vmem:[#allocation4 + $0x1dc0] sm:$0xf]  ;;  %v14951_v11 = vor.u32 %v17778_v60, %v14950_v58  ;;  %6457 = vmatpush.bf16.msrb.mxu0 %v14695_v6 }
  0xe4   :  { %v17842_v62 = vld [vmem:[#allocation4 + $0x1ddc] sm:$0xf0]  ;;  %6452 = vmatmul.bf16.vlgmr.msra.gmra.mxu3 %v18576_v27 }
  0xe5   :  { %v15462_v2 = vld [vmem:[#allocation4 + $0x1fc0] sm:$0xf]  ;;  %v15207_v12 = vor.u32 %v17842_v62, %v15206_v61  ;;  %6470 = vmatpush.bf16.msrb.mxu1 %v14951_v11 }
  0xe6   :  { %v17906_v3 = vld [vmem:[#allocation4 + $0x1fdc] sm:$0xf0] }
  0xe7   :  { %v133_v4 = vld [vmem:[#allocation2 + $0x40] sm:$0xff]  ;;  %v15463_v18 = vor.u32 %v17906_v3, %v15462_v2  ;;  %6483 = vmatpush.bf16.msrb.mxu2 %v15207_v12 }
  0xe8   :  { %v14662_v13 = vld [vmem:[#allocation4 + $0x1980] sm:$0xf]  ;;  %v18570_v19 = vpack.c.bf16 %v133_v4, %v133_v4 }
  0xe9   :  { %v17706_v14 = vld [vmem:[#allocation4 + $0x199c] sm:$0xf0]  ;;  %6496 = vmatpush.bf16.msrb.mxu3 %v15463_v18 }
  0xea   :  { %v14918_v15 = vld [vmem:[#allocation4 + $0x1b80] sm:$0xf]  ;;  %v14663_v28 = vor.u32 %v17706_v14, %v14662_v13  ;;  %6413 = vmatmul.bf16.vlgmr.msra.gmra.mxu0 %v18570_v19 }
  0xeb   :  { %v17770_v20 = vld [vmem:[#allocation4 + $0x1b9c] sm:$0xf0] }
  0xec   :  { %v15174_v21 = vld [vmem:[#allocation4 + $0x1d80] sm:$0xf]  ;;  %v14919_v29 = vor.u32 %v17770_v20, %v14918_v15  ;;  %6458 = vmatpush.bf16.msrb.mxu0 %v14663_v28 }
  0xed   :  { %v17834_v22 = vld [vmem:[#allocation4 + $0x1d9c] sm:$0xf0] }
  0xee   :  { %v15430_v25 = vld [vmem:[#allocation4 + $0x1f80] sm:$0xf]  ;;  %v15175_v30 = vor.u32 %v17834_v22, %v15174_v21  ;;  %6471 = vmatpush.bf16.msrb.mxu1 %v14919_v29 }
  0xef   :  { %v17898_v26 = vld [vmem:[#allocation4 + $0x1f9c] sm:$0xf0] }
  0xf0   :  { %v14630_v31 = vld [vmem:[#allocation4 + $0x1940] sm:$0xf]  ;;  %v15431_v35 = vor.u32 %v17898_v26, %v15430_v25  ;;  %6484 = vmatpush.bf16.msrb.mxu2 %v15175_v30 }
  0xf1   :  { %v17698_v32 = vld [vmem:[#allocation4 + $0x195c] sm:$0xf0] }
  0xf2   :  { %v14886_v33 = vld [vmem:[#allocation4 + $0x1b40] sm:$0xf]  ;;  %v14631_v44 = vor.u32 %v17698_v32, %v14630_v31  ;;  %6497 = vmatpush.bf16.msrb.mxu3 %v15431_v35 }
  0xf3   :  { %v17762_v36 = vld [vmem:[#allocation4 + $0x1b5c] sm:$0xf0] }
  0xf4   :  { %v15142_v39 = vld [vmem:[#allocation4 + $0x1d40] sm:$0xf]  ;;  %v14887_v45 = vor.u32 %v17762_v36, %v14886_v33  ;;  %6459 = vmatpush.bf16.msrb.mxu0 %v14631_v44 }
  0xf5   :  { %v17826_v41 = vld [vmem:[#allocation4 + $0x1d5c] sm:$0xf0] }
  0xf6   :  { %v15398_v42 = vld [vmem:[#allocation4 + $0x1f40] sm:$0xf]  ;;  %v15143_v46 = vor.u32 %v17826_v41, %v15142_v39  ;;  %6472 = vmatpush.bf16.msrb.mxu1 %v14887_v45 }
  0xf7   :  { %v17890_v43 = vld [vmem:[#allocation4 + $0x1f5c] sm:$0xf0] }
  0xf8   :  { %v14598_v47 = vld [vmem:[#allocation4 + $0x1900] sm:$0xf]  ;;  %v15399_v50 = vor.u32 %v17890_v43, %v15398_v42  ;;  %6485 = vmatpush.bf16.msrb.mxu2 %v15143_v46 }
  0xf9   :  { %v17690_v48 = vld [vmem:[#allocation4 + $0x191c] sm:$0xf0] }
  0xfa   :  { %v14854_v49 = vld [vmem:[#allocation4 + $0x1b00] sm:$0xf]  ;;  %v14599_v56 = vor.u32 %v17690_v48, %v14598_v47  ;;  %6498 = vmatpush.bf16.msrb.mxu3 %v15399_v50 }
  0xfb   :  { %v17754_v51 = vld [vmem:[#allocation4 + $0x1b1c] sm:$0xf0] }
  0xfc   :  { %v15110_v52 = vld [vmem:[#allocation4 + $0x1d00] sm:$0xf]  ;;  %v14855_v57 = vor.u32 %v17754_v51, %v14854_v49  ;;  %6460 = vmatpush.bf16.msrb.mxu0 %v14599_v56  ;;  %v11880_v56 = vld [vmem:[#allocation4 + $0x3e0] sm:$0xf0] }
  0xfd   :  { %v17818_v53 = vld [vmem:[#allocation4 + $0x1d1c] sm:$0xf0] }
  0xfe   :  { %v15366_v54 = vld [vmem:[#allocation4 + $0x1f00] sm:$0xf]  ;;  %v15111_v58 = vor.u32 %v17818_v53, %v15110_v52  ;;  %6473 = vmatpush.bf16.msrb.mxu1 %v14855_v57  ;;  %v16942_v52 = vld [vmem:[#allocation4 + $0x1c4] sm:$0xf] }
  0xff   :  { %v17882_v55 = vld [vmem:[#allocation4 + $0x1f1c] sm:$0xf0]  ;;  %v11624_v53 = vld [vmem:[#allocation4 + $0x1e0] sm:$0xf0] }
 0x100   :  { %v14566_v59 = vld [vmem:[#allocation4 + $0x18c0] sm:$0xf]  ;;  %v15367_v62 = vor.u32 %v17882_v55, %v15366_v54  ;;  %6486 = vmatpush.bf16.msrb.mxu2 %v15111_v58  ;;  %v17006_v54 = vld [vmem:[#allocation4 + $0x3c4] sm:$0xf] }
 0x101   :  { %v17682_v60 = vld [vmem:[#allocation4 + $0x18dc] sm:$0xf0]  ;;  %v17070_v57 = vld [vmem:[#allocation4 + $0x5c4] sm:$0xf] }
 0x102   :  { %v14822_v61 = vld [vmem:[#allocation4 + $0x1ac0] sm:$0xf]  ;;  %v14567_v5 = vor.u32 %v17682_v60, %v14566_v59  ;;  %6499 = vmatpush.bf16.msrb.mxu3 %v15367_v62  ;;  %v12136_v58 = vld [vmem:[#allocation4 + $0x5e0] sm:$0xf0] }
 0x103   :  { %v17746_v0 = vld [vmem:[#allocation4 + $0x1adc] sm:$0xf0]  ;;  %v12392_v62 = vld [vmem:[#allocation4 + $0x7e0] sm:$0xf0] }
 0x104   :  { %v15078_v1 = vld [vmem:[#allocation4 + $0x1cc0] sm:$0xf]  ;;  %v14823_v6 = vor.u32 %v17746_v0, %v14822_v61  ;;  %6461 = vmatpush.bf16.msrb.mxu0 %v14567_v5  ;;  %v17134_v61 = vld [vmem:[#allocation4 + $0x7c4] sm:$0xf]  ;;  %v140_v5 = vld [vmem:[#allocation2 + $0x78] sm:$0xff] }
 0x105   :  { %v17810_v2 = vld [vmem:[#allocation4 + $0x1cdc] sm:$0xf0] }
 0x106   :  { %v15334_v3 = vld [vmem:[#allocation4 + $0x1ec0] sm:$0xf]  ;;  %v15079_v7 = vor.u32 %v17810_v2, %v15078_v1  ;;  %6474 = vmatpush.bf16.msrb.mxu1 %v14823_v6  ;;  %v11627_v2 = vor.u32 %v16942_v52, %v11624_v53  ;;  %v11883_v6 = vor.u32 %v17006_v54, %v11880_v56  ;;  %v17046_v52 = vld [vmem:[#allocation4 + $0x504] sm:$0xf] }
 0x107   :  { %v17874_v4 = vld [vmem:[#allocation4 + $0x1edc] sm:$0xf0]  ;;  %v12040_v53 = vld [vmem:[#allocation4 + $0x520] sm:$0xf0] }
 0x108   :  { %v14534_v8 = vld [vmem:[#allocation4 + $0x1880] sm:$0xf]  ;;  %v15335_v12 = vor.u32 %v17874_v4, %v15334_v3  ;;  %6487 = vmatpush.bf16.msrb.mxu2 %v15079_v7  ;;  %v139_v3 = vld [vmem:[#allocation2 + $0x70] sm:$0xff]  ;;  %v138_v4 = vld [vmem:[#allocation2 + $0x68] sm:$0xff]  ;;  %v12139_v7 = vor.u32 %v17070_v57, %v12136_v58  ;;  %v12043_v58 = vor.u32 %v17046_v52, %v12040_v53 }
 0x109   :  { %v17674_v10 = vld [vmem:[#allocation4 + $0x189c] sm:$0xf0]  ;;  %v17110_v54 = vld [vmem:[#allocation4 + $0x704] sm:$0xf] }
 0x10a   :  { %v14790_v11 = vld [vmem:[#allocation4 + $0x1a80] sm:$0xf]  ;;  %v14535_v21 = vor.u32 %v17674_v10, %v14534_v8  ;;  %6500 = vmatpush.bf16.msrb.mxu3 %v15335_v12  ;;  %v16934_v8 = vld [vmem:[#allocation4 + $0x184] sm:$0xf]  ;;  %v12395_v12 = vor.u32 %v17134_v61, %v12392_v62 }
 0x10b   :  { %v17738_v13 = vld [vmem:[#allocation4 + $0x1a9c] sm:$0xf0]  ;;  %v11592_v10 = vld [vmem:[#allocation4 + $0x1a0] sm:$0xf0] }
 0x10c   :  { %v15046_v14 = vld [vmem:[#allocation4 + $0x1c80] sm:$0xf]  ;;  %v14791_v22 = vor.u32 %v17738_v13, %v14790_v11  ;;  %6462 = vmatpush.bf16.msrb.mxu0 %v14535_v21  ;;  %v16998_v11 = vld [vmem:[#allocation4 + $0x384] sm:$0xf]  ;;  %v18586_v21 = vpack.c.bf16 %v138_v4, %v138_v4 }
 0x10d   :  { %v17802_v15 = vld [vmem:[#allocation4 + $0x1c9c] sm:$0xf0]  ;;  %v16974_v61 = vld [vmem:[#allocation4 + $0x2c4] sm:$0xf] }
 0x10e   :  { %v15302_v18 = vld [vmem:[#allocation4 + $0x1e80] sm:$0xf]  ;;  %v15047_v25 = vor.u32 %v17802_v15, %v15046_v14  ;;  %6475 = vmatpush.bf16.msrb.mxu1 %v14791_v22  ;;  %v11848_v14 = vld [vmem:[#allocation4 + $0x3a0] sm:$0xf0] }
 0x10f   :  { %v17866_v20 = vld [vmem:[#allocation4 + $0x1e9c] sm:$0xf0]  ;;  %v17062_v15 = vld [vmem:[#allocation4 + $0x584] sm:$0xf] }
 0x110   :  { %v14502_v26 = vld [vmem:[#allocation4 + $0x1840] sm:$0xf]  ;;  %v15303_v30 = vor.u32 %v17866_v20, %v15302_v18  ;;  %6488 = vmatpush.bf16.msrb.mxu2 %v15047_v25  ;;  %v12104_v18 = vld [vmem:[#allocation4 + $0x5a0] sm:$0xf0]  ;;  %v18584_v20 = vpack.c.bf16 %v139_v3, %v139_v3 }
 0x111   :  { %v17666_v28 = vld [vmem:[#allocation4 + $0x185c] sm:$0xf0]  ;;  %v17126_v22 = vld [vmem:[#allocation4 + $0x784] sm:$0xf] }
 0x112   :  { %v14758_v29 = vld [vmem:[#allocation4 + $0x1a40] sm:$0xf]  ;;  %v14503_v39 = vor.u32 %v17666_v28, %v14502_v26  ;;  %6501 = vmatpush.bf16.msrb.mxu3 %v15303_v30  ;;  %v12360_v25 = vld [vmem:[#allocation4 + $0x7a0] sm:$0xf0]  ;;  %v18588_v26 = vpack.c.bf16 %v140_v5, %v140_v5  ;;  %v11595_v28 = vor.u32 %v16934_v8, %v11592_v10  ;;  %v12107_v30 = vor.u32 %v17062_v15, %v12104_v18 }
 0x113   :  { %v17730_v31 = vld [vmem:[#allocation4 + $0x1a5c] sm:$0xf0]  ;;  %v17102_v3 = vld [vmem:[#allocation4 + $0x6c4] sm:$0xf] }
 0x114   :  { %v15014_v32 = vld [vmem:[#allocation4 + $0x1c40] sm:$0xf]  ;;  %v14759_v43 = vor.u32 %v17730_v31, %v14758_v29  ;;  %6463 = vmatpush.bf16.msrb.mxu0 %v14503_v39  ;;  %v11851_v29 = vor.u32 %v16998_v11, %v11848_v14  ;;  %v16926_v31 = vld [vmem:[#allocation4 + $0x144] sm:$0xf] }
 0x115   :  { %v17794_v33 = vld [vmem:[#allocation4 + $0x1c5c] sm:$0xf0]  ;;  %v17054_v39 = vld [vmem:[#allocation4 + $0x544] sm:$0xf] }
 0x116   :  { %v15270_v35 = vld [vmem:[#allocation4 + $0x1e40] sm:$0xf]  ;;  %v15015_v44 = vor.u32 %v17794_v33, %v15014_v32  ;;  %6476 = vmatpush.bf16.msrb.mxu1 %v14759_v43  ;;  %v11560_v32 = vld [vmem:[#allocation4 + $0x160] sm:$0xf0] }
 0x117   :  { %v17858_v36 = vld [vmem:[#allocation4 + $0x1e5c] sm:$0xf0]  ;;  %v16990_v33 = vld [vmem:[#allocation4 + $0x344] sm:$0xf] }
 0x118   :  { %v14470_v41 = vld [vmem:[#allocation4 + $0x1800] sm:$0xf]  ;;  %v15271_v48 = vor.u32 %v17858_v36, %v15270_v35  ;;  %6489 = vmatpush.bf16.msrb.mxu2 %v15015_v44  ;;  %v12363_v35 = vor.u32 %v17126_v22, %v12360_v25  ;;  %v11816_v36 = vld [vmem:[#allocation4 + $0x360] sm:$0xf0]  ;;  %v11563_v44 = vor.u32 %v16926_v31, %v11560_v32 }
 0x119   :  { %v17658_v42 = vld [vmem:[#allocation4 + $0x181c] sm:$0xf0]  ;;  %v12328_v43 = vld [vmem:[#allocation4 + $0x760] sm:$0xf0] }
 0x11a   :  { %v14726_v45 = vld [vmem:[#allocation4 + $0x1a00] sm:$0xf]  ;;  %v14471_v55 = vor.u32 %v17658_v42, %v14470_v41  ;;  %6502 = vmatpush.bf16.msrb.mxu3 %v15271_v48  ;;  %v12072_v41 = vld [vmem:[#allocation4 + $0x560] sm:$0xf0] }
 0x11b   :  { %v17722_v46 = vld [vmem:[#allocation4 + $0x1a1c] sm:$0xf0]  ;;  %v17118_v42 = vld [vmem:[#allocation4 + $0x744] sm:$0xf] }
 0x11c   :  { %v14982_v47 = vld [vmem:[#allocation4 + $0x1c00] sm:$0xf]  ;;  %v14727_v59 = vor.u32 %v17722_v46, %v14726_v45  ;;  %6464 = vmatpush.bf16.msrb.mxu0 %v14471_v55  ;;  %v11819_v45 = vor.u32 %v16990_v33, %v11816_v36  ;;  %v12075_v46 = vor.u32 %v17054_v39, %v12072_v41  ;;  %v11528_v48 = vld [vmem:[#allocation4 + $0x120] sm:$0xf0] }
 0x11d   :  { %v17786_v49 = vld [vmem:[#allocation4 + $0x1c1c] sm:$0xf0]  ;;  %v12296_v55 = vld [vmem:[#allocation4 + $0x720] sm:$0xf0] }
 0x11e   :  { %v15238_v50 = vld [vmem:[#allocation4 + $0x1e00] sm:$0xf]  ;;  %v14983_v60 = vor.u32 %v17786_v49, %v14982_v47  ;;  %6477 = vmatpush.bf16.msrb.mxu1 %v14727_v59  ;;  %v16918_v47 = vld [vmem:[#allocation4 + $0x104] sm:$0xf]  ;;  %v12299_v62 = vor.u32 %v17110_v54, %v12296_v55 }
 0x11f   :  { %v17850_v51 = vld [vmem:[#allocation4 + $0x1e1c] sm:$0xf0]  ;;  %v16982_v49 = vld [vmem:[#allocation4 + $0x304] sm:$0xf]  ;;  %v11531_v56 = vor.u32 %v16918_v47, %v11528_v48 }
 0x120   :  { %v137_v0 = vld [vmem:[#allocation2 + $0x60] sm:$0xff]  ;;  %v15239_v1 = vor.u32 %v17850_v51, %v15238_v50  ;;  %6490 = vmatpush.bf16.msrb.mxu2 %v14983_v60  ;;  %6509 = vmatpush.bf16.msra.mxu0 %v11627_v2  ;;  %v12331_v50 = vor.u32 %v17118_v42, %v12328_v43 }
 0x121   :  { %v18582_v13 = vpack.c.bf16 %v137_v0, %v137_v0  ;;  %6478 = vmatmul.bf16.vlgmr.msrb.gmra.mxu1 %v18586_v21  ;;  %v11784_v51 = vld [vmem:[#allocation4 + $0x320] sm:$0xf0] }
 0x122   :  { %6503 = vmatpush.bf16.msrb.mxu3 %v15239_v1  ;;  %6522 = vmatpush.bf16.msra.mxu1 %v11883_v6  ;;  %v11787_v57 = vor.u32 %v16982_v49, %v11784_v51  ;;  %v16910_v59 = vld [vmem:[#allocation4 + $0xc4] sm:$0xf] }
 0x123   :  { %6465 = vmatmul.bf16.vlgmr.msrb.gmra.mxu0 %v18582_v13  ;;  %6491 = vmatmul.bf16.vlgmr.msrb.gmra.mxu2 %v18584_v20  ;;  %v11496_v60 = vld [vmem:[#allocation4 + $0xe0] sm:$0xf0] }
 0x124   :  { %6535 = vmatpush.bf16.msra.mxu2 %v12139_v7  ;;  %6510 = vmatpush.bf16.msra.mxu0 %v11595_v28  ;;  %v11752_v0 = vld [vmem:[#allocation4 + $0x2e0] sm:$0xf0]  ;;  %v11499_v5 = vor.u32 %v16910_v59, %v11496_v60 }
 0x125   :  { %6504 = vmatmul.bf16.vlgmr.msrb.gmra.mxu3 %v18588_v26  ;;  %v17038_v1 = vld [vmem:[#allocation4 + $0x4c4] sm:$0xf]  ;;  %v11755_v6 = vor.u32 %v16974_v61, %v11752_v0 }
 0x126   :  { %6548 = vmatpush.bf16.msra.mxu3 %v12395_v12  ;;  %6523 = vmatpush.bf16.msra.mxu1 %v11851_v29  ;;  %v12008_v2 = vld [vmem:[#allocation4 + $0x4e0] sm:$0xf0] }
 0x127   :  { %v12264_v4 = vld [vmem:[#allocation4 + $0x6e0] sm:$0xf0]  ;;  %v12011_v7 = vor.u32 %v17038_v1, %v12008_v2 }
 0x128   :  { %6536 = vmatpush.bf16.msra.mxu2 %v12107_v30  ;;  %6511 = vmatpush.bf16.msra.mxu0 %v11563_v44  ;;  %v16902_v8 = vld [vmem:[#allocation4 + $0x84] sm:$0xf]  ;;  %v12267_v12 = vor.u32 %v17102_v3, %v12264_v4 }
 0x129   :  { %v11464_v10 = vld [vmem:[#allocation4 + $0xa0] sm:$0xf0] }
 0x12a   :  { %6549 = vmatpush.bf16.msra.mxu3 %v12363_v35  ;;  %6524 = vmatpush.bf16.msra.mxu1 %v11819_v45  ;;  %v16966_v11 = vld [vmem:[#allocation4 + $0x284] sm:$0xf]  ;;  %v11467_v28 = vor.u32 %v16902_v8, %v11464_v10 }
 0x12b   :  { %v11720_v14 = vld [vmem:[#allocation4 + $0x2a0] sm:$0xf0] }
 0x12c   :  { %6537 = vmatpush.bf16.msra.mxu2 %v12075_v46  ;;  %6512 = vmatpush.bf16.msra.mxu0 %v11531_v56  ;;  %v17030_v15 = vld [vmem:[#allocation4 + $0x484] sm:$0xf]  ;;  %v11723_v29 = vor.u32 %v16966_v11, %v11720_v14 }
 0x12d   :  { %v11976_v18 = vld [vmem:[#allocation4 + $0x4a0] sm:$0xf0] }
 0x12e   :  { %6550 = vmatpush.bf16.msra.mxu3 %v12331_v50  ;;  %6525 = vmatpush.bf16.msra.mxu1 %v11787_v57  ;;  %v17094_v22 = vld [vmem:[#allocation4 + $0x684] sm:$0xf]  ;;  %v11979_v30 = vor.u32 %v17030_v15, %v11976_v18 }
 0x12f   :  { %v12232_v25 = vld [vmem:[#allocation4 + $0x6a0] sm:$0xf0] }
 0x130   :  { %6538 = vmatpush.bf16.msra.mxu2 %v12043_v58  ;;  %6513 = vmatpush.bf16.msra.mxu0 %v11499_v5  ;;  %v16894_v31 = vld [vmem:[#allocation4 + $0x44] sm:$0xf]  ;;  %v12235_v35 = vor.u32 %v17094_v22, %v12232_v25 }
 0x131   :  { %v11432_v32 = vld [vmem:[#allocation4 + $0x60] sm:$0xf0] }
 0x132   :  { %6551 = vmatpush.bf16.msra.mxu3 %v12299_v62  ;;  %6526 = vmatpush.bf16.msra.mxu1 %v11755_v6  ;;  %v16958_v33 = vld [vmem:[#allocation4 + $0x244] sm:$0xf]  ;;  %v11435_v44 = vor.u32 %v16894_v31, %v11432_v32 }
 0x133   :  { %v11688_v36 = vld [vmem:[#allocation4 + $0x260] sm:$0xf0] }
 0x134   :  { %6539 = vmatpush.bf16.msra.mxu2 %v12011_v7  ;;  %v17022_v39 = vld [vmem:[#allocation4 + $0x444] sm:$0xf]  ;;  %6514 = vmatpush.bf16.msra.mxu0 %v11467_v28  ;;  %v11691_v47 = vor.u32 %v16958_v33, %v11688_v36 }
 0x135   :  { %v11944_v41 = vld [vmem:[#allocation4 + $0x460] sm:$0xf0] }
 0x136   :  { %6552 = vmatpush.bf16.msra.mxu3 %v12267_v12  ;;  %v17086_v42 = vld [vmem:[#allocation4 + $0x644] sm:$0xf]  ;;  %6527 = vmatpush.bf16.msra.mxu1 %v11723_v29  ;;  %v11947_v48 = vor.u32 %v17022_v39, %v11944_v41 }
 0x137   :  { %v12200_v43 = vld [vmem:[#allocation4 + $0x660] sm:$0xf0] }
 0x138   :  { %v16886_v45 = vld [vmem:[#allocation4 + $0x4] sm:$0xf]  ;;  %6540 = vmatpush.bf16.msra.mxu2 %v11979_v30  ;;  %v12203_v52 = vor.u32 %v17086_v42, %v12200_v43  ;;  %6515 = vmatpush.bf16.msra.mxu0 %v11435_v44 }
 0x139   :  { %v11400_v46 = vld [vmem:[#allocation4 + $0x20] sm:$0xf0] }
 0x13a   :  { %v16950_v49 = vld [vmem:[#allocation4 + $0x204] sm:$0xf]  ;;  %6553 = vmatpush.bf16.msra.mxu3 %v12235_v35  ;;  %v11403_v59 = vor.u32 %v16886_v45, %v11400_v46  ;;  %6528 = vmatpush.bf16.msra.mxu1 %v11691_v47 }
 0x13b   :  { %v11656_v50 = vld [vmem:[#allocation4 + $0x220] sm:$0xf0] }
 0x13c   :  { %v17014_v51 = vld [vmem:[#allocation4 + $0x404] sm:$0xf]  ;;  %6541 = vmatpush.bf16.msra.mxu2 %v11947_v48  ;;  %v11659_v0 = vor.u32 %v16950_v49, %v11656_v50  ;;  %6516 = vmatpush.bf16.msra.mxu0 %v11403_v59 }
 0x13d   :  { %v11912_v53 = vld [vmem:[#allocation4 + $0x420] sm:$0xf0] }
 0x13e   :  { %v17078_v54 = vld [vmem:[#allocation4 + $0x604] sm:$0xf]  ;;  %v11915_v1 = vor.u32 %v17014_v51, %v11912_v53  ;;  %6554 = vmatpush.bf16.msra.mxu3 %v12203_v52  ;;  %6529 = vmatpush.bf16.msra.mxu1 %v11659_v0 }
 0x13f   :  { %v12168_v55 = vld [vmem:[#allocation4 + $0x620] sm:$0xf0]  ;;  %6517 = vmatmul.bf16.vlgmr.msra.gmra.mxu0 %v18549_v9 }
 0x140   :  { %v17198_v56 = vld [vmem:[#allocation4 + $0x9c4] sm:$0xf]  ;;  %v12171_v4 = vor.u32 %v17078_v54, %v12168_v55  ;;  %6542 = vmatpush.bf16.msra.mxu2 %v11915_v1 }
 0x141   :  { %v12648_v57 = vld [vmem:[#allocation4 + $0x9e0] sm:$0xf0]  ;;  %6530 = vmatmul.bf16.vlgmr.msra.gmra.mxu1 %v18553_v17 }
 0x142   :  { %v17262_v58 = vld [vmem:[#allocation4 + $0xbc4] sm:$0xf]  ;;  %v12651_v5 = vor.u32 %v17198_v56, %v12648_v57  ;;  %6555 = vmatpush.bf16.msra.mxu3 %v12171_v4 }
 0x143   :  { %v12904_v60 = vld [vmem:[#allocation4 + $0xbe0] sm:$0xf0]  ;;  %6543 = vmatmul.bf16.vlgmr.msra.gmra.mxu2 %v18546_v63 }
 0x144   :  { %v17326_v61 = vld [vmem:[#allocation4 + $0xdc4] sm:$0xf]  ;;  %v12907_v6 = vor.u32 %v17262_v58, %v12904_v60  ;;  %6561 = vmatpush.bf16.msrb.mxu0 %v12651_v5 }
 0x145   :  { %v13160_v62 = vld [vmem:[#allocation4 + $0xde0] sm:$0xf0]  ;;  %6556 = vmatmul.bf16.vlgmr.msra.gmra.mxu3 %v18551_v16 }
 0x146   :  { %v17390_v2 = vld [vmem:[#allocation4 + $0xfc4] sm:$0xf]  ;;  %v13163_v7 = vor.u32 %v17326_v61, %v13160_v62  ;;  %6574 = vmatpush.bf16.msrb.mxu1 %v12907_v6  ;;  %v6310_v6 = vpop.f32.mrf.mxu0 }
 0x147   :  { %v13416_v3 = vld [vmem:[#allocation4 + $0xfe0] sm:$0xf0] }
 0x148   :  { %v17190_v8 = vld [vmem:[#allocation4 + $0x984] sm:$0xf]  ;;  %v13419_v12 = vor.u32 %v17390_v2, %v13416_v3  ;;  %6587 = vmatpush.bf16.msrb.mxu2 %v13163_v7 }
 0x149   :  { %v12616_v10 = vld [vmem:[#allocation4 + $0x9a0] sm:$0xf0] }
 0x14a   :  { %v17254_v11 = vld [vmem:[#allocation4 + $0xb84] sm:$0xf]  ;;  %v12619_v28 = vor.u32 %v17190_v8, %v12616_v10  ;;  %6600 = vmatpush.bf16.msrb.mxu3 %v13419_v12 }
 0x14b   :  { %v12872_v14 = vld [vmem:[#allocation4 + $0xba0] sm:$0xf0] }
 0x14c   :  { %v17318_v15 = vld [vmem:[#allocation4 + $0xd84] sm:$0xf]  ;;  %v12875_v29 = vor.u32 %v17254_v11, %v12872_v14  ;;  %6562 = vmatpush.bf16.msrb.mxu0 %v12619_v28 }
 0x14d   :  { %v13128_v18 = vld [vmem:[#allocation4 + $0xda0] sm:$0xf0] }
 0x14e   :  { %v17382_v22 = vld [vmem:[#allocation4 + $0xf84] sm:$0xf]  ;;  %v13131_v30 = vor.u32 %v17318_v15, %v13128_v18  ;;  %6575 = vmatpush.bf16.msrb.mxu1 %v12875_v29  ;;  %v6323_v29 = vpop.f32.mrf.mxu1 }
 0x14f   :  { %v13384_v25 = vld [vmem:[#allocation4 + $0xfa0] sm:$0xf0] }
 0x150   :  { %v17182_v31 = vld [vmem:[#allocation4 + $0x944] sm:$0xf]  ;;  %v13387_v35 = vor.u32 %v17382_v22, %v13384_v25  ;;  %6588 = vmatpush.bf16.msrb.mxu2 %v13131_v30  ;;  %v6336_v30 = vpop.f32.mrf.mxu2 }
 0x151   :  { %v12584_v32 = vld [vmem:[#allocation4 + $0x960] sm:$0xf0] }
 0x152   :  { %v17246_v33 = vld [vmem:[#allocation4 + $0xb44] sm:$0xf]  ;;  %v12587_v44 = vor.u32 %v17182_v31, %v12584_v32  ;;  %6601 = vmatpush.bf16.msrb.mxu3 %v13387_v35  ;;  %v6324_v32 = vadd.f32 %v6323_v29, %v6310_v6 }
 0x153   :  { %v12840_v36 = vld [vmem:[#allocation4 + $0xb60] sm:$0xf0] }
 0x154   :  { %v17310_v39 = vld [vmem:[#allocation4 + $0xd44] sm:$0xf]  ;;  %v12843_v45 = vor.u32 %v17246_v33, %v12840_v36  ;;  %6563 = vmatpush.bf16.msrb.mxu0 %v12587_v44 }
 0x155   :  { %v13096_v41 = vld [vmem:[#allocation4 + $0xd60] sm:$0xf0] }
 0x156   :  { %v17374_v42 = vld [vmem:[#allocation4 + $0xf44] sm:$0xf]  ;;  %v13099_v46 = vor.u32 %v17310_v39, %v13096_v41  ;;  %6576 = vmatpush.bf16.msrb.mxu1 %v12843_v45 }
 0x157   :  { %v13352_v43 = vld [vmem:[#allocation4 + $0xf60] sm:$0xf0] }
 0x158   :  { %v17174_v47 = vld [vmem:[#allocation4 + $0x904] sm:$0xf]  ;;  %v13355_v50 = vor.u32 %v17374_v42, %v13352_v43  ;;  %6589 = vmatpush.bf16.msrb.mxu2 %v13099_v46  ;;  %v6337_v46 = vadd.f32 %v6336_v30, %v6324_v32 }
 0x159   :  { %v12552_v48 = vld [vmem:[#allocation4 + $0x920] sm:$0xf0] }
 0x15a   :  { %v17238_v49 = vld [vmem:[#allocation4 + $0xb04] sm:$0xf]  ;;  %v12555_v56 = vor.u32 %v17174_v47, %v12552_v48  ;;  %6602 = vmatpush.bf16.msrb.mxu3 %v13355_v50 }
 0x15b   :  { %v12808_v51 = vld [vmem:[#allocation4 + $0xb20] sm:$0xf0] }
 0x15c   :  { %v17302_v52 = vld [vmem:[#allocation4 + $0xd04] sm:$0xf]  ;;  %v12811_v57 = vor.u32 %v17238_v49, %v12808_v51  ;;  %6564 = vmatpush.bf16.msrb.mxu0 %v12555_v56  ;;  %v6349_v49 = vpop.f32.mrf.mxu3 }
 0x15d   :  { %v13064_v53 = vld [vmem:[#allocation4 + $0xd20] sm:$0xf0] }
 0x15e   :  { %v17366_v54 = vld [vmem:[#allocation4 + $0xf04] sm:$0xf]  ;;  %v13067_v58 = vor.u32 %v17302_v52, %v13064_v53  ;;  %6577 = vmatpush.bf16.msrb.mxu1 %v12811_v57  ;;  %v18598_v53 = vadd.f32 %v6349_v49, %v6337_v46 }
 0x15f   :  { %v13320_v55 = vld [vmem:[#allocation4 + $0xf20] sm:$0xf0] }
 0x160   :  { %v17166_v59 = vld [vmem:[#allocation4 + $0x8c4] sm:$0xf]  ;;  %v13323_v62 = vor.u32 %v17366_v54, %v13320_v55  ;;  %6590 = vmatpush.bf16.msrb.mxu2 %v13067_v58  ;;  %v6312_v54 = vpop.f32.mrf.mxu0 }
 0x161   :  { %v12520_v60 = vld [vmem:[#allocation4 + $0x8e0] sm:$0xf0] }
 0x162   :  { %v17230_v61 = vld [vmem:[#allocation4 + $0xac4] sm:$0xf]  ;;  %v12523_v5 = vor.u32 %v17166_v59, %v12520_v60  ;;  %6603 = vmatpush.bf16.msrb.mxu3 %v13323_v62 }
 0x163   :  { %v12776_v0 = vld [vmem:[#allocation4 + $0xae0] sm:$0xf0] }
 0x164   :  { %v17294_v1 = vld [vmem:[#allocation4 + $0xcc4] sm:$0xf]  ;;  %v12779_v7 = vor.u32 %v17230_v61, %v12776_v0  ;;  %6565 = vmatpush.bf16.msrb.mxu0 %v12523_v5  ;;  %v6338_v5 = vpop.f32.mrf.mxu2  ;;  %v6351_v32 = vpop.f32.mrf.mxu3 }
 0x165   :  { %v13032_v2 = vld [vmem:[#allocation4 + $0xce0] sm:$0xf0] }
 0x166   :  { %v17358_v3 = vld [vmem:[#allocation4 + $0xec4] sm:$0xf]  ;;  %v13035_v8 = vor.u32 %v17294_v1, %v13032_v2  ;;  %6578 = vmatpush.bf16.msrb.mxu1 %v12779_v7 }
 0x167   :  { %v13288_v4 = vld [vmem:[#allocation4 + $0xee0] sm:$0xf0] }
 0x168   :  { %v17158_v10 = vld [vmem:[#allocation4 + $0x884] sm:$0xf]  ;;  %v13291_v14 = vor.u32 %v17358_v3, %v13288_v4  ;;  %6591 = vmatpush.bf16.msrb.mxu2 %v13035_v8  ;;  %v6325_v4 = vpop.f32.mrf.mxu1 }
 0x169   :  { %v12488_v11 = vld [vmem:[#allocation4 + $0x8a0] sm:$0xf0] }
 0x16a   :  { %v17222_v12 = vld [vmem:[#allocation4 + $0xa84] sm:$0xf]  ;;  %v12491_v31 = vor.u32 %v17158_v10, %v12488_v11  ;;  %6604 = vmatpush.bf16.msrb.mxu3 %v13291_v14 }
 0x16b   :  { %v12744_v15 = vld [vmem:[#allocation4 + $0xaa0] sm:$0xf0] }
 0x16c   :  { %v17286_v18 = vld [vmem:[#allocation4 + $0xc84] sm:$0xf]  ;;  %v12747_v33 = vor.u32 %v17222_v12, %v12744_v15  ;;  %6566 = vmatpush.bf16.msrb.mxu0 %v12491_v31 }
 0x16d   :  { %v13000_v22 = vld [vmem:[#allocation4 + $0xca0] sm:$0xf0] }
 0x16e   :  { %v17350_v25 = vld [vmem:[#allocation4 + $0xe84] sm:$0xf]  ;;  %v13003_v35 = vor.u32 %v17286_v18, %v13000_v22  ;;  %6579 = vmatpush.bf16.msrb.mxu1 %v12747_v33 }
 0x16f   :  { %v13256_v28 = vld [vmem:[#allocation4 + $0xea0] sm:$0xf0] }
 0x170   :  { %v17150_v36 = vld [vmem:[#allocation4 + $0x844] sm:$0xf]  ;;  %v13259_v42 = vor.u32 %v17350_v25, %v13256_v28  ;;  %6592 = vmatpush.bf16.msrb.mxu2 %v13003_v35 }
 0x171   :  { %v12456_v39 = vld [vmem:[#allocation4 + $0x860] sm:$0xf0] }
 0x172   :  { %v17214_v41 = vld [vmem:[#allocation4 + $0xa44] sm:$0xf]  ;;  %v12459_v50 = vor.u32 %v17150_v36, %v12456_v39  ;;  %6605 = vmatpush.bf16.msrb.mxu3 %v13259_v42 }
 0x173   :  { %v12712_v43 = vld [vmem:[#allocation4 + $0xa60] sm:$0xf0] }
 0x174   :  { %v17278_v44 = vld [vmem:[#allocation4 + $0xc44] sm:$0xf]  ;;  %v12715_v55 = vor.u32 %v17214_v41, %v12712_v43  ;;  %6567 = vmatpush.bf16.msrb.mxu0 %v12459_v50 }
 0x175   :  { %v12968_v45 = vld [vmem:[#allocation4 + $0xc60] sm:$0xf0] }
 0x176   :  { %v17342_v47 = vld [vmem:[#allocation4 + $0xe44] sm:$0xf]  ;;  %v12971_v56 = vor.u32 %v17278_v44, %v12968_v45  ;;  %6580 = vmatpush.bf16.msrb.mxu1 %v12715_v55 }
 0x177   :  { %v13224_v48 = vld [vmem:[#allocation4 + $0xe60] sm:$0xf0] }
 0x178   :  { %v17142_v51 = vld [vmem:[#allocation4 + $0x804] sm:$0xf]  ;;  %v13227_v60 = vor.u32 %v17342_v47, %v13224_v48  ;;  %6593 = vmatpush.bf16.msrb.mxu2 %v12971_v56 }
 0x179   :  { %v12424_v52 = vld [vmem:[#allocation4 + $0x820] sm:$0xf0] }
 0x17a   :  { %v17206_v57 = vld [vmem:[#allocation4 + $0xa04] sm:$0xf]  ;;  %v12427_v6 = vor.u32 %v17142_v51, %v12424_v52  ;;  %6606 = vmatpush.bf16.msrb.mxu3 %v13227_v60 }
 0x17b   :  { %v12680_v58 = vld [vmem:[#allocation4 + $0xa20] sm:$0xf0] }
 0x17c   :  { %v17270_v59 = vld [vmem:[#allocation4 + $0xc04] sm:$0xf]  ;;  %v12683_v11 = vor.u32 %v17206_v57, %v12680_v58  ;;  %6568 = vmatpush.bf16.msrb.mxu0 %v12427_v6  ;;  %v6362_v6 = vpop.f32.mrf.mxu0 }
 0x17d   :  { %v12936_v61 = vld [vmem:[#allocation4 + $0xc20] sm:$0xf0] }
 0x17e   :  { %v17334_v62 = vld [vmem:[#allocation4 + $0xe04] sm:$0xf]  ;;  %v12939_v12 = vor.u32 %v17270_v59, %v12936_v61  ;;  %6581 = vmatpush.bf16.msrb.mxu1 %v12683_v11 }
 0x17f   :  { %v13192_v0 = vld [vmem:[#allocation4 + $0xe20] sm:$0xf0]  ;;  %6569 = vmatmul.bf16.vlgmr.msrb.gmra.mxu0 %v18560_v37 }
 0x180   :  { %v17454_v1 = vld [vmem:[#allocation4 + $0x11c4] sm:$0xf]  ;;  %v13195_v18 = vor.u32 %v17334_v62, %v13192_v0  ;;  %6594 = vmatpush.bf16.msrb.mxu2 %v12939_v12 }
 0x181   :  { %v13672_v2 = vld [vmem:[#allocation4 + $0x11e0] sm:$0xf0]  ;;  %6582 = vmatmul.bf16.vlgmr.msrb.gmra.mxu1 %v18564_v40 }
 0x182   :  { %v17518_v3 = vld [vmem:[#allocation4 + $0x13c4] sm:$0xf]  ;;  %v13675_v22 = vor.u32 %v17454_v1, %v13672_v2  ;;  %6607 = vmatpush.bf16.msrb.mxu3 %v13195_v18 }
 0x183   :  { %v13928_v7 = vld [vmem:[#allocation4 + $0x13e0] sm:$0xf0]  ;;  %6595 = vmatmul.bf16.vlgmr.msrb.gmra.mxu2 %v18558_v34 }
 0x184   :  { %v17582_v8 = vld [vmem:[#allocation4 + $0x15c4] sm:$0xf]  ;;  %v13931_v25 = vor.u32 %v17518_v3, %v13928_v7  ;;  %6613 = vmatpush.bf16.msra.mxu0 %v13675_v22 }
 0x185   :  { %v14184_v10 = vld [vmem:[#allocation4 + $0x15e0] sm:$0xf0]  ;;  %6608 = vmatmul.bf16.vlgmr.msrb.gmra.mxu3 %v18562_v38 }
 0x186   :  { %v17646_v14 = vld [vmem:[#allocation4 + $0x17c4] sm:$0xf]  ;;  %v14187_v28 = vor.u32 %v17582_v8, %v14184_v10  ;;  %6626 = vmatpush.bf16.msra.mxu1 %v13931_v25 }
 0x187   :  { %v14440_v15 = vld [vmem:[#allocation4 + $0x17e0] sm:$0xf0] }
 0x188   :  { %v17446_v29 = vld [vmem:[#allocation4 + $0x1184] sm:$0xf]  ;;  %v14443_v33 = vor.u32 %v17646_v14, %v14440_v15  ;;  %6639 = vmatpush.bf16.msra.mxu2 %v14187_v28  ;;  %v6363_v14 = vadd.f32 %v6362_v6, %v18598_v53  ;;  %v6375_v15 = vpop.f32.mrf.mxu1 }
 0x189   :  { %v13640_v30 = vld [vmem:[#allocation4 + $0x11a0] sm:$0xf0] }
 0x18a   :  { %v17510_v31 = vld [vmem:[#allocation4 + $0x1384] sm:$0xf]  ;;  %v13643_v43 = vor.u32 %v17446_v29, %v13640_v30  ;;  %6652 = vmatpush.bf16.msra.mxu3 %v14443_v33 }
 0x18b   :  { %v13896_v35 = vld [vmem:[#allocation4 + $0x13a0] sm:$0xf0] }
 0x18c   :  { %v17574_v36 = vld [vmem:[#allocation4 + $0x1584] sm:$0xf]  ;;  %v13899_v44 = vor.u32 %v17510_v31, %v13896_v35  ;;  %6614 = vmatpush.bf16.msra.mxu0 %v13643_v43  ;;  %v6376_v31 = vadd.f32 %v6375_v15, %v6363_v14 }
 0x18d   :  { %v14152_v39 = vld [vmem:[#allocation4 + $0x15a0] sm:$0xf0] }
 0x18e   :  { %v17638_v41 = vld [vmem:[#allocation4 + $0x1784] sm:$0xf]  ;;  %v14155_v45 = vor.u32 %v17574_v36, %v14152_v39  ;;  %6627 = vmatpush.bf16.msra.mxu1 %v13899_v44 }
 0x18f   :  { %v14408_v42 = vld [vmem:[#allocation4 + $0x17a0] sm:$0xf0] }
 0x190   :  { %v17438_v46 = vld [vmem:[#allocation4 + $0x1144] sm:$0xf]  ;;  %v14411_v49 = vor.u32 %v17638_v41, %v14408_v42  ;;  %6640 = vmatpush.bf16.msra.mxu2 %v14155_v45  ;;  %v6388_v42 = vpop.f32.mrf.mxu2 }
 0x191   :  { %v13608_v47 = vld [vmem:[#allocation4 + $0x1160] sm:$0xf0] }
 0x192   :  { %v17502_v48 = vld [vmem:[#allocation4 + $0x1344] sm:$0xf]  ;;  %v13611_v56 = vor.u32 %v17438_v46, %v13608_v47  ;;  %6653 = vmatpush.bf16.msra.mxu3 %v14411_v49  ;;  %v6389_v46 = vadd.f32 %v6388_v42, %v6376_v31  ;;  %v6401_v47 = vpop.f32.mrf.mxu3 }
 0x193   :  { %v13864_v50 = vld [vmem:[#allocation4 + $0x1360] sm:$0xf0] }
 0x194   :  { %v17566_v51 = vld [vmem:[#allocation4 + $0x1544] sm:$0xf]  ;;  %v13867_v57 = vor.u32 %v17502_v48, %v13864_v50  ;;  %6615 = vmatpush.bf16.msra.mxu0 %v13611_v56 }
 0x195   :  { %v14120_v52 = vld [vmem:[#allocation4 + $0x1560] sm:$0xf0] }
 0x196   :  { %v17630_v54 = vld [vmem:[#allocation4 + $0x1744] sm:$0xf]  ;;  %v14123_v58 = vor.u32 %v17566_v51, %v14120_v52  ;;  %6628 = vmatpush.bf16.msra.mxu1 %v13867_v57  ;;  %v18605_v51 = vadd.f32 %v6401_v47, %v6389_v46  ;;  %v6364_v52 = vpop.f32.mrf.mxu0 }
 0x197   :  { %v14376_v55 = vld [vmem:[#allocation4 + $0x1760] sm:$0xf0] }
 0x198   :  { %v17430_v59 = vld [vmem:[#allocation4 + $0x1104] sm:$0xf]  ;;  %v14379_v62 = vor.u32 %v17630_v54, %v14376_v55  ;;  %6641 = vmatpush.bf16.msra.mxu2 %v14123_v58 }
 0x199   :  { %v13576_v60 = vld [vmem:[#allocation4 + $0x1120] sm:$0xf0] }
 0x19a   :  { %v17494_v61 = vld [vmem:[#allocation4 + $0x1304] sm:$0xf]  ;;  %v13579_v5 = vor.u32 %v17430_v59, %v13576_v60  ;;  %6654 = vmatpush.bf16.msra.mxu3 %v14379_v62  ;;  %v6377_v59 = vpop.f32.mrf.mxu1 }
 0x19b   :  { %v13832_v0 = vld [vmem:[#allocation4 + $0x1320] sm:$0xf0] }
 0x19c   :  { %v17558_v1 = vld [vmem:[#allocation4 + $0x1504] sm:$0xf]  ;;  %v13835_v7 = vor.u32 %v17494_v61, %v13832_v0  ;;  %6616 = vmatpush.bf16.msra.mxu0 %v13579_v5 }
 0x19d   :  { %v14088_v2 = vld [vmem:[#allocation4 + $0x1520] sm:$0xf0] }
 0x19e   :  { %v17622_v3 = vld [vmem:[#allocation4 + $0x1704] sm:$0xf]  ;;  %v14091_v8 = vor.u32 %v17558_v1, %v14088_v2  ;;  %6629 = vmatpush.bf16.msra.mxu1 %v13835_v7 }
 0x19f   :  { %v14344_v4 = vld [vmem:[#allocation4 + $0x1720] sm:$0xf0] }
 0x1a0   :  { %v17422_v10 = vld [vmem:[#allocation4 + $0x10c4] sm:$0xf]  ;;  %v14347_v18 = vor.u32 %v17622_v3, %v14344_v4  ;;  %6642 = vmatpush.bf16.msra.mxu2 %v14091_v8 }
 0x1a1   :  { %v13544_v11 = vld [vmem:[#allocation4 + $0x10e0] sm:$0xf0] }
 0x1a2   :  { %v17486_v12 = vld [vmem:[#allocation4 + $0x12c4] sm:$0xf]  ;;  %v13547_v32 = vor.u32 %v17422_v10, %v13544_v11  ;;  %6655 = vmatpush.bf16.msra.mxu3 %v14347_v18 }
 0x1a3   :  { %v13800_v22 = vld [vmem:[#allocation4 + $0x12e0] sm:$0xf0] }
 0x1a4   :  { %v17550_v25 = vld [vmem:[#allocation4 + $0x14c4] sm:$0xf]  ;;  %v13803_v33 = vor.u32 %v17486_v12, %v13800_v22  ;;  %6617 = vmatpush.bf16.msra.mxu0 %v13547_v32  ;;  %v6390_v12 = vpop.f32.mrf.mxu2 }
 0x1a5   :  { %v14056_v28 = vld [vmem:[#allocation4 + $0x14e0] sm:$0xf0] }
 0x1a6   :  { %v17614_v29 = vld [vmem:[#allocation4 + $0x16c4] sm:$0xf]  ;;  %v14059_v35 = vor.u32 %v17550_v25, %v14056_v28  ;;  %6630 = vmatpush.bf16.msra.mxu1 %v13803_v33  ;;  %v6403_v25 = vpop.f32.mrf.mxu3 }
 0x1a7   :  { %v14312_v30 = vld [vmem:[#allocation4 + $0x16e0] sm:$0xf0]  ;;  %v6414_v25 = vpop.f32.mrf.mxu0 }
 0x1a8   :  { %v17414_v36 = vld [vmem:[#allocation4 + $0x1084] sm:$0xf]  ;;  %v14315_v53 = vor.u32 %v17614_v29, %v14312_v30  ;;  %6643 = vmatpush.bf16.msra.mxu2 %v14059_v35 }
 0x1a9   :  { %v13512_v39 = vld [vmem:[#allocation4 + $0x10a0] sm:$0xf0] }
 0x1aa   :  { %v17478_v41 = vld [vmem:[#allocation4 + $0x1284] sm:$0xf]  ;;  %v13515_v50 = vor.u32 %v17414_v36, %v13512_v39  ;;  %6656 = vmatpush.bf16.msra.mxu3 %v14315_v53 }
 0x1ab   :  { %v13768_v43 = vld [vmem:[#allocation4 + $0x12a0] sm:$0xf0] }
 0x1ac   :  { %v17542_v44 = vld [vmem:[#allocation4 + $0x1484] sm:$0xf]  ;;  %v13771_v54 = vor.u32 %v17478_v41, %v13768_v43  ;;  %6618 = vmatpush.bf16.msra.mxu0 %v13515_v50 }
 0x1ad   :  { %v14024_v45 = vld [vmem:[#allocation4 + $0x14a0] sm:$0xf0] }
 0x1ae   :  { %v17606_v48 = vld [vmem:[#allocation4 + $0x1684] sm:$0xf]  ;;  %v14027_v55 = vor.u32 %v17542_v44, %v14024_v45  ;;  %6631 = vmatpush.bf16.msra.mxu1 %v13771_v54 }
 0x1af   :  { %v14280_v49 = vld [vmem:[#allocation4 + $0x16a0] sm:$0xf0] }
 0x1b0   :  { %v17406_v56 = vld [vmem:[#allocation4 + $0x1044] sm:$0xf]  ;;  %v14283_v60 = vor.u32 %v17606_v48, %v14280_v49  ;;  %6644 = vmatpush.bf16.msra.mxu2 %v14027_v55 }
 0x1b1   :  { %v13480_v57 = vld [vmem:[#allocation4 + $0x1060] sm:$0xf0] }
 0x1b2   :  { %v17470_v58 = vld [vmem:[#allocation4 + $0x1244] sm:$0xf]  ;;  %v13483_v3 = vor.u32 %v17406_v56, %v13480_v57  ;;  %6657 = vmatpush.bf16.msra.mxu3 %v14283_v60 }
 0x1b3   :  { %v13736_v61 = vld [vmem:[#allocation4 + $0x1260] sm:$0xf0] }
 0x1b4   :  { %v17534_v62 = vld [vmem:[#allocation4 + $0x1444] sm:$0xf]  ;;  %v13739_v6 = vor.u32 %v17470_v58, %v13736_v61  ;;  %6619 = vmatpush.bf16.msra.mxu0 %v13483_v3 }
 0x1b5   :  { %v13992_v0 = vld [vmem:[#allocation4 + $0x1460] sm:$0xf0] }
 0x1b6   :  { %v17598_v1 = vld [vmem:[#allocation4 + $0x1644] sm:$0xf]  ;;  %v13995_v7 = vor.u32 %v17534_v62, %v13992_v0  ;;  %6632 = vmatpush.bf16.msra.mxu1 %v13739_v6 }
 0x1b7   :  { %v14248_v2 = vld [vmem:[#allocation4 + $0x1660] sm:$0xf0] }
 0x1b8   :  { %v17398_v4 = vld [vmem:[#allocation4 + $0x1004] sm:$0xf]  ;;  %v14251_v14 = vor.u32 %v17598_v1, %v14248_v2  ;;  %6645 = vmatpush.bf16.msra.mxu2 %v13995_v7 }
 0x1b9   :  { %v13448_v5 = vld [vmem:[#allocation4 + $0x1020] sm:$0xf0] }
 0x1ba   :  { %v17462_v8 = vld [vmem:[#allocation4 + $0x1204] sm:$0xf]  ;;  %v13451_v31 = vor.u32 %v17398_v4, %v13448_v5  ;;  %6658 = vmatpush.bf16.msra.mxu3 %v14251_v14 }
 0x1bb   :  { %v13704_v10 = vld [vmem:[#allocation4 + $0x1220] sm:$0xf0] }
 0x1bc   :  { %v17526_v11 = vld [vmem:[#allocation4 + $0x1404] sm:$0xf]  ;;  %v13707_v36 = vor.u32 %v17462_v8, %v13704_v10  ;;  %6620 = vmatpush.bf16.msra.mxu0 %v13451_v31 }
 0x1bd   :  { %v13960_v15 = vld [vmem:[#allocation4 + $0x1420] sm:$0xf0] }
 0x1be   :  { %v17590_v18 = vld [vmem:[#allocation4 + $0x1604] sm:$0xf]  ;;  %v13963_v39 = vor.u32 %v17526_v11, %v13960_v15  ;;  %6633 = vmatpush.bf16.msra.mxu1 %v13707_v36 }
 0x1bf   :  { %v14216_v22 = vld [vmem:[#allocation4 + $0x1620] sm:$0xf0]  ;;  %6621 = vmatmul.bf16.vlgmr.msra.gmra.mxu0 %v18570_v19 }
 0x1c0   :  { %v17710_v28 = vld [vmem:[#allocation4 + $0x19c4] sm:$0xf]  ;;  %v14219_v53 = vor.u32 %v17590_v18, %v14216_v22  ;;  %6646 = vmatpush.bf16.msra.mxu2 %v13963_v39 }
 0x1c1   :  { %v14696_v29 = vld [vmem:[#allocation4 + $0x19e0] sm:$0xf0]  ;;  %6634 = vmatmul.bf16.vlgmr.msra.gmra.mxu1 %v18574_v24 }
 0x1c2   :  { %v17774_v30 = vld [vmem:[#allocation4 + $0x1bc4] sm:$0xf]  ;;  %v14699_v43 = vor.u32 %v17710_v28, %v14696_v29  ;;  %6659 = vmatpush.bf16.msra.mxu3 %v14219_v53 }
 0x1c3   :  { %v14952_v32 = vld [vmem:[#allocation4 + $0x1be0] sm:$0xf0]  ;;  %6647 = vmatmul.bf16.vlgmr.msra.gmra.mxu2 %v18572_v23 }
 0x1c4   :  { %v17838_v33 = vld [vmem:[#allocation4 + $0x1dc4] sm:$0xf]  ;;  %v14955_v44 = vor.u32 %v17774_v30, %v14952_v32  ;;  %6665 = vmatpush.bf16.msrb.mxu0 %v14699_v43  ;;  %v6415_v30 = vadd.f32 %v6414_v25, %v18605_v51  ;;  %v6427_v32 = vpop.f32.mrf.mxu1 }
 0x1c5   :  { %v15208_v35 = vld [vmem:[#allocation4 + $0x1de0] sm:$0xf0]  ;;  %6660 = vmatmul.bf16.vlgmr.msra.gmra.mxu3 %v18576_v27 }
 0x1c6   :  { %v17902_v41 = vld [vmem:[#allocation4 + $0x1fc4] sm:$0xf]  ;;  %v15211_v45 = vor.u32 %v17838_v33, %v15208_v35  ;;  %6678 = vmatpush.bf16.msrb.mxu1 %v14955_v44  ;;  %v6428_v53 = vadd.f32 %v6427_v32, %v6415_v30 }
 0x1c7   :  { %v15464_v42 = vld [vmem:[#allocation4 + $0x1fe0] sm:$0xf0] }
 0x1c8   :  { %v17702_v46 = vld [vmem:[#allocation4 + $0x1984] sm:$0xf]  ;;  %v15467_v49 = vor.u32 %v17902_v41, %v15464_v42  ;;  %6691 = vmatpush.bf16.msrb.mxu2 %v15211_v45 }
 0x1c9   :  { %v14664_v47 = vld [vmem:[#allocation4 + $0x19a0] sm:$0xf0] }
 0x1ca   :  { %v17766_v48 = vld [vmem:[#allocation4 + $0x1b84] sm:$0xf]  ;;  %v14667_v57 = vor.u32 %v17702_v46, %v14664_v47  ;;  %6704 = vmatpush.bf16.msrb.mxu3 %v15467_v49 }
 0x1cb   :  { %v14920_v50 = vld [vmem:[#allocation4 + $0x1ba0] sm:$0xf0] }
 0x1cc   :  { %v17830_v52 = vld [vmem:[#allocation4 + $0x1d84] sm:$0xf]  ;;  %v14923_v58 = vor.u32 %v17766_v48, %v14920_v50  ;;  %6666 = vmatpush.bf16.msrb.mxu0 %v14667_v57 }
 0x1cd   :  { %v15176_v54 = vld [vmem:[#allocation4 + $0x1da0] sm:$0xf0] }
 0x1ce   :  { %v17894_v55 = vld [vmem:[#allocation4 + $0x1f84] sm:$0xf]  ;;  %v15179_v59 = vor.u32 %v17830_v52, %v15176_v54  ;;  %6679 = vmatpush.bf16.msrb.mxu1 %v14923_v58 }
 0x1cf   :  { %v15432_v56 = vld [vmem:[#allocation4 + $0x1fa0] sm:$0xf0] }
 0x1d0   :  { %v17694_v60 = vld [vmem:[#allocation4 + $0x1944] sm:$0xf]  ;;  %v15435_v0 = vor.u32 %v17894_v55, %v15432_v56  ;;  %6692 = vmatpush.bf16.msrb.mxu2 %v15179_v59  ;;  %v6440_v56 = vpop.f32.mrf.mxu2 }
 0x1d1   :  { %v14632_v61 = vld [vmem:[#allocation4 + $0x1960] sm:$0xf0] }
 0x1d2   :  { %v17758_v62 = vld [vmem:[#allocation4 + $0x1b44] sm:$0xf]  ;;  %v14635_v6 = vor.u32 %v17694_v60, %v14632_v61  ;;  %6705 = vmatpush.bf16.msrb.mxu3 %v15435_v0  ;;  %v6441_v60 = vadd.f32 %v6440_v56, %v6428_v53  ;;  %v6453_v61 = vpop.f32.mrf.mxu3 }
 0x1d3   :  { %v14888_v1 = vld [vmem:[#allocation4 + $0x1b60] sm:$0xf0] }
 0x1d4   :  { %v17822_v2 = vld [vmem:[#allocation4 + $0x1d44] sm:$0xf]  ;;  %v14891_v7 = vor.u32 %v17758_v62, %v14888_v1  ;;  %6667 = vmatpush.bf16.msrb.mxu0 %v14635_v6  ;;  %v6416_v1 = vpop.f32.mrf.mxu0 }
 0x1d5   :  { %v15144_v3 = vld [vmem:[#allocation4 + $0x1d60] sm:$0xf0]  ;;  %v17003_v1 = vld [vmem:[#allocation4 + $0x3a4] sm:$0xf0] }
 0x1d6   :  { %v17886_v4 = vld [vmem:[#allocation4 + $0x1f44] sm:$0xf]  ;;  %v15147_v8 = vor.u32 %v17822_v2, %v15144_v3  ;;  %6680 = vmatpush.bf16.msrb.mxu1 %v14891_v7  ;;  %v6429_v3 = vpop.f32.mrf.mxu1 }
 0x1d7   :  { %v15400_v5 = vld [vmem:[#allocation4 + $0x1f60] sm:$0xf0]  ;;  %v17067_v3 = vld [vmem:[#allocation4 + $0x5a4] sm:$0xf0] }
 0x1d8   :  { %v17686_v10 = vld [vmem:[#allocation4 + $0x1904] sm:$0xf]  ;;  %v15403_v14 = vor.u32 %v17886_v4, %v15400_v5  ;;  %6693 = vmatpush.bf16.msrb.mxu2 %v15147_v8  ;;  %v18612_v4 = vadd.f32 %v6453_v61, %v6441_v60  ;;  %v6442_v53 = vpop.f32.mrf.mxu2  ;;  %v11598_v60 = vld [vmem:[#allocation4 + $0x188] sm:$0xf] }
 0x1d9   :  { %v14600_v11 = vld [vmem:[#allocation4 + $0x1920] sm:$0xf0]  ;;  %v16939_v61 = vld [vmem:[#allocation4 + $0x1a4] sm:$0xf0] }
 0x1da   :  { %v17750_v12 = vld [vmem:[#allocation4 + $0x1b04] sm:$0xf]  ;;  %v14603_v31 = vor.u32 %v17686_v10, %v14600_v11  ;;  %6706 = vmatpush.bf16.msrb.mxu3 %v15403_v14  ;;  %v17051_v53 = vld [vmem:[#allocation4 + $0x524] sm:$0xf0] }
 0x1db   :  { %v14856_v15 = vld [vmem:[#allocation4 + $0x1b20] sm:$0xf0] }
 0x1dc   :  { %v17814_v18 = vld [vmem:[#allocation4 + $0x1d04] sm:$0xf]  ;;  %v14859_v33 = vor.u32 %v17750_v12, %v14856_v15  ;;  %6668 = vmatpush.bf16.msrb.mxu0 %v14603_v31 }
 0x1dd   :  { %v15112_v22 = vld [vmem:[#allocation4 + $0x1d20] sm:$0xf0] }
 0x1de   :  { %v17878_v28 = vld [vmem:[#allocation4 + $0x1f04] sm:$0xf]  ;;  %v15115_v35 = vor.u32 %v17814_v18, %v15112_v22  ;;  %6681 = vmatpush.bf16.msrb.mxu1 %v14859_v33 }
 0x1df   :  { %v15368_v29 = vld [vmem:[#allocation4 + $0x1f20] sm:$0xf0] }
 0x1e0   :  { %v17678_v36 = vld [vmem:[#allocation4 + $0x18c4] sm:$0xf]  ;;  %v15371_v42 = vor.u32 %v17878_v28, %v15368_v29  ;;  %6694 = vmatpush.bf16.msrb.mxu2 %v15115_v35 }
 0x1e1   :  { %v14568_v39 = vld [vmem:[#allocation4 + $0x18e0] sm:$0xf0] }
 0x1e2   :  { %v17742_v41 = vld [vmem:[#allocation4 + $0x1ac4] sm:$0xf]  ;;  %v14571_v48 = vor.u32 %v17678_v36, %v14568_v39  ;;  %6707 = vmatpush.bf16.msrb.mxu3 %v15371_v42 }
 0x1e3   :  { %v14824_v43 = vld [vmem:[#allocation4 + $0x1ae0] sm:$0xf0] }
 0x1e4   :  { %v17806_v44 = vld [vmem:[#allocation4 + $0x1cc4] sm:$0xf]  ;;  %v14827_v51 = vor.u32 %v17742_v41, %v14824_v43  ;;  %6669 = vmatpush.bf16.msrb.mxu0 %v14571_v48  ;;  %v11630_v43 = vld [vmem:[#allocation4 + $0x1c8] sm:$0xf] }
 0x1e5   :  { %v15080_v45 = vld [vmem:[#allocation4 + $0x1ce0] sm:$0xf0]  ;;  %v17011_v48 = vld [vmem:[#allocation4 + $0x3e4] sm:$0xf0] }
 0x1e6   :  { %v17870_v46 = vld [vmem:[#allocation4 + $0x1ec4] sm:$0xf]  ;;  %v15083_v49 = vor.u32 %v17806_v44, %v15080_v45  ;;  %6682 = vmatpush.bf16.msrb.mxu1 %v14827_v51  ;;  %v16947_v44 = vld [vmem:[#allocation4 + $0x1e4] sm:$0xf0] }
 0x1e7   :  { %v15336_v47 = vld [vmem:[#allocation4 + $0x1ee0] sm:$0xf0]  ;;  %v11886_v45 = vld [vmem:[#allocation4 + $0x3c8] sm:$0xf] }
 0x1e8   :  { %v17670_v50 = vld [vmem:[#allocation4 + $0x1884] sm:$0xf]  ;;  %v15339_v55 = vor.u32 %v17870_v46, %v15336_v47  ;;  %6695 = vmatpush.bf16.msrb.mxu2 %v15083_v49  ;;  %v6455_v46 = vpop.f32.mrf.mxu3  ;;  %v12142_v51 = vld [vmem:[#allocation4 + $0x5c8] sm:$0xf] }
 0x1e9   :  { %v14536_v52 = vld [vmem:[#allocation4 + $0x18a0] sm:$0xf0]  ;;  %v17075_v49 = vld [vmem:[#allocation4 + $0x5e4] sm:$0xf0] }
 0x1ea   :  { %v17734_v54 = vld [vmem:[#allocation4 + $0x1a84] sm:$0xf]  ;;  %v14539_v2 = vor.u32 %v17670_v50, %v14536_v52  ;;  %6708 = vmatpush.bf16.msrb.mxu3 %v15339_v55  ;;  %v17139_v55 = vld [vmem:[#allocation4 + $0x7e4] sm:$0xf0] }
 0x1eb   :  { %v14792_v57 = vld [vmem:[#allocation4 + $0x1aa0] sm:$0xf0] }
 0x1ec   :  { %v17798_v58 = vld [vmem:[#allocation4 + $0x1c84] sm:$0xf]  ;;  %v14795_v5 = vor.u32 %v17734_v54, %v14792_v57  ;;  %6670 = vmatpush.bf16.msrb.mxu0 %v14539_v2  ;;  %v12398_v54 = vld [vmem:[#allocation4 + $0x7c8] sm:$0xf]  ;;  %v11631_v57 = vor.u32 %v16947_v44, %v11630_v43  ;;  %v6466_v43 = vpop.f32.mrf.mxu0 }
 0x1ed   :  { %v15048_v59 = vld [vmem:[#allocation4 + $0x1ca0] sm:$0xf0]  ;;  %v12110_v2 = vld [vmem:[#allocation4 + $0x588] sm:$0xf]  ;;  %v6467_v46 = vadd.f32 %v6466_v43, %v18612_v4 }
 0x1ee   :  { %v17862_v62 = vld [vmem:[#allocation4 + $0x1e84] sm:$0xf]  ;;  %v15051_v6 = vor.u32 %v17798_v58, %v15048_v59  ;;  %6683 = vmatpush.bf16.msrb.mxu1 %v14795_v5  ;;  %v11887_v58 = vor.u32 %v17011_v48, %v11886_v45  ;;  %v12143_v59 = vor.u32 %v17075_v49, %v12142_v51  ;;  %v12366_v5 = vld [vmem:[#allocation4 + $0x788] sm:$0xf]  ;;  %v6479_v48 = vpop.f32.mrf.mxu1 }
 0x1ef   :  { %v15304_v0 = vld [vmem:[#allocation4 + $0x1ea0] sm:$0xf0]  ;;  %v12302_v44 = vld [vmem:[#allocation4 + $0x708] sm:$0xf] }
 0x1f0   :  { %v17662_v7 = vld [vmem:[#allocation4 + $0x1844] sm:$0xf]  ;;  %v15307_v11 = vor.u32 %v17862_v62, %v15304_v0  ;;  %6696 = vmatpush.bf16.msrb.mxu2 %v15051_v6  ;;  %v11854_v62 = vld [vmem:[#allocation4 + $0x388] sm:$0xf]  ;;  %v12399_v0 = vor.u32 %v17139_v55, %v12398_v54 }
 0x1f1   :  { %v14504_v8 = vld [vmem:[#allocation4 + $0x1860] sm:$0xf0]  ;;  %v17131_v6 = vld [vmem:[#allocation4 + $0x7a4] sm:$0xf0] }
 0x1f2   :  { %v17726_v10 = vld [vmem:[#allocation4 + $0x1a44] sm:$0xf]  ;;  %v14507_v25 = vor.u32 %v17662_v7, %v14504_v8  ;;  %6709 = vmatpush.bf16.msrb.mxu3 %v15307_v11  ;;  %v11599_v7 = vor.u32 %v16939_v61, %v11598_v60  ;;  %v11855_v8 = vor.u32 %v17003_v1, %v11854_v62  ;;  %v11566_v11 = vld [vmem:[#allocation4 + $0x148] sm:$0xf] }
 0x1f3   :  { %v14760_v12 = vld [vmem:[#allocation4 + $0x1a60] sm:$0xf0]  ;;  %v17115_v45 = vld [vmem:[#allocation4 + $0x724] sm:$0xf0] }
 0x1f4   :  { %v17790_v14 = vld [vmem:[#allocation4 + $0x1c44] sm:$0xf]  ;;  %v14763_v30 = vor.u32 %v17726_v10, %v14760_v12  ;;  %6671 = vmatpush.bf16.msrb.mxu0 %v14507_v25  ;;  %v12111_v10 = vor.u32 %v17067_v3, %v12110_v2  ;;  %v16931_v12 = vld [vmem:[#allocation4 + $0x164] sm:$0xf0]  ;;  %v12303_v55 = vor.u32 %v17115_v45, %v12302_v44 }
 0x1f5   :  { %v15016_v15 = vld [vmem:[#allocation4 + $0x1c60] sm:$0xf0]  ;;  %v17059_v25 = vld [vmem:[#allocation4 + $0x564] sm:$0xf0] }
 0x1f6   :  { %v17854_v18 = vld [vmem:[#allocation4 + $0x1e44] sm:$0xf]  ;;  %v15019_v31 = vor.u32 %v17790_v14, %v15016_v15  ;;  %6684 = vmatpush.bf16.msrb.mxu1 %v14763_v30  ;;  %v11822_v14 = vld [vmem:[#allocation4 + $0x348] sm:$0xf]  ;;  %v12367_v15 = vor.u32 %v17131_v6, %v12366_v5  ;;  %v11567_v30 = vor.u32 %v16931_v12, %v11566_v11  ;;  %v6492_v6 = vpop.f32.mrf.mxu2  ;;  %v6505_v12 = vpop.f32.mrf.mxu3 }
 0x1f7   :  { %v15272_v22 = vld [vmem:[#allocation4 + $0x1e60] sm:$0xf0]  ;;  %v11758_v54 = vld [vmem:[#allocation4 + $0x2c8] sm:$0xf] }
 0x1f8   :  { %v17654_v28 = vld [vmem:[#allocation4 + $0x1804] sm:$0xf]  ;;  %v15275_v36 = vor.u32 %v17854_v18, %v15272_v22  ;;  %6697 = vmatpush.bf16.msrb.mxu2 %v15019_v31  ;;  %v16995_v18 = vld [vmem:[#allocation4 + $0x364] sm:$0xf0] }
 0x1f9   :  { %v14472_v29 = vld [vmem:[#allocation4 + $0x1820] sm:$0xf0]  ;;  %v12078_v22 = vld [vmem:[#allocation4 + $0x548] sm:$0xf]  ;;  %v11823_v31 = vor.u32 %v16995_v18, %v11822_v14  ;;  %v6468_v18 = vpop.f32.mrf.mxu0 }
 0x1fa   :  { %v17718_v32 = vld [vmem:[#allocation4 + $0x1a04] sm:$0xf]  ;;  %v14475_v47 = vor.u32 %v17654_v28, %v14472_v29  ;;  %6710 = vmatpush.bf16.msrb.mxu3 %v15275_v36  ;;  %v12334_v28 = vld [vmem:[#allocation4 + $0x748] sm:$0xf] }
 0x1fb   :  { %v14728_v33 = vld [vmem:[#allocation4 + $0x1a20] sm:$0xf0]  ;;  %v17123_v29 = vld [vmem:[#allocation4 + $0x764] sm:$0xf0] }
 0x1fc   :  { %v17782_v35 = vld [vmem:[#allocation4 + $0x1c04] sm:$0xf]  ;;  %v14731_v50 = vor.u32 %v17718_v32, %v14728_v33  ;;  %6672 = vmatpush.bf16.msrb.mxu0 %v14475_v47  ;;  %v12079_v32 = vor.u32 %v17059_v25, %v12078_v22  ;;  %v11534_v33 = vld [vmem:[#allocation4 + $0x108] sm:$0xf]  ;;  %v6481_v25 = vpop.f32.mrf.mxu1 }
 0x1fd   :  { %v14984_v39 = vld [vmem:[#allocation4 + $0x1c20] sm:$0xf0]  ;;  %v11790_v36 = vld [vmem:[#allocation4 + $0x308] sm:$0xf] }
 0x1fe   :  { %v17846_v41 = vld [vmem:[#allocation4 + $0x1e04] sm:$0xf]  ;;  %v14987_v52 = vor.u32 %v17782_v35, %v14984_v39  ;;  %6685 = vmatpush.bf16.msrb.mxu1 %v14731_v50  ;;  %v16923_v35 = vld [vmem:[#allocation4 + $0x124] sm:$0xf0]  ;;  %v12335_v39 = vor.u32 %v17123_v29, %v12334_v28 }
 0x1ff   :  { %v15240_v42 = vld [vmem:[#allocation4 + $0x1e20] sm:$0xf0]  ;;  %6673 = vmatmul.bf16.vlgmr.msrb.gmra.mxu0 %v18582_v13  ;;  %v11535_v47 = vor.u32 %v16923_v35, %v11534_v33  ;;  %v11502_v50 = vld [vmem:[#allocation4 + $0xc8] sm:$0xf] }
 0x200   :  { %v15243_v56 = vor.u32 %v17846_v41, %v15240_v42  ;;  %6698 = vmatpush.bf16.msrb.mxu2 %v14987_v52  ;;  %6717 = vmatpush.bf16.msra.mxu0 %v11631_v57  ;;  %v16987_v41 = vld [vmem:[#allocation4 + $0x324] sm:$0xf0] }
 0x201   :  { %6686 = vmatmul.bf16.vlgmr.msrb.gmra.mxu1 %v18586_v21  ;;  %v12046_v42 = vld [vmem:[#allocation4 + $0x508] sm:$0xf]  ;;  %v11791_v51 = vor.u32 %v16987_v41, %v11790_v36 }
 0x202   :  { %6711 = vmatpush.bf16.msrb.mxu3 %v15243_v56  ;;  %6730 = vmatpush.bf16.msra.mxu1 %v11887_v58  ;;  %v12047_v49 = vor.u32 %v17051_v53, %v12046_v42  ;;  %v16915_v52 = vld [vmem:[#allocation4 + $0xe4] sm:$0xf0]  ;;  %v6480_v56 = vadd.f32 %v6479_v48, %v6467_v46 }
 0x203   :  { %6699 = vmatmul.bf16.vlgmr.msrb.gmra.mxu2 %v18584_v20  ;;  %v16979_v57 = vld [vmem:[#allocation4 + $0x2e4] sm:$0xf0]  ;;  %v11503_v62 = vor.u32 %v16915_v52, %v11502_v50 }
 0x204   :  { %6743 = vmatpush.bf16.msra.mxu2 %v12143_v59  ;;  %6718 = vmatpush.bf16.msra.mxu0 %v11599_v7  ;;  %v12014_v58 = vld [vmem:[#allocation4 + $0x4c8] sm:$0xf]  ;;  %v11759_v4 = vor.u32 %v16979_v57, %v11758_v54  ;;  %v6493_v11 = vadd.f32 %v6492_v6, %v6480_v56  ;;  %v6494_v56 = vpop.f32.mrf.mxu2 }
 0x205   :  { %6712 = vmatmul.bf16.vlgmr.msrb.gmra.mxu3 %v18588_v26  ;;  %v17043_v59 = vld [vmem:[#allocation4 + $0x4e4] sm:$0xf0] }
 0x206   :  { %6756 = vmatpush.bf16.msra.mxu3 %v12399_v0  ;;  %6731 = vmatpush.bf16.msra.mxu1 %v11855_v8  ;;  %v12270_v60 = vld [vmem:[#allocation4 + $0x6c8] sm:$0xf]  ;;  %v12015_v0 = vor.u32 %v17043_v59, %v12014_v58  ;;  %v18619_v28 = vadd.f32 %v6505_v12, %v6493_v11 }
 0x207   :  { %v17107_v61 = vld [vmem:[#allocation4 + $0x6e4] sm:$0xf0] }
 0x208   :  { %6744 = vmatpush.bf16.msra.mxu2 %v12111_v10  ;;  %6719 = vmatpush.bf16.msra.mxu0 %v11567_v30  ;;  %v11470_v1 = vld [vmem:[#allocation4 + $0x88] sm:$0xf]  ;;  %v12271_v5 = vor.u32 %v17107_v61, %v12270_v60  ;;  %v6507_v60 = vpop.f32.mrf.mxu3 }
 0x209   :  { %v16907_v2 = vld [vmem:[#allocation4 + $0xa4] sm:$0xf0]  ;;  %v6518_v60 = vpop.f32.mrf.mxu0 }
 0x20a   :  { %6757 = vmatpush.bf16.msra.mxu3 %v12367_v15  ;;  %6732 = vmatpush.bf16.msra.mxu1 %v11823_v31  ;;  %v11726_v3 = vld [vmem:[#allocation4 + $0x288] sm:$0xf]  ;;  %v11471_v22 = vor.u32 %v16907_v2, %v11470_v1 }
 0x20b   :  { %v16971_v7 = vld [vmem:[#allocation4 + $0x2a4] sm:$0xf0] }
 0x20c   :  { %6745 = vmatpush.bf16.msra.mxu2 %v12079_v32  ;;  %6720 = vmatpush.bf16.msra.mxu0 %v11535_v47  ;;  %v11982_v8 = vld [vmem:[#allocation4 + $0x488] sm:$0xf]  ;;  %v11727_v29 = vor.u32 %v16971_v7, %v11726_v3 }
 0x20d   :  { %v17035_v10 = vld [vmem:[#allocation4 + $0x4a4] sm:$0xf0] }
 0x20e   :  { %6758 = vmatpush.bf16.msra.mxu3 %v12335_v39  ;;  %6733 = vmatpush.bf16.msra.mxu1 %v11791_v51  ;;  %v12238_v14 = vld [vmem:[#allocation4 + $0x688] sm:$0xf]  ;;  %v11983_v30 = vor.u32 %v17035_v10, %v11982_v8 }
 0x20f   :  { %v17099_v15 = vld [vmem:[#allocation4 + $0x6a4] sm:$0xf0] }
 0x210   :  { %6746 = vmatpush.bf16.msra.mxu2 %v12047_v49  ;;  %6721 = vmatpush.bf16.msra.mxu0 %v11503_v62  ;;  %v11438_v31 = vld [vmem:[#allocation4 + $0x48] sm:$0xf]  ;;  %v12239_v35 = vor.u32 %v17099_v15, %v12238_v14 }
 0x211   :  { %v16899_v32 = vld [vmem:[#allocation4 + $0x64] sm:$0xf0] }
 0x212   :  { %6759 = vmatpush.bf16.msra.mxu3 %v12303_v55  ;;  %6734 = vmatpush.bf16.msra.mxu1 %v11759_v4  ;;  %v11694_v33 = vld [vmem:[#allocation4 + $0x248] sm:$0xf]  ;;  %v11439_v43 = vor.u32 %v16899_v32, %v11438_v31 }
 0x213   :  { %v16963_v36 = vld [vmem:[#allocation4 + $0x264] sm:$0xf0] }
 0x214   :  { %6747 = vmatpush.bf16.msra.mxu2 %v12015_v0  ;;  %v11950_v39 = vld [vmem:[#allocation4 + $0x448] sm:$0xf]  ;;  %6722 = vmatpush.bf16.msra.mxu0 %v11471_v22  ;;  %v11695_v46 = vor.u32 %v16963_v36, %v11694_v33 }
 0x215   :  { %v17027_v41 = vld [vmem:[#allocation4 + $0x464] sm:$0xf0] }
 0x216   :  { %6760 = vmatpush.bf16.msra.mxu3 %v12271_v5  ;;  %v12206_v42 = vld [vmem:[#allocation4 + $0x648] sm:$0xf]  ;;  %6735 = vmatpush.bf16.msra.mxu1 %v11727_v29  ;;  %v11951_v47 = vor.u32 %v17027_v41, %v11950_v39 }
 0x217   :  { %v17091_v53 = vld [vmem:[#allocation4 + $0x664] sm:$0xf0] }
 0x218   :  { %v11406_v44 = vld [vmem:[#allocation4 + $0x8] sm:$0xf]  ;;  %6748 = vmatpush.bf16.msra.mxu2 %v11983_v30  ;;  %v12207_v50 = vor.u32 %v17091_v53, %v12206_v42  ;;  %6723 = vmatpush.bf16.msra.mxu0 %v11439_v43 }
 0x219   :  { %v16891_v45 = vld [vmem:[#allocation4 + $0x24] sm:$0xf0] }
 0x21a   :  { %v11662_v48 = vld [vmem:[#allocation4 + $0x208] sm:$0xf]  ;;  %6761 = vmatpush.bf16.msra.mxu3 %v12239_v35  ;;  %v11407_v61 = vor.u32 %v16891_v45, %v11406_v44  ;;  %6736 = vmatpush.bf16.msra.mxu1 %v11695_v46 }
 0x21b   :  { %v16955_v51 = vld [vmem:[#allocation4 + $0x224] sm:$0xf0] }
 0x21c   :  { %v11918_v49 = vld [vmem:[#allocation4 + $0x408] sm:$0xf]  ;;  %6749 = vmatpush.bf16.msra.mxu2 %v11951_v47  ;;  %v11663_v1 = vor.u32 %v16955_v51, %v11662_v48  ;;  %6724 = vmatpush.bf16.msra.mxu0 %v11407_v61 }
 0x21d   :  { %v17019_v52 = vld [vmem:[#allocation4 + $0x424] sm:$0xf0] }
 0x21e   :  { %v12174_v54 = vld [vmem:[#allocation4 + $0x608] sm:$0xf]  ;;  %v11919_v2 = vor.u32 %v17019_v52, %v11918_v49  ;;  %6762 = vmatpush.bf16.msra.mxu3 %v12207_v50  ;;  %6737 = vmatpush.bf16.msra.mxu1 %v11663_v1 }
 0x21f   :  { %v17083_v55 = vld [vmem:[#allocation4 + $0x624] sm:$0xf0]  ;;  %6725 = vmatmul.bf16.vlgmr.msra.gmra.mxu0 %v18549_v9 }
 0x220   :  { %v12654_v57 = vld [vmem:[#allocation4 + $0x9c8] sm:$0xf]  ;;  %v12175_v6 = vor.u32 %v17083_v55, %v12174_v54  ;;  %6750 = vmatpush.bf16.msra.mxu2 %v11919_v2  ;;  %v6531_v2 = vpop.f32.mrf.mxu1 }
 0x221   :  { %v17203_v58 = vld [vmem:[#allocation4 + $0x9e4] sm:$0xf0]  ;;  %6738 = vmatmul.bf16.vlgmr.msra.gmra.mxu1 %v18553_v17 }
 0x222   :  { %v12910_v59 = vld [vmem:[#allocation4 + $0xbc8] sm:$0xf]  ;;  %v12655_v7 = vor.u32 %v17203_v58, %v12654_v57  ;;  %6763 = vmatpush.bf16.msra.mxu3 %v12175_v6 }
 0x223   :  { %v17267_v62 = vld [vmem:[#allocation4 + $0xbe4] sm:$0xf0]  ;;  %6751 = vmatmul.bf16.vlgmr.msra.gmra.mxu2 %v18546_v63 }
 0x224   :  { %v13166_v4 = vld [vmem:[#allocation4 + $0xdc8] sm:$0xf]  ;;  %v12911_v8 = vor.u32 %v17267_v62, %v12910_v59  ;;  %6769 = vmatpush.bf16.msrb.mxu0 %v12655_v7 }
 0x225   :  { %v17331_v0 = vld [vmem:[#allocation4 + $0xde4] sm:$0xf0]  ;;  %6764 = vmatmul.bf16.vlgmr.msra.gmra.mxu3 %v18551_v16 }
 0x226   :  { %v13422_v3 = vld [vmem:[#allocation4 + $0xfc8] sm:$0xf]  ;;  %v13167_v10 = vor.u32 %v17331_v0, %v13166_v4  ;;  %6782 = vmatpush.bf16.msrb.mxu1 %v12911_v8  ;;  %v6532_v8 = vadd.f32 %v6531_v2, %v6518_v60 }
 0x227   :  { %v17395_v5 = vld [vmem:[#allocation4 + $0xfe4] sm:$0xf0] }
 0x228   :  { %v12622_v11 = vld [vmem:[#allocation4 + $0x988] sm:$0xf]  ;;  %v13423_v15 = vor.u32 %v17395_v5, %v13422_v3  ;;  %6795 = vmatpush.bf16.msrb.mxu2 %v13167_v10 }
 0x229   :  { %v17195_v12 = vld [vmem:[#allocation4 + $0x9a4] sm:$0xf0] }
 0x22a   :  { %v12878_v14 = vld [vmem:[#allocation4 + $0xb88] sm:$0xf]  ;;  %v12623_v31 = vor.u32 %v17195_v12, %v12622_v11  ;;  %6808 = vmatpush.bf16.msrb.mxu3 %v13423_v15 }
 0x22b   :  { %v17259_v18 = vld [vmem:[#allocation4 + $0xba4] sm:$0xf0] }
 0x22c   :  { %v13134_v22 = vld [vmem:[#allocation4 + $0xd88] sm:$0xf]  ;;  %v12879_v32 = vor.u32 %v17259_v18, %v12878_v14  ;;  %6770 = vmatpush.bf16.msrb.mxu0 %v12623_v31 }
 0x22d   :  { %v17323_v25 = vld [vmem:[#allocation4 + $0xda4] sm:$0xf0] }
 0x22e   :  { %v13390_v29 = vld [vmem:[#allocation4 + $0xf88] sm:$0xf]  ;;  %v13135_v33 = vor.u32 %v17323_v25, %v13134_v22  ;;  %6783 = vmatpush.bf16.msrb.mxu1 %v12879_v32 }
 0x22f   :  { %v17387_v30 = vld [vmem:[#allocation4 + $0xfa4] sm:$0xf0] }
 0x230   :  { %v12590_v35 = vld [vmem:[#allocation4 + $0x948] sm:$0xf]  ;;  %v13391_v41 = vor.u32 %v17387_v30, %v13390_v29  ;;  %6796 = vmatpush.bf16.msrb.mxu2 %v13135_v33  ;;  %v6544_v29 = vpop.f32.mrf.mxu2 }
 0x231   :  { %v17187_v36 = vld [vmem:[#allocation4 + $0x964] sm:$0xf0] }
 0x232   :  { %v12846_v39 = vld [vmem:[#allocation4 + $0xb48] sm:$0xf]  ;;  %v12591_v46 = vor.u32 %v17187_v36, %v12590_v35  ;;  %6809 = vmatpush.bf16.msrb.mxu3 %v13391_v41  ;;  %v6545_v35 = vadd.f32 %v6544_v29, %v6532_v8  ;;  %v6557_v36 = vpop.f32.mrf.mxu3 }
 0x233   :  { %v17251_v42 = vld [vmem:[#allocation4 + $0xb64] sm:$0xf0] }
 0x234   :  { %v13102_v53 = vld [vmem:[#allocation4 + $0xd48] sm:$0xf]  ;;  %v12847_v47 = vor.u32 %v17251_v42, %v12846_v39  ;;  %6771 = vmatpush.bf16.msrb.mxu0 %v12591_v46 }
 0x235   :  { %v17315_v43 = vld [vmem:[#allocation4 + $0xd64] sm:$0xf0] }
 0x236   :  { %v13358_v44 = vld [vmem:[#allocation4 + $0xf48] sm:$0xf]  ;;  %v13103_v48 = vor.u32 %v17315_v43, %v13102_v53  ;;  %6784 = vmatpush.bf16.msrb.mxu1 %v12847_v47  ;;  %v18625_v53 = vadd.f32 %v6557_v36, %v6545_v35  ;;  %v6520_v43 = vpop.f32.mrf.mxu0 }
 0x237   :  { %v17379_v45 = vld [vmem:[#allocation4 + $0xf64] sm:$0xf0] }
 0x238   :  { %v12558_v51 = vld [vmem:[#allocation4 + $0x908] sm:$0xf]  ;;  %v13359_v52 = vor.u32 %v17379_v45, %v13358_v44  ;;  %6797 = vmatpush.bf16.msrb.mxu2 %v13103_v48 }
 0x239   :  { %v17179_v49 = vld [vmem:[#allocation4 + $0x924] sm:$0xf0] }
 0x23a   :  { %v12814_v50 = vld [vmem:[#allocation4 + $0xb08] sm:$0xf]  ;;  %v12559_v59 = vor.u32 %v17179_v49, %v12558_v51  ;;  %6810 = vmatpush.bf16.msrb.mxu3 %v13359_v52  ;;  %v6533_v51 = vpop.f32.mrf.mxu1 }
 0x23b   :  { %v17243_v54 = vld [vmem:[#allocation4 + $0xb24] sm:$0xf0] }
 0x23c   :  { %v13070_v55 = vld [vmem:[#allocation4 + $0xd08] sm:$0xf]  ;;  %v12815_v61 = vor.u32 %v17243_v54, %v12814_v50  ;;  %6772 = vmatpush.bf16.msrb.mxu0 %v12559_v59 }
 0x23d   :  { %v17307_v56 = vld [vmem:[#allocation4 + $0xd24] sm:$0xf0] }
 0x23e   :  { %v13326_v57 = vld [vmem:[#allocation4 + $0xf08] sm:$0xf]  ;;  %v13071_v62 = vor.u32 %v17307_v56, %v13070_v55  ;;  %6785 = vmatpush.bf16.msrb.mxu1 %v12815_v61 }
 0x23f   :  { %v17371_v58 = vld [vmem:[#allocation4 + $0xf24] sm:$0xf0] }
 0x240   :  { %v12526_v4 = vld [vmem:[#allocation4 + $0x8c8] sm:$0xf]  ;;  %v13327_v3 = vor.u32 %v17371_v58, %v13326_v57  ;;  %6798 = vmatpush.bf16.msrb.mxu2 %v13071_v62 }
 0x241   :  { %v17171_v0 = vld [vmem:[#allocation4 + $0x8e4] sm:$0xf0] }
 0x242   :  { %v12782_v1 = vld [vmem:[#allocation4 + $0xac8] sm:$0xf]  ;;  %v12527_v12 = vor.u32 %v17171_v0, %v12526_v4  ;;  %6811 = vmatpush.bf16.msrb.mxu3 %v13327_v3 }
 0x243   :  { %v17235_v5 = vld [vmem:[#allocation4 + $0xae4] sm:$0xf0] }
 0x244   :  { %v13038_v6 = vld [vmem:[#allocation4 + $0xcc8] sm:$0xf]  ;;  %v12783_v14 = vor.u32 %v17235_v5, %v12782_v1  ;;  %6773 = vmatpush.bf16.msrb.mxu0 %v12527_v12  ;;  %v6546_v1 = vpop.f32.mrf.mxu2 }
 0x245   :  { %v17299_v7 = vld [vmem:[#allocation4 + $0xce4] sm:$0xf0] }
 0x246   :  { %v13294_v10 = vld [vmem:[#allocation4 + $0xec8] sm:$0xf]  ;;  %v13039_v15 = vor.u32 %v17299_v7, %v13038_v6  ;;  %6786 = vmatpush.bf16.msrb.mxu1 %v12783_v14  ;;  %v6559_v7 = vpop.f32.mrf.mxu3 }
 0x247   :  { %v17363_v11 = vld [vmem:[#allocation4 + $0xee4] sm:$0xf0] }
 0x248   :  { %v12494_v18 = vld [vmem:[#allocation4 + $0x888] sm:$0xf]  ;;  %v13295_v30 = vor.u32 %v17363_v11, %v13294_v10  ;;  %6799 = vmatpush.bf16.msrb.mxu2 %v13039_v15 }
 0x249   :  { %v17163_v22 = vld [vmem:[#allocation4 + $0x8a4] sm:$0xf0] }
 0x24a   :  { %v12750_v25 = vld [vmem:[#allocation4 + $0xa88] sm:$0xf]  ;;  %v12495_v42 = vor.u32 %v17163_v22, %v12494_v18  ;;  %6812 = vmatpush.bf16.msrb.mxu3 %v13295_v30 }
 0x24b   :  { %v17227_v31 = vld [vmem:[#allocation4 + $0xaa4] sm:$0xf0] }
 0x24c   :  { %v13006_v32 = vld [vmem:[#allocation4 + $0xc88] sm:$0xf]  ;;  %v12751_v44 = vor.u32 %v17227_v31, %v12750_v25  ;;  %6774 = vmatpush.bf16.msrb.mxu0 %v12495_v42 }
 0x24d   :  { %v17291_v33 = vld [vmem:[#allocation4 + $0xca4] sm:$0xf0] }
 0x24e   :  { %v13262_v39 = vld [vmem:[#allocation4 + $0xe88] sm:$0xf]  ;;  %v13007_v45 = vor.u32 %v17291_v33, %v13006_v32  ;;  %6787 = vmatpush.bf16.msrb.mxu1 %v12751_v44 }
 0x24f   :  { %v17355_v41 = vld [vmem:[#allocation4 + $0xea4] sm:$0xf0] }
 0x250   :  { %v12462_v46 = vld [vmem:[#allocation4 + $0x848] sm:$0xf]  ;;  %v13263_v49 = vor.u32 %v17355_v41, %v13262_v39  ;;  %6800 = vmatpush.bf16.msrb.mxu2 %v13007_v45 }
 0x251   :  { %v17155_v47 = vld [vmem:[#allocation4 + $0x864] sm:$0xf0] }
 0x252   :  { %v12718_v48 = vld [vmem:[#allocation4 + $0xa48] sm:$0xf]  ;;  %v12463_v57 = vor.u32 %v17155_v47, %v12462_v46  ;;  %6813 = vmatpush.bf16.msrb.mxu3 %v13263_v49 }
 0x253   :  { %v17219_v50 = vld [vmem:[#allocation4 + $0xa64] sm:$0xf0] }
 0x254   :  { %v12974_v52 = vld [vmem:[#allocation4 + $0xc48] sm:$0xf]  ;;  %v12719_v60 = vor.u32 %v17219_v50, %v12718_v48  ;;  %6775 = vmatpush.bf16.msrb.mxu0 %v12463_v57 }
 0x255   :  { %v17283_v54 = vld [vmem:[#allocation4 + $0xc64] sm:$0xf0] }
 0x256   :  { %v13230_v55 = vld [vmem:[#allocation4 + $0xe48] sm:$0xf]  ;;  %v12975_v61 = vor.u32 %v17283_v54, %v12974_v52  ;;  %6788 = vmatpush.bf16.msrb.mxu1 %v12719_v60 }
 0x257   :  { %v17347_v56 = vld [vmem:[#allocation4 + $0xe64] sm:$0xf0] }
 0x258   :  { %v12430_v58 = vld [vmem:[#allocation4 + $0x808] sm:$0xf]  ;;  %v13231_v2 = vor.u32 %v17347_v56, %v13230_v55  ;;  %6801 = vmatpush.bf16.msrb.mxu2 %v12975_v61 }
 0x259   :  { %v17147_v59 = vld [vmem:[#allocation4 + $0x824] sm:$0xf0] }
 0x25a   :  { %v12686_v62 = vld [vmem:[#allocation4 + $0xa08] sm:$0xf]  ;;  %v12431_v12 = vor.u32 %v17147_v59, %v12430_v58  ;;  %6814 = vmatpush.bf16.msrb.mxu3 %v13231_v2 }
 0x25b   :  { %v17211_v4 = vld [vmem:[#allocation4 + $0xa24] sm:$0xf0] }
 0x25c   :  { %v12942_v0 = vld [vmem:[#allocation4 + $0xc08] sm:$0xf]  ;;  %v12687_v22 = vor.u32 %v17211_v4, %v12686_v62  ;;  %6776 = vmatpush.bf16.msrb.mxu0 %v12431_v12  ;;  %v6570_v12 = vpop.f32.mrf.mxu0 }
 0x25d   :  { %v17275_v3 = vld [vmem:[#allocation4 + $0xc24] sm:$0xf0] }
 0x25e   :  { %v13198_v5 = vld [vmem:[#allocation4 + $0xe08] sm:$0xf]  ;;  %v12943_v25 = vor.u32 %v17275_v3, %v12942_v0  ;;  %6789 = vmatpush.bf16.msrb.mxu1 %v12687_v22 }
 0x25f   :  { %v17339_v6 = vld [vmem:[#allocation4 + $0xe24] sm:$0xf0]  ;;  %6777 = vmatmul.bf16.vlgmr.msrb.gmra.mxu0 %v18560_v37 }
 0x260   :  { %v13678_v8 = vld [vmem:[#allocation4 + $0x11c8] sm:$0xf]  ;;  %v13199_v31 = vor.u32 %v17339_v6, %v13198_v5  ;;  %6802 = vmatpush.bf16.msrb.mxu2 %v12943_v25 }
 0x261   :  { %v17459_v10 = vld [vmem:[#allocation4 + $0x11e4] sm:$0xf0]  ;;  %6790 = vmatmul.bf16.vlgmr.msrb.gmra.mxu1 %v18564_v40 }
 0x262   :  { %v13934_v11 = vld [vmem:[#allocation4 + $0x13c8] sm:$0xf]  ;;  %v13679_v32 = vor.u32 %v17459_v10, %v13678_v8  ;;  %6815 = vmatpush.bf16.msrb.mxu3 %v13199_v31 }
 0x263   :  { %v17523_v14 = vld [vmem:[#allocation4 + $0x13e4] sm:$0xf0]  ;;  %6803 = vmatmul.bf16.vlgmr.msrb.gmra.mxu2 %v18558_v34 }
 0x264   :  { %v14190_v15 = vld [vmem:[#allocation4 + $0x15c8] sm:$0xf]  ;;  %v13935_v33 = vor.u32 %v17523_v14, %v13934_v11  ;;  %6821 = vmatpush.bf16.msra.mxu0 %v13679_v32 }
 0x265   :  { %v17587_v18 = vld [vmem:[#allocation4 + $0x15e4] sm:$0xf0]  ;;  %6816 = vmatmul.bf16.vlgmr.msrb.gmra.mxu3 %v18562_v38 }
 0x266   :  { %v14446_v29 = vld [vmem:[#allocation4 + $0x17c8] sm:$0xf]  ;;  %v14191_v35 = vor.u32 %v17587_v18, %v14190_v15  ;;  %6834 = vmatpush.bf16.msra.mxu1 %v13935_v33 }
 0x267   :  { %v17651_v30 = vld [vmem:[#allocation4 + $0x17e4] sm:$0xf0] }
 0x268   :  { %v13646_v36 = vld [vmem:[#allocation4 + $0x1188] sm:$0xf]  ;;  %v14447_v42 = vor.u32 %v17651_v30, %v14446_v29  ;;  %6847 = vmatpush.bf16.msra.mxu2 %v14191_v35  ;;  %v6571_v29 = vadd.f32 %v6570_v12, %v18625_v53  ;;  %v6583_v30 = vpop.f32.mrf.mxu1 }
 0x269   :  { %v17451_v39 = vld [vmem:[#allocation4 + $0x11a4] sm:$0xf0] }
 0x26a   :  { %v13902_v41 = vld [vmem:[#allocation4 + $0x1388] sm:$0xf]  ;;  %v13647_v48 = vor.u32 %v17451_v39, %v13646_v36  ;;  %6860 = vmatpush.bf16.msra.mxu3 %v14447_v42 }
 0x26b   :  { %v17515_v43 = vld [vmem:[#allocation4 + $0x13a4] sm:$0xf0] }
 0x26c   :  { %v14158_v44 = vld [vmem:[#allocation4 + $0x1588] sm:$0xf]  ;;  %v13903_v51 = vor.u32 %v17515_v43, %v13902_v41  ;;  %6822 = vmatpush.bf16.msra.mxu0 %v13647_v48  ;;  %v6584_v41 = vadd.f32 %v6583_v30, %v6571_v29  ;;  %v6596_v48 = vpop.f32.mrf.mxu2 }
 0x26d   :  { %v17579_v45 = vld [vmem:[#allocation4 + $0x15a4] sm:$0xf0] }
 0x26e   :  { %v14414_v46 = vld [vmem:[#allocation4 + $0x1788] sm:$0xf]  ;;  %v14159_v49 = vor.u32 %v17579_v45, %v14158_v44  ;;  %6835 = vmatpush.bf16.msra.mxu1 %v13903_v51 }
 0x26f   :  { %v17643_v47 = vld [vmem:[#allocation4 + $0x17a4] sm:$0xf0] }
 0x270   :  { %v13614_v50 = vld [vmem:[#allocation4 + $0x1148] sm:$0xf]  ;;  %v14415_v55 = vor.u32 %v17643_v47, %v14414_v46  ;;  %6848 = vmatpush.bf16.msra.mxu2 %v14159_v49 }
 0x271   :  { %v17443_v52 = vld [vmem:[#allocation4 + $0x1164] sm:$0xf0] }
 0x272   :  { %v13870_v54 = vld [vmem:[#allocation4 + $0x1348] sm:$0xf]  ;;  %v13615_v61 = vor.u32 %v17443_v52, %v13614_v50  ;;  %6861 = vmatpush.bf16.msra.mxu3 %v14415_v55  ;;  %v6597_v52 = vadd.f32 %v6596_v48, %v6584_v41 }
 0x273   :  { %v17507_v56 = vld [vmem:[#allocation4 + $0x1364] sm:$0xf0] }
 0x274   :  { %v14126_v57 = vld [vmem:[#allocation4 + $0x1548] sm:$0xf]  ;;  %v13871_v62 = vor.u32 %v17507_v56, %v13870_v54  ;;  %6823 = vmatpush.bf16.msra.mxu0 %v13615_v61  ;;  %v6609_v54 = vpop.f32.mrf.mxu3  ;;  %v6598_v29 = vpop.f32.mrf.mxu2 }
 0x275   :  { %v17571_v58 = vld [vmem:[#allocation4 + $0x1564] sm:$0xf0] }
 0x276   :  { %v14382_v59 = vld [vmem:[#allocation4 + $0x1748] sm:$0xf]  ;;  %v14127_v4 = vor.u32 %v17571_v58, %v14126_v57  ;;  %6836 = vmatpush.bf16.msra.mxu1 %v13871_v62  ;;  %v18632_v58 = vadd.f32 %v6609_v54, %v6597_v52 }
 0x277   :  { %v17635_v60 = vld [vmem:[#allocation4 + $0x1764] sm:$0xf0] }
 0x278   :  { %v13582_v0 = vld [vmem:[#allocation4 + $0x1108] sm:$0xf]  ;;  %v14383_v3 = vor.u32 %v17635_v60, %v14382_v59  ;;  %6849 = vmatpush.bf16.msra.mxu2 %v14127_v4  ;;  %v6572_v59 = vpop.f32.mrf.mxu0 }
 0x279   :  { %v17435_v1 = vld [vmem:[#allocation4 + $0x1124] sm:$0xf0] }
 0x27a   :  { %v13838_v2 = vld [vmem:[#allocation4 + $0x1308] sm:$0xf]  ;;  %v13583_v11 = vor.u32 %v17435_v1, %v13582_v0  ;;  %6862 = vmatpush.bf16.msra.mxu3 %v14383_v3  ;;  %v6585_v1 = vpop.f32.mrf.mxu1 }
 0x27b   :  { %v17499_v5 = vld [vmem:[#allocation4 + $0x1324] sm:$0xf0]  ;;  %v7965_v1 = vrot.slane %v18619_v28, 4 }
 0x27c   :  { %v14094_v6 = vld [vmem:[#allocation4 + $0x1508] sm:$0xf]  ;;  %v13839_v14 = vor.u32 %v17499_v5, %v13838_v2  ;;  %6824 = vmatpush.bf16.msra.mxu0 %v13583_v11 }
 0x27d   :  { %v17563_v7 = vld [vmem:[#allocation4 + $0x1524] sm:$0xf0] }
 0x27e   :  { %v14350_v8 = vld [vmem:[#allocation4 + $0x1708] sm:$0xf]  ;;  %v14095_v15 = vor.u32 %v17563_v7, %v14094_v6  ;;  %6837 = vmatpush.bf16.msra.mxu1 %v13839_v14 }
 0x27f   :  { %v17627_v10 = vld [vmem:[#allocation4 + $0x1724] sm:$0xf0] }
 0x280   :  { %v13550_v18 = vld [vmem:[#allocation4 + $0x10c8] sm:$0xf]  ;;  %v14351_v31 = vor.u32 %v17627_v10, %v14350_v8  ;;  %6850 = vmatpush.bf16.msra.mxu2 %v14095_v15 }
 0x281   :  { %v17427_v22 = vld [vmem:[#allocation4 + $0x10e4] sm:$0xf0] }
 0x282   :  { %v13806_v25 = vld [vmem:[#allocation4 + $0x12c8] sm:$0xf]  ;;  %v13551_v42 = vor.u32 %v17427_v22, %v13550_v18  ;;  %6863 = vmatpush.bf16.msra.mxu3 %v14351_v31 }
 0x283   :  { %v17491_v32 = vld [vmem:[#allocation4 + $0x12e4] sm:$0xf0] }
 0x284   :  { %v14062_v33 = vld [vmem:[#allocation4 + $0x14c8] sm:$0xf]  ;;  %v13807_v43 = vor.u32 %v17491_v32, %v13806_v25  ;;  %6825 = vmatpush.bf16.msra.mxu0 %v13551_v42 }
 0x285   :  { %v17555_v35 = vld [vmem:[#allocation4 + $0x14e4] sm:$0xf0] }
 0x286   :  { %v14318_v36 = vld [vmem:[#allocation4 + $0x16c8] sm:$0xf]  ;;  %v14063_v44 = vor.u32 %v17555_v35, %v14062_v33  ;;  %6838 = vmatpush.bf16.msra.mxu1 %v13807_v43  ;;  %v6611_v35 = vpop.f32.mrf.mxu3 }
 0x287   :  { %v17619_v39 = vld [vmem:[#allocation4 + $0x16e4] sm:$0xf0] }
 0x288   :  { %v13518_v45 = vld [vmem:[#allocation4 + $0x1088] sm:$0xf]  ;;  %v14319_v53 = vor.u32 %v17619_v39, %v14318_v36  ;;  %6851 = vmatpush.bf16.msra.mxu2 %v14063_v44 }
 0x289   :  { %v17419_v46 = vld [vmem:[#allocation4 + $0x10a4] sm:$0xf0] }
 0x28a   :  { %v13774_v47 = vld [vmem:[#allocation4 + $0x1288] sm:$0xf]  ;;  %v13519_v57 = vor.u32 %v17419_v46, %v13518_v45  ;;  %6864 = vmatpush.bf16.msra.mxu3 %v14319_v53 }
 0x28b   :  { %v17483_v51 = vld [vmem:[#allocation4 + $0x12a4] sm:$0xf0] }
 0x28c   :  { %v14030_v49 = vld [vmem:[#allocation4 + $0x1488] sm:$0xf]  ;;  %v13775_v60 = vor.u32 %v17483_v51, %v13774_v47  ;;  %6826 = vmatpush.bf16.msra.mxu0 %v13519_v57  ;;  %v18477_v57 = vmov 8.0  }
 0x28d   :  { %v17547_v50 = vld [vmem:[#allocation4 + $0x14a4] sm:$0xf0]  ;;  %18274 = vrcp.f32 %v18477_v57 }
 0x28e   :  { %v14286_v55 = vld [vmem:[#allocation4 + $0x1688] sm:$0xf]  ;;  %v14031_v61 = vor.u32 %v17547_v50, %v14030_v49  ;;  %6839 = vmatpush.bf16.msra.mxu1 %v13775_v60 }
 0x28f   :  { %v17611_v56 = vld [vmem:[#allocation4 + $0x16a4] sm:$0xf0] }
 0x290   :  { %v13486_v62 = vld [vmem:[#allocation4 + $0x1048] sm:$0xf]  ;;  %v14287_v2 = vor.u32 %v17611_v56, %v14286_v55  ;;  %6852 = vmatpush.bf16.msra.mxu2 %v14031_v61 }
 0x291   :  { %v17411_v4 = vld [vmem:[#allocation4 + $0x1064] sm:$0xf0] }
 0x292   :  { %v13742_v0 = vld [vmem:[#allocation4 + $0x1248] sm:$0xf]  ;;  %v13487_v10 = vor.u32 %v17411_v4, %v13486_v62  ;;  %6865 = vmatpush.bf16.msra.mxu3 %v14287_v2 }
 0x293   :  { %v17475_v3 = vld [vmem:[#allocation4 + $0x1264] sm:$0xf0] }
 0x294   :  { %v13998_v5 = vld [vmem:[#allocation4 + $0x1448] sm:$0xf]  ;;  %v13743_v14 = vor.u32 %v17475_v3, %v13742_v0  ;;  %6827 = vmatpush.bf16.msra.mxu0 %v13487_v10 }
 0x295   :  { %v17539_v6 = vld [vmem:[#allocation4 + $0x1464] sm:$0xf0] }
 0x296   :  { %v14254_v7 = vld [vmem:[#allocation4 + $0x1648] sm:$0xf]  ;;  %v13999_v15 = vor.u32 %v17539_v6, %v13998_v5  ;;  %6840 = vmatpush.bf16.msra.mxu1 %v13743_v14 }
 0x297   :  { %v17603_v8 = vld [vmem:[#allocation4 + $0x1664] sm:$0xf0] }
 0x298   :  { %v13454_v11 = vld [vmem:[#allocation4 + $0x1008] sm:$0xf]  ;;  %v14255_v30 = vor.u32 %v17603_v8, %v14254_v7  ;;  %6853 = vmatpush.bf16.msra.mxu2 %v13999_v15 }
 0x299   :  { %v17403_v12 = vld [vmem:[#allocation4 + $0x1024] sm:$0xf0] }
 0x29a   :  { %v13710_v18 = vld [vmem:[#allocation4 + $0x1208] sm:$0xf]  ;;  %v13455_v42 = vor.u32 %v17403_v12, %v13454_v11  ;;  %6866 = vmatpush.bf16.msra.mxu3 %v14255_v30 }
 0x29b   :  { %v17467_v22 = vld [vmem:[#allocation4 + $0x1224] sm:$0xf0] }
 0x29c   :  { %v13966_v25 = vld [vmem:[#allocation4 + $0x1408] sm:$0xf]  ;;  %v13711_v46 = vor.u32 %v17467_v22, %v13710_v18  ;;  %6828 = vmatpush.bf16.msra.mxu0 %v13455_v42  ;;  %v18638_v22 = vpop.eup %18274 }
 0x29d   :  { %v17531_v31 = vld [vmem:[#allocation4 + $0x1424] sm:$0xf0]  ;;  %vm8018_vm0 = vweird.f32 %v18638_v22 }
 0x29e   :  { %v14222_v32 = vld [vmem:[#allocation4 + $0x1608] sm:$0xf]  ;;  %v13967_v47 = vor.u32 %v17531_v31, %v13966_v25  ;;  %6841 = vmatpush.bf16.msra.mxu1 %v13711_v46  ;;  %v7966_v25 = vadd.f32 %v7965_v1, %v18619_v28 }
 0x29f   :  { %v17595_v33 = vld [vmem:[#allocation4 + $0x1624] sm:$0xf0]  ;;  %6829 = vmatmul.bf16.vlgmr.msra.gmra.mxu0 %v18570_v19 }
 0x2a0   :  { %v14702_v36 = vld [vmem:[#allocation4 + $0x19c8] sm:$0xf]  ;;  %v14223_v51 = vor.u32 %v17595_v33, %v14222_v32  ;;  %6854 = vmatpush.bf16.msra.mxu2 %v13967_v47  ;;  %v7967_v47 = vrot.slane %v7966_v25, 2 }
 0x2a1   :  { %v17715_v39 = vld [vmem:[#allocation4 + $0x19e4] sm:$0xf0]  ;;  %6842 = vmatmul.bf16.vlgmr.msra.gmra.mxu1 %v18574_v24 }
 0x2a2   :  { %v14958_v41 = vld [vmem:[#allocation4 + $0x1bc8] sm:$0xf]  ;;  %v14703_v49 = vor.u32 %v17715_v39, %v14702_v36  ;;  %6867 = vmatpush.bf16.msra.mxu3 %v14223_v51  ;;  %v6635_v51 = vpop.f32.mrf.mxu1  ;;  %v7968_v1 = vadd.f32 %v7967_v47, %v7966_v25 }
 0x2a3   :  { %v17779_v43 = vld [vmem:[#allocation4 + $0x1be4] sm:$0xf0]  ;;  %6855 = vmatmul.bf16.vlgmr.msra.gmra.mxu2 %v18572_v23 }
 0x2a4   :  { %v15214_v44 = vld [vmem:[#allocation4 + $0x1dc8] sm:$0xf]  ;;  %v14959_v50 = vor.u32 %v17779_v43, %v14958_v41  ;;  %6873 = vmatpush.bf16.msrb.mxu0 %v14703_v49  ;;  %v8014_v43 = vmul.f32 8.0, %v18638_v22 }
 0x2a5   :  { %v17843_v45 = vld [vmem:[#allocation4 + $0x1de4] sm:$0xf0]  ;;  %6868 = vmatmul.bf16.vlgmr.msra.gmra.mxu3 %v18576_v27 }
 0x2a6   :  { %v15470_v48 = vld [vmem:[#allocation4 + $0x1fc8] sm:$0xf]  ;;  %v15215_v52 = vor.u32 %v17843_v45, %v15214_v44  ;;  %6886 = vmatpush.bf16.msrb.mxu1 %v14959_v50  ;;  %v6622_v44 = vpop.f32.mrf.mxu0 }
 0x2a7   :  { %v17907_v53 = vld [vmem:[#allocation4 + $0x1fe4] sm:$0xf0] }
 0x2a8   :  { %v14670_v54 = vld [vmem:[#allocation4 + $0x1988] sm:$0xf]  ;;  %v15471_v59 = vor.u32 %v17907_v53, %v15470_v48  ;;  %6899 = vmatpush.bf16.msrb.mxu2 %v15215_v52  ;;  %v6623_v48 = vadd.f32 %v6622_v44, %v18632_v58 }
 0x2a9   :  { %v17707_v55 = vld [vmem:[#allocation4 + $0x19a4] sm:$0xf0] }
 0x2aa   :  { %v14926_v56 = vld [vmem:[#allocation4 + $0x1b88] sm:$0xf]  ;;  %v14671_v2 = vor.u32 %v17707_v55, %v14670_v54  ;;  %6912 = vmatpush.bf16.msrb.mxu3 %v15471_v59  ;;  %v6636_v57 = vadd.f32 %v6635_v51, %v6623_v48 }
 0x2ab   :  { %v17771_v60 = vld [vmem:[#allocation4 + $0x1ba4] sm:$0xf0] }
 0x2ac   :  { %v15182_v61 = vld [vmem:[#allocation4 + $0x1d88] sm:$0xf]  ;;  %v14927_v3 = vor.u32 %v17771_v60, %v14926_v56  ;;  %6874 = vmatpush.bf16.msrb.mxu0 %v14671_v2 }
 0x2ad   :  { %v17835_v62 = vld [vmem:[#allocation4 + $0x1da4] sm:$0xf0] }
 0x2ae   :  { %v15438_v4 = vld [vmem:[#allocation4 + $0x1f88] sm:$0xf]  ;;  %v15183_v5 = vor.u32 %v17835_v62, %v15182_v61  ;;  %6887 = vmatpush.bf16.msrb.mxu1 %v14927_v3  ;;  %v8015_v62 = vsub.f32 1.0, %v8014_v43 }
 0x2af   :  { %v17899_v0 = vld [vmem:[#allocation4 + $0x1fa4] sm:$0xf0] }
 0x2b0   :  { %v14638_v6 = vld [vmem:[#allocation4 + $0x1948] sm:$0xf]  ;;  %v15439_v10 = vor.u32 %v17899_v0, %v15438_v4  ;;  %6900 = vmatpush.bf16.msrb.mxu2 %v15183_v5 }
 0x2b1   :  { %v17699_v7 = vld [vmem:[#allocation4 + $0x1964] sm:$0xf0] }
 0x2b2   :  { %v14894_v8 = vld [vmem:[#allocation4 + $0x1b48] sm:$0xf]  ;;  %v14639_v29 = vor.u32 %v17699_v7, %v14638_v6  ;;  %6913 = vmatpush.bf16.msrb.mxu3 %v15439_v10  ;;  %v6648_v10 = vpop.f32.mrf.mxu2 }
 0x2b3   :  { %v17763_v11 = vld [vmem:[#allocation4 + $0x1b64] sm:$0xf0] }
 0x2b4   :  { %v15150_v12 = vld [vmem:[#allocation4 + $0x1d48] sm:$0xf]  ;;  %v14895_v30 = vor.u32 %v17763_v11, %v14894_v8  ;;  %6875 = vmatpush.bf16.msrb.mxu0 %v14639_v29  ;;  %v6661_v29 = vpop.f32.mrf.mxu3 }
 0x2b5   :  { %v17827_v14 = vld [vmem:[#allocation4 + $0x1d64] sm:$0xf0] }
 0x2b6   :  { %v15406_v15 = vld [vmem:[#allocation4 + $0x1f48] sm:$0xf]  ;;  %v15151_v31 = vor.u32 %v17827_v14, %v15150_v12  ;;  %6888 = vmatpush.bf16.msrb.mxu1 %v14895_v30 }
 0x2b7   :  { %v17891_v18 = vld [vmem:[#allocation4 + $0x1f64] sm:$0xf0] }
 0x2b8   :  { %v14606_v32 = vld [vmem:[#allocation4 + $0x1908] sm:$0xf]  ;;  %v15407_v36 = vor.u32 %v17891_v18, %v15406_v15  ;;  %6901 = vmatpush.bf16.msrb.mxu2 %v15151_v31  ;;  %v8016_v15 = vmul.f32 %v18638_v22, %v8015_v62  ;;  %v6649_v18 = vadd.f32 %v6648_v10, %v6636_v57  ;;  %v6624_v31 = vpop.f32.mrf.mxu0 }
 0x2b9   :  { %v17691_v33 = vld [vmem:[#allocation4 + $0x1924] sm:$0xf0] }
 0x2ba   :  { %v14862_v35 = vld [vmem:[#allocation4 + $0x1b08] sm:$0xf]  ;;  %v14607_v53 = vor.u32 %v17691_v33, %v14606_v32  ;;  %6914 = vmatpush.bf16.msrb.mxu3 %v15407_v36  ;;  %v7969_v32 = vrot.slane %v7968_v1, 1  ;;  %v18645_v36 = vadd.f32 %v6661_v29, %v6649_v18  ;;  %v17135_v18 = vld [vmem:[#allocation4 + $0x7cc] sm:$0xf] }
 0x2bb   :  { %v17755_v39 = vld [vmem:[#allocation4 + $0x1b24] sm:$0xf0]  ;;  %v12400_v29 = vld [vmem:[#allocation4 + $0x7e8] sm:$0xf0] }
 0x2bc   :  { %v15118_v41 = vld [vmem:[#allocation4 + $0x1d08] sm:$0xf]  ;;  %v14863_v49 = vor.u32 %v17755_v39, %v14862_v35  ;;  %6876 = vmatpush.bf16.msrb.mxu0 %v14607_v53  ;;  %v6637_v35 = vpop.f32.mrf.mxu1  ;;  %v8017_v53 = vadd.f32 %v18638_v22, %v8016_v15 }
 0x2bd   :  { %v17819_v42 = vld [vmem:[#allocation4 + $0x1d24] sm:$0xf0]  ;;  %v11600_v35 = vld [vmem:[#allocation4 + $0x1a8] sm:$0xf0] }
 0x2be   :  { %v15374_v45 = vld [vmem:[#allocation4 + $0x1f08] sm:$0xf]  ;;  %v15119_v50 = vor.u32 %v17819_v42, %v15118_v41  ;;  %6889 = vmatpush.bf16.msrb.mxu1 %v14863_v49 }
 0x2bf   :  { %v17883_v46 = vld [vmem:[#allocation4 + $0x1f24] sm:$0xf0] }
 0x2c0   :  { %v14574_v52 = vld [vmem:[#allocation4 + $0x18c8] sm:$0xf]  ;;  %v15375_v56 = vor.u32 %v17883_v46, %v15374_v45  ;;  %6902 = vmatpush.bf16.msrb.mxu2 %v15119_v50 }
 0x2c1   :  { %v17683_v54 = vld [vmem:[#allocation4 + $0x18e4] sm:$0xf0] }
 0x2c2   :  { %v14830_v55 = vld [vmem:[#allocation4 + $0x1ac8] sm:$0xf]  ;;  %v14575_v58 = vor.u32 %v17683_v54, %v14574_v52  ;;  %6915 = vmatpush.bf16.msrb.mxu3 %v15375_v56 }
 0x2c3   :  { %v17747_v59 = vld [vmem:[#allocation4 + $0x1ae4] sm:$0xf0] }
 0x2c4   :  { %v15086_v60 = vld [vmem:[#allocation4 + $0x1cc8] sm:$0xf]  ;;  %v14831_v2 = vor.u32 %v17747_v59, %v14830_v55  ;;  %6877 = vmatpush.bf16.msrb.mxu0 %v14575_v58 }
 0x2c5   :  { %v17811_v61 = vld [vmem:[#allocation4 + $0x1ce4] sm:$0xf0] }
 0x2c6   :  { %v15342_v4 = vld [vmem:[#allocation4 + $0x1ec8] sm:$0xf]  ;;  %v15087_v3 = vor.u32 %v17811_v61, %v15086_v60  ;;  %6890 = vmatpush.bf16.msrb.mxu1 %v14831_v2  ;;  %v7970_v61 = vadd.f32 %v7969_v32, %v7968_v1  ;;  %v6650_v2 = vpop.f32.mrf.mxu2  ;;  %v12144_v1 = vld [vmem:[#allocation4 + $0x5e8] sm:$0xf0] }
 0x2c7   :  { %v17875_v0 = vld [vmem:[#allocation4 + $0x1ee4] sm:$0xf0]  ;;  %v16983_v2 = vld [vmem:[#allocation4 + $0x30c] sm:$0xf] }
 0x2c8   :  { %v14542_v5 = vld [vmem:[#allocation4 + $0x1888] sm:$0xf]  ;;  %v15343_v8 = vor.u32 %v17875_v0, %v15342_v4  ;;  %6903 = vmatpush.bf16.msrb.mxu2 %v15087_v3  ;;  %v18652_v3 = vsel %vm8018_vm0, %v18638_v22, %v8017_v53 }
 0x2c9   :  { %v17675_v6 = vld [vmem:[#allocation4 + $0x18a4] sm:$0xf0] }
 0x2ca   :  { %v14798_v7 = vld [vmem:[#allocation4 + $0x1a88] sm:$0xf]  ;;  %v14543_v33 = vor.u32 %v17675_v6, %v14542_v5  ;;  %6916 = vmatpush.bf16.msrb.mxu3 %v15343_v8  ;;  %v16943_v5 = vld [vmem:[#allocation4 + $0x1cc] sm:$0xf]  ;;  %v6663_v8 = vpop.f32.mrf.mxu3 }
 0x2cb   :  { %v17739_v11 = vld [vmem:[#allocation4 + $0x1aa4] sm:$0xf0]  ;;  %v11632_v6 = vld [vmem:[#allocation4 + $0x1e8] sm:$0xf0] }
 0x2cc   :  { %v15054_v12 = vld [vmem:[#allocation4 + $0x1c88] sm:$0xf]  ;;  %v14799_v39 = vor.u32 %v17739_v11, %v14798_v7  ;;  %6878 = vmatpush.bf16.msrb.mxu0 %v14543_v33  ;;  %v17007_v7 = vld [vmem:[#allocation4 + $0x3cc] sm:$0xf] }
 0x2cd   :  { %v17803_v14 = vld [vmem:[#allocation4 + $0x1ca4] sm:$0xf0]  ;;  %v11888_v11 = vld [vmem:[#allocation4 + $0x3e8] sm:$0xf0] }
 0x2ce   :  { %v15310_v25 = vld [vmem:[#allocation4 + $0x1e88] sm:$0xf]  ;;  %v15055_v41 = vor.u32 %v17803_v14, %v15054_v12  ;;  %6891 = vmatpush.bf16.msrb.mxu1 %v14799_v39  ;;  %v17071_v12 = vld [vmem:[#allocation4 + $0x5cc] sm:$0xf]  ;;  %v11891_v31 = vor.u32 %v17007_v7, %v11888_v11 }
 0x2cf   :  { %v17867_v30 = vld [vmem:[#allocation4 + $0x1ea4] sm:$0xf0]  ;;  %v12147_v32 = vor.u32 %v17071_v12, %v12144_v1  ;;  %v16935_v33 = vld [vmem:[#allocation4 + $0x18c] sm:$0xf] }
 0x2d0   :  { %v14510_v42 = vld [vmem:[#allocation4 + $0x1848] sm:$0xf]  ;;  %v15311_v45 = vor.u32 %v17867_v30, %v15310_v25  ;;  %6904 = vmatpush.bf16.msrb.mxu2 %v15055_v41  ;;  %v8020_v25 = vmul.f32 %v18652_v3, %v7970_v61  ;;  %v11635_v30 = vor.u32 %v16943_v5, %v11632_v6  ;;  %v16999_v39 = vld [vmem:[#allocation4 + $0x38c] sm:$0xf]  ;;  %v12403_v41 = vor.u32 %v17135_v18, %v12400_v29  ;;  %v6687_v18 = vpop.f32.mrf.mxu1 }
 0x2d1   :  { %v17667_v43 = vld [vmem:[#allocation4 + $0x1864] sm:$0xf0]  ;;  %v11792_v6 = vld [vmem:[#allocation4 + $0x328] sm:$0xf0] }
 0x2d2   :  { %v14766_v44 = vld [vmem:[#allocation4 + $0x1a48] sm:$0xf]  ;;  %v14511_v50 = vor.u32 %v17667_v43, %v14510_v42  ;;  %6917 = vmatpush.bf16.msrb.mxu3 %v15311_v45  ;;  %v11856_v42 = vld [vmem:[#allocation4 + $0x3a8] sm:$0xf0]  ;;  %v11795_v29 = vor.u32 %v16983_v2, %v11792_v6 }
 0x2d3   :  { %v17731_v46 = vld [vmem:[#allocation4 + $0x1a64] sm:$0xf0]  ;;  %v17063_v43 = vld [vmem:[#allocation4 + $0x58c] sm:$0xf]  ;;  %v11859_v53 = vor.u32 %v16999_v39, %v11856_v42 }
 0x2d4   :  { %v15022_v47 = vld [vmem:[#allocation4 + $0x1c48] sm:$0xf]  ;;  %v14767_v55 = vor.u32 %v17731_v46, %v14766_v44  ;;  %6879 = vmatpush.bf16.msrb.mxu0 %v14511_v50  ;;  %v12112_v44 = vld [vmem:[#allocation4 + $0x5a8] sm:$0xf0] }
 0x2d5   :  { %v17795_v48 = vld [vmem:[#allocation4 + $0x1c64] sm:$0xf0]  ;;  %v17127_v45 = vld [vmem:[#allocation4 + $0x78c] sm:$0xf] }
 0x2d6   :  { %v15278_v51 = vld [vmem:[#allocation4 + $0x1e48] sm:$0xf]  ;;  %v15023_v56 = vor.u32 %v17795_v48, %v15022_v47  ;;  %6892 = vmatpush.bf16.msrb.mxu1 %v14767_v55  ;;  %v12368_v46 = vld [vmem:[#allocation4 + $0x7a8] sm:$0xf0]  ;;  %v18656_v47 = vsub.f32 %v18619_v28, %v8020_v25  ;;  %v11603_v48 = vor.u32 %v16935_v33, %v11600_v35 }
 0x2d7   :  { %v17859_v49 = vld [vmem:[#allocation4 + $0x1e64] sm:$0xf0]  ;;  %v11568_v50 = vld [vmem:[#allocation4 + $0x168] sm:$0xf0] }
 0x2d8   :  { %v14478_v52 = vld [vmem:[#allocation4 + $0x1808] sm:$0xf]  ;;  %v15279_v62 = vor.u32 %v17859_v49, %v15278_v51  ;;  %6905 = vmatpush.bf16.msrb.mxu2 %v15023_v56  ;;  %v12115_v51 = vor.u32 %v17063_v43, %v12112_v44  ;;  %v16927_v49 = vld [vmem:[#allocation4 + $0x14c] sm:$0xf] }
 0x2d9   :  { %v17659_v54 = vld [vmem:[#allocation4 + $0x1824] sm:$0xf0]  ;;  %v11824_v55 = vld [vmem:[#allocation4 + $0x368] sm:$0xf0]  ;;  %v11571_v61 = vor.u32 %v16927_v49, %v11568_v50  ;;  %v6700_v50 = vpop.f32.mrf.mxu2 }
 0x2da   :  { %v14734_v57 = vld [vmem:[#allocation4 + $0x1a08] sm:$0xf]  ;;  %v14479_v10 = vor.u32 %v17659_v54, %v14478_v52  ;;  %6918 = vmatpush.bf16.msrb.mxu3 %v15279_v62  ;;  %v16991_v52 = vld [vmem:[#allocation4 + $0x34c] sm:$0xf]  ;;  %v12371_v54 = vor.u32 %v17127_v45, %v12368_v46 }
 0x2db   :  { %v17723_v59 = vld [vmem:[#allocation4 + $0x1a24] sm:$0xf0]  ;;  %v17055_v56 = vld [vmem:[#allocation4 + $0x54c] sm:$0xf]  ;;  %v11827_v62 = vor.u32 %v16991_v52, %v11824_v55 }
 0x2dc   :  { %v14990_v60 = vld [vmem:[#allocation4 + $0x1c08] sm:$0xf]  ;;  %v14735_v14 = vor.u32 %v17723_v59, %v14734_v57  ;;  %6880 = vmatpush.bf16.msrb.mxu0 %v14479_v10  ;;  %v12080_v57 = vld [vmem:[#allocation4 + $0x568] sm:$0xf0]  ;;  %v6674_v10 = vpop.f32.mrf.mxu0 }
 0x2dd   :  { %v17787_v4 = vld [vmem:[#allocation4 + $0x1c24] sm:$0xf0]  ;;  %v17119_v28 = vld [vmem:[#allocation4 + $0x74c] sm:$0xf] }
 0x2de   :  { %v15246_v0 = vld [vmem:[#allocation4 + $0x1e08] sm:$0xf]  ;;  %v14991_v15 = vor.u32 %v17787_v4, %v14990_v60  ;;  %6893 = vmatpush.bf16.msrb.mxu1 %v14735_v14  ;;  %v12336_v59 = vld [vmem:[#allocation4 + $0x768] sm:$0xf0]  ;;  %v8036_v60 = vmul.f32 %v18656_v47, %v18656_v47  ;;  %v12083_v4 = vor.u32 %v17055_v56, %v12080_v57  ;;  %v6675_v14 = vadd.f32 %v6674_v10, %v18645_v36  ;;  %v6713_v57 = vpop.f32.mrf.mxu3 }
 0x2df   :  { %v17851_v58 = vld [vmem:[#allocation4 + $0x1e24] sm:$0xf0]  ;;  %6881 = vmatmul.bf16.vlgmr.msrb.gmra.mxu0 %v18582_v13  ;;  %v12339_v5 = vor.u32 %v17119_v28, %v12336_v59  ;;  %v17047_v7 = vld [vmem:[#allocation4 + $0x50c] sm:$0xf] }
 0x2e0   :  { %v15247_v22 = vor.u32 %v17851_v58, %v15246_v0  ;;  %6906 = vmatpush.bf16.msrb.mxu2 %v14991_v15  ;;  %6925 = vmatpush.bf16.msra.mxu0 %v11635_v30  ;;  %v16919_v0 = vld [vmem:[#allocation4 + $0x10c] sm:$0xf]  ;;  %v8044_v1 = vrot.slane %v8036_v60, 4  ;;  %v6688_v33 = vadd.f32 %v6687_v18, %v6675_v14 }
 0x2e1   :  { %6894 = vmatmul.bf16.vlgmr.msrb.gmra.mxu1 %v18586_v21  ;;  %v11536_v58 = vld [vmem:[#allocation4 + $0x128] sm:$0xf0] }
 0x2e2   :  { %6919 = vmatpush.bf16.msrb.mxu3 %v15247_v22  ;;  %6938 = vmatpush.bf16.msra.mxu1 %v11891_v31  ;;  %v12048_v8 = vld [vmem:[#allocation4 + $0x528] sm:$0xf0]  ;;  %v11539_v15 = vor.u32 %v16919_v0, %v11536_v58  ;;  %v8045_v44 = vadd.f32 %v8044_v1, %v8036_v60  ;;  %v6701_v56 = vadd.f32 %v6700_v50, %v6688_v33 }
 0x2e3   :  { %6907 = vmatmul.bf16.vlgmr.msrb.gmra.mxu2 %v18584_v20  ;;  %v17111_v11 = vld [vmem:[#allocation4 + $0x70c] sm:$0xf]  ;;  %v12051_v25 = vor.u32 %v17047_v7, %v12048_v8 }
 0x2e4   :  { %6951 = vmatpush.bf16.msra.mxu2 %v12147_v32  ;;  %6926 = vmatpush.bf16.msra.mxu0 %v11603_v48  ;;  %v12304_v12 = vld [vmem:[#allocation4 + $0x728] sm:$0xf0]  ;;  %v6676_v60 = vpop.f32.mrf.mxu0  ;;  %v18665_v0 = vadd.f32 %v6713_v57, %v6701_v56 }
 0x2e5   :  { %6920 = vmatmul.bf16.vlgmr.msrb.gmra.mxu3 %v18588_v26  ;;  %v16911_v22 = vld [vmem:[#allocation4 + $0xcc] sm:$0xf]  ;;  %v12307_v32 = vor.u32 %v17111_v11, %v12304_v12 }
 0x2e6   :  { %6964 = vmatpush.bf16.msra.mxu3 %v12403_v41  ;;  %6939 = vmatpush.bf16.msra.mxu1 %v11859_v53  ;;  %v11504_v30 = vld [vmem:[#allocation4 + $0xe8] sm:$0xf0]  ;;  %v7971_v1 = vrot.slane %v18665_v0, 4 }
 0x2e7   :  { %v16975_v31 = vld [vmem:[#allocation4 + $0x2cc] sm:$0xf]  ;;  %v11507_v36 = vor.u32 %v16911_v22, %v11504_v30 }
 0x2e8   :  { %6952 = vmatpush.bf16.msra.mxu2 %v12115_v51  ;;  %6927 = vmatpush.bf16.msra.mxu0 %v11571_v61  ;;  %v11760_v35 = vld [vmem:[#allocation4 + $0x2e8] sm:$0xf0]  ;;  %v8046_v61 = vrot.slane %v8045_v44, 2  ;;  %v7972_v30 = vadd.f32 %v7971_v1, %v18665_v0 }
 0x2e9   :  { %v17039_v39 = vld [vmem:[#allocation4 + $0x4cc] sm:$0xf]  ;;  %v11763_v45 = vor.u32 %v16975_v31, %v11760_v35 }
 0x2ea   :  { %6965 = vmatpush.bf16.msra.mxu3 %v12371_v54  ;;  %6940 = vmatpush.bf16.msra.mxu1 %v11827_v62  ;;  %v12016_v41 = vld [vmem:[#allocation4 + $0x4e8] sm:$0xf0] }
 0x2eb   :  { %v17103_v42 = vld [vmem:[#allocation4 + $0x6cc] sm:$0xf]  ;;  %v12019_v46 = vor.u32 %v17039_v39, %v12016_v41  ;;  %v8047_v41 = vadd.f32 %v8046_v61, %v8045_v44 }
 0x2ec   :  { %6953 = vmatpush.bf16.msra.mxu2 %v12083_v4  ;;  %v12272_v43 = vld [vmem:[#allocation4 + $0x6e8] sm:$0xf0]  ;;  %6928 = vmatpush.bf16.msra.mxu0 %v11539_v15  ;;  %v6689_v4 = vpop.f32.mrf.mxu1 }
 0x2ed   :  { %v16903_v48 = vld [vmem:[#allocation4 + $0x8c] sm:$0xf]  ;;  %v12275_v49 = vor.u32 %v17103_v42, %v12272_v43  ;;  %v8048_v60 = vrot.slane %v8047_v41, 1 }
 0x2ee   :  { %6966 = vmatpush.bf16.msra.mxu3 %v12339_v5  ;;  %6941 = vmatpush.bf16.msra.mxu1 %v11795_v29  ;;  %v11472_v53 = vld [vmem:[#allocation4 + $0xa8] sm:$0xf0] }
 0x2ef   :  { %v16967_v51 = vld [vmem:[#allocation4 + $0x28c] sm:$0xf]  ;;  %v11475_v62 = vor.u32 %v16903_v48, %v11472_v53  ;;  %v7973_v48 = vrot.slane %v7972_v30, 2 }
 0x2f0   :  { %6954 = vmatpush.bf16.msra.mxu2 %v12051_v25  ;;  %v11728_v52 = vld [vmem:[#allocation4 + $0x2a8] sm:$0xf0]  ;;  %6929 = vmatpush.bf16.msra.mxu0 %v11507_v36 }
 0x2f1   :  { %v17031_v54 = vld [vmem:[#allocation4 + $0x48c] sm:$0xf]  ;;  %v11731_v58 = vor.u32 %v16967_v51, %v11728_v52  ;;  %v7974_v56 = vadd.f32 %v7973_v48, %v7972_v30 }
 0x2f2   :  { %6967 = vmatpush.bf16.msra.mxu3 %v12307_v32  ;;  %v11984_v55 = vld [vmem:[#allocation4 + $0x4a8] sm:$0xf0]  ;;  %6942 = vmatpush.bf16.msra.mxu1 %v11763_v45 }
 0x2f3   :  { %v17095_v28 = vld [vmem:[#allocation4 + $0x68c] sm:$0xf]  ;;  %v11987_v2 = vor.u32 %v17031_v54, %v11984_v55 }
 0x2f4   :  { %v12240_v59 = vld [vmem:[#allocation4 + $0x6a8] sm:$0xf0]  ;;  %6955 = vmatpush.bf16.msra.mxu2 %v12019_v46  ;;  %6930 = vmatpush.bf16.msra.mxu0 %v11475_v62  ;;  %v6702_v46 = vpop.f32.mrf.mxu2 }
 0x2f5   :  { %v16895_v5 = vld [vmem:[#allocation4 + $0x4c] sm:$0xf]  ;;  %v12243_v8 = vor.u32 %v17095_v28, %v12240_v59 }
 0x2f6   :  { %v11440_v6 = vld [vmem:[#allocation4 + $0x68] sm:$0xf0]  ;;  %6968 = vmatpush.bf16.msra.mxu3 %v12275_v49  ;;  %6943 = vmatpush.bf16.msra.mxu1 %v11731_v58  ;;  %v6715_v49 = vpop.f32.mrf.mxu3  ;;  %v7975_v58 = vrot.slane %v7974_v56, 1 }
 0x2f7   :  { %v16959_v7 = vld [vmem:[#allocation4 + $0x24c] sm:$0xf]  ;;  %v11443_v18 = vor.u32 %v16895_v5, %v11440_v6 }
 0x2f8   :  { %v11696_v10 = vld [vmem:[#allocation4 + $0x268] sm:$0xf0]  ;;  %6956 = vmatpush.bf16.msra.mxu2 %v11987_v2  ;;  %v7976_v1 = vadd.f32 %v7975_v58, %v7974_v56 }
 0x2f9   :  { %v17023_v11 = vld [vmem:[#allocation4 + $0x44c] sm:$0xf]  ;;  %v11699_v31 = vor.u32 %v16959_v7, %v11696_v10  ;;  %6931 = vmatpush.bf16.msra.mxu0 %v11443_v18  ;;  %v8049_v18 = vadd.f32 %v8048_v60, %v8047_v41 }
 0x2fa   :  { %v11952_v12 = vld [vmem:[#allocation4 + $0x468] sm:$0xf0]  ;;  %6969 = vmatpush.bf16.msra.mxu3 %v12243_v8 }
 0x2fb   :  { %v17087_v14 = vld [vmem:[#allocation4 + $0x64c] sm:$0xf]  ;;  %v11955_v32 = vor.u32 %v17023_v11, %v11952_v12  ;;  %6944 = vmatpush.bf16.msra.mxu1 %v11699_v31  ;;  %v8092_v46 = vmul.f32 %v8049_v18, %v18652_v3 }
 0x2fc   :  { %v12208_v15 = vld [vmem:[#allocation4 + $0x668] sm:$0xf0] }
 0x2fd   :  { %v16887_v29 = vld [vmem:[#allocation4 + $0xc] sm:$0xf]  ;;  %v12211_v42 = vor.u32 %v17087_v14, %v12208_v15  ;;  %6957 = vmatpush.bf16.msra.mxu2 %v11955_v32  ;;  %v18680_v60 = vadd.f32 1e-05, %v8092_v46 }
 0x2fe   :  { %v11408_v25 = vld [vmem:[#allocation4 + $0x28] sm:$0xf0] }
 0x2ff   :  { %v16951_v22 = vld [vmem:[#allocation4 + $0x20c] sm:$0xf]  ;;  %v11411_v50 = vor.u32 %v16887_v29, %v11408_v25  ;;  %6970 = vmatpush.bf16.msra.mxu3 %v12211_v42  ;;  %v8021_v25 = vmul.f32 %v18652_v3, %v7976_v1  ;;  %18276 = vrsqrt.f32 %v18680_v60  ;;  %vm8121_vm6 = vweird.f32 %v18680_v60 }
 0x300   :  { %v11664_v33 = vld [vmem:[#allocation4 + $0x228] sm:$0xf0] }
 0x301   :  { %v17015_v35 = vld [vmem:[#allocation4 + $0x40c] sm:$0xf]  ;;  %v11667_v57 = vor.u32 %v16951_v22, %v11664_v33  ;;  %6932 = vmatpush.bf16.msra.mxu0 %v11411_v50  ;;  %v18672_v41 = vsub.f32 %v18665_v0, %v8021_v25 }
 0x302   :  { %v11920_v39 = vld [vmem:[#allocation4 + $0x428] sm:$0xf0] }
 0x303   :  { %v17079_v43 = vld [vmem:[#allocation4 + $0x60c] sm:$0xf]  ;;  %v11923_v44 = vor.u32 %v17015_v35, %v11920_v39  ;;  %6945 = vmatpush.bf16.msra.mxu1 %v11667_v57 }
 0x304   :  { %v12176_v36 = vld [vmem:[#allocation4 + $0x628] sm:$0xf0]  ;;  %6933 = vmatmul.bf16.vlgmr.msra.gmra.mxu0 %v18549_v9 }
 0x305   :  { %v17199_v45 = vld [vmem:[#allocation4 + $0x9cc] sm:$0xf]  ;;  %v12179_v61 = vor.u32 %v17079_v43, %v12176_v36  ;;  %6958 = vmatpush.bf16.msra.mxu2 %v11923_v44 }
 0x306   :  { %v12656_v53 = vld [vmem:[#allocation4 + $0x9e8] sm:$0xf0]  ;;  %6946 = vmatmul.bf16.vlgmr.msra.gmra.mxu1 %v18553_v17 }
 0x307   :  { %v17263_v51 = vld [vmem:[#allocation4 + $0xbcc] sm:$0xf]  ;;  %v12659_v62 = vor.u32 %v17199_v45, %v12656_v53  ;;  %6971 = vmatpush.bf16.msra.mxu3 %v12179_v61  ;;  %v8037_v53 = vmul.f32 %v18672_v41, %v18672_v41 }
 0x308   :  { %v12912_v52 = vld [vmem:[#allocation4 + $0xbe8] sm:$0xf0]  ;;  %6959 = vmatmul.bf16.vlgmr.msra.gmra.mxu2 %v18546_v63 }
 0x309   :  { %v17327_v54 = vld [vmem:[#allocation4 + $0xdcc] sm:$0xf]  ;;  %v12915_v2 = vor.u32 %v17263_v51, %v12912_v52  ;;  %6977 = vmatpush.bf16.msrb.mxu0 %v12659_v62  ;;  %v8050_v44 = vrot.slane %v8037_v53, 4  ;;  %v6726_v62 = vpop.f32.mrf.mxu0 }
 0x30a   :  { %v13168_v55 = vld [vmem:[#allocation4 + $0xde8] sm:$0xf0]  ;;  %6972 = vmatmul.bf16.vlgmr.msra.gmra.mxu3 %v18551_v16 }
 0x30b   :  { %v17391_v28 = vld [vmem:[#allocation4 + $0xfcc] sm:$0xf]  ;;  %v13171_v5 = vor.u32 %v17327_v54, %v13168_v55  ;;  %6990 = vmatpush.bf16.msrb.mxu1 %v12915_v2 }
 0x30c   :  { %v13424_v59 = vld [vmem:[#allocation4 + $0xfe8] sm:$0xf0] }
 0x30d   :  { %v17191_v4 = vld [vmem:[#allocation4 + $0x98c] sm:$0xf]  ;;  %v13427_v8 = vor.u32 %v17391_v28, %v13424_v59  ;;  %7003 = vmatpush.bf16.msrb.mxu2 %v13171_v5 }
 0x30e   :  { %v12624_v6 = vld [vmem:[#allocation4 + $0x9a8] sm:$0xf0] }
 0x30f   :  { %v17255_v7 = vld [vmem:[#allocation4 + $0xb8c] sm:$0xf]  ;;  %v12627_v29 = vor.u32 %v17191_v4, %v12624_v6  ;;  %7016 = vmatpush.bf16.msrb.mxu3 %v13427_v8  ;;  %v8051_v4 = vadd.f32 %v8050_v44, %v8037_v53  ;;  %v6739_v8 = vpop.f32.mrf.mxu1 }
 0x310   :  { %v12880_v10 = vld [vmem:[#allocation4 + $0xba8] sm:$0xf0] }
 0x311   :  { %v17319_v11 = vld [vmem:[#allocation4 + $0xd8c] sm:$0xf]  ;;  %v12883_v22 = vor.u32 %v17255_v7, %v12880_v10  ;;  %6978 = vmatpush.bf16.msrb.mxu0 %v12627_v29  ;;  %v6740_v29 = vadd.f32 %v6739_v8, %v6726_v62 }
 0x312   :  { %v13136_v12 = vld [vmem:[#allocation4 + $0xda8] sm:$0xf0] }
 0x313   :  { %v17383_v14 = vld [vmem:[#allocation4 + $0xf8c] sm:$0xf]  ;;  %v13139_v30 = vor.u32 %v17319_v11, %v13136_v12  ;;  %6991 = vmatpush.bf16.msrb.mxu1 %v12883_v22 }
 0x314   :  { %v13392_v15 = vld [vmem:[#allocation4 + $0xfa8] sm:$0xf0] }
 0x315   :  { %v17183_v31 = vld [vmem:[#allocation4 + $0x94c] sm:$0xf]  ;;  %v13395_v35 = vor.u32 %v17383_v14, %v13392_v15  ;;  %7004 = vmatpush.bf16.msrb.mxu2 %v13139_v30  ;;  %v8052_v14 = vrot.slane %v8051_v4, 2 }
 0x316   :  { %v12592_v32 = vld [vmem:[#allocation4 + $0x968] sm:$0xf0] }
 0x317   :  { %v17247_v33 = vld [vmem:[#allocation4 + $0xb4c] sm:$0xf]  ;;  %v12595_v48 = vor.u32 %v17183_v31, %v12592_v32  ;;  %7017 = vmatpush.bf16.msrb.mxu3 %v13395_v35  ;;  %v8053_v22 = vadd.f32 %v8052_v14, %v8051_v4 }
 0x318   :  { %v12848_v39 = vld [vmem:[#allocation4 + $0xb68] sm:$0xf0] }
 0x319   :  { %v17311_v42 = vld [vmem:[#allocation4 + $0xd4c] sm:$0xf]  ;;  %v12851_v51 = vor.u32 %v17247_v33, %v12848_v39  ;;  %6979 = vmatpush.bf16.msrb.mxu0 %v12595_v48  ;;  %v6752_v39 = vpop.f32.mrf.mxu2  ;;  %v6765_v48 = vpop.f32.mrf.mxu3  ;;  %v8054_v53 = vrot.slane %v8053_v22, 1 }
 0x31a   :  { %v13104_v43 = vld [vmem:[#allocation4 + $0xd68] sm:$0xf0]  ;;  %v6753_v46 = vadd.f32 %v6752_v39, %v6740_v29 }
 0x31b   :  { %v17375_v36 = vld [vmem:[#allocation4 + $0xf4c] sm:$0xf]  ;;  %v13107_v0 = vor.u32 %v17311_v42, %v13104_v43  ;;  %6992 = vmatpush.bf16.msrb.mxu1 %v12851_v51 }
 0x31c   :  { %v13360_v45 = vld [vmem:[#allocation4 + $0xf68] sm:$0xf0] }
 0x31d   :  { %v17175_v49 = vld [vmem:[#allocation4 + $0x90c] sm:$0xf]  ;;  %v13363_v54 = vor.u32 %v17375_v36, %v13360_v45  ;;  %7005 = vmatpush.bf16.msrb.mxu2 %v13107_v0 }
 0x31e   :  { %v12560_v50 = vld [vmem:[#allocation4 + $0x928] sm:$0xf0] }
 0x31f   :  { %v17239_v52 = vld [vmem:[#allocation4 + $0xb0c] sm:$0xf]  ;;  %v12563_v61 = vor.u32 %v17175_v49, %v12560_v50  ;;  %7018 = vmatpush.bf16.msrb.mxu3 %v13363_v54  ;;  %v18683_v50 = vadd.f32 %v6765_v48, %v6753_v46  ;;  %v8055_v54 = vadd.f32 %v8054_v53, %v8053_v22 }
 0x320   :  { %v12816_v55 = vld [vmem:[#allocation4 + $0xb28] sm:$0xf0] }
 0x321   :  { %v17303_v56 = vld [vmem:[#allocation4 + $0xd0c] sm:$0xf]  ;;  %v12819_v58 = vor.u32 %v17239_v52, %v12816_v55  ;;  %6980 = vmatpush.bf16.msrb.mxu0 %v12563_v61  ;;  %v6728_v52 = vpop.f32.mrf.mxu0 }
 0x322   :  { %v13072_v57 = vld [vmem:[#allocation4 + $0xd28] sm:$0xf0] }
 0x323   :  { %v17367_v28 = vld [vmem:[#allocation4 + $0xf0c] sm:$0xf]  ;;  %v13075_v2 = vor.u32 %v17303_v56, %v13072_v57  ;;  %6993 = vmatpush.bf16.msrb.mxu1 %v12819_v58 }
 0x324   :  { %v13328_v59 = vld [vmem:[#allocation4 + $0xf28] sm:$0xf0] }
 0x325   :  { %v17167_v5 = vld [vmem:[#allocation4 + $0x8cc] sm:$0xf]  ;;  %v13331_v10 = vor.u32 %v17367_v28, %v13328_v59  ;;  %7006 = vmatpush.bf16.msrb.mxu2 %v13075_v2  ;;  %v6741_v59 = vpop.f32.mrf.mxu1  ;;  %v18685_v2 = vpop.eup %18276 }
 0x326   :  { %v12528_v6 = vld [vmem:[#allocation4 + $0x8e8] sm:$0xf0]  ;;  %v8116_v22 = vmul.f32 %v18685_v2, %v18680_v60  ;;  %vm8122_vm2 = vweird.f32 %v18685_v2 }
 0x327   :  { %v17231_v7 = vld [vmem:[#allocation4 + $0xacc] sm:$0xf]  ;;  %v12531_v25 = vor.u32 %v17167_v5, %v12528_v6  ;;  %7019 = vmatpush.bf16.msrb.mxu3 %v13331_v10  ;;  %v8093_v5 = vmul.f32 %v8055_v54, %v18652_v3  ;;  %vm8123_vm7 = vmor %vm8121_vm6, %vm8122_vm2 }
 0x328   :  { %v12784_v11 = vld [vmem:[#allocation4 + $0xae8] sm:$0xf0]  ;;  %v8117_v52 = vmul.f32 %v18685_v2, %v8116_v22 }
 0x329   :  { %v17295_v12 = vld [vmem:[#allocation4 + $0xccc] sm:$0xf]  ;;  %v12787_v30 = vor.u32 %v17231_v7, %v12784_v11  ;;  %6981 = vmatpush.bf16.msrb.mxu0 %v12531_v25  ;;  %v6754_v25 = vpop.f32.mrf.mxu2 }
 0x32a   :  { %v13040_v1 = vld [vmem:[#allocation4 + $0xce8] sm:$0xf0] }
 0x32b   :  { %v17359_v15 = vld [vmem:[#allocation4 + $0xecc] sm:$0xf]  ;;  %v13043_v31 = vor.u32 %v17295_v12, %v13040_v1  ;;  %6994 = vmatpush.bf16.msrb.mxu1 %v12787_v30  ;;  %v18688_v1 = vadd.f32 1e-05, %v8093_v5 }
 0x32c   :  { %v13296_v18 = vld [vmem:[#allocation4 + $0xee8] sm:$0xf0] }
 0x32d   :  { %v17159_v32 = vld [vmem:[#allocation4 + $0x88c] sm:$0xf]  ;;  %v13299_v42 = vor.u32 %v17359_v15, %v13296_v18  ;;  %7007 = vmatpush.bf16.msrb.mxu2 %v13043_v31  ;;  %18278 = vrsqrt.f32 %v18688_v1  ;;  %vm8131_vm3 = vweird.f32 %v18688_v1 }
 0x32e   :  { %v12496_v33 = vld [vmem:[#allocation4 + $0x8a8] sm:$0xf0] }
 0x32f   :  { %v17223_v35 = vld [vmem:[#allocation4 + $0xa8c] sm:$0xf]  ;;  %v12499_v49 = vor.u32 %v17159_v32, %v12496_v33  ;;  %7020 = vmatpush.bf16.msrb.mxu3 %v13299_v42 }
 0x330   :  { %v12752_v43 = vld [vmem:[#allocation4 + $0xaa8] sm:$0xf0] }
 0x331   :  { %v17287_v36 = vld [vmem:[#allocation4 + $0xc8c] sm:$0xf]  ;;  %v12755_v55 = vor.u32 %v17223_v35, %v12752_v43  ;;  %6982 = vmatpush.bf16.msrb.mxu0 %v12499_v49  ;;  %v6767_v35 = vpop.f32.mrf.mxu3 }
 0x332   :  { %v13008_v45 = vld [vmem:[#allocation4 + $0xca8] sm:$0xf0] }
 0x333   :  { %v17351_v51 = vld [vmem:[#allocation4 + $0xe8c] sm:$0xf]  ;;  %v13011_v56 = vor.u32 %v17287_v36, %v13008_v45  ;;  %6995 = vmatpush.bf16.msrb.mxu1 %v12755_v55  ;;  %v18694_v5 = vpop.eup %18278 }
 0x334   :  { %v13264_v0 = vld [vmem:[#allocation4 + $0xea8] sm:$0xf0]  ;;  %vm8132_vm1 = vweird.f32 %v18694_v5 }
 0x335   :  { %v17151_v57 = vld [vmem:[#allocation4 + $0x84c] sm:$0xf]  ;;  %v13267_v61 = vor.u32 %v17351_v51, %v13264_v0  ;;  %7008 = vmatpush.bf16.msrb.mxu2 %v13011_v56  ;;  %vm18710_vm4 = vmor %vm8131_vm3, %vm8132_vm1 }
 0x336   :  { %v12464_v44 = vld [vmem:[#allocation4 + $0x868] sm:$0xf0] }
 0x337   :  { %v17215_v28 = vld [vmem:[#allocation4 + $0xa4c] sm:$0xf]  ;;  %v12467_v8 = vor.u32 %v17151_v57, %v12464_v44  ;;  %7021 = vmatpush.bf16.msrb.mxu3 %v13267_v61 }
 0x338   :  { %v12720_v62 = vld [vmem:[#allocation4 + $0xa68] sm:$0xf0] }
 0x339   :  { %v17279_v4 = vld [vmem:[#allocation4 + $0xc4c] sm:$0xf]  ;;  %v12723_v14 = vor.u32 %v17215_v28, %v12720_v62  ;;  %6983 = vmatpush.bf16.msrb.mxu0 %v12467_v8  ;;  %v8118_v8 = vmul.f32 0.5, %v8117_v52 }
 0x33a   :  { %v12976_v58 = vld [vmem:[#allocation4 + $0xc68] sm:$0xf0] }
 0x33b   :  { %v17343_v6 = vld [vmem:[#allocation4 + $0xe4c] sm:$0xf]  ;;  %v12979_v15 = vor.u32 %v17279_v4, %v12976_v58  ;;  %6996 = vmatpush.bf16.msrb.mxu1 %v12723_v14 }
 0x33c   :  { %v13232_v7 = vld [vmem:[#allocation4 + $0xe68] sm:$0xf0] }
 0x33d   :  { %v17143_v10 = vld [vmem:[#allocation4 + $0x80c] sm:$0xf]  ;;  %v13235_v30 = vor.u32 %v17343_v6, %v13232_v7  ;;  %7009 = vmatpush.bf16.msrb.mxu2 %v12979_v15 }
 0x33e   :  { %v12432_v11 = vld [vmem:[#allocation4 + $0x828] sm:$0xf0] }
 0x33f   :  { %v17207_v12 = vld [vmem:[#allocation4 + $0xa0c] sm:$0xf]  ;;  %v12435_v36 = vor.u32 %v17143_v10, %v12432_v11  ;;  %7022 = vmatpush.bf16.msrb.mxu3 %v13235_v30  ;;  %v8126_v10 = vmul.f32 %v18694_v5, %v18688_v1  ;;  %v6791_v1 = vpop.f32.mrf.mxu1 }
 0x340   :  { %v12688_v18 = vld [vmem:[#allocation4 + $0xa28] sm:$0xf0] }
 0x341   :  { %v17271_v29 = vld [vmem:[#allocation4 + $0xc0c] sm:$0xf]  ;;  %v12691_v53 = vor.u32 %v17207_v12, %v12688_v18  ;;  %6984 = vmatpush.bf16.msrb.mxu0 %v12435_v36  ;;  %v8127_v25 = vmul.f32 %v18694_v5, %v8126_v10 }
 0x342   :  { %v12944_v31 = vld [vmem:[#allocation4 + $0xc28] sm:$0xf0] }
 0x343   :  { %v17335_v32 = vld [vmem:[#allocation4 + $0xe0c] sm:$0xf]  ;;  %v12947_v51 = vor.u32 %v17271_v29, %v12944_v31  ;;  %6997 = vmatpush.bf16.msrb.mxu1 %v12691_v53 }
 0x344   :  { %v13200_v33 = vld [vmem:[#allocation4 + $0xe28] sm:$0xf0]  ;;  %6985 = vmatmul.bf16.vlgmr.msrb.gmra.mxu0 %v18560_v37 }
 0x345   :  { %v17455_v39 = vld [vmem:[#allocation4 + $0x11cc] sm:$0xf]  ;;  %v13203_v54 = vor.u32 %v17335_v32, %v13200_v33  ;;  %7010 = vmatpush.bf16.msrb.mxu2 %v12947_v51 }
 0x346   :  { %v13680_v42 = vld [vmem:[#allocation4 + $0x11e8] sm:$0xf0]  ;;  %6998 = vmatmul.bf16.vlgmr.msrb.gmra.mxu1 %v18564_v40 }
 0x347   :  { %v17519_v43 = vld [vmem:[#allocation4 + $0x13cc] sm:$0xf]  ;;  %v13683_v55 = vor.u32 %v17455_v39, %v13680_v42  ;;  %7023 = vmatpush.bf16.msrb.mxu3 %v13203_v54  ;;  %v8119_v39 = vsub.f32 1.5, %v8118_v8  ;;  %v8128_v42 = vmul.f32 0.5, %v8127_v25 }
 0x348   :  { %v13936_v45 = vld [vmem:[#allocation4 + $0x13e8] sm:$0xf0]  ;;  %7011 = vmatmul.bf16.vlgmr.msrb.gmra.mxu2 %v18558_v34 }
 0x349   :  { %v17583_v46 = vld [vmem:[#allocation4 + $0x15cc] sm:$0xf]  ;;  %v13939_v56 = vor.u32 %v17519_v43, %v13936_v45  ;;  %7029 = vmatpush.bf16.msra.mxu0 %v13683_v55 }
 0x34a   :  { %v14192_v48 = vld [vmem:[#allocation4 + $0x15e8] sm:$0xf0]  ;;  %7024 = vmatmul.bf16.vlgmr.msrb.gmra.mxu3 %v18562_v38 }
 0x34b   :  { %v17647_v0 = vld [vmem:[#allocation4 + $0x17cc] sm:$0xf]  ;;  %v14195_v57 = vor.u32 %v17583_v46, %v14192_v48  ;;  %7042 = vmatpush.bf16.msra.mxu1 %v13939_v56 }
 0x34c   :  { %v14448_v49 = vld [vmem:[#allocation4 + $0x17e8] sm:$0xf0] }
 0x34d   :  { %v17447_v44 = vld [vmem:[#allocation4 + $0x118c] sm:$0xf]  ;;  %v14451_v61 = vor.u32 %v17647_v0, %v14448_v49  ;;  %7055 = vmatpush.bf16.msra.mxu2 %v14195_v57  ;;  %v8129_v0 = vsub.f32 1.5, %v8128_v42  ;;  %v8120_v57 = vmul.f32 %v18685_v2, %v8119_v39  ;;  %v6804_v39 = vpop.f32.mrf.mxu2 }
 0x34e   :  { %v13648_v28 = vld [vmem:[#allocation4 + $0x11a8] sm:$0xf0] }
 0x34f   :  { %v17511_v59 = vld [vmem:[#allocation4 + $0x138c] sm:$0xf]  ;;  %v13651_v11 = vor.u32 %v17447_v44, %v13648_v28  ;;  %7068 = vmatpush.bf16.msra.mxu3 %v14451_v61  ;;  %v8130_v44 = vmul.f32 %v18694_v5, %v8129_v0  ;;  %v6778_v61 = vpop.f32.mrf.mxu0 }
 0x350   :  { %v13904_v62 = vld [vmem:[#allocation4 + $0x13a8] sm:$0xf0]  ;;  %v6779_v8 = vadd.f32 %v6778_v61, %v18683_v50  ;;  %v8124_v50 = vsel %vm8123_vm7, %v18685_v2, %v8120_v57  ;;  %v6817_v2 = vpop.f32.mrf.mxu3  ;;  %vm8216_vm7 = vcmask 1044484  }
 0x351   :  { %v17575_v4 = vld [vmem:[#allocation4 + $0x158c] sm:$0xf]  ;;  %v13907_v12 = vor.u32 %v17511_v59, %v13904_v62  ;;  %7030 = vmatpush.bf16.msra.mxu0 %v13651_v11  ;;  %v8134_v10 = vsel %vm18710_vm4, %v18694_v5, %v8130_v44  ;;  %v6793_v44 = vpop.f32.mrf.mxu1 }
 0x352   :  { %v14160_v58 = vld [vmem:[#allocation4 + $0x15a8] sm:$0xf0] }
 0x353   :  { %v17639_v6 = vld [vmem:[#allocation4 + $0x178c] sm:$0xf]  ;;  %v14163_v14 = vor.u32 %v17575_v4, %v14160_v58  ;;  %7043 = vmatpush.bf16.msra.mxu1 %v13907_v12 }
 0x354   :  { %v14416_v7 = vld [vmem:[#allocation4 + $0x17a8] sm:$0xf0] }
 0x355   :  { %v17439_v15 = vld [vmem:[#allocation4 + $0x114c] sm:$0xf]  ;;  %v14419_v22 = vor.u32 %v17639_v6, %v14416_v7  ;;  %7056 = vmatpush.bf16.msra.mxu2 %v14163_v14 }
 0x356   :  { %v13616_v18 = vld [vmem:[#allocation4 + $0x1168] sm:$0xf0] }
 0x357   :  { %v17503_v29 = vld [vmem:[#allocation4 + $0x134c] sm:$0xf]  ;;  %v13619_v43 = vor.u32 %v17439_v15, %v13616_v18  ;;  %7069 = vmatpush.bf16.msra.mxu3 %v14419_v22  ;;  %v8203_v18 = vrot.slane %v8134_v10, 7  ;;  %v6792_v22 = vadd.f32 %v6791_v1, %v6779_v8 }
 0x358   :  { %v13872_v30 = vld [vmem:[#allocation4 + $0x1368] sm:$0xf0] }
 0x359   :  { %v17567_v31 = vld [vmem:[#allocation4 + $0x154c] sm:$0xf]  ;;  %v13875_v45 = vor.u32 %v17503_v29, %v13872_v30  ;;  %7031 = vmatpush.bf16.msra.mxu0 %v13619_v43  ;;  %v18723_v30 = vsel %vm8210_vm5, %v8124_v50, %v8203_v18  ;;  %v6819_v50 = vpop.f32.mrf.mxu3 }
 0x35a   :  { %v14128_v32 = vld [vmem:[#allocation4 + $0x1568] sm:$0xf0] }
 0x35b   :  { %v17631_v33 = vld [vmem:[#allocation4 + $0x174c] sm:$0xf]  ;;  %v14131_v46 = vor.u32 %v17567_v31, %v14128_v32  ;;  %7044 = vmatpush.bf16.msra.mxu1 %v13875_v45 }
 0x35c   :  { %v14384_v35 = vld [vmem:[#allocation4 + $0x1768] sm:$0xf0] }
 0x35d   :  { %v17431_v36 = vld [vmem:[#allocation4 + $0x110c] sm:$0xf]  ;;  %v14387_v49 = vor.u32 %v17631_v33, %v14384_v35  ;;  %7057 = vmatpush.bf16.msra.mxu2 %v14131_v46  ;;  %v6805_v46 = vadd.f32 %v6804_v39, %v6792_v22 }
 0x35e   :  { %v13584_v48 = vld [vmem:[#allocation4 + $0x1128] sm:$0xf0] }
 0x35f   :  { %v17495_v53 = vld [vmem:[#allocation4 + $0x130c] sm:$0xf]  ;;  %v13587_v28 = vor.u32 %v17431_v36, %v13584_v48  ;;  %7070 = vmatpush.bf16.msra.mxu3 %v14387_v49  ;;  %v18725_v0 = vadd.f32 %v6817_v2, %v6805_v46  ;;  %v6780_v49 = vpop.f32.mrf.mxu0 }
 0x360   :  { %v13840_v51 = vld [vmem:[#allocation4 + $0x1328] sm:$0xf0] }
 0x361   :  { %v17559_v52 = vld [vmem:[#allocation4 + $0x150c] sm:$0xf]  ;;  %v13843_v4 = vor.u32 %v17495_v53, %v13840_v51  ;;  %7032 = vmatpush.bf16.msra.mxu0 %v13587_v28 }
 0x362   :  { %v14096_v54 = vld [vmem:[#allocation4 + $0x1528] sm:$0xf0] }
 0x363   :  { %v17623_v55 = vld [vmem:[#allocation4 + $0x170c] sm:$0xf]  ;;  %v14099_v58 = vor.u32 %v17559_v52, %v14096_v54  ;;  %7045 = vmatpush.bf16.msra.mxu1 %v13843_v4 }
 0x364   :  { %v14352_v56 = vld [vmem:[#allocation4 + $0x1728] sm:$0xf0] }
 0x365   :  { %v17423_v59 = vld [vmem:[#allocation4 + $0x10cc] sm:$0xf]  ;;  %v14355_v11 = vor.u32 %v17623_v55, %v14352_v56  ;;  %7058 = vmatpush.bf16.msra.mxu2 %v14099_v58 }
 0x366   :  { %v13552_v6 = vld [vmem:[#allocation4 + $0x10e8] sm:$0xf0] }
 0x367   :  { %v17487_v7 = vld [vmem:[#allocation4 + $0x12cc] sm:$0xf]  ;;  %v13555_v60 = vor.u32 %v17423_v59, %v13552_v6  ;;  %7071 = vmatpush.bf16.msra.mxu3 %v14355_v11 }
 0x368   :  { %v13808_v12 = vld [vmem:[#allocation4 + $0x12e8] sm:$0xf0] }
 0x369   :  { %v17551_v14 = vld [vmem:[#allocation4 + $0x14cc] sm:$0xf]  ;;  %v13811_v5 = vor.u32 %v17487_v7, %v13808_v12  ;;  %7033 = vmatpush.bf16.msra.mxu0 %v13555_v60 }
 0x36a   :  { %v14064_v15 = vld [vmem:[#allocation4 + $0x14e8] sm:$0xf0] }
 0x36b   :  { %v17615_v29 = vld [vmem:[#allocation4 + $0x16cc] sm:$0xf]  ;;  %v14067_v31 = vor.u32 %v17551_v14, %v14064_v15  ;;  %7046 = vmatpush.bf16.msra.mxu1 %v13811_v5  ;;  %v6806_v15 = vpop.f32.mrf.mxu2 }
 0x36c   :  { %v14320_v25 = vld [vmem:[#allocation4 + $0x16e8] sm:$0xf0] }
 0x36d   :  { %v17415_v32 = vld [vmem:[#allocation4 + $0x108c] sm:$0xf]  ;;  %v14323_v42 = vor.u32 %v17615_v29, %v14320_v25  ;;  %7059 = vmatpush.bf16.msra.mxu2 %v14067_v31 }
 0x36e   :  { %v13520_v33 = vld [vmem:[#allocation4 + $0x10a8] sm:$0xf0] }
 0x36f   :  { %v17479_v35 = vld [vmem:[#allocation4 + $0x128c] sm:$0xf]  ;;  %v13523_v51 = vor.u32 %v17415_v32, %v13520_v33  ;;  %7072 = vmatpush.bf16.msra.mxu3 %v14323_v42 }
 0x370   :  { %v13776_v43 = vld [vmem:[#allocation4 + $0x12a8] sm:$0xf0] }
 0x371   :  { %v17543_v36 = vld [vmem:[#allocation4 + $0x148c] sm:$0xf]  ;;  %v13779_v52 = vor.u32 %v17479_v35, %v13776_v43  ;;  %7034 = vmatpush.bf16.msra.mxu0 %v13523_v51 }
 0x372   :  { %v14032_v45 = vld [vmem:[#allocation4 + $0x14a8] sm:$0xf0] }
 0x373   :  { %v17607_v48 = vld [vmem:[#allocation4 + $0x168c] sm:$0xf]  ;;  %v14035_v54 = vor.u32 %v17543_v36, %v14032_v45  ;;  %7047 = vmatpush.bf16.msra.mxu1 %v13779_v52 }
 0x374   :  { %v14288_v53 = vld [vmem:[#allocation4 + $0x16a8] sm:$0xf0] }
 0x375   :  { %v17407_v55 = vld [vmem:[#allocation4 + $0x104c] sm:$0xf]  ;;  %v14291_v28 = vor.u32 %v17607_v48, %v14288_v53  ;;  %7060 = vmatpush.bf16.msra.mxu2 %v14035_v54 }
 0x376   :  { %v13488_v56 = vld [vmem:[#allocation4 + $0x1068] sm:$0xf0] }
 0x377   :  { %v17471_v57 = vld [vmem:[#allocation4 + $0x124c] sm:$0xf]  ;;  %v13491_v6 = vor.u32 %v17407_v55, %v13488_v56  ;;  %7073 = vmatpush.bf16.msra.mxu3 %v14291_v28 }
 0x378   :  { %v13744_v59 = vld [vmem:[#allocation4 + $0x1268] sm:$0xf0] }
 0x379   :  { %v17535_v61 = vld [vmem:[#allocation4 + $0x144c] sm:$0xf]  ;;  %v13747_v1 = vor.u32 %v17471_v57, %v13744_v59  ;;  %7035 = vmatpush.bf16.msra.mxu0 %v13491_v6 }
 0x37a   :  { %v14000_v62 = vld [vmem:[#allocation4 + $0x1468] sm:$0xf0] }
 0x37b   :  { %v17599_v4 = vld [vmem:[#allocation4 + $0x164c] sm:$0xf]  ;;  %v14003_v10 = vor.u32 %v17535_v61, %v14000_v62  ;;  %7048 = vmatpush.bf16.msra.mxu1 %v13747_v1 }
 0x37c   :  { %v14256_v58 = vld [vmem:[#allocation4 + $0x1668] sm:$0xf0] }
 0x37d   :  { %v17399_v7 = vld [vmem:[#allocation4 + $0x100c] sm:$0xf]  ;;  %v14259_v18 = vor.u32 %v17599_v4, %v14256_v58  ;;  %7061 = vmatpush.bf16.msra.mxu2 %v14003_v10 }
 0x37e   :  { %v13456_v8 = vld [vmem:[#allocation4 + $0x1028] sm:$0xf0] }
 0x37f   :  { %v17463_v11 = vld [vmem:[#allocation4 + $0x120c] sm:$0xf]  ;;  %v13459_v32 = vor.u32 %v17399_v7, %v13456_v8  ;;  %7074 = vmatpush.bf16.msra.mxu3 %v14259_v18 }
 0x380   :  { %v13712_v12 = vld [vmem:[#allocation4 + $0x1228] sm:$0xf0] }
 0x381   :  { %v17527_v14 = vld [vmem:[#allocation4 + $0x140c] sm:$0xf]  ;;  %v13715_v42 = vor.u32 %v17463_v11, %v13712_v12  ;;  %7036 = vmatpush.bf16.msra.mxu0 %v13459_v32  ;;  %v6830_v32 = vpop.f32.mrf.mxu0 }
 0x382   :  { %v13968_v29 = vld [vmem:[#allocation4 + $0x1428] sm:$0xf0] }
 0x383   :  { %v17591_v25 = vld [vmem:[#allocation4 + $0x160c] sm:$0xf]  ;;  %v13971_v43 = vor.u32 %v17527_v14, %v13968_v29  ;;  %7049 = vmatpush.bf16.msra.mxu1 %v13715_v42 }
 0x384   :  { %v14224_v22 = vld [vmem:[#allocation4 + $0x1628] sm:$0xf0]  ;;  %7037 = vmatmul.bf16.vlgmr.msra.gmra.mxu0 %v18570_v19 }
 0x385   :  { %v17711_v60 = vld [vmem:[#allocation4 + $0x19cc] sm:$0xf]  ;;  %v14227_v46 = vor.u32 %v17591_v25, %v14224_v22  ;;  %7062 = vmatpush.bf16.msra.mxu2 %v13971_v43  ;;  %v6843_v43 = vpop.f32.mrf.mxu1 }
 0x386   :  { %v14704_v5 = vld [vmem:[#allocation4 + $0x19e8] sm:$0xf0]  ;;  %7050 = vmatmul.bf16.vlgmr.msra.gmra.mxu1 %v18574_v24 }
 0x387   :  { %v17775_v31 = vld [vmem:[#allocation4 + $0x1bcc] sm:$0xf]  ;;  %v14707_v2 = vor.u32 %v17711_v60, %v14704_v5  ;;  %7075 = vmatpush.bf16.msra.mxu3 %v14227_v46 }
 0x388   :  { %v14960_v33 = vld [vmem:[#allocation4 + $0x1be8] sm:$0xf0]  ;;  %7063 = vmatmul.bf16.vlgmr.msra.gmra.mxu2 %v18572_v23 }
 0x389   :  { %v17839_v35 = vld [vmem:[#allocation4 + $0x1dcc] sm:$0xf]  ;;  %v14963_v48 = vor.u32 %v17775_v31, %v14960_v33  ;;  %7081 = vmatpush.bf16.msrb.mxu0 %v14707_v2 }
 0x38a   :  { %v15216_v39 = vld [vmem:[#allocation4 + $0x1de8] sm:$0xf0]  ;;  %7076 = vmatmul.bf16.vlgmr.msra.gmra.mxu3 %v18576_v27 }
 0x38b   :  { %v17903_v36 = vld [vmem:[#allocation4 + $0x1fcc] sm:$0xf]  ;;  %v15219_v53 = vor.u32 %v17839_v35, %v15216_v39  ;;  %7094 = vmatpush.bf16.msrb.mxu1 %v14963_v48  ;;  %v6831_v39 = vadd.f32 %v6830_v32, %v18725_v0 }
 0x38c   :  { %v15472_v45 = vld [vmem:[#allocation4 + $0x1fe8] sm:$0xf0] }
 0x38d   :  { %v17703_v51 = vld [vmem:[#allocation4 + $0x198c] sm:$0xf]  ;;  %v15475_v54 = vor.u32 %v17903_v36, %v15472_v45  ;;  %7107 = vmatpush.bf16.msrb.mxu2 %v15219_v53 }
 0x38e   :  { %v14672_v49 = vld [vmem:[#allocation4 + $0x19a8] sm:$0xf0] }
 0x38f   :  { %v17767_v52 = vld [vmem:[#allocation4 + $0x1b8c] sm:$0xf]  ;;  %v14675_v59 = vor.u32 %v17703_v51, %v14672_v49  ;;  %7120 = vmatpush.bf16.msrb.mxu3 %v15475_v54  ;;  %v6844_v51 = vadd.f32 %v6843_v43, %v6831_v39 }
 0x390   :  { %v14928_v55 = vld [vmem:[#allocation4 + $0x1ba8] sm:$0xf0] }
 0x391   :  { %v17831_v56 = vld [vmem:[#allocation4 + $0x1d8c] sm:$0xf]  ;;  %v14931_v61 = vor.u32 %v17767_v52, %v14928_v55  ;;  %7082 = vmatpush.bf16.msrb.mxu0 %v14675_v59 }
 0x392   :  { %v15184_v57 = vld [vmem:[#allocation4 + $0x1da8] sm:$0xf0] }
 0x393   :  { %v17895_v44 = vld [vmem:[#allocation4 + $0x1f8c] sm:$0xf]  ;;  %v15187_v62 = vor.u32 %v17831_v56, %v15184_v57  ;;  %7095 = vmatpush.bf16.msrb.mxu1 %v14931_v61 }
 0x394   :  { %v15440_v28 = vld [vmem:[#allocation4 + $0x1fa8] sm:$0xf0] }
 0x395   :  { %v17695_v4 = vld [vmem:[#allocation4 + $0x194c] sm:$0xf]  ;;  %v15443_v7 = vor.u32 %v17895_v44, %v15440_v28  ;;  %7108 = vmatpush.bf16.msrb.mxu2 %v15187_v62 }
 0x396   :  { %v14640_v58 = vld [vmem:[#allocation4 + $0x1968] sm:$0xf0] }
 0x397   :  { %v17759_v6 = vld [vmem:[#allocation4 + $0x1b4c] sm:$0xf]  ;;  %v14643_v14 = vor.u32 %v17695_v4, %v14640_v58  ;;  %7121 = vmatpush.bf16.msrb.mxu3 %v15443_v7  ;;  %v6856_v4 = vpop.f32.mrf.mxu2 }
 0x398   :  { %v14896_v8 = vld [vmem:[#allocation4 + $0x1b68] sm:$0xf0] }
 0x399   :  { %v17823_v1 = vld [vmem:[#allocation4 + $0x1d4c] sm:$0xf]  ;;  %v14899_v15 = vor.u32 %v17759_v6, %v14896_v8  ;;  %7083 = vmatpush.bf16.msrb.mxu0 %v14643_v14  ;;  %v6857_v8 = vadd.f32 %v6856_v4, %v6844_v51 }
 0x39a   :  { %v15152_v10 = vld [vmem:[#allocation4 + $0x1d68] sm:$0xf0] }
 0x39b   :  { %v17887_v11 = vld [vmem:[#allocation4 + $0x1f4c] sm:$0xf]  ;;  %v15155_v18 = vor.u32 %v17823_v1, %v15152_v10  ;;  %7096 = vmatpush.bf16.msrb.mxu1 %v14899_v15  ;;  %v6869_v1 = vpop.f32.mrf.mxu3  ;;  %v6845_v15 = vpop.f32.mrf.mxu1 }
 0x39c   :  { %v15408_v12 = vld [vmem:[#allocation4 + $0x1f68] sm:$0xf0]  ;;  %v11862_v15 = vld [vmem:[#allocation4 + $0x390] sm:$0xf] }
 0x39d   :  { %v17687_v29 = vld [vmem:[#allocation4 + $0x190c] sm:$0xf]  ;;  %v15411_v50 = vor.u32 %v17887_v11, %v15408_v12  ;;  %7109 = vmatpush.bf16.msrb.mxu2 %v15155_v18  ;;  %v6832_v12 = vpop.f32.mrf.mxu0  ;;  %v18732_v18 = vadd.f32 %v6869_v1, %v6857_v8 }
 0x39e   :  { %v14608_v25 = vld [vmem:[#allocation4 + $0x1928] sm:$0xf0]  ;;  %v11606_v12 = vld [vmem:[#allocation4 + $0x190] sm:$0xf] }
 0x39f   :  { %v17751_v22 = vld [vmem:[#allocation4 + $0x1b0c] sm:$0xf]  ;;  %v14611_v42 = vor.u32 %v17687_v29, %v14608_v25  ;;  %7122 = vmatpush.bf16.msrb.mxu3 %v15411_v50 }
 0x3a0   :  { %v14864_v60 = vld [vmem:[#allocation4 + $0x1b28] sm:$0xf0] }
 0x3a1   :  { %v17815_v5 = vld [vmem:[#allocation4 + $0x1d0c] sm:$0xf]  ;;  %v14867_v36 = vor.u32 %v17751_v22, %v14864_v60  ;;  %7084 = vmatpush.bf16.msrb.mxu0 %v14611_v42 }
 0x3a2   :  { %v15120_v31 = vld [vmem:[#allocation4 + $0x1d28] sm:$0xf0] }
 0x3a3   :  { %v17879_v33 = vld [vmem:[#allocation4 + $0x1f0c] sm:$0xf]  ;;  %v15123_v45 = vor.u32 %v17815_v5, %v15120_v31  ;;  %7097 = vmatpush.bf16.msrb.mxu1 %v14867_v36 }
 0x3a4   :  { %v15376_v35 = vld [vmem:[#allocation4 + $0x1f28] sm:$0xf0] }
 0x3a5   :  { %v17679_v46 = vld [vmem:[#allocation4 + $0x18cc] sm:$0xf]  ;;  %v15379_v53 = vor.u32 %v17879_v33, %v15376_v35  ;;  %7110 = vmatpush.bf16.msrb.mxu2 %v15123_v45 }
 0x3a6   :  { %v14576_v2 = vld [vmem:[#allocation4 + $0x18e8] sm:$0xf0] }
 0x3a7   :  { %v17743_v48 = vld [vmem:[#allocation4 + $0x1acc] sm:$0xf]  ;;  %v14579_v57 = vor.u32 %v17679_v46, %v14576_v2  ;;  %7123 = vmatpush.bf16.msrb.mxu3 %v15379_v53 }
 0x3a8   :  { %v14832_v49 = vld [vmem:[#allocation4 + $0x1ae8] sm:$0xf0] }
 0x3a9   :  { %v17807_v52 = vld [vmem:[#allocation4 + $0x1ccc] sm:$0xf]  ;;  %v14835_v0 = vor.u32 %v17743_v48, %v14832_v49  ;;  %7085 = vmatpush.bf16.msrb.mxu0 %v14579_v57  ;;  %v16948_v57 = vld [vmem:[#allocation4 + $0x1ec] sm:$0xf0] }
 0x3aa   :  { %v15088_v54 = vld [vmem:[#allocation4 + $0x1ce8] sm:$0xf0] }
 0x3ab   :  { %v17871_v55 = vld [vmem:[#allocation4 + $0x1ecc] sm:$0xf]  ;;  %v15091_v44 = vor.u32 %v17807_v52, %v15088_v54  ;;  %7098 = vmatpush.bf16.msrb.mxu1 %v14835_v0  ;;  %v11894_v0 = vld [vmem:[#allocation4 + $0x3d0] sm:$0xf] }
 0x3ac   :  { %v15344_v56 = vld [vmem:[#allocation4 + $0x1ee8] sm:$0xf0] }
 0x3ad   :  { %v17671_v28 = vld [vmem:[#allocation4 + $0x188c] sm:$0xf]  ;;  %v15347_v62 = vor.u32 %v17871_v55, %v15344_v56  ;;  %7111 = vmatpush.bf16.msrb.mxu2 %v15091_v44  ;;  %v6858_v55 = vpop.f32.mrf.mxu2  ;;  %v11638_v56 = vld [vmem:[#allocation4 + $0x1d0] sm:$0xf]  ;;  %v6871_v44 = vpop.f32.mrf.mxu3 }
 0x3ae   :  { %v14544_v59 = vld [vmem:[#allocation4 + $0x18a8] sm:$0xf0]  ;;  %v11639_v1 = vor.u32 %v16948_v57, %v11638_v56  ;;  %v11798_v55 = vld [vmem:[#allocation4 + $0x310] sm:$0xf] }
 0x3af   :  { %v17735_v61 = vld [vmem:[#allocation4 + $0x1a8c] sm:$0xf]  ;;  %v14547_v14 = vor.u32 %v17671_v28, %v14544_v59  ;;  %7124 = vmatpush.bf16.msrb.mxu3 %v15347_v62  ;;  %v17012_v59 = vld [vmem:[#allocation4 + $0x3ec] sm:$0xf0] }
 0x3b0   :  { %v14800_v58 = vld [vmem:[#allocation4 + $0x1aa8] sm:$0xf0]  ;;  %v17076_v62 = vld [vmem:[#allocation4 + $0x5ec] sm:$0xf0] }
 0x3b1   :  { %v17799_v6 = vld [vmem:[#allocation4 + $0x1c8c] sm:$0xf]  ;;  %v14803_v29 = vor.u32 %v17735_v61, %v14800_v58  ;;  %7086 = vmatpush.bf16.msrb.mxu0 %v14547_v14  ;;  %v12150_v61 = vld [vmem:[#allocation4 + $0x5d0] sm:$0xf] }
 0x3b2   :  { %v15056_v7 = vld [vmem:[#allocation4 + $0x1ca8] sm:$0xf0]  ;;  %v16940_v14 = vld [vmem:[#allocation4 + $0x1ac] sm:$0xf0] }
 0x3b3   :  { %v17863_v10 = vld [vmem:[#allocation4 + $0x1e8c] sm:$0xf]  ;;  %v15059_v25 = vor.u32 %v17799_v6, %v15056_v7  ;;  %7099 = vmatpush.bf16.msrb.mxu1 %v14803_v29  ;;  %v12406_v6 = vld [vmem:[#allocation4 + $0x7d0] sm:$0xf] }
 0x3b4   :  { %v15312_v11 = vld [vmem:[#allocation4 + $0x1ea8] sm:$0xf0]  ;;  %v17140_v7 = vld [vmem:[#allocation4 + $0x7ec] sm:$0xf0] }
 0x3b5   :  { %v17663_v22 = vld [vmem:[#allocation4 + $0x184c] sm:$0xf]  ;;  %v15315_v5 = vor.u32 %v17863_v10, %v15312_v11  ;;  %7112 = vmatpush.bf16.msrb.mxu2 %v15059_v25  ;;  %v11895_v10 = vor.u32 %v17012_v59, %v11894_v0  ;;  %v12151_v11 = vor.u32 %v17076_v62, %v12150_v61  ;;  %v12407_v29 = vor.u32 %v17140_v7, %v12406_v6  ;;  %v17004_v25 = vld [vmem:[#allocation4 + $0x3ac] sm:$0xf0] }
 0x3b6   :  { %v14512_v50 = vld [vmem:[#allocation4 + $0x1868] sm:$0xf0]  ;;  %v16988_v57 = vld [vmem:[#allocation4 + $0x32c] sm:$0xf0] }
 0x3b7   :  { %v17727_v60 = vld [vmem:[#allocation4 + $0x1a4c] sm:$0xf]  ;;  %v14515_v42 = vor.u32 %v17663_v22, %v14512_v50  ;;  %7125 = vmatpush.bf16.msrb.mxu3 %v15315_v5  ;;  %v12118_v22 = vld [vmem:[#allocation4 + $0x590] sm:$0xf]  ;;  %v11799_v6 = vor.u32 %v16988_v57, %v11798_v55 }
 0x3b8   :  { %v14768_v31 = vld [vmem:[#allocation4 + $0x1a68] sm:$0xf0]  ;;  %v17068_v50 = vld [vmem:[#allocation4 + $0x5ac] sm:$0xf0] }
 0x3b9   :  { %v17791_v32 = vld [vmem:[#allocation4 + $0x1c4c] sm:$0xf]  ;;  %v14771_v45 = vor.u32 %v17727_v60, %v14768_v31  ;;  %7087 = vmatpush.bf16.msrb.mxu0 %v14515_v42  ;;  %v12374_v60 = vld [vmem:[#allocation4 + $0x790] sm:$0xf]  ;;  %v11607_v31 = vor.u32 %v16940_v14, %v11606_v12 }
 0x3ba   :  { %v15024_v33 = vld [vmem:[#allocation4 + $0x1c68] sm:$0xf0]  ;;  %v17132_v5 = vld [vmem:[#allocation4 + $0x7ac] sm:$0xf0] }
 0x3bb   :  { %v17855_v35 = vld [vmem:[#allocation4 + $0x1e4c] sm:$0xf]  ;;  %v15027_v46 = vor.u32 %v17791_v32, %v15024_v33  ;;  %7100 = vmatpush.bf16.msrb.mxu1 %v14771_v45  ;;  %v11863_v32 = vor.u32 %v17004_v25, %v11862_v15  ;;  %v12119_v33 = vor.u32 %v17068_v50, %v12118_v22  ;;  %v11830_v42 = vld [vmem:[#allocation4 + $0x350] sm:$0xf] }
 0x3bc   :  { %v15280_v39 = vld [vmem:[#allocation4 + $0x1e68] sm:$0xf0]  ;;  %v12086_v45 = vld [vmem:[#allocation4 + $0x550] sm:$0xf] }
 0x3bd   :  { %v17655_v43 = vld [vmem:[#allocation4 + $0x180c] sm:$0xf]  ;;  %v15283_v51 = vor.u32 %v17855_v35, %v15280_v39  ;;  %7113 = vmatpush.bf16.msrb.mxu2 %v15027_v46  ;;  %v11574_v35 = vld [vmem:[#allocation4 + $0x150] sm:$0xf] }
 0x3be   :  { %v14480_v36 = vld [vmem:[#allocation4 + $0x1828] sm:$0xf0]  ;;  %v16932_v39 = vld [vmem:[#allocation4 + $0x16c] sm:$0xf0] }
 0x3bf   :  { %v17719_v2 = vld [vmem:[#allocation4 + $0x1a0c] sm:$0xf]  ;;  %v14483_v28 = vor.u32 %v17655_v43, %v14480_v36  ;;  %7126 = vmatpush.bf16.msrb.mxu3 %v15283_v51  ;;  %v12375_v43 = vor.u32 %v17132_v5, %v12374_v60  ;;  %v16996_v36 = vld [vmem:[#allocation4 + $0x36c] sm:$0xf0] }
 0x3c0   :  { %v14736_v48 = vld [vmem:[#allocation4 + $0x1a28] sm:$0xf0]  ;;  %v17060_v46 = vld [vmem:[#allocation4 + $0x56c] sm:$0xf0]  ;;  %v11831_v51 = vor.u32 %v16996_v36, %v11830_v42 }
 0x3c1   :  { %v17783_v53 = vld [vmem:[#allocation4 + $0x1c0c] sm:$0xf]  ;;  %v14739_v4 = vor.u32 %v17719_v2, %v14736_v48  ;;  %7088 = vmatpush.bf16.msrb.mxu0 %v14483_v28  ;;  %v12342_v2 = vld [vmem:[#allocation4 + $0x750] sm:$0xf]  ;;  %v6882_v28 = vpop.f32.mrf.mxu0 }
 0x3c2   :  { %v14992_v49 = vld [vmem:[#allocation4 + $0x1c28] sm:$0xf0]  ;;  %v17124_v48 = vld [vmem:[#allocation4 + $0x76c] sm:$0xf0]  ;;  %v6883_v62 = vadd.f32 %v6882_v28, %v18732_v18 }
 0x3c3   :  { %v17847_v52 = vld [vmem:[#allocation4 + $0x1e0c] sm:$0xf]  ;;  %v14995_v58 = vor.u32 %v17783_v53, %v14992_v49  ;;  %7101 = vmatpush.bf16.msrb.mxu1 %v14739_v4  ;;  %v11575_v53 = vor.u32 %v16932_v39, %v11574_v35  ;;  %v12087_v49 = vor.u32 %v17060_v46, %v12086_v45  ;;  %v12343_v56 = vor.u32 %v17124_v48, %v12342_v2  ;;  %v12054_v0 = vld [vmem:[#allocation4 + $0x510] sm:$0xf]  ;;  %v6908_v35 = vpop.f32.mrf.mxu2  ;;  %v6921_v45 = vpop.f32.mrf.mxu3 }
 0x3c4   :  { %v15248_v54 = vld [vmem:[#allocation4 + $0x1e28] sm:$0xf0]  ;;  %7089 = vmatmul.bf16.vlgmr.msrb.gmra.mxu0 %v18582_v13  ;;  %v17052_v44 = vld [vmem:[#allocation4 + $0x52c] sm:$0xf0] }
 0x3c5   :  { %v15251_v8 = vor.u32 %v17847_v52, %v15248_v54  ;;  %7114 = vmatpush.bf16.msrb.mxu2 %v14995_v58  ;;  %7133 = vmatpush.bf16.msra.mxu0 %v11639_v1  ;;  %v11542_v52 = vld [vmem:[#allocation4 + $0x110] sm:$0xf]  ;;  %v6895_v58 = vpop.f32.mrf.mxu1  ;;  %v12055_v7 = vor.u32 %v17052_v44, %v12054_v0 }
 0x3c6   :  { %7102 = vmatmul.bf16.vlgmr.msrb.gmra.mxu1 %v18586_v21  ;;  %v16924_v54 = vld [vmem:[#allocation4 + $0x12c] sm:$0xf0]  ;;  %v6896_v12 = vadd.f32 %v6895_v58, %v6883_v62 }
 0x3c7   :  { %7127 = vmatpush.bf16.msrb.mxu3 %v15251_v8  ;;  %7146 = vmatpush.bf16.msra.mxu1 %v11895_v10  ;;  %v12310_v59 = vld [vmem:[#allocation4 + $0x710] sm:$0xf]  ;;  %v11543_v4 = vor.u32 %v16924_v54, %v11542_v52 }
 0x3c8   :  { %7115 = vmatmul.bf16.vlgmr.msrb.gmra.mxu2 %v18584_v20  ;;  %v17116_v61 = vld [vmem:[#allocation4 + $0x72c] sm:$0xf0]  ;;  %v6909_v36 = vadd.f32 %v6908_v35, %v6896_v12 }
 0x3c9   :  { %7159 = vmatpush.bf16.msra.mxu2 %v12151_v11  ;;  %7134 = vmatpush.bf16.msra.mxu0 %v11607_v31  ;;  %v11510_v8 = vld [vmem:[#allocation4 + $0xd0] sm:$0xf]  ;;  %v12311_v11 = vor.u32 %v17116_v61, %v12310_v59  ;;  %v6884_v48 = vpop.f32.mrf.mxu0 }
 0x3ca   :  { %7128 = vmatmul.bf16.vlgmr.msrb.gmra.mxu3 %v18588_v26  ;;  %v16916_v1 = vld [vmem:[#allocation4 + $0xec] sm:$0xf0] }
 0x3cb   :  { %7172 = vmatpush.bf16.msra.mxu3 %v12407_v29  ;;  %7147 = vmatpush.bf16.msra.mxu1 %v11863_v32  ;;  %v11766_v10 = vld [vmem:[#allocation4 + $0x2d0] sm:$0xf]  ;;  %v11511_v50 = vor.u32 %v16916_v1, %v11510_v8 }
 0x3cc   :  { %v16980_v14 = vld [vmem:[#allocation4 + $0x2ec] sm:$0xf0] }
 0x3cd   :  { %7160 = vmatpush.bf16.msra.mxu2 %v12119_v33  ;;  %7135 = vmatpush.bf16.msra.mxu0 %v11575_v53  ;;  %v12022_v15 = vld [vmem:[#allocation4 + $0x4d0] sm:$0xf]  ;;  %v11767_v18 = vor.u32 %v16980_v14, %v11766_v10 }
 0x3ce   :  { %v17044_v29 = vld [vmem:[#allocation4 + $0x4ec] sm:$0xf0] }
 0x3cf   :  { %7173 = vmatpush.bf16.msra.mxu3 %v12375_v43  ;;  %7148 = vmatpush.bf16.msra.mxu1 %v11831_v51  ;;  %v12278_v25 = vld [vmem:[#allocation4 + $0x6d0] sm:$0xf]  ;;  %v12023_v60 = vor.u32 %v17044_v29, %v12022_v15  ;;  %v6897_v51 = vpop.f32.mrf.mxu1 }
 0x3d0   :  { %v17108_v22 = vld [vmem:[#allocation4 + $0x6ec] sm:$0xf0] }
 0x3d1   :  { %7161 = vmatpush.bf16.msra.mxu2 %v12087_v49  ;;  %7136 = vmatpush.bf16.msra.mxu0 %v11543_v4  ;;  %v11478_v5 = vld [vmem:[#allocation4 + $0x90] sm:$0xf]  ;;  %v12279_v33 = vor.u32 %v17108_v22, %v12278_v25  ;;  %v18739_v49 = vadd.f32 %v6921_v45, %v6909_v36  ;;  %v6910_v25 = vpop.f32.mrf.mxu2 }
 0x3d2   :  { %v16908_v31 = vld [vmem:[#allocation4 + $0xac] sm:$0xf0] }
 0x3d3   :  { %7174 = vmatpush.bf16.msra.mxu3 %v12343_v56  ;;  %7149 = vmatpush.bf16.msra.mxu1 %v11799_v6  ;;  %v11734_v32 = vld [vmem:[#allocation4 + $0x290] sm:$0xf]  ;;  %v11479_v53 = vor.u32 %v16908_v31, %v11478_v5 }
 0x3d4   :  { %v16972_v39 = vld [vmem:[#allocation4 + $0x2ac] sm:$0xf0] }
 0x3d5   :  { %7162 = vmatpush.bf16.msra.mxu2 %v12055_v7  ;;  %v11990_v42 = vld [vmem:[#allocation4 + $0x490] sm:$0xf]  ;;  %7137 = vmatpush.bf16.msra.mxu0 %v11511_v50  ;;  %v11735_v52 = vor.u32 %v16972_v39, %v11734_v32 }
 0x3d6   :  { %v17036_v43 = vld [vmem:[#allocation4 + $0x4ac] sm:$0xf0] }
 0x3d7   :  { %7175 = vmatpush.bf16.msra.mxu3 %v12311_v11  ;;  %v12246_v46 = vld [vmem:[#allocation4 + $0x690] sm:$0xf]  ;;  %7150 = vmatpush.bf16.msra.mxu1 %v11767_v18  ;;  %v11991_v54 = vor.u32 %v17036_v43, %v11990_v42 }
 0x3d8   :  { %v17100_v2 = vld [vmem:[#allocation4 + $0x6ac] sm:$0xf0] }
 0x3d9   :  { %7163 = vmatpush.bf16.msra.mxu2 %v12023_v60  ;;  %v11446_v55 = vld [vmem:[#allocation4 + $0x50] sm:$0xf]  ;;  %v12247_v0 = vor.u32 %v17100_v2, %v12246_v46  ;;  %7138 = vmatpush.bf16.msra.mxu0 %v11479_v53  ;;  %v6923_v60 = vpop.f32.mrf.mxu3 }
 0x3da   :  { %v16900_v56 = vld [vmem:[#allocation4 + $0x6c] sm:$0xf0] }
 0x3db   :  { %v11702_v57 = vld [vmem:[#allocation4 + $0x250] sm:$0xf]  ;;  %7176 = vmatpush.bf16.msra.mxu3 %v12279_v33  ;;  %v11447_v4 = vor.u32 %v16900_v56, %v11446_v55  ;;  %7151 = vmatpush.bf16.msra.mxu1 %v11735_v52 }
 0x3dc   :  { %v16964_v44 = vld [vmem:[#allocation4 + $0x26c] sm:$0xf0] }
 0x3dd   :  { %v11958_v28 = vld [vmem:[#allocation4 + $0x450] sm:$0xf]  ;;  %7164 = vmatpush.bf16.msra.mxu2 %v11991_v54  ;;  %v11703_v7 = vor.u32 %v16964_v44, %v11702_v57  ;;  %7139 = vmatpush.bf16.msra.mxu0 %v11447_v4 }
 0x3de   :  { %v17028_v59 = vld [vmem:[#allocation4 + $0x46c] sm:$0xf0] }
 0x3df   :  { %v12214_v61 = vld [vmem:[#allocation4 + $0x650] sm:$0xf]  ;;  %v11959_v8 = vor.u32 %v17028_v59, %v11958_v28  ;;  %7177 = vmatpush.bf16.msra.mxu3 %v12247_v0  ;;  %7152 = vmatpush.bf16.msra.mxu1 %v11703_v7 }
 0x3e0   :  { %v17092_v62 = vld [vmem:[#allocation4 + $0x66c] sm:$0xf0] }
 0x3e1   :  { %v11414_v58 = vld [vmem:[#allocation4 + $0x10] sm:$0xf]  ;;  %v12215_v12 = vor.u32 %v17092_v62, %v12214_v61  ;;  %7165 = vmatpush.bf16.msra.mxu2 %v11959_v8 }
 0x3e2   :  { %v16892_v6 = vld [vmem:[#allocation4 + $0x2c] sm:$0xf0] }
 0x3e3   :  { %v11670_v1 = vld [vmem:[#allocation4 + $0x210] sm:$0xf]  ;;  %v11415_v5 = vor.u32 %v16892_v6, %v11414_v58  ;;  %7178 = vmatpush.bf16.msra.mxu3 %v12215_v12 }
 0x3e4   :  { %v16956_v10 = vld [vmem:[#allocation4 + $0x22c] sm:$0xf0] }
 0x3e5   :  { %v11926_v11 = vld [vmem:[#allocation4 + $0x410] sm:$0xf]  ;;  %v11671_v35 = vor.u32 %v16956_v10, %v11670_v1  ;;  %7140 = vmatpush.bf16.msra.mxu0 %v11415_v5 }
 0x3e6   :  { %v17020_v14 = vld [vmem:[#allocation4 + $0x42c] sm:$0xf0] }
 0x3e7   :  { %v12182_v15 = vld [vmem:[#allocation4 + $0x610] sm:$0xf]  ;;  %v11927_v39 = vor.u32 %v17020_v14, %v11926_v11  ;;  %7153 = vmatpush.bf16.msra.mxu1 %v11671_v35 }
 0x3e8   :  { %v17084_v29 = vld [vmem:[#allocation4 + $0x62c] sm:$0xf0]  ;;  %7141 = vmatmul.bf16.vlgmr.msra.gmra.mxu0 %v18549_v9 }
 0x3e9   :  { %v12662_v22 = vld [vmem:[#allocation4 + $0x9d0] sm:$0xf]  ;;  %v12183_v36 = vor.u32 %v17084_v29, %v12182_v15  ;;  %7166 = vmatpush.bf16.msra.mxu2 %v11927_v39 }
 0x3ea   :  { %v17204_v50 = vld [vmem:[#allocation4 + $0x9ec] sm:$0xf0]  ;;  %7154 = vmatmul.bf16.vlgmr.msra.gmra.mxu1 %v18553_v17 }
 0x3eb   :  { %v12918_v18 = vld [vmem:[#allocation4 + $0xbd0] sm:$0xf]  ;;  %v12663_v45 = vor.u32 %v17204_v50, %v12662_v22  ;;  %7179 = vmatpush.bf16.msra.mxu3 %v12183_v36 }
 0x3ec   :  { %v17268_v31 = vld [vmem:[#allocation4 + $0xbec] sm:$0xf0]  ;;  %7167 = vmatmul.bf16.vlgmr.msra.gmra.mxu2 %v18546_v63 }
 0x3ed   :  { %v13174_v32 = vld [vmem:[#allocation4 + $0xdd0] sm:$0xf]  ;;  %v12919_v46 = vor.u32 %v17268_v31, %v12918_v18  ;;  %7185 = vmatpush.bf16.msrb.mxu0 %v12663_v45  ;;  %v6947_v45 = vpop.f32.mrf.mxu1 }
 0x3ee   :  { %v17332_v33 = vld [vmem:[#allocation4 + $0xdec] sm:$0xf0]  ;;  %7180 = vmatmul.bf16.vlgmr.msra.gmra.mxu3 %v18551_v16 }
 0x3ef   :  { %v13430_v42 = vld [vmem:[#allocation4 + $0xfd0] sm:$0xf]  ;;  %v13175_v2 = vor.u32 %v17332_v33, %v13174_v32  ;;  %7198 = vmatpush.bf16.msrb.mxu1 %v12919_v46  ;;  %v6934_v33 = vpop.f32.mrf.mxu0 }
 0x3f0   :  { %v17396_v43 = vld [vmem:[#allocation4 + $0xfec] sm:$0xf0] }
 0x3f1   :  { %v12630_v48 = vld [vmem:[#allocation4 + $0x990] sm:$0xf]  ;;  %v13431_v52 = vor.u32 %v17396_v43, %v13430_v42  ;;  %7211 = vmatpush.bf16.msrb.mxu2 %v13175_v2 }
 0x3f2   :  { %v17196_v53 = vld [vmem:[#allocation4 + $0x9ac] sm:$0xf0] }
 0x3f3   :  { %v12886_v51 = vld [vmem:[#allocation4 + $0xb90] sm:$0xf]  ;;  %v12631_v44 = vor.u32 %v17196_v53, %v12630_v48  ;;  %7224 = vmatpush.bf16.msrb.mxu3 %v13431_v52 }
 0x3f4   :  { %v17260_v54 = vld [vmem:[#allocation4 + $0xbac] sm:$0xf0] }
 0x3f5   :  { %v13142_v55 = vld [vmem:[#allocation4 + $0xd90] sm:$0xf]  ;;  %v12887_v28 = vor.u32 %v17260_v54, %v12886_v51  ;;  %7186 = vmatpush.bf16.msrb.mxu0 %v12631_v44  ;;  %v6948_v51 = vadd.f32 %v6947_v45, %v6934_v33 }
 0x3f6   :  { %v17324_v56 = vld [vmem:[#allocation4 + $0xdac] sm:$0xf0] }
 0x3f7   :  { %v13398_v57 = vld [vmem:[#allocation4 + $0xf90] sm:$0xf]  ;;  %v13143_v59 = vor.u32 %v17324_v56, %v13142_v55  ;;  %7199 = vmatpush.bf16.msrb.mxu1 %v12887_v28 }
 0x3f8   :  { %v17388_v0 = vld [vmem:[#allocation4 + $0xfac] sm:$0xf0] }
 0x3f9   :  { %v12598_v61 = vld [vmem:[#allocation4 + $0x950] sm:$0xf]  ;;  %v13399_v58 = vor.u32 %v17388_v0, %v13398_v57  ;;  %7212 = vmatpush.bf16.msrb.mxu2 %v13143_v59  ;;  %v6960_v59 = vpop.f32.mrf.mxu2 }
 0x3fa   :  { %v17188_v62 = vld [vmem:[#allocation4 + $0x96c] sm:$0xf0] }
 0x3fb   :  { %v12854_v4 = vld [vmem:[#allocation4 + $0xb50] sm:$0xf]  ;;  %v12599_v11 = vor.u32 %v17188_v62, %v12598_v61  ;;  %7225 = vmatpush.bf16.msrb.mxu3 %v13399_v58 }
 0x3fc   :  { %v17252_v6 = vld [vmem:[#allocation4 + $0xb6c] sm:$0xf0] }
 0x3fd   :  { %v13110_v7 = vld [vmem:[#allocation4 + $0xd50] sm:$0xf]  ;;  %v12855_v12 = vor.u32 %v17252_v6, %v12854_v4  ;;  %7187 = vmatpush.bf16.msrb.mxu0 %v12599_v11  ;;  %v6961_v6 = vadd.f32 %v6960_v59, %v6948_v51 }
 0x3fe   :  { %v17316_v8 = vld [vmem:[#allocation4 + $0xd6c] sm:$0xf0] }
 0x3ff   :  { %v13366_v1 = vld [vmem:[#allocation4 + $0xf50] sm:$0xf]  ;;  %v13111_v14 = vor.u32 %v17316_v8, %v13110_v7  ;;  %7200 = vmatpush.bf16.msrb.mxu1 %v12855_v12  ;;  %v6973_v7 = vpop.f32.mrf.mxu3  ;;  %v6936_v12 = vpop.f32.mrf.mxu0 }
 0x400   :  { %v17380_v10 = vld [vmem:[#allocation4 + $0xf6c] sm:$0xf0]  ;;  %v18745_v11 = vadd.f32 %v6973_v7, %v6961_v6 }
 0x401   :  { %v12566_v15 = vld [vmem:[#allocation4 + $0x910] sm:$0xf]  ;;  %v13367_v22 = vor.u32 %v17380_v10, %v13366_v1  ;;  %7213 = vmatpush.bf16.msrb.mxu2 %v13111_v14 }
 0x402   :  { %v17180_v29 = vld [vmem:[#allocation4 + $0x92c] sm:$0xf0] }
 0x403   :  { %v12822_v25 = vld [vmem:[#allocation4 + $0xb10] sm:$0xf]  ;;  %v12567_v32 = vor.u32 %v17180_v29, %v12566_v15  ;;  %7226 = vmatpush.bf16.msrb.mxu3 %v13367_v22 }
 0x404   :  { %v17244_v50 = vld [vmem:[#allocation4 + $0xb2c] sm:$0xf0] }
 0x405   :  { %v13078_v18 = vld [vmem:[#allocation4 + $0xd10] sm:$0xf]  ;;  %v12823_v35 = vor.u32 %v17244_v50, %v12822_v25  ;;  %7188 = vmatpush.bf16.msrb.mxu0 %v12567_v32  ;;  %v6949_v50 = vpop.f32.mrf.mxu1 }
 0x406   :  { %v17308_v60 = vld [vmem:[#allocation4 + $0xd2c] sm:$0xf0] }
 0x407   :  { %v13334_v5 = vld [vmem:[#allocation4 + $0xf10] sm:$0xf]  ;;  %v13079_v39 = vor.u32 %v17308_v60, %v13078_v18  ;;  %7201 = vmatpush.bf16.msrb.mxu1 %v12823_v35 }
 0x408   :  { %v17372_v31 = vld [vmem:[#allocation4 + $0xf2c] sm:$0xf0] }
 0x409   :  { %v12534_v42 = vld [vmem:[#allocation4 + $0x8d0] sm:$0xf]  ;;  %v13335_v46 = vor.u32 %v17372_v31, %v13334_v5  ;;  %7214 = vmatpush.bf16.msrb.mxu2 %v13079_v39 }
 0x40a   :  { %v17172_v43 = vld [vmem:[#allocation4 + $0x8ec] sm:$0xf0] }
 0x40b   :  { %v12790_v36 = vld [vmem:[#allocation4 + $0xad0] sm:$0xf]  ;;  %v12535_v55 = vor.u32 %v17172_v43, %v12534_v42  ;;  %7227 = vmatpush.bf16.msrb.mxu3 %v13335_v46 }
 0x40c   :  { %v17236_v2 = vld [vmem:[#allocation4 + $0xaec] sm:$0xf0] }
 0x40d   :  { %v13046_v48 = vld [vmem:[#allocation4 + $0xcd0] sm:$0xf]  ;;  %v12791_v56 = vor.u32 %v17236_v2, %v12790_v36  ;;  %7189 = vmatpush.bf16.msrb.mxu0 %v12535_v55  ;;  %v6975_v55 = vpop.f32.mrf.mxu3 }
 0x40e   :  { %v17300_v53 = vld [vmem:[#allocation4 + $0xcec] sm:$0xf0] }
 0x40f   :  { %v13302_v52 = vld [vmem:[#allocation4 + $0xed0] sm:$0xf]  ;;  %v13047_v57 = vor.u32 %v17300_v53, %v13046_v48  ;;  %7202 = vmatpush.bf16.msrb.mxu1 %v12791_v56  ;;  %v6962_v48 = vpop.f32.mrf.mxu2 }
 0x410   :  { %v17364_v54 = vld [vmem:[#allocation4 + $0xeec] sm:$0xf0] }
 0x411   :  { %v12502_v0 = vld [vmem:[#allocation4 + $0x890] sm:$0xf]  ;;  %v13303_v61 = vor.u32 %v17364_v54, %v13302_v52  ;;  %7215 = vmatpush.bf16.msrb.mxu2 %v13047_v57 }
 0x412   :  { %v17164_v44 = vld [vmem:[#allocation4 + $0x8ac] sm:$0xf0] }
 0x413   :  { %v12758_v28 = vld [vmem:[#allocation4 + $0xa90] sm:$0xf]  ;;  %v12503_v10 = vor.u32 %v17164_v44, %v12502_v0  ;;  %7228 = vmatpush.bf16.msrb.mxu3 %v13303_v61 }
 0x414   :  { %v17228_v62 = vld [vmem:[#allocation4 + $0xaac] sm:$0xf0] }
 0x415   :  { %v13014_v4 = vld [vmem:[#allocation4 + $0xc90] sm:$0xf]  ;;  %v12759_v14 = vor.u32 %v17228_v62, %v12758_v28  ;;  %7190 = vmatpush.bf16.msrb.mxu0 %v12503_v10 }
 0x416   :  { %v17292_v58 = vld [vmem:[#allocation4 + $0xcac] sm:$0xf0] }
 0x417   :  { %v13270_v8 = vld [vmem:[#allocation4 + $0xe90] sm:$0xf]  ;;  %v13015_v15 = vor.u32 %v17292_v58, %v13014_v4  ;;  %7203 = vmatpush.bf16.msrb.mxu1 %v12759_v14 }
 0x418   :  { %v17356_v1 = vld [vmem:[#allocation4 + $0xeac] sm:$0xf0] }
 0x419   :  { %v12470_v29 = vld [vmem:[#allocation4 + $0x850] sm:$0xf]  ;;  %v13271_v18 = vor.u32 %v17356_v1, %v13270_v8  ;;  %7216 = vmatpush.bf16.msrb.mxu2 %v13015_v15 }
 0x41a   :  { %v17156_v25 = vld [vmem:[#allocation4 + $0x86c] sm:$0xf0] }
 0x41b   :  { %v12726_v22 = vld [vmem:[#allocation4 + $0xa50] sm:$0xf]  ;;  %v12471_v35 = vor.u32 %v17156_v25, %v12470_v29  ;;  %7229 = vmatpush.bf16.msrb.mxu3 %v13271_v18 }
 0x41c   :  { %v17220_v60 = vld [vmem:[#allocation4 + $0xa6c] sm:$0xf0] }
 0x41d   :  { %v12982_v5 = vld [vmem:[#allocation4 + $0xc50] sm:$0xf]  ;;  %v12727_v43 = vor.u32 %v17220_v60, %v12726_v22  ;;  %7191 = vmatpush.bf16.msrb.mxu0 %v12471_v35 }
 0x41e   :  { %v17284_v31 = vld [vmem:[#allocation4 + $0xc6c] sm:$0xf0] }
 0x41f   :  { %v13238_v32 = vld [vmem:[#allocation4 + $0xe50] sm:$0xf]  ;;  %v12983_v36 = vor.u32 %v17284_v31, %v12982_v5  ;;  %7204 = vmatpush.bf16.msrb.mxu1 %v12727_v43 }
 0x420   :  { %v17348_v33 = vld [vmem:[#allocation4 + $0xe6c] sm:$0xf0] }
 0x421   :  { %v12438_v39 = vld [vmem:[#allocation4 + $0x810] sm:$0xf]  ;;  %v13239_v53 = vor.u32 %v17348_v33, %v13238_v32  ;;  %7217 = vmatpush.bf16.msrb.mxu2 %v12983_v36 }
 0x422   :  { %v17148_v42 = vld [vmem:[#allocation4 + $0x82c] sm:$0xf0] }
 0x423   :  { %v12694_v45 = vld [vmem:[#allocation4 + $0xa10] sm:$0xf]  ;;  %v12439_v44 = vor.u32 %v17148_v42, %v12438_v39  ;;  %7230 = vmatpush.bf16.msrb.mxu3 %v13239_v53 }
 0x424   :  { %v17212_v46 = vld [vmem:[#allocation4 + $0xa2c] sm:$0xf0] }
 0x425   :  { %v12950_v2 = vld [vmem:[#allocation4 + $0xc10] sm:$0xf]  ;;  %v12695_v62 = vor.u32 %v17212_v46, %v12694_v45  ;;  %7192 = vmatpush.bf16.msrb.mxu0 %v12439_v44 }
 0x426   :  { %v17276_v51 = vld [vmem:[#allocation4 + $0xc2c] sm:$0xf0] }
 0x427   :  { %v13206_v52 = vld [vmem:[#allocation4 + $0xe10] sm:$0xf]  ;;  %v12951_v4 = vor.u32 %v17276_v51, %v12950_v2  ;;  %7205 = vmatpush.bf16.msrb.mxu1 %v12695_v62  ;;  %v6986_v62 = vpop.f32.mrf.mxu0 }
 0x428   :  { %v17340_v54 = vld [vmem:[#allocation4 + $0xe2c] sm:$0xf0]  ;;  %7193 = vmatmul.bf16.vlgmr.msrb.gmra.mxu0 %v18560_v37 }
 0x429   :  { %v13686_v56 = vld [vmem:[#allocation4 + $0x11d0] sm:$0xf]  ;;  %v13207_v7 = vor.u32 %v17340_v54, %v13206_v52  ;;  %7218 = vmatpush.bf16.msrb.mxu2 %v12951_v4 }
 0x42a   :  { %v17460_v57 = vld [vmem:[#allocation4 + $0x11ec] sm:$0xf0]  ;;  %7206 = vmatmul.bf16.vlgmr.msrb.gmra.mxu1 %v18564_v40 }
 0x42b   :  { %v13942_v0 = vld [vmem:[#allocation4 + $0x13d0] sm:$0xf]  ;;  %v13687_v8 = vor.u32 %v17460_v57, %v13686_v56  ;;  %7231 = vmatpush.bf16.msrb.mxu3 %v13207_v7 }
 0x42c   :  { %v17524_v28 = vld [vmem:[#allocation4 + $0x13ec] sm:$0xf0]  ;;  %7219 = vmatmul.bf16.vlgmr.msrb.gmra.mxu2 %v18558_v34 }
 0x42d   :  { %v14198_v59 = vld [vmem:[#allocation4 + $0x15d0] sm:$0xf]  ;;  %v13943_v1 = vor.u32 %v17524_v28, %v13942_v0  ;;  %7237 = vmatpush.bf16.msra.mxu0 %v13687_v8 }
 0x42e   :  { %v17588_v61 = vld [vmem:[#allocation4 + $0x15ec] sm:$0xf0]  ;;  %7232 = vmatmul.bf16.vlgmr.msrb.gmra.mxu3 %v18562_v38 }
 0x42f   :  { %v14454_v58 = vld [vmem:[#allocation4 + $0x17d0] sm:$0xf]  ;;  %v14199_v10 = vor.u32 %v17588_v61, %v14198_v59  ;;  %7250 = vmatpush.bf16.msra.mxu1 %v13943_v1  ;;  %v6987_v1 = vadd.f32 %v6986_v62, %v18745_v11 }
 0x430   :  { %v17652_v6 = vld [vmem:[#allocation4 + $0x17ec] sm:$0xf0] }
 0x431   :  { %v13654_v12 = vld [vmem:[#allocation4 + $0x1190] sm:$0xf]  ;;  %v14455_v29 = vor.u32 %v17652_v6, %v14454_v58  ;;  %7263 = vmatpush.bf16.msra.mxu2 %v14199_v10  ;;  %v6999_v10 = vpop.f32.mrf.mxu1 }
 0x432   :  { %v17452_v14 = vld [vmem:[#allocation4 + $0x11ac] sm:$0xf0] }
 0x433   :  { %v13910_v15 = vld [vmem:[#allocation4 + $0x1390] sm:$0xf]  ;;  %v13655_v5 = vor.u32 %v17452_v14, %v13654_v12  ;;  %7276 = vmatpush.bf16.msra.mxu3 %v14455_v29 }
 0x434   :  { %v17516_v25 = vld [vmem:[#allocation4 + $0x13ac] sm:$0xf0] }
 0x435   :  { %v14166_v22 = vld [vmem:[#allocation4 + $0x1590] sm:$0xf]  ;;  %v13911_v31 = vor.u32 %v17516_v25, %v13910_v15  ;;  %7238 = vmatpush.bf16.msra.mxu0 %v13655_v5 }
 0x436   :  { %v17580_v50 = vld [vmem:[#allocation4 + $0x15ac] sm:$0xf0] }
 0x437   :  { %v14422_v18 = vld [vmem:[#allocation4 + $0x1790] sm:$0xf]  ;;  %v14167_v32 = vor.u32 %v17580_v50, %v14166_v22  ;;  %7251 = vmatpush.bf16.msra.mxu1 %v13911_v31  ;;  %v7000_v50 = vadd.f32 %v6999_v10, %v6987_v1 }
 0x438   :  { %v17644_v60 = vld [vmem:[#allocation4 + $0x17ac] sm:$0xf0] }
 0x439   :  { %v13622_v33 = vld [vmem:[#allocation4 + $0x1150] sm:$0xf]  ;;  %v14423_v42 = vor.u32 %v17644_v60, %v14422_v18  ;;  %7264 = vmatpush.bf16.msra.mxu2 %v14167_v32 }
 0x43a   :  { %v17444_v35 = vld [vmem:[#allocation4 + $0x116c] sm:$0xf0] }
 0x43b   :  { %v13878_v39 = vld [vmem:[#allocation4 + $0x1350] sm:$0xf]  ;;  %v13623_v48 = vor.u32 %v17444_v35, %v13622_v33  ;;  %7277 = vmatpush.bf16.msra.mxu3 %v14423_v42  ;;  %v7012_v35 = vpop.f32.mrf.mxu2 }
 0x43c   :  { %v17508_v43 = vld [vmem:[#allocation4 + $0x136c] sm:$0xf0] }
 0x43d   :  { %v14134_v36 = vld [vmem:[#allocation4 + $0x1550] sm:$0xf]  ;;  %v13879_v53 = vor.u32 %v17508_v43, %v13878_v39  ;;  %7239 = vmatpush.bf16.msra.mxu0 %v13623_v48  ;;  %v7977_v48 = vrot.slane %v18739_v49, 4 }
 0x43e   :  { %v17572_v45 = vld [vmem:[#allocation4 + $0x156c] sm:$0xf0] }
 0x43f   :  { %v14390_v46 = vld [vmem:[#allocation4 + $0x1750] sm:$0xf]  ;;  %v14135_v51 = vor.u32 %v17572_v45, %v14134_v36  ;;  %7252 = vmatpush.bf16.msra.mxu1 %v13879_v53  ;;  %v7013_v36 = vadd.f32 %v7012_v35, %v7000_v50  ;;  %v7025_v45 = vpop.f32.mrf.mxu3 }
 0x440   :  { %v17636_v2 = vld [vmem:[#allocation4 + $0x176c] sm:$0xf0] }
 0x441   :  { %v13590_v52 = vld [vmem:[#allocation4 + $0x1110] sm:$0xf]  ;;  %v14391_v56 = vor.u32 %v17636_v2, %v14390_v46  ;;  %7265 = vmatpush.bf16.msra.mxu2 %v14135_v51  ;;  %v18753_v51 = vadd.f32 %v7025_v45, %v7013_v36 }
 0x442   :  { %v17436_v54 = vld [vmem:[#allocation4 + $0x112c] sm:$0xf0] }
 0x443   :  { %v13846_v55 = vld [vmem:[#allocation4 + $0x1310] sm:$0xf]  ;;  %v13591_v61 = vor.u32 %v17436_v54, %v13590_v52  ;;  %7278 = vmatpush.bf16.msra.mxu3 %v14391_v56  ;;  %v6988_v52 = vpop.f32.mrf.mxu0 }
 0x444   :  { %v17500_v57 = vld [vmem:[#allocation4 + $0x132c] sm:$0xf0] }
 0x445   :  { %v14102_v0 = vld [vmem:[#allocation4 + $0x1510] sm:$0xf]  ;;  %v13847_v4 = vor.u32 %v17500_v57, %v13846_v55  ;;  %7240 = vmatpush.bf16.msra.mxu0 %v13591_v61 }
 0x446   :  { %v17564_v44 = vld [vmem:[#allocation4 + $0x152c] sm:$0xf0] }
 0x447   :  { %v14358_v28 = vld [vmem:[#allocation4 + $0x1710] sm:$0xf]  ;;  %v14103_v58 = vor.u32 %v17564_v44, %v14102_v0  ;;  %7253 = vmatpush.bf16.msra.mxu1 %v13847_v4  ;;  %v7001_v44 = vpop.f32.mrf.mxu1 }
 0x448   :  { %v17628_v59 = vld [vmem:[#allocation4 + $0x172c] sm:$0xf0] }
 0x449   :  { %v13558_v6 = vld [vmem:[#allocation4 + $0x10d0] sm:$0xf]  ;;  %v14359_v12 = vor.u32 %v17628_v59, %v14358_v28  ;;  %7266 = vmatpush.bf16.msra.mxu2 %v14103_v58 }
 0x44a   :  { %v17428_v7 = vld [vmem:[#allocation4 + $0x10ec] sm:$0xf0] }
 0x44b   :  { %v13814_v8 = vld [vmem:[#allocation4 + $0x12d0] sm:$0xf]  ;;  %v13559_v18 = vor.u32 %v17428_v7, %v13558_v6  ;;  %7279 = vmatpush.bf16.msra.mxu3 %v14359_v12 }
 0x44c   :  { %v17492_v14 = vld [vmem:[#allocation4 + $0x12ec] sm:$0xf0] }
 0x44d   :  { %v14070_v15 = vld [vmem:[#allocation4 + $0x14d0] sm:$0xf]  ;;  %v13815_v60 = vor.u32 %v17492_v14, %v13814_v8  ;;  %7241 = vmatpush.bf16.msra.mxu0 %v13559_v18 }
 0x44e   :  { %v17556_v29 = vld [vmem:[#allocation4 + $0x14ec] sm:$0xf0] }
 0x44f   :  { %v14326_v25 = vld [vmem:[#allocation4 + $0x16d0] sm:$0xf]  ;;  %v14071_v5 = vor.u32 %v17556_v29, %v14070_v15  ;;  %7254 = vmatpush.bf16.msra.mxu1 %v13815_v60  ;;  %v7014_v29 = vpop.f32.mrf.mxu2 }
 0x450   :  { %v17620_v22 = vld [vmem:[#allocation4 + $0x16ec] sm:$0xf0] }
 0x451   :  { %v13526_v31 = vld [vmem:[#allocation4 + $0x1090] sm:$0xf]  ;;  %v14327_v11 = vor.u32 %v17620_v22, %v14326_v25  ;;  %7267 = vmatpush.bf16.msra.mxu2 %v14071_v5  ;;  %v7978_v25 = vadd.f32 %v7977_v48, %v18739_v49  ;;  %v7027_v5 = vpop.f32.mrf.mxu3 }
 0x452   :  { %v17420_v32 = vld [vmem:[#allocation4 + $0x10ac] sm:$0xf0] }
 0x453   :  { %v13782_v33 = vld [vmem:[#allocation4 + $0x1290] sm:$0xf]  ;;  %v13527_v53 = vor.u32 %v17420_v32, %v13526_v31  ;;  %7280 = vmatpush.bf16.msra.mxu3 %v14327_v11 }
 0x454   :  { %v17484_v39 = vld [vmem:[#allocation4 + $0x12ac] sm:$0xf0] }
 0x455   :  { %v14038_v42 = vld [vmem:[#allocation4 + $0x1490] sm:$0xf]  ;;  %v13783_v54 = vor.u32 %v17484_v39, %v13782_v33  ;;  %7242 = vmatpush.bf16.msra.mxu0 %v13527_v53 }
 0x456   :  { %v17548_v43 = vld [vmem:[#allocation4 + $0x14ac] sm:$0xf0] }
 0x457   :  { %v14294_v46 = vld [vmem:[#allocation4 + $0x1690] sm:$0xf]  ;;  %v14039_v55 = vor.u32 %v17548_v43, %v14038_v42  ;;  %7255 = vmatpush.bf16.msra.mxu1 %v13783_v54 }
 0x458   :  { %v17612_v2 = vld [vmem:[#allocation4 + $0x16ac] sm:$0xf0] }
 0x459   :  { %v13494_v56 = vld [vmem:[#allocation4 + $0x1050] sm:$0xf]  ;;  %v14295_v28 = vor.u32 %v17612_v2, %v14294_v46  ;;  %7268 = vmatpush.bf16.msra.mxu2 %v14039_v55  ;;  %v7979_v2 = vrot.slane %v7978_v25, 2 }
 0x45a   :  { %v17412_v57 = vld [vmem:[#allocation4 + $0x106c] sm:$0xf0] }
 0x45b   :  { %v13750_v0 = vld [vmem:[#allocation4 + $0x1250] sm:$0xf]  ;;  %v13495_v6 = vor.u32 %v17412_v57, %v13494_v56  ;;  %7281 = vmatpush.bf16.msra.mxu3 %v14295_v28 }
 0x45c   :  { %v17476_v59 = vld [vmem:[#allocation4 + $0x126c] sm:$0xf0] }
 0x45d   :  { %v14006_v61 = vld [vmem:[#allocation4 + $0x1450] sm:$0xf]  ;;  %v13751_v1 = vor.u32 %v17476_v59, %v13750_v0  ;;  %7243 = vmatpush.bf16.msra.mxu0 %v13495_v6 }
 0x45e   :  { %v17540_v62 = vld [vmem:[#allocation4 + $0x146c] sm:$0xf0] }
 0x45f   :  { %v14262_v4 = vld [vmem:[#allocation4 + $0x1650] sm:$0xf]  ;;  %v14007_v10 = vor.u32 %v17540_v62, %v14006_v61  ;;  %7256 = vmatpush.bf16.msra.mxu1 %v13751_v1 }
 0x460   :  { %v17604_v58 = vld [vmem:[#allocation4 + $0x166c] sm:$0xf0] }
 0x461   :  { %v13462_v7 = vld [vmem:[#allocation4 + $0x1010] sm:$0xf]  ;;  %v14263_v22 = vor.u32 %v17604_v58, %v14262_v4  ;;  %7269 = vmatpush.bf16.msra.mxu2 %v14007_v10  ;;  %v7980_v4 = vadd.f32 %v7979_v2, %v7978_v25 }
 0x462   :  { %v17404_v8 = vld [vmem:[#allocation4 + $0x102c] sm:$0xf0] }
 0x463   :  { %v13718_v12 = vld [vmem:[#allocation4 + $0x1210] sm:$0xf]  ;;  %v13463_v35 = vor.u32 %v17404_v8, %v13462_v7  ;;  %7282 = vmatpush.bf16.msra.mxu3 %v14263_v22 }
 0x464   :  { %v17468_v14 = vld [vmem:[#allocation4 + $0x122c] sm:$0xf0] }
 0x465   :  { %v13974_v15 = vld [vmem:[#allocation4 + $0x1410] sm:$0xf]  ;;  %v13719_v43 = vor.u32 %v17468_v14, %v13718_v12  ;;  %7244 = vmatpush.bf16.msra.mxu0 %v13463_v35 }
 0x466   :  { %v17532_v50 = vld [vmem:[#allocation4 + $0x142c] sm:$0xf0] }
 0x467   :  { %v14230_v18 = vld [vmem:[#allocation4 + $0x1610] sm:$0xf]  ;;  %v13975_v36 = vor.u32 %v17532_v50, %v13974_v15  ;;  %7257 = vmatpush.bf16.msra.mxu1 %v13719_v43  ;;  %v7981_v50 = vrot.slane %v7980_v4, 1  ;;  %v7038_v43 = vpop.f32.mrf.mxu0 }
 0x468   :  { %v17596_v60 = vld [vmem:[#allocation4 + $0x162c] sm:$0xf0]  ;;  %7245 = vmatmul.bf16.vlgmr.msra.gmra.mxu0 %v18570_v19 }
 0x469   :  { %v14710_v31 = vld [vmem:[#allocation4 + $0x19d0] sm:$0xf]  ;;  %v14231_v48 = vor.u32 %v17596_v60, %v14230_v18  ;;  %7270 = vmatpush.bf16.msra.mxu2 %v13975_v36 }
 0x46a   :  { %v17716_v32 = vld [vmem:[#allocation4 + $0x19ec] sm:$0xf0]  ;;  %7258 = vmatmul.bf16.vlgmr.msra.gmra.mxu1 %v18574_v24 }
 0x46b   :  { %v14966_v33 = vld [vmem:[#allocation4 + $0x1bd0] sm:$0xf]  ;;  %v14711_v53 = vor.u32 %v17716_v32, %v14710_v31  ;;  %7283 = vmatpush.bf16.msra.mxu3 %v14231_v48  ;;  %v7051_v48 = vpop.f32.mrf.mxu1 }
 0x46c   :  { %v17780_v11 = vld [vmem:[#allocation4 + $0x1bec] sm:$0xf0]  ;;  %7271 = vmatmul.bf16.vlgmr.msra.gmra.mxu2 %v18572_v23 }
 0x46d   :  { %v15222_v39 = vld [vmem:[#allocation4 + $0x1dd0] sm:$0xf]  ;;  %v14967_v52 = vor.u32 %v17780_v11, %v14966_v33  ;;  %7289 = vmatpush.bf16.msrb.mxu0 %v14711_v53 }
 0x46e   :  { %v17844_v42 = vld [vmem:[#allocation4 + $0x1dec] sm:$0xf0]  ;;  %7284 = vmatmul.bf16.vlgmr.msra.gmra.mxu3 %v18576_v27 }
 0x46f   :  { %v15478_v45 = vld [vmem:[#allocation4 + $0x1fd0] sm:$0xf]  ;;  %v15223_v54 = vor.u32 %v17844_v42, %v15222_v39  ;;  %7302 = vmatpush.bf16.msrb.mxu1 %v14967_v52 }
 0x470   :  { %v17908_v46 = vld [vmem:[#allocation4 + $0x1fec] sm:$0xf0] }
 0x471   :  { %v14678_v55 = vld [vmem:[#allocation4 + $0x1990] sm:$0xf]  ;;  %v15479_v0 = vor.u32 %v17908_v46, %v15478_v45  ;;  %7315 = vmatpush.bf16.msrb.mxu2 %v15223_v54  ;;  %v7039_v46 = vadd.f32 %v7038_v43, %v18753_v51 }
 0x472   :  { %v17708_v56 = vld [vmem:[#allocation4 + $0x19ac] sm:$0xf0] }
 0x473   :  { %v14934_v57 = vld [vmem:[#allocation4 + $0x1b90] sm:$0xf]  ;;  %v14679_v58 = vor.u32 %v17708_v56, %v14678_v55  ;;  %7328 = vmatpush.bf16.msrb.mxu3 %v15479_v0 }
 0x474   :  { %v17772_v44 = vld [vmem:[#allocation4 + $0x1bac] sm:$0xf0] }
 0x475   :  { %v15190_v28 = vld [vmem:[#allocation4 + $0x1d90] sm:$0xf]  ;;  %v14935_v6 = vor.u32 %v17772_v44, %v14934_v57  ;;  %7290 = vmatpush.bf16.msrb.mxu0 %v14679_v58  ;;  %v7982_v57 = vadd.f32 %v7981_v50, %v7980_v4  ;;  %v7052_v44 = vadd.f32 %v7051_v48, %v7039_v46  ;;  %v7077_v50 = vpop.f32.mrf.mxu3 }
 0x476   :  { %v17836_v59 = vld [vmem:[#allocation4 + $0x1dac] sm:$0xf0] }
 0x477   :  { %v15446_v61 = vld [vmem:[#allocation4 + $0x1f90] sm:$0xf]  ;;  %v15191_v7 = vor.u32 %v17836_v59, %v15190_v28  ;;  %7303 = vmatpush.bf16.msrb.mxu1 %v14935_v6 }
 0x478   :  { %v17900_v62 = vld [vmem:[#allocation4 + $0x1fac] sm:$0xf0] }
 0x479   :  { %v14646_v8 = vld [vmem:[#allocation4 + $0x1950] sm:$0xf]  ;;  %v15447_v12 = vor.u32 %v17900_v62, %v15446_v61  ;;  %7316 = vmatpush.bf16.msrb.mxu2 %v15191_v7 }
 0x47a   :  { %v17700_v1 = vld [vmem:[#allocation4 + $0x196c] sm:$0xf0] }
 0x47b   :  { %v14902_v10 = vld [vmem:[#allocation4 + $0x1b50] sm:$0xf]  ;;  %v14647_v18 = vor.u32 %v17700_v1, %v14646_v8  ;;  %7329 = vmatpush.bf16.msrb.mxu3 %v15447_v12  ;;  %v8022_v12 = vmul.f32 %v18652_v3, %v7982_v57 }
 0x47c   :  { %v17764_v14 = vld [vmem:[#allocation4 + $0x1b6c] sm:$0xf0] }
 0x47d   :  { %v15158_v15 = vld [vmem:[#allocation4 + $0x1d50] sm:$0xf]  ;;  %v14903_v60 = vor.u32 %v17764_v14, %v14902_v10  ;;  %7291 = vmatpush.bf16.msrb.mxu0 %v14647_v18  ;;  %v7064_v14 = vpop.f32.mrf.mxu2 }
 0x47e   :  { %v17828_v29 = vld [vmem:[#allocation4 + $0x1d6c] sm:$0xf0] }
 0x47f   :  { %v15414_v25 = vld [vmem:[#allocation4 + $0x1f50] sm:$0xf]  ;;  %v15159_v5 = vor.u32 %v17828_v29, %v15158_v15  ;;  %7304 = vmatpush.bf16.msrb.mxu1 %v14903_v60 }
 0x480   :  { %v17892_v22 = vld [vmem:[#allocation4 + $0x1f6c] sm:$0xf0] }
 0x481   :  { %v14614_v31 = vld [vmem:[#allocation4 + $0x1910] sm:$0xf]  ;;  %v15415_v35 = vor.u32 %v17892_v22, %v15414_v25  ;;  %7317 = vmatpush.bf16.msrb.mxu2 %v15159_v5  ;;  %v7065_v22 = vadd.f32 %v7064_v14, %v7052_v44  ;;  %v7040_v5 = vpop.f32.mrf.mxu0  ;;  %v17072_v14 = vld [vmem:[#allocation4 + $0x5d4] sm:$0xf] }
 0x482   :  { %v17692_v32 = vld [vmem:[#allocation4 + $0x192c] sm:$0xf0] }
 0x483   :  { %v14870_v33 = vld [vmem:[#allocation4 + $0x1b10] sm:$0xf]  ;;  %v14615_v2 = vor.u32 %v17692_v32, %v14614_v31  ;;  %7330 = vmatpush.bf16.msrb.mxu3 %v15415_v35  ;;  %v7053_v32 = vpop.f32.mrf.mxu1 }
 0x484   :  { %v17756_v11 = vld [vmem:[#allocation4 + $0x1b2c] sm:$0xf0] }
 0x485   :  { %v15126_v39 = vld [vmem:[#allocation4 + $0x1d10] sm:$0xf]  ;;  %v14871_v53 = vor.u32 %v17756_v11, %v14870_v33  ;;  %7292 = vmatpush.bf16.msrb.mxu0 %v14615_v2  ;;  %v18762_v33 = vadd.f32 %v7077_v50, %v7065_v22  ;;  %v17136_v22 = vld [vmem:[#allocation4 + $0x7d4] sm:$0xf] }
 0x486   :  { %v17820_v42 = vld [vmem:[#allocation4 + $0x1d2c] sm:$0xf0]  ;;  %v12408_v50 = vld [vmem:[#allocation4 + $0x7f0] sm:$0xf0] }
 0x487   :  { %v15382_v36 = vld [vmem:[#allocation4 + $0x1f10] sm:$0xf]  ;;  %v15127_v52 = vor.u32 %v17820_v42, %v15126_v39  ;;  %7305 = vmatpush.bf16.msrb.mxu1 %v14871_v53 }
 0x488   :  { %v17884_v45 = vld [vmem:[#allocation4 + $0x1f2c] sm:$0xf0] }
 0x489   :  { %v14582_v54 = vld [vmem:[#allocation4 + $0x18d0] sm:$0xf]  ;;  %v15383_v0 = vor.u32 %v17884_v45, %v15382_v36  ;;  %7318 = vmatpush.bf16.msrb.mxu2 %v15127_v52  ;;  %v18765_v36 = vsub.f32 %v18739_v49, %v8022_v12 }
 0x48a   :  { %v17684_v55 = vld [vmem:[#allocation4 + $0x18ec] sm:$0xf0] }
 0x48b   :  { %v14838_v56 = vld [vmem:[#allocation4 + $0x1ad0] sm:$0xf]  ;;  %v14583_v51 = vor.u32 %v17684_v55, %v14582_v54  ;;  %7331 = vmatpush.bf16.msrb.mxu3 %v15383_v0  ;;  %v8038_v49 = vmul.f32 %v18765_v36, %v18765_v36 }
 0x48c   :  { %v17748_v28 = vld [vmem:[#allocation4 + $0x1aec] sm:$0xf0] }
 0x48d   :  { %v15094_v59 = vld [vmem:[#allocation4 + $0x1cd0] sm:$0xf]  ;;  %v14839_v6 = vor.u32 %v17748_v28, %v14838_v56  ;;  %7293 = vmatpush.bf16.msrb.mxu0 %v14583_v51 }
 0x48e   :  { %v17812_v61 = vld [vmem:[#allocation4 + $0x1cec] sm:$0xf0] }
 0x48f   :  { %v15350_v62 = vld [vmem:[#allocation4 + $0x1ed0] sm:$0xf]  ;;  %v15095_v7 = vor.u32 %v17812_v61, %v15094_v59  ;;  %7306 = vmatpush.bf16.msrb.mxu1 %v14839_v6  ;;  %v7066_v6 = vpop.f32.mrf.mxu2 }
 0x490   :  { %v17876_v58 = vld [vmem:[#allocation4 + $0x1eec] sm:$0xf0] }
 0x491   :  { %v14550_v8 = vld [vmem:[#allocation4 + $0x1890] sm:$0xf]  ;;  %v15351_v4 = vor.u32 %v17876_v58, %v15350_v62  ;;  %7319 = vmatpush.bf16.msrb.mxu2 %v15095_v7  ;;  %v16944_v7 = vld [vmem:[#allocation4 + $0x1d4] sm:$0xf] }
 0x492   :  { %v17676_v1 = vld [vmem:[#allocation4 + $0x18ac] sm:$0xf0] }
 0x493   :  { %v14806_v10 = vld [vmem:[#allocation4 + $0x1a90] sm:$0xf]  ;;  %v14551_v31 = vor.u32 %v17676_v1, %v14550_v8  ;;  %7332 = vmatpush.bf16.msrb.mxu3 %v15351_v4  ;;  %v11640_v8 = vld [vmem:[#allocation4 + $0x1f0] sm:$0xf0] }
 0x494   :  { %v17740_v15 = vld [vmem:[#allocation4 + $0x1aac] sm:$0xf0]  ;;  %v17008_v1 = vld [vmem:[#allocation4 + $0x3d4] sm:$0xf]  ;;  %v11643_v5 = vor.u32 %v16944_v7, %v11640_v8 }
 0x495   :  { %v15062_v29 = vld [vmem:[#allocation4 + $0x1c90] sm:$0xf]  ;;  %v14807_v35 = vor.u32 %v17740_v15, %v14806_v10  ;;  %7294 = vmatpush.bf16.msrb.mxu0 %v14551_v31  ;;  %v7079_v10 = vpop.f32.mrf.mxu3  ;;  %v11896_v4 = vld [vmem:[#allocation4 + $0x3f0] sm:$0xf0] }
 0x496   :  { %v17804_v25 = vld [vmem:[#allocation4 + $0x1cac] sm:$0xf0]  ;;  %v12152_v15 = vld [vmem:[#allocation4 + $0x5f0] sm:$0xf0]  ;;  %v11899_v31 = vor.u32 %v17008_v1, %v11896_v4 }
 0x497   :  { %v15318_v18 = vld [vmem:[#allocation4 + $0x1e90] sm:$0xf]  ;;  %v15063_v11 = vor.u32 %v17804_v25, %v15062_v29  ;;  %7307 = vmatpush.bf16.msrb.mxu1 %v14807_v35  ;;  %v12155_v32 = vor.u32 %v17072_v14, %v12152_v15  ;;  %v16936_v35 = vld [vmem:[#allocation4 + $0x194] sm:$0xf] }
 0x498   :  { %v17868_v60 = vld [vmem:[#allocation4 + $0x1eac] sm:$0xf0]  ;;  %v16920_v8 = vld [vmem:[#allocation4 + $0x114] sm:$0xf] }
 0x499   :  { %v14518_v39 = vld [vmem:[#allocation4 + $0x1850] sm:$0xf]  ;;  %v15319_v45 = vor.u32 %v17868_v60, %v15318_v18  ;;  %7320 = vmatpush.bf16.msrb.mxu2 %v15063_v11  ;;  %v8056_v18 = vrot.slane %v8038_v49, 4  ;;  %v11608_v11 = vld [vmem:[#allocation4 + $0x1b0] sm:$0xf0] }
 0x49a   :  { %v17668_v42 = vld [vmem:[#allocation4 + $0x186c] sm:$0xf0]  ;;  %v11544_v1 = vld [vmem:[#allocation4 + $0x130] sm:$0xf0] }
 0x49b   :  { %v14774_v43 = vld [vmem:[#allocation4 + $0x1a50] sm:$0xf]  ;;  %v14519_v54 = vor.u32 %v17668_v42, %v14518_v39  ;;  %7333 = vmatpush.bf16.msrb.mxu3 %v15319_v45  ;;  %v17000_v39 = vld [vmem:[#allocation4 + $0x394] sm:$0xf]  ;;  %v12411_v42 = vor.u32 %v17136_v22, %v12408_v50 }
 0x49c   :  { %v17732_v46 = vld [vmem:[#allocation4 + $0x1a6c] sm:$0xf0]  ;;  %v17064_v45 = vld [vmem:[#allocation4 + $0x594] sm:$0xf] }
 0x49d   :  { %v15030_v2 = vld [vmem:[#allocation4 + $0x1c50] sm:$0xf]  ;;  %v14775_v57 = vor.u32 %v17732_v46, %v14774_v43  ;;  %7295 = vmatpush.bf16.msrb.mxu0 %v14519_v54  ;;  %v11864_v43 = vld [vmem:[#allocation4 + $0x3b0] sm:$0xf0] }
 0x49e   :  { %v17796_v48 = vld [vmem:[#allocation4 + $0x1c6c] sm:$0xf0]  ;;  %v12120_v46 = vld [vmem:[#allocation4 + $0x5b0] sm:$0xf0]  ;;  %v11867_v54 = vor.u32 %v17000_v39, %v11864_v43 }
 0x49f   :  { %v15286_v53 = vld [vmem:[#allocation4 + $0x1e50] sm:$0xf]  ;;  %v15031_v0 = vor.u32 %v17796_v48, %v15030_v2  ;;  %7308 = vmatpush.bf16.msrb.mxu1 %v14775_v57  ;;  %v17128_v2 = vld [vmem:[#allocation4 + $0x794] sm:$0xf] }
 0x4a0   :  { %v17860_v52 = vld [vmem:[#allocation4 + $0x1e6c] sm:$0xf0]  ;;  %v12376_v48 = vld [vmem:[#allocation4 + $0x7b0] sm:$0xf0] }
 0x4a1   :  { %v14486_v55 = vld [vmem:[#allocation4 + $0x1810] sm:$0xf]  ;;  %v15287_v61 = vor.u32 %v17860_v52, %v15286_v53  ;;  %7321 = vmatpush.bf16.msrb.mxu2 %v15031_v0  ;;  %v8057_v53 = vadd.f32 %v8056_v18, %v8038_v49  ;;  %v11611_v52 = vor.u32 %v16936_v35, %v11608_v11  ;;  %v11576_v57 = vld [vmem:[#allocation4 + $0x170] sm:$0xf0] }
 0x4a2   :  { %v17660_v56 = vld [vmem:[#allocation4 + $0x182c] sm:$0xf0]  ;;  %v16992_v0 = vld [vmem:[#allocation4 + $0x354] sm:$0xf] }
 0x4a3   :  { %v14742_v44 = vld [vmem:[#allocation4 + $0x1a10] sm:$0xf]  ;;  %v14487_v12 = vor.u32 %v17660_v56, %v14486_v55  ;;  %7334 = vmatpush.bf16.msrb.mxu3 %v15287_v61  ;;  %v12123_v55 = vor.u32 %v17064_v45, %v12120_v46  ;;  %v16928_v56 = vld [vmem:[#allocation4 + $0x154] sm:$0xf] }
 0x4a4   :  { %v17724_v28 = vld [vmem:[#allocation4 + $0x1a2c] sm:$0xf0]  ;;  %v12088_v61 = vld [vmem:[#allocation4 + $0x570] sm:$0xf0] }
 0x4a5   :  { %v14998_v59 = vld [vmem:[#allocation4 + $0x1c10] sm:$0xf]  ;;  %v14743_v29 = vor.u32 %v17724_v28, %v14742_v44  ;;  %7296 = vmatpush.bf16.msrb.mxu0 %v14487_v12  ;;  %v12379_v44 = vor.u32 %v17128_v2, %v12376_v48  ;;  %v11832_v28 = vld [vmem:[#allocation4 + $0x370] sm:$0xf0] }
 0x4a6   :  { %v17788_v62 = vld [vmem:[#allocation4 + $0x1c2c] sm:$0xf0]  ;;  %v17120_v49 = vld [vmem:[#allocation4 + $0x754] sm:$0xf]  ;;  %v11835_v6 = vor.u32 %v16992_v0, %v11832_v28  ;;  %v7116_v28 = vpop.f32.mrf.mxu2 }
 0x4a7   :  { %v15254_v58 = vld [vmem:[#allocation4 + $0x1e10] sm:$0xf]  ;;  %v14999_v25 = vor.u32 %v17788_v62, %v14998_v59  ;;  %7309 = vmatpush.bf16.msrb.mxu1 %v14743_v29  ;;  %v17056_v59 = vld [vmem:[#allocation4 + $0x554] sm:$0xf]  ;;  %v7090_v29 = vpop.f32.mrf.mxu0 }
 0x4a8   :  { %v17852_v51 = vld [vmem:[#allocation4 + $0x1e2c] sm:$0xf0]  ;;  %7297 = vmatmul.bf16.vlgmr.msrb.gmra.mxu0 %v18582_v13  ;;  %v12344_v62 = vld [vmem:[#allocation4 + $0x770] sm:$0xf0]  ;;  %v12091_v7 = vor.u32 %v17056_v59, %v12088_v61  ;;  %v7091_v18 = vadd.f32 %v7090_v29, %v18762_v33 }
 0x4a9   :  { %v15255_v60 = vor.u32 %v17852_v51, %v15254_v58  ;;  %7322 = vmatpush.bf16.msrb.mxu2 %v14999_v25  ;;  %7341 = vmatpush.bf16.msra.mxu0 %v11643_v5  ;;  %v8058_v58 = vrot.slane %v8057_v53, 2  ;;  %v11579_v51 = vor.u32 %v16928_v56, %v11576_v57  ;;  %v16984_v10 = vld [vmem:[#allocation4 + $0x314] sm:$0xf]  ;;  %v12347_v12 = vor.u32 %v17120_v49, %v12344_v62  ;;  %v7103_v5 = vpop.f32.mrf.mxu1 }
 0x4aa   :  { %7310 = vmatmul.bf16.vlgmr.msrb.gmra.mxu1 %v18586_v21  ;;  %v11800_v4 = vld [vmem:[#allocation4 + $0x330] sm:$0xf0]  ;;  %v7104_v43 = vadd.f32 %v7103_v5, %v7091_v18 }
 0x4ab   :  { %7335 = vmatpush.bf16.msrb.mxu3 %v15255_v60  ;;  %7354 = vmatpush.bf16.msra.mxu1 %v11899_v31  ;;  %v17048_v14 = vld [vmem:[#allocation4 + $0x514] sm:$0xf]  ;;  %v8059_v50 = vadd.f32 %v8058_v58, %v8057_v53  ;;  %v11547_v60 = vor.u32 %v16920_v8, %v11544_v1  ;;  %v11803_v31 = vor.u32 %v16984_v10, %v11800_v4  ;;  %v7129_v58 = vpop.f32.mrf.mxu3 }
 0x4ac   :  { %7323 = vmatmul.bf16.vlgmr.msrb.gmra.mxu2 %v18584_v20  ;;  %v12056_v15 = vld [vmem:[#allocation4 + $0x530] sm:$0xf0]  ;;  %v7117_v62 = vadd.f32 %v7116_v28, %v7104_v43 }
 0x4ad   :  { %7367 = vmatpush.bf16.msra.mxu2 %v12155_v32  ;;  %7342 = vmatpush.bf16.msra.mxu0 %v11611_v52  ;;  %v17112_v25 = vld [vmem:[#allocation4 + $0x714] sm:$0xf]  ;;  %v12059_v32 = vor.u32 %v17048_v14, %v12056_v15  ;;  %v8060_v52 = vrot.slane %v8059_v50, 1 }
 0x4ae   :  { %7336 = vmatmul.bf16.vlgmr.msrb.gmra.mxu3 %v18588_v26  ;;  %v12312_v22 = vld [vmem:[#allocation4 + $0x730] sm:$0xf0]  ;;  %v18774_v10 = vadd.f32 %v7129_v58, %v7117_v62 }
 0x4af   :  { %7380 = vmatpush.bf16.msra.mxu3 %v12411_v42  ;;  %7355 = vmatpush.bf16.msra.mxu1 %v11867_v54  ;;  %v16912_v35 = vld [vmem:[#allocation4 + $0xd4] sm:$0xf]  ;;  %v12315_v42 = vor.u32 %v17112_v25, %v12312_v22  ;;  %v8061_v25 = vadd.f32 %v8060_v52, %v8059_v50 }
 0x4b0   :  { %v11512_v11 = vld [vmem:[#allocation4 + $0xf0] sm:$0xf0] }
 0x4b1   :  { %7368 = vmatpush.bf16.msra.mxu2 %v12123_v55  ;;  %7343 = vmatpush.bf16.msra.mxu0 %v11579_v51  ;;  %v16976_v39 = vld [vmem:[#allocation4 + $0x2d4] sm:$0xf]  ;;  %v11515_v33 = vor.u32 %v16912_v35, %v11512_v11  ;;  %v7105_v1 = vpop.f32.mrf.mxu1  ;;  %v8094_v52 = vmul.f32 %v8061_v25, %v18652_v3 }
 0x4b2   :  { %v11768_v45 = vld [vmem:[#allocation4 + $0x2f0] sm:$0xf0] }
 0x4b3   :  { %7381 = vmatpush.bf16.msra.mxu3 %v12379_v44  ;;  %7356 = vmatpush.bf16.msra.mxu1 %v11835_v6  ;;  %v17040_v46 = vld [vmem:[#allocation4 + $0x4d4] sm:$0xf]  ;;  %v11771_v54 = vor.u32 %v16976_v39, %v11768_v45 }
 0x4b4   :  { %v12024_v2 = vld [vmem:[#allocation4 + $0x4f0] sm:$0xf0] }
 0x4b5   :  { %7369 = vmatpush.bf16.msra.mxu2 %v12091_v7  ;;  %v17104_v48 = vld [vmem:[#allocation4 + $0x6d4] sm:$0xf]  ;;  %7344 = vmatpush.bf16.msra.mxu0 %v11547_v60  ;;  %v12027_v55 = vor.u32 %v17040_v46, %v12024_v2  ;;  %v7092_v7 = vpop.f32.mrf.mxu0 }
 0x4b6   :  { %v12280_v53 = vld [vmem:[#allocation4 + $0x6f0] sm:$0xf0] }
 0x4b7   :  { %7382 = vmatpush.bf16.msra.mxu3 %v12347_v12  ;;  %7357 = vmatpush.bf16.msra.mxu1 %v11803_v31  ;;  %v16904_v56 = vld [vmem:[#allocation4 + $0x94] sm:$0xf]  ;;  %v12283_v44 = vor.u32 %v17104_v48, %v12280_v53  ;;  %v7983_v31 = vrot.slane %v18774_v10, 4 }
 0x4b8   :  { %v11480_v57 = vld [vmem:[#allocation4 + $0xb0] sm:$0xf0] }
 0x4b9   :  { %7370 = vmatpush.bf16.msra.mxu2 %v12059_v32  ;;  %v16968_v0 = vld [vmem:[#allocation4 + $0x294] sm:$0xf]  ;;  %7345 = vmatpush.bf16.msra.mxu0 %v11515_v33  ;;  %v11483_v8 = vor.u32 %v16904_v56, %v11480_v57  ;;  %v7984_v45 = vadd.f32 %v7983_v31, %v18774_v10  ;;  %v7118_v57 = vpop.f32.mrf.mxu2 }
 0x4ba   :  { %v11736_v59 = vld [vmem:[#allocation4 + $0x2b0] sm:$0xf0] }
 0x4bb   :  { %7383 = vmatpush.bf16.msra.mxu3 %v12315_v42  ;;  %v17032_v61 = vld [vmem:[#allocation4 + $0x494] sm:$0xf]  ;;  %7358 = vmatpush.bf16.msra.mxu1 %v11771_v54  ;;  %v11739_v12 = vor.u32 %v16968_v0, %v11736_v59  ;;  %v7985_v0 = vrot.slane %v7984_v45, 2  ;;  %v7131_v59 = vpop.f32.mrf.mxu3 }
 0x4bc   :  { %v11992_v49 = vld [vmem:[#allocation4 + $0x4b0] sm:$0xf0] }
 0x4bd   :  { %v17096_v51 = vld [vmem:[#allocation4 + $0x694] sm:$0xf]  ;;  %7371 = vmatpush.bf16.msra.mxu2 %v12027_v55  ;;  %v11995_v4 = vor.u32 %v17032_v61, %v11992_v49  ;;  %7346 = vmatpush.bf16.msra.mxu0 %v11483_v8 }
 0x4be   :  { %v12248_v6 = vld [vmem:[#allocation4 + $0x6b0] sm:$0xf0] }
 0x4bf   :  { %v16896_v14 = vld [vmem:[#allocation4 + $0x54] sm:$0xf]  ;;  %7384 = vmatpush.bf16.msra.mxu3 %v12283_v44  ;;  %v12251_v22 = vor.u32 %v17096_v51, %v12248_v6  ;;  %7359 = vmatpush.bf16.msra.mxu1 %v11739_v12  ;;  %v7986_v51 = vadd.f32 %v7985_v0, %v7984_v45  ;;  %v18779_v12 = vadd.f32 1e-05, %v8094_v52 }
 0x4c0   :  { %v11448_v15 = vld [vmem:[#allocation4 + $0x70] sm:$0xf0] }
 0x4c1   :  { %v16960_v29 = vld [vmem:[#allocation4 + $0x254] sm:$0xf]  ;;  %v11451_v11 = vor.u32 %v16896_v14, %v11448_v15  ;;  %7372 = vmatpush.bf16.msra.mxu2 %v11995_v4  ;;  %18280 = vrsqrt.f32 %v18779_v12  ;;  %vm8141_vm9 = vweird.f32 %v18779_v12 }
 0x4c2   :  { %v11704_v18 = vld [vmem:[#allocation4 + $0x270] sm:$0xf0] }
 0x4c3   :  { %v17024_v60 = vld [vmem:[#allocation4 + $0x454] sm:$0xf]  ;;  %v11707_v46 = vor.u32 %v16960_v29, %v11704_v18  ;;  %7385 = vmatpush.bf16.msra.mxu3 %v12251_v22  ;;  %7347 = vmatpush.bf16.msra.mxu0 %v11451_v11  ;;  %v7987_v29 = vrot.slane %v7986_v51, 1 }
 0x4c4   :  { %v11960_v5 = vld [vmem:[#allocation4 + $0x470] sm:$0xf0] }
 0x4c5   :  { %v17088_v32 = vld [vmem:[#allocation4 + $0x654] sm:$0xf]  ;;  %v11963_v50 = vor.u32 %v17024_v60, %v11960_v5  ;;  %7360 = vmatpush.bf16.msra.mxu1 %v11707_v46  ;;  %v7988_v11 = vadd.f32 %v7987_v29, %v7986_v51  ;;  %v7142_v29 = vpop.f32.mrf.mxu0 }
 0x4c6   :  { %v12216_v35 = vld [vmem:[#allocation4 + $0x670] sm:$0xf0] }
 0x4c7   :  { %v16888_v39 = vld [vmem:[#allocation4 + $0x14] sm:$0xf]  ;;  %v12219_v33 = vor.u32 %v17088_v32, %v12216_v35  ;;  %7373 = vmatpush.bf16.msra.mxu2 %v11963_v50  ;;  %v8023_v45 = vmul.f32 %v18652_v3, %v7988_v11 }
 0x4c8   :  { %v11416_v42 = vld [vmem:[#allocation4 + $0x30] sm:$0xf0] }
 0x4c9   :  { %v16952_v43 = vld [vmem:[#allocation4 + $0x214] sm:$0xf]  ;;  %v11419_v61 = vor.u32 %v16888_v39, %v11416_v42  ;;  %7386 = vmatpush.bf16.msra.mxu3 %v12219_v33 }
 0x4ca   :  { %v11672_v2 = vld [vmem:[#allocation4 + $0x230] sm:$0xf0] }
 0x4cb   :  { %v17016_v48 = vld [vmem:[#allocation4 + $0x414] sm:$0xf]  ;;  %v11675_v6 = vor.u32 %v16952_v43, %v11672_v2  ;;  %7348 = vmatpush.bf16.msra.mxu0 %v11419_v61 }
 0x4cc   :  { %v11928_v53 = vld [vmem:[#allocation4 + $0x430] sm:$0xf0] }
 0x4cd   :  { %v17080_v54 = vld [vmem:[#allocation4 + $0x614] sm:$0xf]  ;;  %v11931_v7 = vor.u32 %v17016_v48, %v11928_v53  ;;  %7361 = vmatpush.bf16.msra.mxu1 %v11675_v6 }
 0x4ce   :  { %v12184_v55 = vld [vmem:[#allocation4 + $0x630] sm:$0xf0]  ;;  %7349 = vmatmul.bf16.vlgmr.msra.gmra.mxu0 %v18549_v9 }
 0x4cf   :  { %v17200_v56 = vld [vmem:[#allocation4 + $0x9d4] sm:$0xf]  ;;  %v12187_v4 = vor.u32 %v17080_v54, %v12184_v55  ;;  %7374 = vmatpush.bf16.msra.mxu2 %v11931_v7 }
 0x4d0   :  { %v12664_v44 = vld [vmem:[#allocation4 + $0x9f0] sm:$0xf0]  ;;  %7362 = vmatmul.bf16.vlgmr.msra.gmra.mxu1 %v18553_v17 }
 0x4d1   :  { %v17264_v28 = vld [vmem:[#allocation4 + $0xbd4] sm:$0xf]  ;;  %v12667_v14 = vor.u32 %v17200_v56, %v12664_v44  ;;  %7387 = vmatpush.bf16.msra.mxu3 %v12187_v4  ;;  %v18785_v56 = vsub.f32 %v18774_v10, %v8023_v45 }
 0x4d2   :  { %v12920_v49 = vld [vmem:[#allocation4 + $0xbf0] sm:$0xf0]  ;;  %7375 = vmatmul.bf16.vlgmr.msra.gmra.mxu2 %v18546_v63 }
 0x4d3   :  { %v17328_v62 = vld [vmem:[#allocation4 + $0xdd4] sm:$0xf]  ;;  %v12923_v25 = vor.u32 %v17264_v28, %v12920_v49  ;;  %7393 = vmatpush.bf16.msrb.mxu0 %v12667_v14  ;;  %v8039_v28 = vmul.f32 %v18785_v56, %v18785_v56  ;;  %v18792_v14 = vpop.eup %18280 }
 0x4d4   :  { %v13176_v58 = vld [vmem:[#allocation4 + $0xdf0] sm:$0xf0]  ;;  %7388 = vmatmul.bf16.vlgmr.msra.gmra.mxu3 %v18551_v16  ;;  %vm8142_vm8 = vweird.f32 %v18792_v14 }
 0x4d5   :  { %v17392_v8 = vld [vmem:[#allocation4 + $0xfd4] sm:$0xf]  ;;  %v13179_v22 = vor.u32 %v17328_v62, %v13176_v58  ;;  %7406 = vmatpush.bf16.msrb.mxu1 %v12923_v25  ;;  %vm18816_vm10 = vmor %vm8141_vm9, %vm8142_vm8 }
 0x4d6   :  { %v13432_v1 = vld [vmem:[#allocation4 + $0xff0] sm:$0xf0] }
 0x4d7   :  { %v17192_v15 = vld [vmem:[#allocation4 + $0x994] sm:$0xf]  ;;  %v13435_v5 = vor.u32 %v17392_v8, %v13432_v1  ;;  %7419 = vmatpush.bf16.msrb.mxu2 %v13179_v22  ;;  %v8062_v8 = vrot.slane %v8039_v28, 4 }
 0x4d8   :  { %v12632_v18 = vld [vmem:[#allocation4 + $0x9b0] sm:$0xf0] }
 0x4d9   :  { %v17256_v60 = vld [vmem:[#allocation4 + $0xb94] sm:$0xf]  ;;  %v12635_v43 = vor.u32 %v17192_v15, %v12632_v18  ;;  %7432 = vmatpush.bf16.msrb.mxu3 %v13435_v5  ;;  %v8063_v25 = vadd.f32 %v8062_v8, %v8039_v28 }
 0x4da   :  { %v12888_v31 = vld [vmem:[#allocation4 + $0xbb0] sm:$0xf0] }
 0x4db   :  { %v17320_v32 = vld [vmem:[#allocation4 + $0xd94] sm:$0xf]  ;;  %v12891_v46 = vor.u32 %v17256_v60, %v12888_v31  ;;  %7394 = vmatpush.bf16.msrb.mxu0 %v12635_v43  ;;  %v8136_v43 = vmul.f32 %v18792_v14, %v18779_v12  ;;  %v8064_v45 = vrot.slane %v8063_v25, 2 }
 0x4dc   :  { %v13144_v35 = vld [vmem:[#allocation4 + $0xdb0] sm:$0xf0] }
 0x4dd   :  { %v17384_v39 = vld [vmem:[#allocation4 + $0xf94] sm:$0xf]  ;;  %v13147_v50 = vor.u32 %v17320_v32, %v13144_v35  ;;  %7407 = vmatpush.bf16.msrb.mxu1 %v12891_v46  ;;  %v7155_v32 = vpop.f32.mrf.mxu1 }
 0x4de   :  { %v13400_v42 = vld [vmem:[#allocation4 + $0xfb0] sm:$0xf0] }
 0x4df   :  { %v17184_v2 = vld [vmem:[#allocation4 + $0x954] sm:$0xf]  ;;  %v13403_v52 = vor.u32 %v17384_v39, %v13400_v42  ;;  %7420 = vmatpush.bf16.msrb.mxu2 %v13147_v50 }
 0x4e0   :  { %v12600_v48 = vld [vmem:[#allocation4 + $0x970] sm:$0xf0] }
 0x4e1   :  { %v17248_v53 = vld [vmem:[#allocation4 + $0xb54] sm:$0xf]  ;;  %v12603_v44 = vor.u32 %v17184_v2, %v12600_v48  ;;  %7433 = vmatpush.bf16.msrb.mxu3 %v13403_v52  ;;  %v7156_v48 = vadd.f32 %v7155_v32, %v7142_v29 }
 0x4e2   :  { %v12856_v33 = vld [vmem:[#allocation4 + $0xb70] sm:$0xf0] }
 0x4e3   :  { %v17312_v54 = vld [vmem:[#allocation4 + $0xd54] sm:$0xf]  ;;  %v12859_v59 = vor.u32 %v17248_v53, %v12856_v33  ;;  %7395 = vmatpush.bf16.msrb.mxu0 %v12603_v44  ;;  %v8065_v53 = vadd.f32 %v8064_v45, %v8063_v25 }
 0x4e4   :  { %v13112_v55 = vld [vmem:[#allocation4 + $0xd70] sm:$0xf0] }
 0x4e5   :  { %v17376_v57 = vld [vmem:[#allocation4 + $0xf54] sm:$0xf]  ;;  %v13115_v61 = vor.u32 %v17312_v54, %v13112_v55  ;;  %7408 = vmatpush.bf16.msrb.mxu1 %v12859_v59 }
 0x4e6   :  { %v13368_v0 = vld [vmem:[#allocation4 + $0xf70] sm:$0xf0] }
 0x4e7   :  { %v17176_v49 = vld [vmem:[#allocation4 + $0x914] sm:$0xf]  ;;  %v13371_v58 = vor.u32 %v17376_v57, %v13368_v0  ;;  %7421 = vmatpush.bf16.msrb.mxu2 %v13115_v61  ;;  %v7168_v0 = vpop.f32.mrf.mxu2 }
 0x4e8   :  { %v12568_v10 = vld [vmem:[#allocation4 + $0x930] sm:$0xf0] }
 0x4e9   :  { %v17240_v62 = vld [vmem:[#allocation4 + $0xb14] sm:$0xf]  ;;  %v12571_v15 = vor.u32 %v17176_v49, %v12568_v10  ;;  %7434 = vmatpush.bf16.msrb.mxu3 %v13371_v58  ;;  %v7169_v49 = vadd.f32 %v7168_v0, %v7156_v48  ;;  %v7181_v10 = vpop.f32.mrf.mxu3  ;;  %v8066_v58 = vrot.slane %v8065_v53, 1 }
 0x4ea   :  { %v12824_v51 = vld [vmem:[#allocation4 + $0xb30] sm:$0xf0] }
 0x4eb   :  { %v17304_v6 = vld [vmem:[#allocation4 + $0xd14] sm:$0xf]  ;;  %v12827_v22 = vor.u32 %v17240_v62, %v12824_v51  ;;  %7396 = vmatpush.bf16.msrb.mxu0 %v12571_v15  ;;  %v8137_v62 = vmul.f32 %v18792_v14, %v8136_v43  ;;  %v18797_v8 = vadd.f32 %v7181_v10, %v7169_v49 }
 0x4ec   :  { %v13080_v7 = vld [vmem:[#allocation4 + $0xd30] sm:$0xf0] }
 0x4ed   :  { %v17368_v1 = vld [vmem:[#allocation4 + $0xf14] sm:$0xf]  ;;  %v13083_v18 = vor.u32 %v17304_v6, %v13080_v7  ;;  %7409 = vmatpush.bf16.msrb.mxu1 %v12827_v22 }
 0x4ee   :  { %v13336_v4 = vld [vmem:[#allocation4 + $0xf30] sm:$0xf0] }
 0x4ef   :  { %v17168_v60 = vld [vmem:[#allocation4 + $0x8d4] sm:$0xf]  ;;  %v13339_v35 = vor.u32 %v17368_v1, %v13336_v4  ;;  %7422 = vmatpush.bf16.msrb.mxu2 %v13083_v18  ;;  %v7144_v1 = vpop.f32.mrf.mxu0  ;;  %v8067_v4 = vadd.f32 %v8066_v58, %v8065_v53 }
 0x4f0   :  { %v12536_v5 = vld [vmem:[#allocation4 + $0x8f0] sm:$0xf0] }
 0x4f1   :  { %v17232_v31 = vld [vmem:[#allocation4 + $0xad4] sm:$0xf]  ;;  %v12539_v2 = vor.u32 %v17168_v60, %v12536_v5  ;;  %7435 = vmatpush.bf16.msrb.mxu3 %v13339_v35  ;;  %v7157_v60 = vpop.f32.mrf.mxu1 }
 0x4f2   :  { %v12792_v11 = vld [vmem:[#allocation4 + $0xaf0] sm:$0xf0] }
 0x4f3   :  { %v17296_v39 = vld [vmem:[#allocation4 + $0xcd4] sm:$0xf]  ;;  %v12795_v52 = vor.u32 %v17232_v31, %v12792_v11  ;;  %7397 = vmatpush.bf16.msrb.mxu0 %v12539_v2  ;;  %v8138_v11 = vmul.f32 0.5, %v8137_v62 }
 0x4f4   :  { %v13048_v42 = vld [vmem:[#allocation4 + $0xcf0] sm:$0xf0] }
 0x4f5   :  { %v17360_v46 = vld [vmem:[#allocation4 + $0xed4] sm:$0xf]  ;;  %v13051_v33 = vor.u32 %v17296_v39, %v13048_v42  ;;  %7410 = vmatpush.bf16.msrb.mxu1 %v12795_v52  ;;  %v8095_v39 = vmul.f32 %v8067_v4, %v18652_v3 }
 0x4f6   :  { %v13304_v50 = vld [vmem:[#allocation4 + $0xef0] sm:$0xf0] }
 0x4f7   :  { %v17160_v54 = vld [vmem:[#allocation4 + $0x894] sm:$0xf]  ;;  %v13307_v44 = vor.u32 %v17360_v46, %v13304_v50  ;;  %7423 = vmatpush.bf16.msrb.mxu2 %v13051_v33  ;;  %v18800_v48 = vadd.f32 1e-05, %v8095_v39 }
 0x4f8   :  { %v12504_v55 = vld [vmem:[#allocation4 + $0x8b0] sm:$0xf0] }
 0x4f9   :  { %v17224_v57 = vld [vmem:[#allocation4 + $0xa94] sm:$0xf]  ;;  %v12507_v7 = vor.u32 %v17160_v54, %v12504_v55  ;;  %7436 = vmatpush.bf16.msrb.mxu3 %v13307_v44  ;;  %v7170_v55 = vpop.f32.mrf.mxu2  ;;  %18282 = vrsqrt.f32 %v18800_v48  ;;  %vm8151_vm12 = vweird.f32 %v18800_v48 }
 0x4fa   :  { %v12760_v28 = vld [vmem:[#allocation4 + $0xab0] sm:$0xf0] }
 0x4fb   :  { %v17288_v59 = vld [vmem:[#allocation4 + $0xc94] sm:$0xf]  ;;  %v12763_v15 = vor.u32 %v17224_v57, %v12760_v28  ;;  %7398 = vmatpush.bf16.msrb.mxu0 %v12507_v7 }
 0x4fc   :  { %v13016_v61 = vld [vmem:[#allocation4 + $0xcb0] sm:$0xf0] }
 0x4fd   :  { %v17352_v51 = vld [vmem:[#allocation4 + $0xe94] sm:$0xf]  ;;  %v13019_v29 = vor.u32 %v17288_v59, %v13016_v61  ;;  %7411 = vmatpush.bf16.msrb.mxu1 %v12763_v15  ;;  %v7183_v59 = vpop.f32.mrf.mxu3 }
 0x4fe   :  { %v13272_v6 = vld [vmem:[#allocation4 + $0xeb0] sm:$0xf0] }
 0x4ff   :  { %v17152_v25 = vld [vmem:[#allocation4 + $0x854] sm:$0xf]  ;;  %v13275_v5 = vor.u32 %v17352_v51, %v13272_v6  ;;  %7424 = vmatpush.bf16.msrb.mxu2 %v13019_v29  ;;  %v8139_v29 = vsub.f32 1.5, %v8138_v11 }
 0x500   :  { %v12472_v22 = vld [vmem:[#allocation4 + $0x870] sm:$0xf0] }
 0x501   :  { %v17216_v18 = vld [vmem:[#allocation4 + $0xa54] sm:$0xf]  ;;  %v12475_v45 = vor.u32 %v17152_v25, %v12472_v22  ;;  %7437 = vmatpush.bf16.msrb.mxu3 %v13275_v5 }
 0x502   :  { %v12728_v31 = vld [vmem:[#allocation4 + $0xa70] sm:$0xf0] }
 0x503   :  { %v17280_v32 = vld [vmem:[#allocation4 + $0xc54] sm:$0xf]  ;;  %v12731_v53 = vor.u32 %v17216_v18, %v12728_v31  ;;  %7399 = vmatpush.bf16.msrb.mxu0 %v12475_v45  ;;  %v18803_v45 = vpop.eup %18282 }
 0x504   :  { %v12984_v35 = vld [vmem:[#allocation4 + $0xc70] sm:$0xf0]  ;;  %v8146_v11 = vmul.f32 %v18803_v45, %v18800_v48  ;;  %vm8152_vm11 = vweird.f32 %v18803_v45 }
 0x505   :  { %v17344_v42 = vld [vmem:[#allocation4 + $0xe54] sm:$0xf]  ;;  %v12987_v52 = vor.u32 %v17280_v32, %v12984_v35  ;;  %7412 = vmatpush.bf16.msrb.mxu1 %v12731_v53  ;;  %v8140_v53 = vmul.f32 %v18792_v14, %v8139_v29  ;;  %vm18827_vm13 = vmor %vm8151_vm12, %vm8152_vm11 }
 0x506   :  { %v13240_v43 = vld [vmem:[#allocation4 + $0xe70] sm:$0xf0] }
 0x507   :  { %v17144_v46 = vld [vmem:[#allocation4 + $0x814] sm:$0xf]  ;;  %v13243_v57 = vor.u32 %v17344_v42, %v13240_v43  ;;  %7425 = vmatpush.bf16.msrb.mxu2 %v12987_v52  ;;  %v8144_v12 = vsel %vm18816_vm10, %v18792_v14, %v8140_v53 }
 0x508   :  { %v12440_v50 = vld [vmem:[#allocation4 + $0x830] sm:$0xf0] }
 0x509   :  { %v17208_v2 = vld [vmem:[#allocation4 + $0xa14] sm:$0xf]  ;;  %v12443_v62 = vor.u32 %v17144_v46, %v12440_v50  ;;  %7438 = vmatpush.bf16.msrb.mxu3 %v13243_v57 }
 0x50a   :  { %v12696_v33 = vld [vmem:[#allocation4 + $0xa30] sm:$0xf0] }
 0x50b   :  { %v17272_v54 = vld [vmem:[#allocation4 + $0xc14] sm:$0xf]  ;;  %v12699_v7 = vor.u32 %v17208_v2, %v12696_v33  ;;  %7400 = vmatpush.bf16.msrb.mxu0 %v12443_v62 }
 0x50c   :  { %v12952_v0 = vld [vmem:[#allocation4 + $0xc30] sm:$0xf0] }
 0x50d   :  { %v17336_v44 = vld [vmem:[#allocation4 + $0xe14] sm:$0xf]  ;;  %v12955_v1 = vor.u32 %v17272_v54, %v12952_v0  ;;  %7413 = vmatpush.bf16.msrb.mxu1 %v12699_v7  ;;  %v8147_v0 = vmul.f32 %v18803_v45, %v8146_v11 }
 0x50e   :  { %v13208_v28 = vld [vmem:[#allocation4 + $0xe30] sm:$0xf0]  ;;  %7401 = vmatmul.bf16.vlgmr.msrb.gmra.mxu0 %v18560_v37 }
 0x50f   :  { %v17456_v61 = vld [vmem:[#allocation4 + $0x11d4] sm:$0xf]  ;;  %v13211_v25 = vor.u32 %v17336_v44, %v13208_v28  ;;  %7426 = vmatpush.bf16.msrb.mxu2 %v12955_v1 }
 0x510   :  { %v13688_v49 = vld [vmem:[#allocation4 + $0x11f0] sm:$0xf0]  ;;  %7414 = vmatmul.bf16.vlgmr.msrb.gmra.mxu1 %v18564_v40 }
 0x511   :  { %v17520_v10 = vld [vmem:[#allocation4 + $0x13d4] sm:$0xf]  ;;  %v13691_v22 = vor.u32 %v17456_v61, %v13688_v49  ;;  %7439 = vmatpush.bf16.msrb.mxu3 %v13211_v25 }
 0x512   :  { %v13944_v58 = vld [vmem:[#allocation4 + $0x13f0] sm:$0xf0]  ;;  %7427 = vmatmul.bf16.vlgmr.msrb.gmra.mxu2 %v18558_v34 }
 0x513   :  { %v17584_v51 = vld [vmem:[#allocation4 + $0x15d4] sm:$0xf]  ;;  %v13947_v18 = vor.u32 %v17520_v10, %v13944_v58  ;;  %7445 = vmatpush.bf16.msra.mxu0 %v13691_v22  ;;  %v8148_v58 = vmul.f32 0.5, %v8147_v0 }
 0x514   :  { %v14200_v6 = vld [vmem:[#allocation4 + $0x15f0] sm:$0xf0]  ;;  %7440 = vmatmul.bf16.vlgmr.msrb.gmra.mxu3 %v18562_v38 }
 0x515   :  { %v17648_v4 = vld [vmem:[#allocation4 + $0x17d4] sm:$0xf]  ;;  %v14203_v60 = vor.u32 %v17584_v51, %v14200_v6  ;;  %7458 = vmatpush.bf16.msra.mxu1 %v13947_v18  ;;  %v8149_v25 = vsub.f32 1.5, %v8148_v58 }
 0x516   :  { %v14456_v15 = vld [vmem:[#allocation4 + $0x17f0] sm:$0xf0] }
 0x517   :  { %v17448_v5 = vld [vmem:[#allocation4 + $0x1194] sm:$0xf]  ;;  %v14459_v35 = vor.u32 %v17648_v4, %v14456_v15  ;;  %7471 = vmatpush.bf16.msra.mxu2 %v14203_v60 }
 0x518   :  { %v13656_v31 = vld [vmem:[#allocation4 + $0x11b0] sm:$0xf0] }
 0x519   :  { %v17512_v32 = vld [vmem:[#allocation4 + $0x1394] sm:$0xf]  ;;  %v13659_v2 = vor.u32 %v17448_v5, %v13656_v31  ;;  %7484 = vmatpush.bf16.msra.mxu3 %v14459_v35  ;;  %v8150_v35 = vmul.f32 %v18803_v45, %v8149_v25 }
 0x51a   :  { %v13912_v39 = vld [vmem:[#allocation4 + $0x13b0] sm:$0xf0] }
 0x51b   :  { %v17576_v42 = vld [vmem:[#allocation4 + $0x1594] sm:$0xf]  ;;  %v13915_v52 = vor.u32 %v17512_v32, %v13912_v39  ;;  %7446 = vmatpush.bf16.msra.mxu0 %v13659_v2  ;;  %v8204_v32 = vrot.slane %v8144_v12, 6  ;;  %v8154_v48 = vsel %vm18827_vm13, %v18803_v45, %v8150_v35 }
 0x51c   :  { %v14168_v43 = vld [vmem:[#allocation4 + $0x15b0] sm:$0xf0]  ;;  %v8205_v0 = vrot.slane %v8154_v48, 5 }
 0x51d   :  { %v17640_v46 = vld [vmem:[#allocation4 + $0x1794] sm:$0xf]  ;;  %v14171_v33 = vor.u32 %v17576_v42, %v14168_v43  ;;  %7459 = vmatpush.bf16.msra.mxu1 %v13915_v52  ;;  %v7194_v42 = vpop.f32.mrf.mxu0  ;;  %v7207_v52 = vpop.f32.mrf.mxu1 }
 0x51e   :  { %v14424_v50 = vld [vmem:[#allocation4 + $0x17b0] sm:$0xf0]  ;;  %v7195_v53 = vadd.f32 %v7194_v42, %v18797_v8 }
 0x51f   :  { %v17440_v54 = vld [vmem:[#allocation4 + $0x1154] sm:$0xf]  ;;  %v14427_v44 = vor.u32 %v17640_v46, %v14424_v50  ;;  %7472 = vmatpush.bf16.msra.mxu2 %v14171_v33 }
 0x520   :  { %v13624_v55 = vld [vmem:[#allocation4 + $0x1170] sm:$0xf0] }
 0x521   :  { %v17504_v57 = vld [vmem:[#allocation4 + $0x1354] sm:$0xf]  ;;  %v13627_v51 = vor.u32 %v17440_v54, %v13624_v55  ;;  %7485 = vmatpush.bf16.msra.mxu3 %v14427_v44 }
 0x522   :  { %v13880_v28 = vld [vmem:[#allocation4 + $0x1370] sm:$0xf0] }
 0x523   :  { %v17568_v59 = vld [vmem:[#allocation4 + $0x1554] sm:$0xf]  ;;  %v13883_v7 = vor.u32 %v17504_v57, %v13880_v28  ;;  %7447 = vmatpush.bf16.msra.mxu0 %v13627_v51  ;;  %v7220_v51 = vpop.f32.mrf.mxu2 }
 0x524   :  { %v14136_v61 = vld [vmem:[#allocation4 + $0x1570] sm:$0xf0] }
 0x525   :  { %v17632_v49 = vld [vmem:[#allocation4 + $0x1754] sm:$0xf]  ;;  %v14139_v1 = vor.u32 %v17568_v59, %v14136_v61  ;;  %7460 = vmatpush.bf16.msra.mxu1 %v13883_v7  ;;  %v7208_v59 = vadd.f32 %v7207_v52, %v7195_v53 }
 0x526   :  { %v14392_v10 = vld [vmem:[#allocation4 + $0x1770] sm:$0xf0] }
 0x527   :  { %v17432_v6 = vld [vmem:[#allocation4 + $0x1114] sm:$0xf]  ;;  %v14395_v22 = vor.u32 %v17632_v49, %v14392_v10  ;;  %7473 = vmatpush.bf16.msra.mxu2 %v14139_v1  ;;  %v8213_v49 = vsel %vm8212_vm14, %v8204_v32, %v8205_v0 }
 0x528   :  { %v13592_v4 = vld [vmem:[#allocation4 + $0x1130] sm:$0xf0] }
 0x529   :  { %v17496_v15 = vld [vmem:[#allocation4 + $0x1314] sm:$0xf]  ;;  %v13595_v14 = vor.u32 %v17432_v6, %v13592_v4  ;;  %7486 = vmatpush.bf16.msra.mxu3 %v14395_v22  ;;  %v18838_v6 = vsel %vm8214_vm15, %v18723_v30, %v8213_v49 }
 0x52a   :  { %v13848_v29 = vld [vmem:[#allocation4 + $0x1330] sm:$0xf0] }
 0x52b   :  { %v17560_v18 = vld [vmem:[#allocation4 + $0x1514] sm:$0xf]  ;;  %v13851_v46 = vor.u32 %v17496_v15, %v13848_v29  ;;  %7448 = vmatpush.bf16.msra.mxu0 %v13595_v14  ;;  %v7221_v15 = vadd.f32 %v7220_v51, %v7208_v59  ;;  %v7233_v29 = vpop.f32.mrf.mxu3 }
 0x52c   :  { %v14104_v60 = vld [vmem:[#allocation4 + $0x1530] sm:$0xf0] }
 0x52d   :  { %v17624_v5 = vld [vmem:[#allocation4 + $0x1714] sm:$0xf]  ;;  %v14107_v50 = vor.u32 %v17560_v18, %v14104_v60  ;;  %7461 = vmatpush.bf16.msra.mxu1 %v13851_v46  ;;  %v18840_v60 = vadd.f32 %v7233_v29, %v7221_v15 }
 0x52e   :  { %v14360_v31 = vld [vmem:[#allocation4 + $0x1730] sm:$0xf0] }
 0x52f   :  { %v17424_v39 = vld [vmem:[#allocation4 + $0x10d4] sm:$0xf]  ;;  %v14363_v33 = vor.u32 %v17624_v5, %v14360_v31  ;;  %7474 = vmatpush.bf16.msra.mxu2 %v14107_v50  ;;  %v7196_v5 = vpop.f32.mrf.mxu0 }
 0x530   :  { %v13560_v11 = vld [vmem:[#allocation4 + $0x10f0] sm:$0xf0] }
 0x531   :  { %v17488_v2 = vld [vmem:[#allocation4 + $0x12d4] sm:$0xf]  ;;  %v13563_v61 = vor.u32 %v17424_v39, %v13560_v11  ;;  %7487 = vmatpush.bf16.msra.mxu3 %v14363_v33  ;;  %v7209_v39 = vpop.f32.mrf.mxu1 }
 0x532   :  { %v13816_v54 = vld [vmem:[#allocation4 + $0x12f0] sm:$0xf0] }
 0x533   :  { %v17552_v55 = vld [vmem:[#allocation4 + $0x14d4] sm:$0xf]  ;;  %v13819_v8 = vor.u32 %v17488_v2, %v13816_v54  ;;  %7449 = vmatpush.bf16.msra.mxu0 %v13563_v61 }
 0x534   :  { %v14072_v57 = vld [vmem:[#allocation4 + $0x14f0] sm:$0xf0] }
 0x535   :  { %v17616_v44 = vld [vmem:[#allocation4 + $0x16d4] sm:$0xf]  ;;  %v14075_v10 = vor.u32 %v17552_v55, %v14072_v57  ;;  %7462 = vmatpush.bf16.msra.mxu1 %v13819_v8  ;;  %v7235_v8 = vpop.f32.mrf.mxu3 }
 0x536   :  { %v14328_v28 = vld [vmem:[#allocation4 + $0x16f0] sm:$0xf0] }
 0x537   :  { %v17416_v62 = vld [vmem:[#allocation4 + $0x1094] sm:$0xf]  ;;  %v14331_v12 = vor.u32 %v17616_v44, %v14328_v28  ;;  %7475 = vmatpush.bf16.msra.mxu2 %v14075_v10  ;;  %v7222_v44 = vpop.f32.mrf.mxu2 }
 0x538   :  { %v13528_v45 = vld [vmem:[#allocation4 + $0x10b0] sm:$0xf0] }
 0x539   :  { %v17480_v58 = vld [vmem:[#allocation4 + $0x1294] sm:$0xf]  ;;  %v13531_v18 = vor.u32 %v17416_v62, %v13528_v45  ;;  %7488 = vmatpush.bf16.msra.mxu3 %v14331_v12 }
 0x53a   :  { %v13784_v7 = vld [vmem:[#allocation4 + $0x12b0] sm:$0xf0] }
 0x53b   :  { %v17544_v1 = vld [vmem:[#allocation4 + $0x1494] sm:$0xf]  ;;  %v13787_v31 = vor.u32 %v17480_v58, %v13784_v7  ;;  %7450 = vmatpush.bf16.msra.mxu0 %v13531_v18 }
 0x53c   :  { %v14040_v4 = vld [vmem:[#allocation4 + $0x14b0] sm:$0xf0] }
 0x53d   :  { %v17608_v25 = vld [vmem:[#allocation4 + $0x1694] sm:$0xf]  ;;  %v14043_v32 = vor.u32 %v17544_v1, %v14040_v4  ;;  %7463 = vmatpush.bf16.msra.mxu1 %v13787_v31 }
 0x53e   :  { %v14296_v22 = vld [vmem:[#allocation4 + $0x16b0] sm:$0xf0] }
 0x53f   :  { %v17408_v30 = vld [vmem:[#allocation4 + $0x1054] sm:$0xf]  ;;  %v14299_v42 = vor.u32 %v17608_v25, %v14296_v22  ;;  %7476 = vmatpush.bf16.msra.mxu2 %v14043_v32 }
 0x540   :  { %v13496_v35 = vld [vmem:[#allocation4 + $0x1070] sm:$0xf0] }
 0x541   :  { %v17472_v14 = vld [vmem:[#allocation4 + $0x1254] sm:$0xf]  ;;  %v13499_v53 = vor.u32 %v17408_v30, %v13496_v35  ;;  %7489 = vmatpush.bf16.msra.mxu3 %v14299_v42 }
 0x542   :  { %v13752_v43 = vld [vmem:[#allocation4 + $0x1270] sm:$0xf0] }
 0x543   :  { %v17536_v46 = vld [vmem:[#allocation4 + $0x1454] sm:$0xf]  ;;  %v13755_v33 = vor.u32 %v17472_v14, %v13752_v43  ;;  %7451 = vmatpush.bf16.msra.mxu0 %v13499_v53 }
 0x544   :  { %v14008_v50 = vld [vmem:[#allocation4 + $0x1470] sm:$0xf0] }
 0x545   :  { %v17600_v11 = vld [vmem:[#allocation4 + $0x1654] sm:$0xf]  ;;  %v14011_v54 = vor.u32 %v17536_v46, %v14008_v50  ;;  %7464 = vmatpush.bf16.msra.mxu1 %v13755_v33 }
 0x546   :  { %v14264_v2 = vld [vmem:[#allocation4 + $0x1670] sm:$0xf0] }
 0x547   :  { %v17400_v52 = vld [vmem:[#allocation4 + $0x1014] sm:$0xf]  ;;  %v14267_v28 = vor.u32 %v17600_v11, %v14264_v2  ;;  %7477 = vmatpush.bf16.msra.mxu2 %v14011_v54 }
 0x548   :  { %v13464_v48 = vld [vmem:[#allocation4 + $0x1030] sm:$0xf0] }
 0x549   :  { %v17464_v55 = vld [vmem:[#allocation4 + $0x1214] sm:$0xf]  ;;  %v13467_v58 = vor.u32 %v17400_v52, %v13464_v48  ;;  %7490 = vmatpush.bf16.msra.mxu3 %v14267_v28 }
 0x54a   :  { %v13720_v57 = vld [vmem:[#allocation4 + $0x1230] sm:$0xf0] }
 0x54b   :  { %v17528_v0 = vld [vmem:[#allocation4 + $0x1414] sm:$0xf]  ;;  %v13723_v1 = vor.u32 %v17464_v55, %v13720_v57  ;;  %7452 = vmatpush.bf16.msra.mxu0 %v13467_v58 }
 0x54c   :  { %v13976_v59 = vld [vmem:[#allocation4 + $0x1430] sm:$0xf0] }
 0x54d   :  { %v17592_v61 = vld [vmem:[#allocation4 + $0x1614] sm:$0xf]  ;;  %v13979_v4 = vor.u32 %v17528_v0, %v13976_v59  ;;  %7465 = vmatpush.bf16.msra.mxu1 %v13723_v1 }
 0x54e   :  { %v14232_v49 = vld [vmem:[#allocation4 + $0x1630] sm:$0xf0]  ;;  %7453 = vmatmul.bf16.vlgmr.msra.gmra.mxu0 %v18570_v19 }
 0x54f   :  { %v17712_v10 = vld [vmem:[#allocation4 + $0x19d4] sm:$0xf]  ;;  %v14235_v25 = vor.u32 %v17592_v61, %v14232_v49  ;;  %7478 = vmatpush.bf16.msra.mxu2 %v13979_v4 }
 0x550   :  { %v14712_v62 = vld [vmem:[#allocation4 + $0x19f0] sm:$0xf0]  ;;  %7466 = vmatmul.bf16.vlgmr.msra.gmra.mxu1 %v18574_v24 }
 0x551   :  { %v17776_v45 = vld [vmem:[#allocation4 + $0x1bd4] sm:$0xf]  ;;  %v14715_v22 = vor.u32 %v17712_v10, %v14712_v62  ;;  %7491 = vmatpush.bf16.msra.mxu3 %v14235_v25 }
 0x552   :  { %v14968_v51 = vld [vmem:[#allocation4 + $0x1bf0] sm:$0xf0]  ;;  %7479 = vmatmul.bf16.vlgmr.msra.gmra.mxu2 %v18572_v23 }
 0x553   :  { %v17840_v12 = vld [vmem:[#allocation4 + $0x1dd4] sm:$0xf]  ;;  %v14971_v18 = vor.u32 %v17776_v45, %v14968_v51  ;;  %7497 = vmatpush.bf16.msrb.mxu0 %v14715_v22 }
 0x554   :  { %v15224_v7 = vld [vmem:[#allocation4 + $0x1df0] sm:$0xf0]  ;;  %7492 = vmatmul.bf16.vlgmr.msra.gmra.mxu3 %v18576_v27 }
 0x555   :  { %v17904_v15 = vld [vmem:[#allocation4 + $0x1fd4] sm:$0xf]  ;;  %v15227_v5 = vor.u32 %v17840_v12, %v15224_v7  ;;  %7510 = vmatpush.bf16.msrb.mxu1 %v14971_v18  ;;  %v7246_v12 = vpop.f32.mrf.mxu0 }
 0x556   :  { %v15480_v29 = vld [vmem:[#allocation4 + $0x1ff0] sm:$0xf0]  ;;  %v7247_v4 = vadd.f32 %v7246_v12, %v18840_v60 }
 0x557   :  { %v17704_v31 = vld [vmem:[#allocation4 + $0x1994] sm:$0xf]  ;;  %v15483_v35 = vor.u32 %v17904_v15, %v15480_v29  ;;  %7523 = vmatpush.bf16.msrb.mxu2 %v15227_v5  ;;  %v7259_v29 = vpop.f32.mrf.mxu1 }
 0x558   :  { %v14680_v32 = vld [vmem:[#allocation4 + $0x19b0] sm:$0xf0] }
 0x559   :  { %v17768_v30 = vld [vmem:[#allocation4 + $0x1b94] sm:$0xf]  ;;  %v14683_v50 = vor.u32 %v17704_v31, %v14680_v32  ;;  %7536 = vmatpush.bf16.msrb.mxu3 %v15483_v35 }
 0x55a   :  { %v14936_v14 = vld [vmem:[#allocation4 + $0x1bb0] sm:$0xf0] }
 0x55b   :  { %v17832_v39 = vld [vmem:[#allocation4 + $0x1d94] sm:$0xf]  ;;  %v14939_v11 = vor.u32 %v17768_v30, %v14936_v14  ;;  %7498 = vmatpush.bf16.msrb.mxu0 %v14683_v50  ;;  %v7260_v30 = vadd.f32 %v7259_v29, %v7247_v4 }
 0x55c   :  { %v15192_v42 = vld [vmem:[#allocation4 + $0x1db0] sm:$0xf0] }
 0x55d   :  { %v17896_v43 = vld [vmem:[#allocation4 + $0x1f94] sm:$0xf]  ;;  %v15195_v2 = vor.u32 %v17832_v39, %v15192_v42  ;;  %7511 = vmatpush.bf16.msrb.mxu1 %v14939_v11 }
 0x55e   :  { %v15448_v46 = vld [vmem:[#allocation4 + $0x1fb0] sm:$0xf0] }
 0x55f   :  { %v17696_v53 = vld [vmem:[#allocation4 + $0x1954] sm:$0xf]  ;;  %v15451_v33 = vor.u32 %v17896_v43, %v15448_v46  ;;  %7524 = vmatpush.bf16.msrb.mxu2 %v15195_v2 }
 0x560   :  { %v14648_v52 = vld [vmem:[#allocation4 + $0x1970] sm:$0xf0] }
 0x561   :  { %v17760_v48 = vld [vmem:[#allocation4 + $0x1b54] sm:$0xf]  ;;  %v14651_v28 = vor.u32 %v17696_v53, %v14648_v52  ;;  %7537 = vmatpush.bf16.msrb.mxu3 %v15451_v33 }
 0x562   :  { %v14904_v54 = vld [vmem:[#allocation4 + $0x1b70] sm:$0xf0] }
 0x563   :  { %v17824_v55 = vld [vmem:[#allocation4 + $0x1d54] sm:$0xf]  ;;  %v14907_v59 = vor.u32 %v17760_v48, %v14904_v54  ;;  %7499 = vmatpush.bf16.msrb.mxu0 %v14651_v28  ;;  %v7272_v48 = vpop.f32.mrf.mxu2 }
 0x564   :  { %v15160_v57 = vld [vmem:[#allocation4 + $0x1d70] sm:$0xf0] }
 0x565   :  { %v17888_v0 = vld [vmem:[#allocation4 + $0x1f54] sm:$0xf]  ;;  %v15163_v61 = vor.u32 %v17824_v55, %v15160_v57  ;;  %7512 = vmatpush.bf16.msrb.mxu1 %v14907_v59  ;;  %v7273_v57 = vadd.f32 %v7272_v48, %v7260_v30  ;;  %v7248_v59 = vpop.f32.mrf.mxu0  ;;  %v12158_v48 = vld [vmem:[#allocation4 + $0x5d8] sm:$0xf] }
 0x566   :  { %v15416_v44 = vld [vmem:[#allocation4 + $0x1f70] sm:$0xf0] }
 0x567   :  { %v17688_v49 = vld [vmem:[#allocation4 + $0x1914] sm:$0xf]  ;;  %v15419_v62 = vor.u32 %v17888_v0, %v15416_v44  ;;  %7525 = vmatpush.bf16.msrb.mxu2 %v15163_v61  ;;  %v7285_v0 = vpop.f32.mrf.mxu3 }
 0x568   :  { %v14616_v8 = vld [vmem:[#allocation4 + $0x1930] sm:$0xf0] }
 0x569   :  { %v17752_v10 = vld [vmem:[#allocation4 + $0x1b14] sm:$0xf]  ;;  %v14619_v15 = vor.u32 %v17688_v49, %v14616_v8  ;;  %7538 = vmatpush.bf16.msrb.mxu3 %v15419_v62  ;;  %v7261_v49 = vpop.f32.mrf.mxu1  ;;  %v18847_v8 = vadd.f32 %v7285_v0, %v7273_v57  ;;  %v12414_v57 = vld [vmem:[#allocation4 + $0x7d8] sm:$0xf] }
 0x56a   :  { %v14872_v45 = vld [vmem:[#allocation4 + $0x1b30] sm:$0xf0]  ;;  %v17141_v0 = vld [vmem:[#allocation4 + $0x7f4] sm:$0xf0] }
 0x56b   :  { %v17816_v58 = vld [vmem:[#allocation4 + $0x1d14] sm:$0xf]  ;;  %v14875_v25 = vor.u32 %v17752_v10, %v14872_v45  ;;  %7500 = vmatpush.bf16.msrb.mxu0 %v14619_v15  ;;  %v11614_v49 = vld [vmem:[#allocation4 + $0x198] sm:$0xf] }
 0x56c   :  { %v15128_v51 = vld [vmem:[#allocation4 + $0x1d30] sm:$0xf0] }
 0x56d   :  { %v17880_v7 = vld [vmem:[#allocation4 + $0x1f14] sm:$0xf]  ;;  %v15131_v22 = vor.u32 %v17816_v58, %v15128_v51  ;;  %7513 = vmatpush.bf16.msrb.mxu1 %v14875_v25 }
 0x56e   :  { %v15384_v1 = vld [vmem:[#allocation4 + $0x1f30] sm:$0xf0] }
 0x56f   :  { %v17680_v18 = vld [vmem:[#allocation4 + $0x18d4] sm:$0xf]  ;;  %v15387_v32 = vor.u32 %v17880_v7, %v15384_v1  ;;  %7526 = vmatpush.bf16.msrb.mxu2 %v15131_v22 }
 0x570   :  { %v14584_v5 = vld [vmem:[#allocation4 + $0x18f0] sm:$0xf0] }
 0x571   :  { %v17744_v31 = vld [vmem:[#allocation4 + $0x1ad4] sm:$0xf]  ;;  %v14587_v46 = vor.u32 %v17680_v18, %v14584_v5  ;;  %7539 = vmatpush.bf16.msrb.mxu3 %v15387_v32 }
 0x572   :  { %v14840_v35 = vld [vmem:[#allocation4 + $0x1af0] sm:$0xf0] }
 0x573   :  { %v17808_v14 = vld [vmem:[#allocation4 + $0x1cd4] sm:$0xf]  ;;  %v14843_v60 = vor.u32 %v17744_v31, %v14840_v35  ;;  %7501 = vmatpush.bf16.msrb.mxu0 %v14587_v46  ;;  %v7274_v46 = vpop.f32.mrf.mxu2 }
 0x574   :  { %v15096_v39 = vld [vmem:[#allocation4 + $0x1cf0] sm:$0xf0]  ;;  %v11550_v46 = vld [vmem:[#allocation4 + $0x118] sm:$0xf] }
 0x575   :  { %v17872_v42 = vld [vmem:[#allocation4 + $0x1ed4] sm:$0xf]  ;;  %v15099_v50 = vor.u32 %v17808_v14, %v15096_v39  ;;  %7514 = vmatpush.bf16.msrb.mxu1 %v14843_v60  ;;  %v11646_v60 = vld [vmem:[#allocation4 + $0x1d8] sm:$0xf] }
 0x576   :  { %v15352_v43 = vld [vmem:[#allocation4 + $0x1ef0] sm:$0xf0] }
 0x577   :  { %v17672_v11 = vld [vmem:[#allocation4 + $0x1894] sm:$0xf]  ;;  %v15355_v52 = vor.u32 %v17872_v42, %v15352_v43  ;;  %7527 = vmatpush.bf16.msrb.mxu2 %v15099_v50  ;;  %v16949_v50 = vld [vmem:[#allocation4 + $0x1f4] sm:$0xf0] }
 0x578   :  { %v14552_v2 = vld [vmem:[#allocation4 + $0x18b0] sm:$0xf0] }
 0x579   :  { %v17736_v53 = vld [vmem:[#allocation4 + $0x1a94] sm:$0xf]  ;;  %v14555_v61 = vor.u32 %v17672_v11, %v14552_v2  ;;  %7540 = vmatpush.bf16.msrb.mxu3 %v15355_v52  ;;  %v11902_v11 = vld [vmem:[#allocation4 + $0x3d8] sm:$0xf]  ;;  %v7287_v2 = vpop.f32.mrf.mxu3 }
 0x57a   :  { %v14808_v33 = vld [vmem:[#allocation4 + $0x1ab0] sm:$0xf0]  ;;  %v17013_v52 = vld [vmem:[#allocation4 + $0x3f4] sm:$0xf0] }
 0x57b   :  { %v17800_v54 = vld [vmem:[#allocation4 + $0x1c94] sm:$0xf]  ;;  %v14811_v10 = vor.u32 %v17736_v53, %v14808_v33  ;;  %7502 = vmatpush.bf16.msrb.mxu0 %v14555_v61  ;;  %v17077_v33 = vld [vmem:[#allocation4 + $0x5f4] sm:$0xf0]  ;;  %v11903_v59 = vor.u32 %v17013_v52, %v11902_v11 }
 0x57c   :  { %v15064_v55 = vld [vmem:[#allocation4 + $0x1cb0] sm:$0xf0]  ;;  %v12159_v61 = vor.u32 %v17077_v33, %v12158_v48  ;;  %v16989_v2 = vld [vmem:[#allocation4 + $0x334] sm:$0xf0]  ;;  %v7298_v48 = vpop.f32.mrf.mxu0 }
 0x57d   :  { %v17864_v44 = vld [vmem:[#allocation4 + $0x1e94] sm:$0xf]  ;;  %v15067_v62 = vor.u32 %v17800_v54, %v15064_v55  ;;  %7515 = vmatpush.bf16.msrb.mxu1 %v14811_v10  ;;  %v16941_v10 = vld [vmem:[#allocation4 + $0x1b4] sm:$0xf0] }
 0x57e   :  { %v15320_v28 = vld [vmem:[#allocation4 + $0x1eb0] sm:$0xf0]  ;;  %v17053_v52 = vld [vmem:[#allocation4 + $0x534] sm:$0xf0] }
 0x57f   :  { %v17664_v45 = vld [vmem:[#allocation4 + $0x1854] sm:$0xf]  ;;  %v15323_v12 = vor.u32 %v17864_v44, %v15320_v28  ;;  %7528 = vmatpush.bf16.msrb.mxu2 %v15067_v62  ;;  %v11647_v28 = vor.u32 %v16949_v50, %v11646_v60  ;;  %v11870_v62 = vld [vmem:[#allocation4 + $0x398] sm:$0xf] }
 0x580   :  { %v14520_v58 = vld [vmem:[#allocation4 + $0x1870] sm:$0xf0]  ;;  %v16925_v60 = vld [vmem:[#allocation4 + $0x134] sm:$0xf0] }
 0x581   :  { %v17728_v51 = vld [vmem:[#allocation4 + $0x1a54] sm:$0xf]  ;;  %v14523_v25 = vor.u32 %v17664_v45, %v14520_v58  ;;  %7541 = vmatpush.bf16.msrb.mxu3 %v15323_v12  ;;  %v12415_v45 = vor.u32 %v17141_v0, %v12414_v57  ;;  %v17005_v58 = vld [vmem:[#allocation4 + $0x3b4] sm:$0xf0]  ;;  %v11551_v57 = vor.u32 %v16925_v60, %v11550_v46  ;;  %v7311_v0 = vpop.f32.mrf.mxu1 }
 0x582   :  { %v14776_v7 = vld [vmem:[#allocation4 + $0x1a70] sm:$0xf0]  ;;  %v17069_v12 = vld [vmem:[#allocation4 + $0x5b4] sm:$0xf0] }
 0x583   :  { %v17792_v1 = vld [vmem:[#allocation4 + $0x1c54] sm:$0xf]  ;;  %v14779_v5 = vor.u32 %v17728_v51, %v14776_v7  ;;  %7503 = vmatpush.bf16.msrb.mxu0 %v14523_v25  ;;  %v12126_v51 = vld [vmem:[#allocation4 + $0x598] sm:$0xf] }
 0x584   :  { %v15032_v4 = vld [vmem:[#allocation4 + $0x1c70] sm:$0xf0]  ;;  %v12382_v7 = vld [vmem:[#allocation4 + $0x798] sm:$0xf] }
 0x585   :  { %v17856_v15 = vld [vmem:[#allocation4 + $0x1e54] sm:$0xf]  ;;  %v15035_v31 = vor.u32 %v17792_v1, %v15032_v4  ;;  %7516 = vmatpush.bf16.msrb.mxu1 %v14779_v5  ;;  %v17133_v1 = vld [vmem:[#allocation4 + $0x7b4] sm:$0xf0]  ;;  %v11615_v4 = vor.u32 %v16941_v10, %v11614_v49 }
 0x586   :  { %v15288_v29 = vld [vmem:[#allocation4 + $0x1e70] sm:$0xf0]  ;;  %v11582_v25 = vld [vmem:[#allocation4 + $0x158] sm:$0xf]  ;;  %v12383_v5 = vor.u32 %v17133_v1, %v12382_v7 }
 0x587   :  { %v17656_v22 = vld [vmem:[#allocation4 + $0x1814] sm:$0xf]  ;;  %v15291_v14 = vor.u32 %v17856_v15, %v15288_v29  ;;  %7529 = vmatpush.bf16.msrb.mxu2 %v15035_v31  ;;  %v11871_v15 = vor.u32 %v17005_v58, %v11870_v62  ;;  %v12127_v29 = vor.u32 %v17069_v12, %v12126_v51  ;;  %v16997_v31 = vld [vmem:[#allocation4 + $0x374] sm:$0xf0] }
 0x588   :  { %v14488_v18 = vld [vmem:[#allocation4 + $0x1830] sm:$0xf0]  ;;  %v11806_v50 = vld [vmem:[#allocation4 + $0x318] sm:$0xf] }
 0x589   :  { %v17720_v32 = vld [vmem:[#allocation4 + $0x1a14] sm:$0xf]  ;;  %v14491_v53 = vor.u32 %v17656_v22, %v14488_v18  ;;  %7542 = vmatpush.bf16.msrb.mxu3 %v15291_v14  ;;  %v16933_v22 = vld [vmem:[#allocation4 + $0x174] sm:$0xf0]  ;;  %v7313_v46 = vpop.f32.mrf.mxu1 }
 0x58a   :  { %v14744_v30 = vld [vmem:[#allocation4 + $0x1a30] sm:$0xf0]  ;;  %v11838_v18 = vld [vmem:[#allocation4 + $0x358] sm:$0xf] }
 0x58b   :  { %v17784_v35 = vld [vmem:[#allocation4 + $0x1c14] sm:$0xf]  ;;  %v14747_v54 = vor.u32 %v17720_v32, %v14744_v30  ;;  %7504 = vmatpush.bf16.msrb.mxu0 %v14491_v53  ;;  %v12094_v32 = vld [vmem:[#allocation4 + $0x558] sm:$0xf] }
 0x58c   :  { %v15000_v39 = vld [vmem:[#allocation4 + $0x1c30] sm:$0xf0]  ;;  %v17061_v30 = vld [vmem:[#allocation4 + $0x574] sm:$0xf0] }
 0x58d   :  { %v17848_v42 = vld [vmem:[#allocation4 + $0x1e14] sm:$0xf]  ;;  %v15003_v55 = vor.u32 %v17784_v35, %v15000_v39  ;;  %7517 = vmatpush.bf16.msrb.mxu1 %v14747_v54  ;;  %v12350_v35 = vld [vmem:[#allocation4 + $0x758] sm:$0xf]  ;;  %v11583_v39 = vor.u32 %v16933_v22, %v11582_v25 }
 0x58e   :  { %v15256_v43 = vld [vmem:[#allocation4 + $0x1e30] sm:$0xf0]  ;;  %7505 = vmatmul.bf16.vlgmr.msrb.gmra.mxu0 %v18582_v13  ;;  %v17125_v14 = vld [vmem:[#allocation4 + $0x774] sm:$0xf0] }
 0x58f   :  { %v15259_v44 = vor.u32 %v17848_v42, %v15256_v43  ;;  %7530 = vmatpush.bf16.msrb.mxu2 %v15003_v55  ;;  %7549 = vmatpush.bf16.msra.mxu0 %v11647_v28  ;;  %v11839_v42 = vor.u32 %v16997_v31, %v11838_v18  ;;  %v12095_v43 = vor.u32 %v17061_v30, %v12094_v32  ;;  %v12062_v53 = vld [vmem:[#allocation4 + $0x518] sm:$0xf]  ;;  %v7324_v18 = vpop.f32.mrf.mxu2 }
 0x590   :  { %7518 = vmatmul.bf16.vlgmr.msrb.gmra.mxu1 %v18586_v21  ;;  %v12351_v11 = vor.u32 %v17125_v14, %v12350_v35  ;;  %v12318_v33 = vld [vmem:[#allocation4 + $0x718] sm:$0xf]  ;;  %v7299_v55 = vadd.f32 %v7298_v48, %v18847_v8  ;;  %v12063_v28 = vor.u32 %v17053_v52, %v12062_v53  ;;  %v7337_v35 = vpop.f32.mrf.mxu3 }
 0x591   :  { %7543 = vmatpush.bf16.msrb.mxu3 %v15259_v44  ;;  %7562 = vmatpush.bf16.msra.mxu1 %v11903_v59  ;;  %v17117_v54 = vld [vmem:[#allocation4 + $0x734] sm:$0xf0]  ;;  %v11807_v44 = vor.u32 %v16989_v2, %v11806_v50 }
 0x592   :  { %7531 = vmatmul.bf16.vlgmr.msrb.gmra.mxu2 %v18584_v20  ;;  %v11518_v59 = vld [vmem:[#allocation4 + $0xd8] sm:$0xf]  ;;  %v12319_v10 = vor.u32 %v17117_v54, %v12318_v33  ;;  %v7312_v62 = vadd.f32 %v7311_v0, %v7299_v55 }
 0x593   :  { %7575 = vmatpush.bf16.msra.mxu2 %v12159_v61  ;;  %7550 = vmatpush.bf16.msra.mxu0 %v11615_v4  ;;  %v16917_v61 = vld [vmem:[#allocation4 + $0xf4] sm:$0xf0] }
 0x594   :  { %7544 = vmatmul.bf16.vlgmr.msrb.gmra.mxu3 %v18588_v26  ;;  %v11774_v49 = vld [vmem:[#allocation4 + $0x2d8] sm:$0xf]  ;;  %v11519_v1 = vor.u32 %v16917_v61, %v11518_v59  ;;  %v7325_v30 = vadd.f32 %v7324_v18, %v7312_v62 }
 0x595   :  { %7588 = vmatpush.bf16.msra.mxu3 %v12415_v45  ;;  %7563 = vmatpush.bf16.msra.mxu1 %v11871_v15  ;;  %v16981_v45 = vld [vmem:[#allocation4 + $0x2f4] sm:$0xf0] }
 0x596   :  { %v12030_v58 = vld [vmem:[#allocation4 + $0x4d8] sm:$0xf]  ;;  %v11775_v8 = vor.u32 %v16981_v45, %v11774_v49  ;;  %v18854_v60 = vadd.f32 %v7337_v35, %v7325_v30 }
 0x597   :  { %7576 = vmatpush.bf16.msra.mxu2 %v12127_v29  ;;  %7551 = vmatpush.bf16.msra.mxu0 %v11583_v39  ;;  %v17045_v51 = vld [vmem:[#allocation4 + $0x4f4] sm:$0xf0] }
 0x598   :  { %v12286_v12 = vld [vmem:[#allocation4 + $0x6d8] sm:$0xf]  ;;  %v12031_v4 = vor.u32 %v17045_v51, %v12030_v58 }
 0x599   :  { %7589 = vmatpush.bf16.msra.mxu3 %v12383_v5  ;;  %7564 = vmatpush.bf16.msra.mxu1 %v11839_v42  ;;  %v17109_v7 = vld [vmem:[#allocation4 + $0x6f4] sm:$0xf0]  ;;  %v7300_v42 = vpop.f32.mrf.mxu0 }
 0x59a   :  { %v11486_v15 = vld [vmem:[#allocation4 + $0x98] sm:$0xf]  ;;  %v12287_v22 = vor.u32 %v17109_v7, %v12286_v12 }
 0x59b   :  { %7577 = vmatpush.bf16.msra.mxu2 %v12095_v43  ;;  %7552 = vmatpush.bf16.msra.mxu0 %v11551_v57  ;;  %v16909_v29 = vld [vmem:[#allocation4 + $0xb4] sm:$0xf0] }
 0x59c   :  { %v11742_v25 = vld [vmem:[#allocation4 + $0x298] sm:$0xf]  ;;  %v11487_v43 = vor.u32 %v16909_v29, %v11486_v15  ;;  %v7339_v29 = vpop.f32.mrf.mxu3 }
 0x59d   :  { %7590 = vmatpush.bf16.msra.mxu3 %v12351_v11  ;;  %7565 = vmatpush.bf16.msra.mxu1 %v11807_v44  ;;  %v16973_v5 = vld [vmem:[#allocation4 + $0x2b4] sm:$0xf0] }
 0x59e   :  { %v11998_v31 = vld [vmem:[#allocation4 + $0x498] sm:$0xf]  ;;  %v11743_v50 = vor.u32 %v16973_v5, %v11742_v25 }
 0x59f   :  { %7578 = vmatpush.bf16.msra.mxu2 %v12063_v28  ;;  %v17037_v32 = vld [vmem:[#allocation4 + $0x4b4] sm:$0xf0]  ;;  %7553 = vmatpush.bf16.msra.mxu0 %v11519_v1  ;;  %v7326_v1 = vpop.f32.mrf.mxu2 }
 0x5a0   :  { %v12254_v14 = vld [vmem:[#allocation4 + $0x698] sm:$0xf]  ;;  %v11999_v11 = vor.u32 %v17037_v32, %v11998_v31 }
 0x5a1   :  { %7591 = vmatpush.bf16.msra.mxu3 %v12319_v10  ;;  %v17101_v39 = vld [vmem:[#allocation4 + $0x6b4] sm:$0xf0]  ;;  %7566 = vmatpush.bf16.msra.mxu1 %v11775_v8 }
 0x5a2   :  { %v11454_v2 = vld [vmem:[#allocation4 + $0x58] sm:$0xf]  ;;  %v12255_v48 = vor.u32 %v17101_v39, %v12254_v14 }
 0x5a3   :  { %7579 = vmatpush.bf16.msra.mxu2 %v12031_v4  ;;  %v16901_v53 = vld [vmem:[#allocation4 + $0x74] sm:$0xf0]  ;;  %7554 = vmatpush.bf16.msra.mxu0 %v11487_v43 }
 0x5a4   :  { %v11710_v52 = vld [vmem:[#allocation4 + $0x258] sm:$0xf]  ;;  %v11455_v44 = vor.u32 %v16901_v53, %v11454_v2 }
 0x5a5   :  { %7592 = vmatpush.bf16.msra.mxu3 %v12287_v22  ;;  %v16965_v33 = vld [vmem:[#allocation4 + $0x274] sm:$0xf0]  ;;  %7567 = vmatpush.bf16.msra.mxu1 %v11743_v50 }
 0x5a6   :  { %v11966_v54 = vld [vmem:[#allocation4 + $0x458] sm:$0xf]  ;;  %v11711_v61 = vor.u32 %v16965_v33, %v11710_v52 }
 0x5a7   :  { %v17029_v55 = vld [vmem:[#allocation4 + $0x474] sm:$0xf0]  ;;  %7580 = vmatpush.bf16.msra.mxu2 %v11999_v11  ;;  %7555 = vmatpush.bf16.msra.mxu0 %v11455_v44 }
 0x5a8   :  { %v12222_v57 = vld [vmem:[#allocation4 + $0x658] sm:$0xf]  ;;  %v11967_v49 = vor.u32 %v17029_v55, %v11966_v54 }
 0x5a9   :  { %v17093_v0 = vld [vmem:[#allocation4 + $0x674] sm:$0xf0]  ;;  %7593 = vmatpush.bf16.msra.mxu3 %v12255_v48  ;;  %7568 = vmatpush.bf16.msra.mxu1 %v11711_v61 }
 0x5aa   :  { %v11422_v28 = vld [vmem:[#allocation4 + $0x18] sm:$0xf]  ;;  %v12223_v58 = vor.u32 %v17093_v0, %v12222_v57 }
 0x5ab   :  { %v16893_v59 = vld [vmem:[#allocation4 + $0x34] sm:$0xf0]  ;;  %7581 = vmatpush.bf16.msra.mxu2 %v11967_v49 }
 0x5ac   :  { %v11678_v10 = vld [vmem:[#allocation4 + $0x218] sm:$0xf]  ;;  %v11423_v25 = vor.u32 %v16893_v59, %v11422_v28 }
 0x5ad   :  { %v16957_v62 = vld [vmem:[#allocation4 + $0x234] sm:$0xf0]  ;;  %7594 = vmatpush.bf16.msra.mxu3 %v12223_v58 }
 0x5ae   :  { %v11934_v45 = vld [vmem:[#allocation4 + $0x418] sm:$0xf]  ;;  %v11679_v31 = vor.u32 %v16957_v62, %v11678_v10  ;;  %7556 = vmatpush.bf16.msra.mxu0 %v11423_v25 }
 0x5af   :  { %v17021_v51 = vld [vmem:[#allocation4 + $0x434] sm:$0xf0] }
 0x5b0   :  { %v12190_v12 = vld [vmem:[#allocation4 + $0x618] sm:$0xf]  ;;  %v11935_v32 = vor.u32 %v17021_v51, %v11934_v45  ;;  %7569 = vmatpush.bf16.msra.mxu1 %v11679_v31 }
 0x5b1   :  { %v17085_v7 = vld [vmem:[#allocation4 + $0x634] sm:$0xf0]  ;;  %7557 = vmatmul.bf16.vlgmr.msra.gmra.mxu0 %v18549_v9 }
 0x5b2   :  { %v12670_v8 = vld [vmem:[#allocation4 + $0x9d8] sm:$0xf]  ;;  %v12191_v14 = vor.u32 %v17085_v7, %v12190_v12  ;;  %7582 = vmatpush.bf16.msra.mxu2 %v11935_v32  ;;  %v7350_v32 = vpop.f32.mrf.mxu0 }
 0x5b3   :  { %v17205_v4 = vld [vmem:[#allocation4 + $0x9f4] sm:$0xf0]  ;;  %7570 = vmatmul.bf16.vlgmr.msra.gmra.mxu1 %v18553_v17 }
 0x5b4   :  { %v12926_v15 = vld [vmem:[#allocation4 + $0xbd8] sm:$0xf]  ;;  %v12671_v39 = vor.u32 %v17205_v4, %v12670_v8  ;;  %7595 = vmatpush.bf16.msra.mxu3 %v12191_v14 }
 0x5b5   :  { %v17269_v22 = vld [vmem:[#allocation4 + $0xbf4] sm:$0xf0]  ;;  %7583 = vmatmul.bf16.vlgmr.msra.gmra.mxu2 %v18546_v63 }
 0x5b6   :  { %v13182_v18 = vld [vmem:[#allocation4 + $0xdd8] sm:$0xf]  ;;  %v12927_v42 = vor.u32 %v17269_v22, %v12926_v15  ;;  %7601 = vmatpush.bf16.msrb.mxu0 %v12671_v39 }
 0x5b7   :  { %v17333_v5 = vld [vmem:[#allocation4 + $0xdf4] sm:$0xf0]  ;;  %7596 = vmatmul.bf16.vlgmr.msra.gmra.mxu3 %v18551_v16 }
 0x5b8   :  { %v13438_v30 = vld [vmem:[#allocation4 + $0xfd8] sm:$0xf]  ;;  %v13183_v43 = vor.u32 %v17333_v5, %v13182_v18  ;;  %7614 = vmatpush.bf16.msrb.mxu1 %v12927_v42 }
 0x5b9   :  { %v17397_v35 = vld [vmem:[#allocation4 + $0xff4] sm:$0xf0] }
 0x5ba   :  { %v12638_v46 = vld [vmem:[#allocation4 + $0x998] sm:$0xf]  ;;  %v13439_v2 = vor.u32 %v17397_v35, %v13438_v30  ;;  %7627 = vmatpush.bf16.msrb.mxu2 %v13183_v43  ;;  %v7363_v43 = vpop.f32.mrf.mxu1 }
 0x5bb   :  { %v17197_v50 = vld [vmem:[#allocation4 + $0x9b4] sm:$0xf0] }
 0x5bc   :  { %v12894_v11 = vld [vmem:[#allocation4 + $0xb98] sm:$0xf]  ;;  %v12639_v55 = vor.u32 %v17197_v50, %v12638_v46  ;;  %7640 = vmatpush.bf16.msrb.mxu3 %v13439_v2 }
 0x5bd   :  { %v17261_v53 = vld [vmem:[#allocation4 + $0xbb4] sm:$0xf0] }
 0x5be   :  { %v13150_v52 = vld [vmem:[#allocation4 + $0xd98] sm:$0xf]  ;;  %v12895_v57 = vor.u32 %v17261_v53, %v12894_v11  ;;  %7602 = vmatpush.bf16.msrb.mxu0 %v12639_v55  ;;  %v7364_v53 = vadd.f32 %v7363_v43, %v7350_v32 }
 0x5bf   :  { %v17325_v48 = vld [vmem:[#allocation4 + $0xdb4] sm:$0xf0] }
 0x5c0   :  { %v13406_v33 = vld [vmem:[#allocation4 + $0xf98] sm:$0xf]  ;;  %v13151_v0 = vor.u32 %v17325_v48, %v13150_v52  ;;  %7615 = vmatpush.bf16.msrb.mxu1 %v12895_v57 }
 0x5c1   :  { %v17389_v54 = vld [vmem:[#allocation4 + $0xfb4] sm:$0xf0] }
 0x5c2   :  { %v12606_v44 = vld [vmem:[#allocation4 + $0x958] sm:$0xf]  ;;  %v13407_v61 = vor.u32 %v17389_v54, %v13406_v33  ;;  %7628 = vmatpush.bf16.msrb.mxu2 %v13151_v0 }
 0x5c3   :  { %v17189_v28 = vld [vmem:[#allocation4 + $0x974] sm:$0xf0] }
 0x5c4   :  { %v12862_v59 = vld [vmem:[#allocation4 + $0xb58] sm:$0xf]  ;;  %v12607_v51 = vor.u32 %v17189_v28, %v12606_v44  ;;  %7641 = vmatpush.bf16.msrb.mxu3 %v13407_v61  ;;  %v7376_v28 = vpop.f32.mrf.mxu2 }
 0x5c5   :  { %v17253_v49 = vld [vmem:[#allocation4 + $0xb74] sm:$0xf0] }
 0x5c6   :  { %v13118_v10 = vld [vmem:[#allocation4 + $0xd58] sm:$0xf]  ;;  %v12863_v12 = vor.u32 %v17253_v49, %v12862_v59  ;;  %7603 = vmatpush.bf16.msrb.mxu0 %v12607_v51 }
 0x5c7   :  { %v17317_v62 = vld [vmem:[#allocation4 + $0xd74] sm:$0xf0] }
 0x5c8   :  { %v13374_v45 = vld [vmem:[#allocation4 + $0xf58] sm:$0xf]  ;;  %v13119_v7 = vor.u32 %v17317_v62, %v13118_v10  ;;  %7616 = vmatpush.bf16.msrb.mxu1 %v12863_v12  ;;  %v7377_v62 = vadd.f32 %v7376_v28, %v7364_v53 }
 0x5c9   :  { %v17381_v58 = vld [vmem:[#allocation4 + $0xf74] sm:$0xf0] }
 0x5ca   :  { %v12574_v1 = vld [vmem:[#allocation4 + $0x918] sm:$0xf]  ;;  %v13375_v15 = vor.u32 %v17381_v58, %v13374_v45  ;;  %7629 = vmatpush.bf16.msrb.mxu2 %v13119_v7  ;;  %v7389_v45 = vpop.f32.mrf.mxu3 }
 0x5cb   :  { %v17181_v8 = vld [vmem:[#allocation4 + $0x934] sm:$0xf0]  ;;  %v18860_v7 = vadd.f32 %v7389_v45, %v7377_v62 }
 0x5cc   :  { %v12830_v4 = vld [vmem:[#allocation4 + $0xb18] sm:$0xf]  ;;  %v12575_v31 = vor.u32 %v17181_v8, %v12574_v1  ;;  %7642 = vmatpush.bf16.msrb.mxu3 %v13375_v15  ;;  %v7352_v1 = vpop.f32.mrf.mxu0  ;;  %v7378_v53 = vpop.f32.mrf.mxu2 }
 0x5cd   :  { %v17245_v29 = vld [vmem:[#allocation4 + $0xb34] sm:$0xf0] }
 0x5ce   :  { %v13086_v25 = vld [vmem:[#allocation4 + $0xd18] sm:$0xf]  ;;  %v12831_v30 = vor.u32 %v17245_v29, %v12830_v4  ;;  %7604 = vmatpush.bf16.msrb.mxu0 %v12575_v31 }
 0x5cf   :  { %v17309_v22 = vld [vmem:[#allocation4 + $0xd34] sm:$0xf0] }
 0x5d0   :  { %v13342_v18 = vld [vmem:[#allocation4 + $0xf18] sm:$0xf]  ;;  %v13087_v35 = vor.u32 %v17309_v22, %v13086_v25  ;;  %7617 = vmatpush.bf16.msrb.mxu1 %v12831_v30  ;;  %v7365_v22 = vpop.f32.mrf.mxu1 }
 0x5d1   :  { %v17373_v5 = vld [vmem:[#allocation4 + $0xf34] sm:$0xf0] }
 0x5d2   :  { %v12542_v14 = vld [vmem:[#allocation4 + $0x8d8] sm:$0xf]  ;;  %v13343_v46 = vor.u32 %v17373_v5, %v13342_v18  ;;  %7630 = vmatpush.bf16.msrb.mxu2 %v13087_v35 }
 0x5d3   :  { %v17173_v39 = vld [vmem:[#allocation4 + $0x8f4] sm:$0xf0] }
 0x5d4   :  { %v12798_v42 = vld [vmem:[#allocation4 + $0xad8] sm:$0xf]  ;;  %v12543_v33 = vor.u32 %v17173_v39, %v12542_v14  ;;  %7643 = vmatpush.bf16.msrb.mxu3 %v13343_v46 }
 0x5d5   :  { %v17237_v50 = vld [vmem:[#allocation4 + $0xaf4] sm:$0xf0] }
 0x5d6   :  { %v13054_v11 = vld [vmem:[#allocation4 + $0xcd8] sm:$0xf]  ;;  %v12799_v54 = vor.u32 %v17237_v50, %v12798_v42  ;;  %7605 = vmatpush.bf16.msrb.mxu0 %v12543_v33 }
 0x5d7   :  { %v17301_v2 = vld [vmem:[#allocation4 + $0xcf4] sm:$0xf0] }
 0x5d8   :  { %v13310_v52 = vld [vmem:[#allocation4 + $0xed8] sm:$0xf]  ;;  %v13055_v55 = vor.u32 %v17301_v2, %v13054_v11  ;;  %7618 = vmatpush.bf16.msrb.mxu1 %v12799_v54 }
 0x5d9   :  { %v17365_v48 = vld [vmem:[#allocation4 + $0xef4] sm:$0xf0] }
 0x5da   :  { %v12510_v57 = vld [vmem:[#allocation4 + $0x898] sm:$0xf]  ;;  %v13311_v59 = vor.u32 %v17365_v48, %v13310_v52  ;;  %7631 = vmatpush.bf16.msrb.mxu2 %v13055_v55  ;;  %v7391_v55 = vpop.f32.mrf.mxu3 }
 0x5db   :  { %v17165_v0 = vld [vmem:[#allocation4 + $0x8b4] sm:$0xf0] }
 0x5dc   :  { %v12766_v44 = vld [vmem:[#allocation4 + $0xa98] sm:$0xf]  ;;  %v12511_v12 = vor.u32 %v17165_v0, %v12510_v57  ;;  %7644 = vmatpush.bf16.msrb.mxu3 %v13311_v59 }
 0x5dd   :  { %v17229_v61 = vld [vmem:[#allocation4 + $0xab4] sm:$0xf0] }
 0x5de   :  { %v13022_v49 = vld [vmem:[#allocation4 + $0xc98] sm:$0xf]  ;;  %v12767_v8 = vor.u32 %v17229_v61, %v12766_v44  ;;  %7606 = vmatpush.bf16.msrb.mxu0 %v12511_v12 }
 0x5df   :  { %v17293_v10 = vld [vmem:[#allocation4 + $0xcb4] sm:$0xf0] }
 0x5e0   :  { %v13278_v58 = vld [vmem:[#allocation4 + $0xe98] sm:$0xf]  ;;  %v13023_v4 = vor.u32 %v17293_v10, %v13022_v49  ;;  %7619 = vmatpush.bf16.msrb.mxu1 %v12767_v8 }
 0x5e1   :  { %v17357_v51 = vld [vmem:[#allocation4 + $0xeb4] sm:$0xf0] }
 0x5e2   :  { %v12478_v15 = vld [vmem:[#allocation4 + $0x858] sm:$0xf]  ;;  %v13279_v18 = vor.u32 %v17357_v51, %v13278_v58  ;;  %7632 = vmatpush.bf16.msrb.mxu2 %v13023_v4 }
 0x5e3   :  { %v17157_v29 = vld [vmem:[#allocation4 + $0x874] sm:$0xf0] }
 0x5e4   :  { %v12734_v25 = vld [vmem:[#allocation4 + $0xa58] sm:$0xf]  ;;  %v12479_v14 = vor.u32 %v17157_v29, %v12478_v15  ;;  %7645 = vmatpush.bf16.msrb.mxu3 %v13279_v18 }
 0x5e5   :  { %v17221_v5 = vld [vmem:[#allocation4 + $0xa74] sm:$0xf0] }
 0x5e6   :  { %v12990_v31 = vld [vmem:[#allocation4 + $0xc58] sm:$0xf]  ;;  %v12735_v43 = vor.u32 %v17221_v5, %v12734_v25  ;;  %7607 = vmatpush.bf16.msrb.mxu0 %v12479_v14 }
 0x5e7   :  { %v17285_v32 = vld [vmem:[#allocation4 + $0xc74] sm:$0xf0] }
 0x5e8   :  { %v13246_v30 = vld [vmem:[#allocation4 + $0xe58] sm:$0xf]  ;;  %v12991_v46 = vor.u32 %v17285_v32, %v12990_v31  ;;  %7620 = vmatpush.bf16.msrb.mxu1 %v12735_v43 }
 0x5e9   :  { %v17349_v35 = vld [vmem:[#allocation4 + $0xe74] sm:$0xf0] }
 0x5ea   :  { %v12446_v39 = vld [vmem:[#allocation4 + $0x818] sm:$0xf]  ;;  %v13247_v52 = vor.u32 %v17349_v35, %v13246_v30  ;;  %7633 = vmatpush.bf16.msrb.mxu2 %v12991_v46 }
 0x5eb   :  { %v17149_v42 = vld [vmem:[#allocation4 + $0x834] sm:$0xf0] }
 0x5ec   :  { %v12702_v50 = vld [vmem:[#allocation4 + $0xa18] sm:$0xf]  ;;  %v12447_v28 = vor.u32 %v17149_v42, %v12446_v39  ;;  %7646 = vmatpush.bf16.msrb.mxu3 %v13247_v52 }
 0x5ed   :  { %v17213_v11 = vld [vmem:[#allocation4 + $0xa34] sm:$0xf0] }
 0x5ee   :  { %v12958_v2 = vld [vmem:[#allocation4 + $0xc18] sm:$0xf]  ;;  %v12703_v10 = vor.u32 %v17213_v11, %v12702_v50  ;;  %7608 = vmatpush.bf16.msrb.mxu0 %v12447_v28 }
 0x5ef   :  { %v17277_v48 = vld [vmem:[#allocation4 + $0xc34] sm:$0xf0] }
 0x5f0   :  { %v13214_v33 = vld [vmem:[#allocation4 + $0xe18] sm:$0xf]  ;;  %v12959_v62 = vor.u32 %v17277_v48, %v12958_v2  ;;  %7621 = vmatpush.bf16.msrb.mxu1 %v12703_v10 }
 0x5f1   :  { %v17341_v54 = vld [vmem:[#allocation4 + $0xe34] sm:$0xf0]  ;;  %7609 = vmatmul.bf16.vlgmr.msrb.gmra.mxu0 %v18560_v37 }
 0x5f2   :  { %v13694_v57 = vld [vmem:[#allocation4 + $0x11d8] sm:$0xf]  ;;  %v13215_v51 = vor.u32 %v17341_v54, %v13214_v33  ;;  %7634 = vmatpush.bf16.msrb.mxu2 %v12959_v62 }
 0x5f3   :  { %v17461_v0 = vld [vmem:[#allocation4 + $0x11f4] sm:$0xf0]  ;;  %7622 = vmatmul.bf16.vlgmr.msrb.gmra.mxu1 %v18564_v40 }
 0x5f4   :  { %v13950_v44 = vld [vmem:[#allocation4 + $0x13d8] sm:$0xf]  ;;  %v13695_v12 = vor.u32 %v17461_v0, %v13694_v57  ;;  %7647 = vmatpush.bf16.msrb.mxu3 %v13215_v51 }
 0x5f5   :  { %v17525_v59 = vld [vmem:[#allocation4 + $0x13f4] sm:$0xf0]  ;;  %7635 = vmatmul.bf16.vlgmr.msrb.gmra.mxu2 %v18558_v34 }
 0x5f6   :  { %v14206_v61 = vld [vmem:[#allocation4 + $0x15d8] sm:$0xf]  ;;  %v13951_v1 = vor.u32 %v17525_v59, %v13950_v44  ;;  %7653 = vmatpush.bf16.msra.mxu0 %v13695_v12 }
 0x5f7   :  { %v17589_v49 = vld [vmem:[#allocation4 + $0x15f4] sm:$0xf0]  ;;  %7648 = vmatmul.bf16.vlgmr.msrb.gmra.mxu3 %v18562_v38 }
 0x5f8   :  { %v14462_v45 = vld [vmem:[#allocation4 + $0x17d8] sm:$0xf]  ;;  %v14207_v8 = vor.u32 %v17589_v49, %v14206_v61  ;;  %7666 = vmatpush.bf16.msra.mxu1 %v13951_v1 }
 0x5f9   :  { %v17653_v58 = vld [vmem:[#allocation4 + $0x17f4] sm:$0xf0] }
 0x5fa   :  { %v13662_v4 = vld [vmem:[#allocation4 + $0x1198] sm:$0xf]  ;;  %v14463_v25 = vor.u32 %v17653_v58, %v14462_v45  ;;  %7679 = vmatpush.bf16.msra.mxu2 %v14207_v8  ;;  %v7402_v45 = vpop.f32.mrf.mxu0 }
 0x5fb   :  { %v17453_v15 = vld [vmem:[#allocation4 + $0x11b4] sm:$0xf0] }
 0x5fc   :  { %v13918_v29 = vld [vmem:[#allocation4 + $0x1398] sm:$0xf]  ;;  %v13663_v30 = vor.u32 %v17453_v15, %v13662_v4  ;;  %7692 = vmatpush.bf16.msra.mxu3 %v14463_v25  ;;  %v7403_v4 = vadd.f32 %v7402_v45, %v18860_v7  ;;  %v7415_v15 = vpop.f32.mrf.mxu1 }
 0x5fd   :  { %v17517_v22 = vld [vmem:[#allocation4 + $0x13b4] sm:$0xf0] }
 0x5fe   :  { %v14174_v18 = vld [vmem:[#allocation4 + $0x1598] sm:$0xf]  ;;  %v13919_v35 = vor.u32 %v17517_v22, %v13918_v29  ;;  %7654 = vmatpush.bf16.msra.mxu0 %v13663_v30 }
 0x5ff   :  { %v17581_v5 = vld [vmem:[#allocation4 + $0x15b4] sm:$0xf0] }
 0x600   :  { %v14430_v31 = vld [vmem:[#allocation4 + $0x1798] sm:$0xf]  ;;  %v14175_v14 = vor.u32 %v17581_v5, %v14174_v18  ;;  %7667 = vmatpush.bf16.msra.mxu1 %v13919_v35 }
 0x601   :  { %v17645_v32 = vld [vmem:[#allocation4 + $0x17b4] sm:$0xf0] }
 0x602   :  { %v13630_v39 = vld [vmem:[#allocation4 + $0x1158] sm:$0xf]  ;;  %v14431_v46 = vor.u32 %v17645_v32, %v14430_v31  ;;  %7680 = vmatpush.bf16.msra.mxu2 %v14175_v14  ;;  %v7416_v32 = vadd.f32 %v7415_v15, %v7403_v4 }
 0x603   :  { %v17445_v42 = vld [vmem:[#allocation4 + $0x1174] sm:$0xf0] }
 0x604   :  { %v13886_v43 = vld [vmem:[#allocation4 + $0x1358] sm:$0xf]  ;;  %v13631_v48 = vor.u32 %v17445_v42, %v13630_v39  ;;  %7693 = vmatpush.bf16.msra.mxu3 %v14431_v46  ;;  %v7428_v46 = vpop.f32.mrf.mxu2 }
 0x605   :  { %v17509_v50 = vld [vmem:[#allocation4 + $0x1374] sm:$0xf0] }
 0x606   :  { %v14142_v11 = vld [vmem:[#allocation4 + $0x1558] sm:$0xf]  ;;  %v13887_v33 = vor.u32 %v17509_v50, %v13886_v43  ;;  %7655 = vmatpush.bf16.msra.mxu0 %v13631_v48 }
 0x607   :  { %v17573_v2 = vld [vmem:[#allocation4 + $0x1574] sm:$0xf0] }
 0x608   :  { %v14398_v53 = vld [vmem:[#allocation4 + $0x1758] sm:$0xf]  ;;  %v14143_v54 = vor.u32 %v17573_v2, %v14142_v11  ;;  %7668 = vmatpush.bf16.msra.mxu1 %v13887_v33 }
 0x609   :  { %v17637_v52 = vld [vmem:[#allocation4 + $0x1774] sm:$0xf0] }
 0x60a   :  { %v13598_v55 = vld [vmem:[#allocation4 + $0x1118] sm:$0xf]  ;;  %v14399_v44 = vor.u32 %v17637_v52, %v14398_v53  ;;  %7681 = vmatpush.bf16.msra.mxu2 %v14143_v54  ;;  %v7429_v53 = vadd.f32 %v7428_v46, %v7416_v32  ;;  %v7441_v52 = vpop.f32.mrf.mxu3 }
 0x60b   :  { %v17437_v57 = vld [vmem:[#allocation4 + $0x1134] sm:$0xf0] }
 0x60c   :  { %v13854_v0 = vld [vmem:[#allocation4 + $0x1318] sm:$0xf]  ;;  %v13599_v62 = vor.u32 %v17437_v57, %v13598_v55  ;;  %7694 = vmatpush.bf16.msra.mxu3 %v14399_v44  ;;  %v18867_v55 = vadd.f32 %v7441_v52, %v7429_v53  ;;  %v7404_v57 = vpop.f32.mrf.mxu0 }
 0x60d   :  { %v17501_v28 = vld [vmem:[#allocation4 + $0x1334] sm:$0xf0] }
 0x60e   :  { %v14110_v59 = vld [vmem:[#allocation4 + $0x1518] sm:$0xf]  ;;  %v13855_v58 = vor.u32 %v17501_v28, %v13854_v0  ;;  %7656 = vmatpush.bf16.msra.mxu0 %v13599_v62 }
 0x60f   :  { %v17565_v61 = vld [vmem:[#allocation4 + $0x1534] sm:$0xf0] }
 0x610   :  { %v14366_v49 = vld [vmem:[#allocation4 + $0x1718] sm:$0xf]  ;;  %v14111_v51 = vor.u32 %v17565_v61, %v14110_v59  ;;  %7669 = vmatpush.bf16.msra.mxu1 %v13855_v58 }
 0x611   :  { %v17629_v10 = vld [vmem:[#allocation4 + $0x1734] sm:$0xf0] }
 0x612   :  { %v13566_v12 = vld [vmem:[#allocation4 + $0x10d8] sm:$0xf]  ;;  %v14367_v29 = vor.u32 %v17629_v10, %v14366_v49  ;;  %7682 = vmatpush.bf16.msra.mxu2 %v14111_v51  ;;  %v7417_v49 = vpop.f32.mrf.mxu1 }
 0x613   :  { %v17429_v1 = vld [vmem:[#allocation4 + $0x10f4] sm:$0xf0] }
 0x614   :  { %v13822_v8 = vld [vmem:[#allocation4 + $0x12d8] sm:$0xf]  ;;  %v13567_v30 = vor.u32 %v17429_v1, %v13566_v12  ;;  %7695 = vmatpush.bf16.msra.mxu3 %v14367_v29 }
 0x615   :  { %v17493_v25 = vld [vmem:[#allocation4 + $0x12f4] sm:$0xf0] }
 0x616   :  { %v14078_v22 = vld [vmem:[#allocation4 + $0x14d8] sm:$0xf]  ;;  %v13823_v35 = vor.u32 %v17493_v25, %v13822_v8  ;;  %7657 = vmatpush.bf16.msra.mxu0 %v13567_v30 }
 0x617   :  { %v17557_v18 = vld [vmem:[#allocation4 + $0x14f4] sm:$0xf0] }
 0x618   :  { %v14334_v5 = vld [vmem:[#allocation4 + $0x16d8] sm:$0xf]  ;;  %v14079_v14 = vor.u32 %v17557_v18, %v14078_v22  ;;  %7670 = vmatpush.bf16.msra.mxu1 %v13823_v35 }
 0x619   :  { %v17621_v31 = vld [vmem:[#allocation4 + $0x16f4] sm:$0xf0] }
 0x61a   :  { %v13534_v39 = vld [vmem:[#allocation4 + $0x1098] sm:$0xf]  ;;  %v14335_v7 = vor.u32 %v17621_v31, %v14334_v5  ;;  %7683 = vmatpush.bf16.msra.mxu2 %v14079_v14  ;;  %v7430_v5 = vpop.f32.mrf.mxu2  ;;  %v7443_v14 = vpop.f32.mrf.mxu3 }
 0x61b   :  { %v17421_v42 = vld [vmem:[#allocation4 + $0x10b4] sm:$0xf0] }
 0x61c   :  { %v13790_v43 = vld [vmem:[#allocation4 + $0x1298] sm:$0xf]  ;;  %v13535_v54 = vor.u32 %v17421_v42, %v13534_v39  ;;  %7696 = vmatpush.bf16.msra.mxu3 %v14335_v7 }
 0x61d   :  { %v17485_v50 = vld [vmem:[#allocation4 + $0x12b4] sm:$0xf0] }
 0x61e   :  { %v14046_v11 = vld [vmem:[#allocation4 + $0x1498] sm:$0xf]  ;;  %v13791_v0 = vor.u32 %v17485_v50, %v13790_v43  ;;  %7658 = vmatpush.bf16.msra.mxu0 %v13535_v54 }
 0x61f   :  { %v17549_v2 = vld [vmem:[#allocation4 + $0x14b4] sm:$0xf0] }
 0x620   :  { %v14302_v48 = vld [vmem:[#allocation4 + $0x1698] sm:$0xf]  ;;  %v14047_v44 = vor.u32 %v17549_v2, %v14046_v11  ;;  %7671 = vmatpush.bf16.msra.mxu1 %v13791_v0 }
 0x621   :  { %v17613_v33 = vld [vmem:[#allocation4 + $0x16b4] sm:$0xf0] }
 0x622   :  { %v13502_v28 = vld [vmem:[#allocation4 + $0x1058] sm:$0xf]  ;;  %v14303_v10 = vor.u32 %v17613_v33, %v14302_v48  ;;  %7684 = vmatpush.bf16.msra.mxu2 %v14047_v44  ;;  %v7989_v33 = vrot.slane %v18854_v60, 4 }
 0x623   :  { %v17413_v59 = vld [vmem:[#allocation4 + $0x1074] sm:$0xf0] }
 0x624   :  { %v13758_v61 = vld [vmem:[#allocation4 + $0x1258] sm:$0xf]  ;;  %v13503_v1 = vor.u32 %v17413_v59, %v13502_v28  ;;  %7697 = vmatpush.bf16.msra.mxu3 %v14303_v10 }
 0x625   :  { %v17477_v62 = vld [vmem:[#allocation4 + $0x1274] sm:$0xf0] }
 0x626   :  { %v14014_v45 = vld [vmem:[#allocation4 + $0x1458] sm:$0xf]  ;;  %v13759_v15 = vor.u32 %v17477_v62, %v13758_v61  ;;  %7659 = vmatpush.bf16.msra.mxu0 %v13503_v1 }
 0x627   :  { %v17541_v58 = vld [vmem:[#allocation4 + $0x1474] sm:$0xf0] }
 0x628   :  { %v14270_v51 = vld [vmem:[#allocation4 + $0x1658] sm:$0xf]  ;;  %v14015_v29 = vor.u32 %v17541_v58, %v14014_v45  ;;  %7672 = vmatpush.bf16.msra.mxu1 %v13759_v15 }
 0x629   :  { %v17605_v12 = vld [vmem:[#allocation4 + $0x1674] sm:$0xf0] }
 0x62a   :  { %v13470_v8 = vld [vmem:[#allocation4 + $0x1018] sm:$0xf]  ;;  %v14271_v31 = vor.u32 %v17605_v12, %v14270_v51  ;;  %7685 = vmatpush.bf16.msra.mxu2 %v14015_v29  ;;  %v7990_v12 = vadd.f32 %v7989_v33, %v18854_v60 }
 0x62b   :  { %v17405_v4 = vld [vmem:[#allocation4 + $0x1034] sm:$0xf0] }
 0x62c   :  { %v13726_v25 = vld [vmem:[#allocation4 + $0x1218] sm:$0xf]  ;;  %v13471_v46 = vor.u32 %v17405_v4, %v13470_v8  ;;  %7698 = vmatpush.bf16.msra.mxu3 %v14271_v31 }
 0x62d   :  { %v17469_v22 = vld [vmem:[#allocation4 + $0x1234] sm:$0xf0] }
 0x62e   :  { %v13982_v18 = vld [vmem:[#allocation4 + $0x1418] sm:$0xf]  ;;  %v13727_v2 = vor.u32 %v17469_v22, %v13726_v25  ;;  %7660 = vmatpush.bf16.msra.mxu0 %v13471_v46 }
 0x62f   :  { %v17533_v32 = vld [vmem:[#allocation4 + $0x1434] sm:$0xf0] }
 0x630   :  { %v14238_v30 = vld [vmem:[#allocation4 + $0x1618] sm:$0xf]  ;;  %v13983_v53 = vor.u32 %v17533_v32, %v13982_v18  ;;  %7673 = vmatpush.bf16.msra.mxu1 %v13727_v2 }
 0x631   :  { %v17597_v35 = vld [vmem:[#allocation4 + $0x1634] sm:$0xf0]  ;;  %7661 = vmatmul.bf16.vlgmr.msra.gmra.mxu0 %v18570_v19 }
 0x632   :  { %v14718_v39 = vld [vmem:[#allocation4 + $0x19d8] sm:$0xf]  ;;  %v14239_v54 = vor.u32 %v17597_v35, %v14238_v30  ;;  %7686 = vmatpush.bf16.msra.mxu2 %v13983_v53  ;;  %v7991_v35 = vrot.slane %v7990_v12, 2 }
 0x633   :  { %v17717_v42 = vld [vmem:[#allocation4 + $0x19f4] sm:$0xf0]  ;;  %7674 = vmatmul.bf16.vlgmr.msra.gmra.mxu1 %v18574_v24 }
 0x634   :  { %v14974_v43 = vld [vmem:[#allocation4 + $0x1bd8] sm:$0xf]  ;;  %v14719_v57 = vor.u32 %v17717_v42, %v14718_v39  ;;  %7699 = vmatpush.bf16.msra.mxu3 %v14239_v54  ;;  %v7992_v54 = vadd.f32 %v7991_v35, %v7990_v12 }
 0x635   :  { %v17781_v7 = vld [vmem:[#allocation4 + $0x1bf4] sm:$0xf0]  ;;  %7687 = vmatmul.bf16.vlgmr.msra.gmra.mxu2 %v18572_v23 }
 0x636   :  { %v15230_v50 = vld [vmem:[#allocation4 + $0x1dd8] sm:$0xf]  ;;  %v14975_v0 = vor.u32 %v17781_v7, %v14974_v43  ;;  %7705 = vmatpush.bf16.msrb.mxu0 %v14719_v57 }
 0x637   :  { %v17845_v11 = vld [vmem:[#allocation4 + $0x1df4] sm:$0xf0]  ;;  %7700 = vmatmul.bf16.vlgmr.msra.gmra.mxu3 %v18576_v27 }
 0x638   :  { %v15486_v52 = vld [vmem:[#allocation4 + $0x1fd8] sm:$0xf]  ;;  %v15231_v44 = vor.u32 %v17845_v11, %v15230_v50  ;;  %7718 = vmatpush.bf16.msrb.mxu1 %v14975_v0 }
 0x639   :  { %v17909_v48 = vld [vmem:[#allocation4 + $0x1ff4] sm:$0xf0] }
 0x63a   :  { %v14686_v28 = vld [vmem:[#allocation4 + $0x1998] sm:$0xf]  ;;  %v15487_v49 = vor.u32 %v17909_v48, %v15486_v52  ;;  %7731 = vmatpush.bf16.msrb.mxu2 %v15231_v44  ;;  %v7454_v52 = vpop.f32.mrf.mxu0  ;;  %v7467_v44 = vpop.f32.mrf.mxu1 }
 0x63b   :  { %v17709_v59 = vld [vmem:[#allocation4 + $0x19b4] sm:$0xf0]  ;;  %v7455_v57 = vadd.f32 %v7454_v52, %v18867_v55 }
 0x63c   :  { %v14942_v61 = vld [vmem:[#allocation4 + $0x1b98] sm:$0xf]  ;;  %v14687_v1 = vor.u32 %v17709_v59, %v14686_v28  ;;  %7744 = vmatpush.bf16.msrb.mxu3 %v15487_v49 }
 0x63d   :  { %v17773_v10 = vld [vmem:[#allocation4 + $0x1bb4] sm:$0xf0] }
 0x63e   :  { %v15198_v62 = vld [vmem:[#allocation4 + $0x1d98] sm:$0xf]  ;;  %v14943_v8 = vor.u32 %v17773_v10, %v14942_v61  ;;  %7706 = vmatpush.bf16.msrb.mxu0 %v14687_v1 }
 0x63f   :  { %v17837_v45 = vld [vmem:[#allocation4 + $0x1db4] sm:$0xf0] }
 0x640   :  { %v15454_v58 = vld [vmem:[#allocation4 + $0x1f98] sm:$0xf]  ;;  %v15199_v4 = vor.u32 %v17837_v45, %v15198_v62  ;;  %7719 = vmatpush.bf16.msrb.mxu1 %v14943_v8  ;;  %v7468_v45 = vadd.f32 %v7467_v44, %v7455_v57 }
 0x641   :  { %v17901_v51 = vld [vmem:[#allocation4 + $0x1fb4] sm:$0xf0] }
 0x642   :  { %v14654_v15 = vld [vmem:[#allocation4 + $0x1958] sm:$0xf]  ;;  %v15455_v22 = vor.u32 %v17901_v51, %v15454_v58  ;;  %7732 = vmatpush.bf16.msrb.mxu2 %v15199_v4  ;;  %v7993_v4 = vrot.slane %v7992_v54, 1 }
 0x643   :  { %v17701_v29 = vld [vmem:[#allocation4 + $0x1974] sm:$0xf0] }
 0x644   :  { %v14910_v25 = vld [vmem:[#allocation4 + $0x1b58] sm:$0xf]  ;;  %v14655_v14 = vor.u32 %v17701_v29, %v14654_v15  ;;  %7745 = vmatpush.bf16.msrb.mxu3 %v15455_v22 }
 0x645   :  { %v17765_v18 = vld [vmem:[#allocation4 + $0x1b74] sm:$0xf0] }
 0x646   :  { %v15166_v5 = vld [vmem:[#allocation4 + $0x1d58] sm:$0xf]  ;;  %v14911_v39 = vor.u32 %v17765_v18, %v14910_v25  ;;  %7707 = vmatpush.bf16.msrb.mxu0 %v14655_v14 }
 0x647   :  { %v17829_v31 = vld [vmem:[#allocation4 + $0x1d74] sm:$0xf0] }
 0x648   :  { %v15422_v32 = vld [vmem:[#allocation4 + $0x1f58] sm:$0xf]  ;;  %v15167_v42 = vor.u32 %v17829_v31, %v15166_v5  ;;  %7720 = vmatpush.bf16.msrb.mxu1 %v14911_v39  ;;  %v7480_v31 = vpop.f32.mrf.mxu2  ;;  %v7493_v39 = vpop.f32.mrf.mxu3 }
 0x649   :  { %v17893_v30 = vld [vmem:[#allocation4 + $0x1f74] sm:$0xf0]  ;;  %v7481_v14 = vadd.f32 %v7480_v31, %v7468_v45 }
 0x64a   :  { %v14622_v43 = vld [vmem:[#allocation4 + $0x1918] sm:$0xf]  ;;  %v15423_v50 = vor.u32 %v17893_v30, %v15422_v32  ;;  %7733 = vmatpush.bf16.msrb.mxu2 %v15167_v42 }
 0x64b   :  { %v17693_v46 = vld [vmem:[#allocation4 + $0x1934] sm:$0xf0] }
 0x64c   :  { %v14878_v7 = vld [vmem:[#allocation4 + $0x1b18] sm:$0xf]  ;;  %v14623_v0 = vor.u32 %v17693_v46, %v14622_v43  ;;  %7746 = vmatpush.bf16.msrb.mxu3 %v15423_v50  ;;  %v7456_v46 = vpop.f32.mrf.mxu0 }
 0x64d   :  { %v17757_v11 = vld [vmem:[#allocation4 + $0x1b34] sm:$0xf0]  ;;  %v17137_v46 = vld [vmem:[#allocation4 + $0x7dc] sm:$0xf] }
 0x64e   :  { %v15134_v2 = vld [vmem:[#allocation4 + $0x1d18] sm:$0xf]  ;;  %v14879_v28 = vor.u32 %v17757_v11, %v14878_v7  ;;  %7708 = vmatpush.bf16.msrb.mxu0 %v14623_v0  ;;  %v7994_v7 = vadd.f32 %v7993_v4, %v7992_v54  ;;  %v7469_v11 = vpop.f32.mrf.mxu1 }
 0x64f   :  { %v17821_v53 = vld [vmem:[#allocation4 + $0x1d34] sm:$0xf0] }
 0x650   :  { %v15390_v48 = vld [vmem:[#allocation4 + $0x1f18] sm:$0xf]  ;;  %v15135_v59 = vor.u32 %v17821_v53, %v15134_v2  ;;  %7721 = vmatpush.bf16.msrb.mxu1 %v14879_v28  ;;  %v18876_v2 = vadd.f32 %v7493_v39, %v7481_v14  ;;  %v8024_v45 = vmul.f32 %v18652_v3, %v7994_v7  ;;  %v7495_v31 = vpop.f32.mrf.mxu3  ;;  %v12160_v14 = vld [vmem:[#allocation4 + $0x5f8] sm:$0xf0] }
 0x651   :  { %v17885_v33 = vld [vmem:[#allocation4 + $0x1f34] sm:$0xf0]  ;;  %v12416_v7 = vld [vmem:[#allocation4 + $0x7f8] sm:$0xf0] }
 0x652   :  { %v14590_v61 = vld [vmem:[#allocation4 + $0x18d8] sm:$0xf]  ;;  %v15391_v62 = vor.u32 %v17885_v33, %v15390_v48  ;;  %7734 = vmatpush.bf16.msrb.mxu2 %v15135_v59  ;;  %v18880_v39 = vsub.f32 %v18854_v60, %v8024_v45  ;;  %v12128_v60 = vld [vmem:[#allocation4 + $0x5b8] sm:$0xf0] }
 0x653   :  { %v17685_v49 = vld [vmem:[#allocation4 + $0x18f4] sm:$0xf0]  ;;  %v16929_v45 = vld [vmem:[#allocation4 + $0x15c] sm:$0xf] }
 0x654   :  { %v14846_v10 = vld [vmem:[#allocation4 + $0x1ad8] sm:$0xf]  ;;  %v14591_v55 = vor.u32 %v17685_v49, %v14590_v61  ;;  %7747 = vmatpush.bf16.msrb.mxu3 %v15391_v62  ;;  %v11552_v31 = vld [vmem:[#allocation4 + $0x138] sm:$0xf0] }
 0x655   :  { %v17749_v58 = vld [vmem:[#allocation4 + $0x1af4] sm:$0xf0] }
 0x656   :  { %v15102_v51 = vld [vmem:[#allocation4 + $0x1cd8] sm:$0xf]  ;;  %v14847_v15 = vor.u32 %v17749_v58, %v14846_v10  ;;  %7709 = vmatpush.bf16.msrb.mxu0 %v14591_v55 }
 0x657   :  { %v17813_v1 = vld [vmem:[#allocation4 + $0x1cf4] sm:$0xf0] }
 0x658   :  { %v15358_v8 = vld [vmem:[#allocation4 + $0x1ed8] sm:$0xf]  ;;  %v15103_v29 = vor.u32 %v17813_v1, %v15102_v51  ;;  %7722 = vmatpush.bf16.msrb.mxu1 %v14847_v15 }
 0x659   :  { %v17877_v12 = vld [vmem:[#allocation4 + $0x1ef4] sm:$0xf0] }
 0x65a   :  { %v14558_v25 = vld [vmem:[#allocation4 + $0x1898] sm:$0xf]  ;;  %v15359_v5 = vor.u32 %v17877_v12, %v15358_v8  ;;  %7735 = vmatpush.bf16.msrb.mxu2 %v15103_v29 }
 0x65b   :  { %v17677_v22 = vld [vmem:[#allocation4 + $0x18b4] sm:$0xf0] }
 0x65c   :  { %v14814_v18 = vld [vmem:[#allocation4 + $0x1a98] sm:$0xf]  ;;  %v14559_v50 = vor.u32 %v17677_v22, %v14558_v25  ;;  %7748 = vmatpush.bf16.msrb.mxu3 %v15359_v5  ;;  %v7482_v25 = vpop.f32.mrf.mxu2  ;;  %v16945_v22 = vld [vmem:[#allocation4 + $0x1dc] sm:$0xf] }
 0x65d   :  { %v17741_v32 = vld [vmem:[#allocation4 + $0x1ab4] sm:$0xf0]  ;;  %v17009_v5 = vld [vmem:[#allocation4 + $0x3dc] sm:$0xf] }
 0x65e   :  { %v15070_v30 = vld [vmem:[#allocation4 + $0x1c98] sm:$0xf]  ;;  %v14815_v53 = vor.u32 %v17741_v32, %v14814_v18  ;;  %7710 = vmatpush.bf16.msrb.mxu0 %v14559_v50  ;;  %v11648_v18 = vld [vmem:[#allocation4 + $0x1f8] sm:$0xf0] }
 0x65f   :  { %v17805_v35 = vld [vmem:[#allocation4 + $0x1cb4] sm:$0xf0]  ;;  %v11651_v11 = vor.u32 %v16945_v22, %v11648_v18 }
 0x660   :  { %v15326_v42 = vld [vmem:[#allocation4 + $0x1e98] sm:$0xf]  ;;  %v15071_v52 = vor.u32 %v17805_v35, %v15070_v30  ;;  %7723 = vmatpush.bf16.msrb.mxu1 %v14815_v53  ;;  %v11904_v30 = vld [vmem:[#allocation4 + $0x3f8] sm:$0xf0] }
 0x661   :  { %v17869_v43 = vld [vmem:[#allocation4 + $0x1eb4] sm:$0xf0]  ;;  %v17073_v35 = vld [vmem:[#allocation4 + $0x5dc] sm:$0xf]  ;;  %v11907_v53 = vor.u32 %v17009_v5, %v11904_v30 }
 0x662   :  { %v14526_v48 = vld [vmem:[#allocation4 + $0x1858] sm:$0xf]  ;;  %v15327_v0 = vor.u32 %v17869_v43, %v15326_v42  ;;  %7736 = vmatpush.bf16.msrb.mxu2 %v15071_v52  ;;  %v12163_v52 = vor.u32 %v17073_v35, %v12160_v14  ;;  %v16921_v5 = vld [vmem:[#allocation4 + $0x11c] sm:$0xf] }
 0x663   :  { %v17669_v33 = vld [vmem:[#allocation4 + $0x1874] sm:$0xf0]  ;;  %v11808_v35 = vld [vmem:[#allocation4 + $0x338] sm:$0xf0] }
 0x664   :  { %v14782_v57 = vld [vmem:[#allocation4 + $0x1a58] sm:$0xf]  ;;  %v14527_v54 = vor.u32 %v17669_v33, %v14526_v48  ;;  %7749 = vmatpush.bf16.msrb.mxu3 %v15327_v0  ;;  %v16937_v48 = vld [vmem:[#allocation4 + $0x19c] sm:$0xf]  ;;  %v12419_v0 = vor.u32 %v17137_v46, %v12416_v7  ;;  %v7506_v46 = vpop.f32.mrf.mxu0 }
 0x665   :  { %v17733_v44 = vld [vmem:[#allocation4 + $0x1a74] sm:$0xf0]  ;;  %v11616_v33 = vld [vmem:[#allocation4 + $0x1b8] sm:$0xf0] }
 0x666   :  { %v15038_v28 = vld [vmem:[#allocation4 + $0x1c58] sm:$0xf]  ;;  %v14783_v58 = vor.u32 %v17733_v44, %v14782_v57  ;;  %7711 = vmatpush.bf16.msrb.mxu0 %v14527_v54  ;;  %v17001_v57 = vld [vmem:[#allocation4 + $0x39c] sm:$0xf]  ;;  %v11619_v54 = vor.u32 %v16937_v48, %v11616_v33 }
 0x667   :  { %v17797_v59 = vld [vmem:[#allocation4 + $0x1c74] sm:$0xf0]  ;;  %v11872_v44 = vld [vmem:[#allocation4 + $0x3b8] sm:$0xf0] }
 0x668   :  { %v15294_v61 = vld [vmem:[#allocation4 + $0x1e58] sm:$0xf]  ;;  %v15039_v51 = vor.u32 %v17797_v59, %v15038_v28  ;;  %7724 = vmatpush.bf16.msrb.mxu1 %v14783_v58  ;;  %v17065_v28 = vld [vmem:[#allocation4 + $0x59c] sm:$0xf]  ;;  %v8040_v59 = vmul.f32 %v18880_v39, %v18880_v39 }
 0x669   :  { %v17861_v49 = vld [vmem:[#allocation4 + $0x1e74] sm:$0xf0]  ;;  %v11584_v58 = vld [vmem:[#allocation4 + $0x178] sm:$0xf0] }
 0x66a   :  { %v14494_v10 = vld [vmem:[#allocation4 + $0x1818] sm:$0xf]  ;;  %v15295_v4 = vor.u32 %v17861_v49, %v15294_v61  ;;  %7737 = vmatpush.bf16.msrb.mxu2 %v15039_v51  ;;  %v17129_v61 = vld [vmem:[#allocation4 + $0x79c] sm:$0xf]  ;;  %v11587_v25 = vor.u32 %v16929_v45, %v11584_v58 }
 0x66b   :  { %v17661_v62 = vld [vmem:[#allocation4 + $0x1834] sm:$0xf0]  ;;  %v12384_v49 = vld [vmem:[#allocation4 + $0x7b8] sm:$0xf0] }
 0x66c   :  { %v14750_v1 = vld [vmem:[#allocation4 + $0x1a18] sm:$0xf]  ;;  %v14495_v32 = vor.u32 %v17661_v62, %v14494_v10  ;;  %7750 = vmatpush.bf16.msrb.mxu3 %v15295_v4  ;;  %v11875_v10 = vor.u32 %v17001_v57, %v11872_v44  ;;  %v12131_v62 = vor.u32 %v17065_v28, %v12128_v60  ;;  %v16993_v51 = vld [vmem:[#allocation4 + $0x35c] sm:$0xf] }
 0x66d   :  { %v17725_v8 = vld [vmem:[#allocation4 + $0x1a34] sm:$0xf0]  ;;  %v12096_v4 = vld [vmem:[#allocation4 + $0x578] sm:$0xf0] }
 0x66e   :  { %v15006_v12 = vld [vmem:[#allocation4 + $0x1c18] sm:$0xf]  ;;  %v14751_v42 = vor.u32 %v17725_v8, %v14750_v1  ;;  %7712 = vmatpush.bf16.msrb.mxu0 %v14495_v32  ;;  %v12387_v1 = vor.u32 %v17129_v61, %v12384_v49  ;;  %v11840_v8 = vld [vmem:[#allocation4 + $0x378] sm:$0xf0] }
 0x66f   :  { %v17789_v55 = vld [vmem:[#allocation4 + $0x1c34] sm:$0xf0]  ;;  %v11843_v22 = vor.u32 %v16993_v51, %v11840_v8  ;;  %v16985_v32 = vld [vmem:[#allocation4 + $0x31c] sm:$0xf] }
 0x670   :  { %v15262_v15 = vld [vmem:[#allocation4 + $0x1e18] sm:$0xf]  ;;  %v15007_v43 = vor.u32 %v17789_v55, %v15006_v12  ;;  %7725 = vmatpush.bf16.msrb.mxu1 %v14751_v42  ;;  %v17057_v12 = vld [vmem:[#allocation4 + $0x55c] sm:$0xf]  ;;  %v8068_v55 = vrot.slane %v8040_v59, 4  ;;  %v11811_v48 = vor.u32 %v16985_v32, %v11808_v35  ;;  %v7508_v32 = vpop.f32.mrf.mxu0 }
 0x671   :  { %v17853_v29 = vld [vmem:[#allocation4 + $0x1e34] sm:$0xf0]  ;;  %7713 = vmatmul.bf16.vlgmr.msrb.gmra.mxu0 %v18582_v13  ;;  %v12099_v18 = vor.u32 %v17057_v12, %v12096_v4  ;;  %v17049_v14 = vld [vmem:[#allocation4 + $0x51c] sm:$0xf]  ;;  %v7532_v4 = vpop.f32.mrf.mxu2 }
 0x672   :  { %v15263_v50 = vor.u32 %v17853_v29, %v15262_v15  ;;  %7738 = vmatpush.bf16.msrb.mxu2 %v15007_v43  ;;  %7757 = vmatpush.bf16.msra.mxu0 %v11651_v11  ;;  %v17121_v15 = vld [vmem:[#allocation4 + $0x75c] sm:$0xf]  ;;  %v8069_v43 = vadd.f32 %v8068_v55, %v8040_v59  ;;  %v7507_v11 = vadd.f32 %v7506_v46, %v18876_v2 }
 0x673   :  { %7726 = vmatmul.bf16.vlgmr.msrb.gmra.mxu1 %v18586_v21  ;;  %v12352_v29 = vld [vmem:[#allocation4 + $0x778] sm:$0xf0] }
 0x674   :  { %7751 = vmatpush.bf16.msrb.mxu3 %v15263_v50  ;;  %7770 = vmatpush.bf16.msra.mxu1 %v11907_v53  ;;  %v12355_v30 = vor.u32 %v17121_v15, %v12352_v29  ;;  %v12064_v42 = vld [vmem:[#allocation4 + $0x538] sm:$0xf0]  ;;  %v11555_v53 = vor.u32 %v16921_v5, %v11552_v31 }
 0x675   :  { %7739 = vmatmul.bf16.vlgmr.msrb.gmra.mxu2 %v18584_v20  ;;  %v17113_v7 = vld [vmem:[#allocation4 + $0x71c] sm:$0xf]  ;;  %v12067_v33 = vor.u32 %v17049_v14, %v12064_v42 }
 0x676   :  { %7783 = vmatpush.bf16.msra.mxu2 %v12163_v52  ;;  %7758 = vmatpush.bf16.msra.mxu0 %v11619_v54  ;;  %v12320_v50 = vld [vmem:[#allocation4 + $0x738] sm:$0xf0]  ;;  %v7519_v52 = vpop.f32.mrf.mxu1  ;;  %v8070_v54 = vrot.slane %v8069_v43, 2 }
 0x677   :  { %7752 = vmatmul.bf16.vlgmr.msrb.gmra.mxu3 %v18588_v26  ;;  %v16913_v57 = vld [vmem:[#allocation4 + $0xdc] sm:$0xf]  ;;  %v12323_v28 = vor.u32 %v17113_v7, %v12320_v50  ;;  %v7520_v60 = vadd.f32 %v7519_v52, %v7507_v11 }
 0x678   :  { %7796 = vmatpush.bf16.msra.mxu3 %v12419_v0  ;;  %7771 = vmatpush.bf16.msra.mxu1 %v11875_v10  ;;  %v11520_v0 = vld [vmem:[#allocation4 + $0xf8] sm:$0xf0] }
 0x679   :  { %v16977_v44 = vld [vmem:[#allocation4 + $0x2dc] sm:$0xf]  ;;  %v11523_v2 = vor.u32 %v16913_v57, %v11520_v0 }
 0x67a   :  { %7784 = vmatpush.bf16.msra.mxu2 %v12131_v62  ;;  %7759 = vmatpush.bf16.msra.mxu0 %v11587_v25  ;;  %v11776_v61 = vld [vmem:[#allocation4 + $0x2f8] sm:$0xf0]  ;;  %v8071_v25 = vadd.f32 %v8070_v54, %v8069_v43 }
 0x67b   :  { %v17041_v59 = vld [vmem:[#allocation4 + $0x4dc] sm:$0xf]  ;;  %v11779_v45 = vor.u32 %v16977_v44, %v11776_v61 }
 0x67c   :  { %7797 = vmatpush.bf16.msra.mxu3 %v12387_v1  ;;  %7772 = vmatpush.bf16.msra.mxu1 %v11843_v22  ;;  %v12032_v49 = vld [vmem:[#allocation4 + $0x4f8] sm:$0xf0]  ;;  %v7533_v22 = vadd.f32 %v7532_v4, %v7520_v60 }
 0x67d   :  { %v17105_v10 = vld [vmem:[#allocation4 + $0x6dc] sm:$0xf]  ;;  %v12035_v58 = vor.u32 %v17041_v59, %v12032_v49 }
 0x67e   :  { %7785 = vmatpush.bf16.msra.mxu2 %v12099_v18  ;;  %v12288_v62 = vld [vmem:[#allocation4 + $0x6f8] sm:$0xf0]  ;;  %7760 = vmatpush.bf16.msra.mxu0 %v11555_v53  ;;  %v7545_v18 = vpop.f32.mrf.mxu3  ;;  %v7521_v35 = vpop.f32.mrf.mxu1 }
 0x67f   :  { %v16905_v51 = vld [vmem:[#allocation4 + $0x9c] sm:$0xf]  ;;  %v12291_v12 = vor.u32 %v17105_v10, %v12288_v62  ;;  %v18889_v14 = vadd.f32 %v7545_v18, %v7533_v22 }
 0x680   :  { %7798 = vmatpush.bf16.msra.mxu3 %v12355_v30  ;;  %7773 = vmatpush.bf16.msra.mxu1 %v11811_v48  ;;  %v11488_v1 = vld [vmem:[#allocation4 + $0xb8] sm:$0xf0] }
 0x681   :  { %v16969_v8 = vld [vmem:[#allocation4 + $0x29c] sm:$0xf]  ;;  %v11491_v30 = vor.u32 %v16905_v51, %v11488_v1  ;;  %v7995_v57 = vrot.slane %v18889_v14, 4 }
 0x682   :  { %7786 = vmatpush.bf16.msra.mxu2 %v12067_v33  ;;  %v11744_v55 = vld [vmem:[#allocation4 + $0x2b8] sm:$0xf0]  ;;  %7761 = vmatpush.bf16.msra.mxu0 %v11523_v2  ;;  %v8072_v33 = vrot.slane %v8071_v25, 1 }
 0x683   :  { %v17033_v15 = vld [vmem:[#allocation4 + $0x49c] sm:$0xf]  ;;  %v11747_v42 = vor.u32 %v16969_v8, %v11744_v55  ;;  %v7996_v49 = vadd.f32 %v7995_v57, %v18889_v14 }
 0x684   :  { %7799 = vmatpush.bf16.msra.mxu3 %v12323_v28  ;;  %v12000_v29 = vld [vmem:[#allocation4 + $0x4b8] sm:$0xf0]  ;;  %7774 = vmatpush.bf16.msra.mxu1 %v11779_v45 }
 0x685   :  { %v17097_v5 = vld [vmem:[#allocation4 + $0x69c] sm:$0xf]  ;;  %v12003_v46 = vor.u32 %v17033_v15, %v12000_v29  ;;  %v7997_v4 = vrot.slane %v7996_v49, 2 }
 0x686   :  { %v12256_v31 = vld [vmem:[#allocation4 + $0x6b8] sm:$0xf0]  ;;  %7787 = vmatpush.bf16.msra.mxu2 %v12035_v58  ;;  %7762 = vmatpush.bf16.msra.mxu0 %v11491_v30  ;;  %v7547_v29 = vpop.f32.mrf.mxu3 }
 0x687   :  { %v16897_v7 = vld [vmem:[#allocation4 + $0x5c] sm:$0xf]  ;;  %v12259_v53 = vor.u32 %v17097_v5, %v12256_v31  ;;  %v7998_v32 = vadd.f32 %v7997_v4, %v7996_v49 }
 0x688   :  { %v11456_v50 = vld [vmem:[#allocation4 + $0x78] sm:$0xf0]  ;;  %7800 = vmatpush.bf16.msra.mxu3 %v12291_v12  ;;  %7775 = vmatpush.bf16.msra.mxu1 %v11747_v42  ;;  %v7534_v12 = vpop.f32.mrf.mxu2 }
 0x689   :  { %v16961_v11 = vld [vmem:[#allocation4 + $0x25c] sm:$0xf]  ;;  %v11459_v28 = vor.u32 %v16897_v7, %v11456_v50  ;;  %v8073_v7 = vadd.f32 %v8072_v33, %v8071_v25 }
 0x68a   :  { %v11712_v43 = vld [vmem:[#allocation4 + $0x278] sm:$0xf0]  ;;  %7788 = vmatpush.bf16.msra.mxu2 %v12003_v46 }
 0x68b   :  { %v17025_v52 = vld [vmem:[#allocation4 + $0x45c] sm:$0xf]  ;;  %v11715_v54 = vor.u32 %v16961_v11, %v11712_v43  ;;  %7763 = vmatpush.bf16.msra.mxu0 %v11459_v28  ;;  %v7999_v43 = vrot.slane %v7998_v32, 1  ;;  %v8096_v25 = vmul.f32 %v8073_v7, %v18652_v3 }
 0x68c   :  { %v11968_v48 = vld [vmem:[#allocation4 + $0x478] sm:$0xf0]  ;;  %7801 = vmatpush.bf16.msra.mxu3 %v12259_v53 }
 0x68d   :  { %v17089_v0 = vld [vmem:[#allocation4 + $0x65c] sm:$0xf]  ;;  %v11971_v10 = vor.u32 %v17025_v52, %v11968_v48  ;;  %7776 = vmatpush.bf16.msra.mxu1 %v11715_v54  ;;  %v8000_v49 = vadd.f32 %v7999_v43, %v7998_v32 }
 0x68e   :  { %v12224_v44 = vld [vmem:[#allocation4 + $0x678] sm:$0xf0] }
 0x68f   :  { %v16889_v60 = vld [vmem:[#allocation4 + $0x1c] sm:$0xf]  ;;  %v12227_v58 = vor.u32 %v17089_v0, %v12224_v44  ;;  %7789 = vmatpush.bf16.msra.mxu2 %v11971_v10  ;;  %v8025_v10 = vmul.f32 %v18652_v3, %v8000_v49 }
 0x690   :  { %v11424_v61 = vld [vmem:[#allocation4 + $0x38] sm:$0xf0] }
 0x691   :  { %v16953_v59 = vld [vmem:[#allocation4 + $0x21c] sm:$0xf]  ;;  %v11427_v22 = vor.u32 %v16889_v60, %v11424_v61  ;;  %7802 = vmatpush.bf16.msra.mxu3 %v12227_v58 }
 0x692   :  { %v11680_v62 = vld [vmem:[#allocation4 + $0x238] sm:$0xf0] }
 0x693   :  { %v17017_v2 = vld [vmem:[#allocation4 + $0x41c] sm:$0xf]  ;;  %v11683_v30 = vor.u32 %v16953_v59, %v11680_v62  ;;  %7764 = vmatpush.bf16.msra.mxu0 %v11427_v22  ;;  %v18901_v22 = vadd.f32 1e-05, %v8096_v25 }
 0x694   :  { %v11936_v45 = vld [vmem:[#allocation4 + $0x438] sm:$0xf0] }
 0x695   :  { %v17081_v51 = vld [vmem:[#allocation4 + $0x61c] sm:$0xf]  ;;  %v11939_v35 = vor.u32 %v17017_v2, %v11936_v45  ;;  %7777 = vmatpush.bf16.msra.mxu1 %v11683_v30  ;;  %18284 = vrsqrt.f32 %v18901_v22  ;;  %vm8161_vm1 = vweird.f32 %v18901_v22 }
 0x696   :  { %v12192_v1 = vld [vmem:[#allocation4 + $0x638] sm:$0xf0]  ;;  %7765 = vmatmul.bf16.vlgmr.msra.gmra.mxu0 %v18549_v9 }
 0x697   :  { %v17201_v8 = vld [vmem:[#allocation4 + $0x9dc] sm:$0xf]  ;;  %v12195_v50 = vor.u32 %v17081_v51, %v12192_v1  ;;  %7790 = vmatpush.bf16.msra.mxu2 %v11939_v35 }
 0x698   :  { %v12672_v55 = vld [vmem:[#allocation4 + $0x9f8] sm:$0xf0]  ;;  %7778 = vmatmul.bf16.vlgmr.msra.gmra.mxu1 %v18553_v17 }
 0x699   :  { %v17265_v15 = vld [vmem:[#allocation4 + $0xbdc] sm:$0xf]  ;;  %v12675_v11 = vor.u32 %v17201_v8, %v12672_v55  ;;  %7803 = vmatpush.bf16.msra.mxu3 %v12195_v50  ;;  %v18897_v55 = vsub.f32 %v18889_v14, %v8025_v10 }
 0x69a   :  { %v12928_v18 = vld [vmem:[#allocation4 + $0xbf8] sm:$0xf0]  ;;  %7791 = vmatmul.bf16.vlgmr.msra.gmra.mxu2 %v18546_v63 }
 0x69b   :  { %v17329_v5 = vld [vmem:[#allocation4 + $0xddc] sm:$0xf]  ;;  %v12931_v52 = vor.u32 %v17265_v15, %v12928_v18  ;;  %7809 = vmatpush.bf16.msrb.mxu0 %v12675_v11  ;;  %v7558_v11 = vpop.f32.mrf.mxu0 }
 0x69c   :  { %v13184_v31 = vld [vmem:[#allocation4 + $0xdf8] sm:$0xf0]  ;;  %7804 = vmatmul.bf16.vlgmr.msra.gmra.mxu3 %v18551_v16 }
 0x69d   :  { %v17393_v42 = vld [vmem:[#allocation4 + $0xfdc] sm:$0xf]  ;;  %v13187_v48 = vor.u32 %v17329_v5, %v13184_v31  ;;  %7822 = vmatpush.bf16.msrb.mxu1 %v12931_v52  ;;  %v8041_v5 = vmul.f32 %v18897_v55, %v18897_v55 }
 0x69e   :  { %v13440_v46 = vld [vmem:[#allocation4 + $0xff8] sm:$0xf0] }
 0x69f   :  { %v17193_v53 = vld [vmem:[#allocation4 + $0x99c] sm:$0xf]  ;;  %v13443_v44 = vor.u32 %v17393_v42, %v13440_v46  ;;  %7835 = vmatpush.bf16.msrb.mxu2 %v13187_v48  ;;  %v8074_v46 = vrot.slane %v8041_v5, 4 }
 0x6a0   :  { %v12640_v57 = vld [vmem:[#allocation4 + $0x9b8] sm:$0xf0] }
 0x6a1   :  { %v17257_v0 = vld [vmem:[#allocation4 + $0xb9c] sm:$0xf]  ;;  %v12643_v33 = vor.u32 %v17193_v53, %v12640_v57  ;;  %7848 = vmatpush.bf16.msrb.mxu3 %v13443_v44  ;;  %v8075_v53 = vadd.f32 %v8074_v46, %v8041_v5  ;;  %v7571_v44 = vpop.f32.mrf.mxu1  ;;  %v7597_v5 = vpop.f32.mrf.mxu3 }
 0x6a2   :  { %v12896_v28 = vld [vmem:[#allocation4 + $0xbb8] sm:$0xf0] }
 0x6a3   :  { %v17321_v60 = vld [vmem:[#allocation4 + $0xd9c] sm:$0xf]  ;;  %v12899_v62 = vor.u32 %v17257_v0, %v12896_v28  ;;  %7810 = vmatpush.bf16.msrb.mxu0 %v12643_v33  ;;  %v7572_v33 = vadd.f32 %v7571_v44, %v7558_v11 }
 0x6a4   :  { %v13152_v61 = vld [vmem:[#allocation4 + $0xdb8] sm:$0xf0] }
 0x6a5   :  { %v17385_v59 = vld [vmem:[#allocation4 + $0xf9c] sm:$0xf]  ;;  %v13155_v2 = vor.u32 %v17321_v60, %v13152_v61  ;;  %7823 = vmatpush.bf16.msrb.mxu1 %v12899_v62 }
 0x6a6   :  { %v13408_v54 = vld [vmem:[#allocation4 + $0xfb8] sm:$0xf0] }
 0x6a7   :  { %v17185_v45 = vld [vmem:[#allocation4 + $0x95c] sm:$0xf]  ;;  %v13411_v1 = vor.u32 %v17385_v59, %v13408_v54  ;;  %7836 = vmatpush.bf16.msrb.mxu2 %v13155_v2  ;;  %v8076_v59 = vrot.slane %v8075_v53, 2 }
 0x6a8   :  { %v12608_v58 = vld [vmem:[#allocation4 + $0x978] sm:$0xf0] }
 0x6a9   :  { %v17249_v51 = vld [vmem:[#allocation4 + $0xb5c] sm:$0xf]  ;;  %v12611_v18 = vor.u32 %v17185_v45, %v12608_v58  ;;  %7849 = vmatpush.bf16.msrb.mxu3 %v13411_v1  ;;  %v8077_v62 = vadd.f32 %v8076_v59, %v8075_v53  ;;  %v7573_v11 = vpop.f32.mrf.mxu1 }
 0x6aa   :  { %v12864_v8 = vld [vmem:[#allocation4 + $0xb78] sm:$0xf0] }
 0x6ab   :  { %v17313_v12 = vld [vmem:[#allocation4 + $0xd5c] sm:$0xf]  ;;  %v12867_v63 = vor.u32 %v17249_v51, %v12864_v8  ;;  %7811 = vmatpush.bf16.msrb.mxu0 %v12611_v18  ;;  %v7584_v8 = vpop.f32.mrf.mxu2 }
 0x6ac   :  { %v13120_v4 = vld [vmem:[#allocation4 + $0xd78] sm:$0xf0]  ;;  %v7585_v18 = vadd.f32 %v7584_v8, %v7572_v33 }
 0x6ad   :  { %v17377_v15 = vld [vmem:[#allocation4 + $0xf5c] sm:$0xf]  ;;  %v13123_v14 = vor.u32 %v17313_v12, %v13120_v4  ;;  %7824 = vmatpush.bf16.msrb.mxu1 %v12867_v63  ;;  %v18907_v63 = vpop.eup %18284 }
 0x6ae   :  { %v13376_v29 = vld [vmem:[#allocation4 + $0xf78] sm:$0xf0]  ;;  %v8156_v53 = vmul.f32 %v18907_v63, %v18901_v22  ;;  %vm8162_vm0 = vweird.f32 %v18907_v63 }
 0x6af   :  { %v17177_v31 = vld [vmem:[#allocation4 + $0x91c] sm:$0xf]  ;;  %v13379_v9 = vor.u32 %v17377_v15, %v13376_v29  ;;  %7837 = vmatpush.bf16.msrb.mxu2 %v13123_v14  ;;  %v8078_v14 = vrot.slane %v8077_v62, 1  ;;  %vm18933_vm3 = vmor %vm8161_vm1, %vm8162_vm0  ;;  %vm8218_vm0 = vcmask 1046534   ;;  %vm8220_vm1 = vcmask 1045508  }
 0x6b0   :  { %v12576_v32 = vld [vmem:[#allocation4 + $0x938] sm:$0xf0] }
 0x6b1   :  { %v17241_v30 = vld [vmem:[#allocation4 + $0xb1c] sm:$0xf]  ;;  %v12579_v17 = vor.u32 %v17177_v31, %v12576_v32  ;;  %7850 = vmatpush.bf16.msrb.mxu3 %v13379_v9  ;;  %v18909_v9 = vadd.f32 %v7597_v5, %v7585_v18 }
 0x6b2   :  { %v12832_v35 = vld [vmem:[#allocation4 + $0xb38] sm:$0xf0] }
 0x6b3   :  { %v17305_v16 = vld [vmem:[#allocation4 + $0xd1c] sm:$0xf]  ;;  %v12835_v43 = vor.u32 %v17241_v30, %v12832_v35  ;;  %7812 = vmatpush.bf16.msrb.mxu0 %v12579_v17  ;;  %v7560_v35 = vpop.f32.mrf.mxu0 }
 0x6b4   :  { %v13088_v42 = vld [vmem:[#allocation4 + $0xd38] sm:$0xf0] }
 0x6b5   :  { %v17369_v7 = vld [vmem:[#allocation4 + $0xf1c] sm:$0xf]  ;;  %v13091_v52 = vor.u32 %v17305_v16, %v13088_v42  ;;  %7825 = vmatpush.bf16.msrb.mxu1 %v12835_v43  ;;  %v8079_v16 = vadd.f32 %v8078_v14, %v8077_v62 }
 0x6b6   :  { %v13344_v50 = vld [vmem:[#allocation4 + $0xf38] sm:$0xf0] }
 0x6b7   :  { %v17169_v48 = vld [vmem:[#allocation4 + $0x8dc] sm:$0xf]  ;;  %v13347_v28 = vor.u32 %v17369_v7, %v13344_v50  ;;  %7838 = vmatpush.bf16.msrb.mxu2 %v13091_v52 }
 0x6b8   :  { %v12544_v57 = vld [vmem:[#allocation4 + $0x8f8] sm:$0xf0] }
 0x6b9   :  { %v17233_v0 = vld [vmem:[#allocation4 + $0xadc] sm:$0xf]  ;;  %v12547_v10 = vor.u32 %v17169_v48, %v12544_v57  ;;  %7851 = vmatpush.bf16.msrb.mxu3 %v13347_v28 }
 0x6ba   :  { %v12800_v60 = vld [vmem:[#allocation4 + $0xaf8] sm:$0xf0] }
 0x6bb   :  { %v17297_v61 = vld [vmem:[#allocation4 + $0xcdc] sm:$0xf]  ;;  %v12803_v2 = vor.u32 %v17233_v0, %v12800_v60  ;;  %7813 = vmatpush.bf16.msrb.mxu0 %v12547_v10  ;;  %v8097_v0 = vmul.f32 %v8079_v16, %v18652_v3 }
 0x6bc   :  { %v13056_v49 = vld [vmem:[#allocation4 + $0xcf8] sm:$0xf0] }
 0x6bd   :  { %v17361_v54 = vld [vmem:[#allocation4 + $0xedc] sm:$0xf]  ;;  %v13059_v45 = vor.u32 %v17297_v61, %v13056_v49  ;;  %7826 = vmatpush.bf16.msrb.mxu1 %v12803_v2  ;;  %v7586_v2 = vpop.f32.mrf.mxu2 }
 0x6be   :  { %v13312_v25 = vld [vmem:[#allocation4 + $0xef8] sm:$0xf0] }
 0x6bf   :  { %v17161_v58 = vld [vmem:[#allocation4 + $0x89c] sm:$0xf]  ;;  %v13315_v12 = vor.u32 %v17361_v54, %v13312_v25  ;;  %7839 = vmatpush.bf16.msrb.mxu2 %v13059_v45  ;;  %v18914_v54 = vadd.f32 1e-05, %v8097_v0  ;;  %v8157_v45 = vmul.f32 %v18907_v63, %v8156_v53 }
 0x6c0   :  { %v12512_v51 = vld [vmem:[#allocation4 + $0x8b8] sm:$0xf0] }
 0x6c1   :  { %v17225_v1 = vld [vmem:[#allocation4 + $0xa9c] sm:$0xf]  ;;  %v12515_v30 = vor.u32 %v17161_v58, %v12512_v51  ;;  %7852 = vmatpush.bf16.msrb.mxu3 %v13315_v12  ;;  %v7599_v12 = vpop.f32.mrf.mxu3  ;;  %18286 = vrsqrt.f32 %v18914_v54  ;;  %vm8171_vm4 = vweird.f32 %v18914_v54 }
 0x6c2   :  { %v12768_v4 = vld [vmem:[#allocation4 + $0xab8] sm:$0xf0] }
 0x6c3   :  { %v17289_v15 = vld [vmem:[#allocation4 + $0xc9c] sm:$0xf]  ;;  %v12771_v42 = vor.u32 %v17225_v1, %v12768_v4  ;;  %7814 = vmatpush.bf16.msrb.mxu0 %v12515_v30 }
 0x6c4   :  { %v13024_v29 = vld [vmem:[#allocation4 + $0xcb8] sm:$0xf0] }
 0x6c5   :  { %v17353_v31 = vld [vmem:[#allocation4 + $0xe9c] sm:$0xf]  ;;  %v13027_v46 = vor.u32 %v17289_v15, %v13024_v29  ;;  %7827 = vmatpush.bf16.msrb.mxu1 %v12771_v42  ;;  %v8158_v42 = vmul.f32 0.5, %v8157_v45 }
 0x6c6   :  { %v13280_v32 = vld [vmem:[#allocation4 + $0xeb8] sm:$0xf0] }
 0x6c7   :  { %v17153_v7 = vld [vmem:[#allocation4 + $0x85c] sm:$0xf]  ;;  %v13283_v43 = vor.u32 %v17353_v31, %v13280_v32  ;;  %7840 = vmatpush.bf16.msrb.mxu2 %v13027_v46 }
 0x6c8   :  { %v12480_v50 = vld [vmem:[#allocation4 + $0x878] sm:$0xf0] }
 0x6c9   :  { %v17217_v17 = vld [vmem:[#allocation4 + $0xa5c] sm:$0xf]  ;;  %v12483_v60 = vor.u32 %v17153_v7, %v12480_v50  ;;  %7853 = vmatpush.bf16.msrb.mxu3 %v13283_v43 }
 0x6ca   :  { %v12736_v52 = vld [vmem:[#allocation4 + $0xa78] sm:$0xf0] }
 0x6cb   :  { %v17281_v48 = vld [vmem:[#allocation4 + $0xc5c] sm:$0xf]  ;;  %v12739_v25 = vor.u32 %v17217_v17, %v12736_v52  ;;  %7815 = vmatpush.bf16.msrb.mxu0 %v12483_v60 }
 0x6cc   :  { %v12992_v57 = vld [vmem:[#allocation4 + $0xc78] sm:$0xf0] }
 0x6cd   :  { %v17345_v44 = vld [vmem:[#allocation4 + $0xe5c] sm:$0xf]  ;;  %v12995_v33 = vor.u32 %v17281_v48, %v12992_v57  ;;  %7828 = vmatpush.bf16.msrb.mxu1 %v12739_v25 }
 0x6ce   :  { %v13248_v28 = vld [vmem:[#allocation4 + $0xe78] sm:$0xf0] }
 0x6cf   :  { %v17145_v61 = vld [vmem:[#allocation4 + $0x81c] sm:$0xf]  ;;  %v13251_v58 = vor.u32 %v17345_v44, %v13248_v28  ;;  %7841 = vmatpush.bf16.msrb.mxu2 %v12995_v33  ;;  %v18918_v44 = vpop.eup %18286 }
 0x6d0   :  { %v12448_v49 = vld [vmem:[#allocation4 + $0x838] sm:$0xf0]  ;;  %vm8172_vm2 = vweird.f32 %v18918_v44 }
 0x6d1   :  { %v17209_v59 = vld [vmem:[#allocation4 + $0xa1c] sm:$0xf]  ;;  %v12451_v18 = vor.u32 %v17145_v61, %v12448_v49  ;;  %7854 = vmatpush.bf16.msrb.mxu3 %v13251_v58  ;;  %v8159_v61 = vsub.f32 1.5, %v8158_v42  ;;  %v8166_v49 = vmul.f32 %v18918_v44, %v18914_v54  ;;  %vm18944_vm6 = vmor %vm8171_vm4, %vm8172_vm2  ;;  %v7623_v54 = vpop.f32.mrf.mxu1  ;;  %vm8222_vm2 = vcmask 1043456  }
 0x6d2   :  { %v12704_v10 = vld [vmem:[#allocation4 + $0xa38] sm:$0xf0] }
 0x6d3   :  { %v17273_v62 = vld [vmem:[#allocation4 + $0xc1c] sm:$0xf]  ;;  %v12707_v32 = vor.u32 %v17209_v59, %v12704_v10  ;;  %7816 = vmatpush.bf16.msrb.mxu0 %v12451_v18  ;;  %v8167_v45 = vmul.f32 %v18918_v44, %v8166_v49 }
 0x6d4   :  { %v12960_v51 = vld [vmem:[#allocation4 + $0xc38] sm:$0xf0] }
 0x6d5   :  { %v17337_v1 = vld [vmem:[#allocation4 + $0xe1c] sm:$0xf]  ;;  %v12963_v30 = vor.u32 %v17273_v62, %v12960_v51  ;;  %7829 = vmatpush.bf16.msrb.mxu1 %v12707_v32 }
 0x6d6   :  { %v13216_v8 = vld [vmem:[#allocation4 + $0xe38] sm:$0xf0]  ;;  %7817 = vmatmul.bf16.vlgmr.msrb.gmra.mxu0 %v18560_v37 }
 0x6d7   :  { %v17457_v4 = vld [vmem:[#allocation4 + $0x11dc] sm:$0xf]  ;;  %v13219_v46 = vor.u32 %v17337_v1, %v13216_v8  ;;  %7842 = vmatpush.bf16.msrb.mxu2 %v12963_v30 }
 0x6d8   :  { %v13696_v15 = vld [vmem:[#allocation4 + $0x11f8] sm:$0xf0]  ;;  %7830 = vmatmul.bf16.vlgmr.msrb.gmra.mxu1 %v18564_v40 }
 0x6d9   :  { %v17521_v29 = vld [vmem:[#allocation4 + $0x13dc] sm:$0xf]  ;;  %v13699_v7 = vor.u32 %v17457_v4, %v13696_v15  ;;  %7855 = vmatpush.bf16.msrb.mxu3 %v13219_v46  ;;  %v8160_v15 = vmul.f32 %v18907_v63, %v8159_v61 }
 0x6da   :  { %v13952_v5 = vld [vmem:[#allocation4 + $0x13f8] sm:$0xf0]  ;;  %7843 = vmatmul.bf16.vlgmr.msrb.gmra.mxu2 %v18558_v34 }
 0x6db   :  { %v17585_v14 = vld [vmem:[#allocation4 + $0x15dc] sm:$0xf]  ;;  %v13955_v50 = vor.u32 %v17521_v29, %v13952_v5  ;;  %7861 = vmatpush.bf16.msra.mxu0 %v13699_v7  ;;  %v8168_v29 = vmul.f32 0.5, %v8167_v45  ;;  %v8164_v7 = vsel %vm18933_vm3, %v18907_v63, %v8160_v15 }
 0x6dc   :  { %v14208_v31 = vld [vmem:[#allocation4 + $0x15f8] sm:$0xf0]  ;;  %7856 = vmatmul.bf16.vlgmr.msrb.gmra.mxu3 %v18562_v38 }
 0x6dd   :  { %v17649_v35 = vld [vmem:[#allocation4 + $0x17dc] sm:$0xf]  ;;  %v14211_v17 = vor.u32 %v17585_v14, %v14208_v31  ;;  %7874 = vmatpush.bf16.msra.mxu1 %v13955_v50  ;;  %v8169_v38 = vsub.f32 1.5, %v8168_v29 }
 0x6de   :  { %v14464_v16 = vld [vmem:[#allocation4 + $0x17f8] sm:$0xf0] }
 0x6df   :  { %v17449_v11 = vld [vmem:[#allocation4 + $0x119c] sm:$0xf]  ;;  %v14467_v52 = vor.u32 %v17649_v35, %v14464_v16  ;;  %7887 = vmatpush.bf16.msra.mxu2 %v14211_v17  ;;  %v8170_v22 = vmul.f32 %v18918_v44, %v8169_v38 }
 0x6e0   :  { %v13664_v53 = vld [vmem:[#allocation4 + $0x11b8] sm:$0xf0] }
 0x6e1   :  { %v17513_v43 = vld [vmem:[#allocation4 + $0x139c] sm:$0xf]  ;;  %v13667_v59 = vor.u32 %v17449_v11, %v13664_v53  ;;  %7900 = vmatpush.bf16.msra.mxu3 %v14467_v52  ;;  %v7610_v11 = vpop.f32.mrf.mxu0 }
 0x6e2   :  { %v13920_v48 = vld [vmem:[#allocation4 + $0x13b8] sm:$0xf0] }
 0x6e3   :  { %v17577_v57 = vld [vmem:[#allocation4 + $0x159c] sm:$0xf]  ;;  %v13923_v25 = vor.u32 %v17513_v43, %v13920_v48  ;;  %7862 = vmatpush.bf16.msra.mxu0 %v13667_v59  ;;  %v8206_v59 = vrot.slane %v8164_v7, 4 }
 0x6e4   :  { %v14176_v0 = vld [vmem:[#allocation4 + $0x15b8] sm:$0xf0] }
 0x6e5   :  { %v17641_v28 = vld [vmem:[#allocation4 + $0x179c] sm:$0xf]  ;;  %v14179_v33 = vor.u32 %v17577_v57, %v14176_v0  ;;  %7875 = vmatpush.bf16.msra.mxu1 %v13923_v25  ;;  %v7611_v57 = vadd.f32 %v7610_v11, %v18909_v9  ;;  %v8174_v0 = vsel %vm18944_vm6, %v18918_v44, %v8170_v22 }
 0x6e6   :  { %v14432_v60 = vld [vmem:[#allocation4 + $0x17b8] sm:$0xf0]  ;;  %v8207_v25 = vrot.slane %v8174_v0, 3 }
 0x6e7   :  { %v17441_v10 = vld [vmem:[#allocation4 + $0x115c] sm:$0xf]  ;;  %v14435_v58 = vor.u32 %v17641_v28, %v14432_v60  ;;  %7888 = vmatpush.bf16.msra.mxu2 %v14179_v33 }
 0x6e8   :  { %v13632_v62 = vld [vmem:[#allocation4 + $0x1178] sm:$0xf0]  ;;  %v18953_v45 = vsel %vm8216_vm7, %v8206_v59, %v8207_v25 }
 0x6e9   :  { %v17505_v2 = vld [vmem:[#allocation4 + $0x135c] sm:$0xf]  ;;  %v13635_v18 = vor.u32 %v17441_v10, %v13632_v62  ;;  %7901 = vmatpush.bf16.msra.mxu3 %v14435_v58  ;;  %v7624_v62 = vadd.f32 %v7623_v54, %v7611_v57 }
 0x6ea   :  { %v13888_v51 = vld [vmem:[#allocation4 + $0x1378] sm:$0xf0] }
 0x6eb   :  { %v17569_v1 = vld [vmem:[#allocation4 + $0x155c] sm:$0xf]  ;;  %v13891_v34 = vor.u32 %v17505_v2, %v13888_v51  ;;  %7863 = vmatpush.bf16.msra.mxu0 %v13635_v18 }
 0x6ec   :  { %v14144_v8 = vld [vmem:[#allocation4 + $0x1578] sm:$0xf0] }
 0x6ed   :  { %v17633_v12 = vld [vmem:[#allocation4 + $0x175c] sm:$0xf]  ;;  %v14147_v14 = vor.u32 %v17569_v1, %v14144_v8  ;;  %7876 = vmatpush.bf16.msra.mxu1 %v13891_v34  ;;  %v7636_v8 = vpop.f32.mrf.mxu2 }
 0x6ee   :  { %v14400_v4 = vld [vmem:[#allocation4 + $0x1778] sm:$0xf0]  ;;  %v7637_v18 = vadd.f32 %v7636_v8, %v7624_v62 }
 0x6ef   :  { %v17433_v5 = vld [vmem:[#allocation4 + $0x111c] sm:$0xf]  ;;  %v14403_v30 = vor.u32 %v17633_v12, %v14400_v4  ;;  %7889 = vmatpush.bf16.msra.mxu2 %v14147_v14 }
 0x6f0   :  { %v13600_v31 = vld [vmem:[#allocation4 + $0x1138] sm:$0xf0] }
 0x6f1   :  { %v17497_v37 = vld [vmem:[#allocation4 + $0x131c] sm:$0xf]  ;;  %v13603_v50 = vor.u32 %v17433_v5, %v13600_v31  ;;  %7902 = vmatpush.bf16.msra.mxu3 %v14403_v30  ;;  %v7649_v5 = vpop.f32.mrf.mxu3 }
 0x6f2   :  { %v13856_v32 = vld [vmem:[#allocation4 + $0x1338] sm:$0xf0] }
 0x6f3   :  { %v17561_v35 = vld [vmem:[#allocation4 + $0x151c] sm:$0xf]  ;;  %v13859_v43 = vor.u32 %v17497_v37, %v13856_v32  ;;  %7864 = vmatpush.bf16.msra.mxu0 %v13603_v50  ;;  %v18955_v37 = vadd.f32 %v7649_v5, %v7637_v18  ;;  %v7612_v32 = vpop.f32.mrf.mxu0 }
 0x6f4   :  { %v14112_v16 = vld [vmem:[#allocation4 + $0x1538] sm:$0xf0] }
 0x6f5   :  { %v17625_v42 = vld [vmem:[#allocation4 + $0x171c] sm:$0xf]  ;;  %v14115_v52 = vor.u32 %v17561_v35, %v14112_v16  ;;  %7877 = vmatpush.bf16.msra.mxu1 %v13859_v43 }
 0x6f6   :  { %v14368_v46 = vld [vmem:[#allocation4 + $0x1738] sm:$0xf0] }
 0x6f7   :  { %v17425_v17 = vld [vmem:[#allocation4 + $0x10dc] sm:$0xf]  ;;  %v14371_v28 = vor.u32 %v17625_v42, %v14368_v46  ;;  %7890 = vmatpush.bf16.msra.mxu2 %v14115_v52  ;;  %v7625_v42 = vpop.f32.mrf.mxu1 }
 0x6f8   :  { %v13568_v63 = vld [vmem:[#allocation4 + $0x10f8] sm:$0xf0] }
 0x6f9   :  { %v17489_v48 = vld [vmem:[#allocation4 + $0x12dc] sm:$0xf]  ;;  %v13571_v2 = vor.u32 %v17425_v17, %v13568_v63  ;;  %7903 = vmatpush.bf16.msra.mxu3 %v14371_v28  ;;  %v7638_v28 = vpop.f32.mrf.mxu2  ;;  %v7651_v25 = vpop.f32.mrf.mxu3 }
 0x6fa   :  { %v13824_v60 = vld [vmem:[#allocation4 + $0x12f8] sm:$0xf0] }
 0x6fb   :  { %v17553_v61 = vld [vmem:[#allocation4 + $0x14dc] sm:$0xf]  ;;  %v13827_v9 = vor.u32 %v17489_v48, %v13824_v60  ;;  %7865 = vmatpush.bf16.msra.mxu0 %v13571_v2 }
 0x6fc   :  { %v14080_v49 = vld [vmem:[#allocation4 + $0x14f8] sm:$0xf0] }
 0x6fd   :  { %v17617_v33 = vld [vmem:[#allocation4 + $0x16dc] sm:$0xf]  ;;  %v14083_v58 = vor.u32 %v17553_v61, %v14080_v49  ;;  %7878 = vmatpush.bf16.msra.mxu1 %v13827_v9 }
 0x6fe   :  { %v14336_v10 = vld [vmem:[#allocation4 + $0x16f8] sm:$0xf0] }
 0x6ff   :  { %v17417_v44 = vld [vmem:[#allocation4 + $0x109c] sm:$0xf]  ;;  %v14339_v12 = vor.u32 %v17617_v33, %v14336_v10  ;;  %7891 = vmatpush.bf16.msra.mxu2 %v14083_v58 }
 0x700   :  { %v13536_v51 = vld [vmem:[#allocation4 + $0x10b8] sm:$0xf0] }
 0x701   :  { %v17481_v1 = vld [vmem:[#allocation4 + $0x129c] sm:$0xf]  ;;  %v13539_v31 = vor.u32 %v17417_v44, %v13536_v51  ;;  %7904 = vmatpush.bf16.msra.mxu3 %v14339_v12 }
 0x702   :  { %v13792_v4 = vld [vmem:[#allocation4 + $0x12b8] sm:$0xf0] }
 0x703   :  { %v17545_v15 = vld [vmem:[#allocation4 + $0x149c] sm:$0xf]  ;;  %v13795_v38 = vor.u32 %v17481_v1, %v13792_v4  ;;  %7866 = vmatpush.bf16.msra.mxu0 %v13539_v31 }
 0x704   :  { %v14048_v29 = vld [vmem:[#allocation4 + $0x14b8] sm:$0xf0] }
 0x705   :  { %v17609_v34 = vld [vmem:[#allocation4 + $0x169c] sm:$0xf]  ;;  %v14051_v30 = vor.u32 %v17545_v15, %v14048_v29  ;;  %7879 = vmatpush.bf16.msra.mxu1 %v13795_v38 }
 0x706   :  { %v14304_v14 = vld [vmem:[#allocation4 + $0x16b8] sm:$0xf0] }
 0x707   :  { %v17409_v35 = vld [vmem:[#allocation4 + $0x105c] sm:$0xf]  ;;  %v14307_v46 = vor.u32 %v17609_v34, %v14304_v14  ;;  %7892 = vmatpush.bf16.msra.mxu2 %v14051_v30 }
 0x708   :  { %v13504_v16 = vld [vmem:[#allocation4 + $0x1078] sm:$0xf0] }
 0x709   :  { %v17473_v40 = vld [vmem:[#allocation4 + $0x125c] sm:$0xf]  ;;  %v13507_v53 = vor.u32 %v17409_v35, %v13504_v16  ;;  %7905 = vmatpush.bf16.msra.mxu3 %v14307_v46 }
 0x70a   :  { %v13760_v7 = vld [vmem:[#allocation4 + $0x1278] sm:$0xf0] }
 0x70b   :  { %v17537_v22 = vld [vmem:[#allocation4 + $0x145c] sm:$0xf]  ;;  %v13763_v63 = vor.u32 %v17473_v40, %v13760_v7  ;;  %7867 = vmatpush.bf16.msra.mxu0 %v13507_v53 }
 0x70c   :  { %v14016_v50 = vld [vmem:[#allocation4 + $0x1478] sm:$0xf0] }
 0x70d   :  { %v17601_v17 = vld [vmem:[#allocation4 + $0x165c] sm:$0xf]  ;;  %v14019_v48 = vor.u32 %v17537_v22, %v14016_v50  ;;  %7880 = vmatpush.bf16.msra.mxu1 %v13763_v63 }
 0x70e   :  { %v14272_v11 = vld [vmem:[#allocation4 + $0x1678] sm:$0xf0] }
 0x70f   :  { %v17401_v43 = vld [vmem:[#allocation4 + $0x101c] sm:$0xf]  ;;  %v14275_v60 = vor.u32 %v17601_v17, %v14272_v11  ;;  %7893 = vmatpush.bf16.msra.mxu2 %v14019_v48 }
 0x710   :  { %v13472_v52 = vld [vmem:[#allocation4 + $0x1038] sm:$0xf0] }
 0x711   :  { %v17465_v57 = vld [vmem:[#allocation4 + $0x121c] sm:$0xf]  ;;  %v13475_v2 = vor.u32 %v17401_v43, %v13472_v52  ;;  %7906 = vmatpush.bf16.msra.mxu3 %v14275_v60 }
 0x712   :  { %v13728_v54 = vld [vmem:[#allocation4 + $0x1238] sm:$0xf0] }
 0x713   :  { %v17529_v0 = vld [vmem:[#allocation4 + $0x141c] sm:$0xf]  ;;  %v13731_v51 = vor.u32 %v17465_v57, %v13728_v54  ;;  %7868 = vmatpush.bf16.msra.mxu0 %v13475_v2 }
 0x714   :  { %v13984_v61 = vld [vmem:[#allocation4 + $0x1438] sm:$0xf0] }
 0x715   :  { %v17593_v49 = vld [vmem:[#allocation4 + $0x161c] sm:$0xf]  ;;  %v13987_v1 = vor.u32 %v17529_v0, %v13984_v61  ;;  %7881 = vmatpush.bf16.msra.mxu1 %v13731_v51 }
 0x716   :  { %v14240_v59 = vld [vmem:[#allocation4 + $0x1638] sm:$0xf0]  ;;  %7869 = vmatmul.bf16.vlgmr.msra.gmra.mxu0 %v18570_v19 }
 0x717   :  { %v17713_v33 = vld [vmem:[#allocation4 + $0x19dc] sm:$0xf]  ;;  %v14243_v4 = vor.u32 %v17593_v49, %v14240_v59  ;;  %7894 = vmatpush.bf16.msra.mxu2 %v13987_v1  ;;  %v7662_v59 = vpop.f32.mrf.mxu0 }
 0x718   :  { %v14720_v10 = vld [vmem:[#allocation4 + $0x19f8] sm:$0xf0]  ;;  %7882 = vmatmul.bf16.vlgmr.msra.gmra.mxu1 %v18574_v24 }
 0x719   :  { %v17777_v62 = vld [vmem:[#allocation4 + $0x1bdc] sm:$0xf]  ;;  %v14723_v15 = vor.u32 %v17713_v33, %v14720_v10  ;;  %7907 = vmatpush.bf16.msra.mxu3 %v14243_v4  ;;  %v7675_v10 = vpop.f32.mrf.mxu1 }
 0x71a   :  { %v14976_v9 = vld [vmem:[#allocation4 + $0x1bf8] sm:$0xf0]  ;;  %7895 = vmatmul.bf16.vlgmr.msra.gmra.mxu2 %v18572_v23 }
 0x71b   :  { %v17841_v58 = vld [vmem:[#allocation4 + $0x1ddc] sm:$0xf]  ;;  %v14979_v29 = vor.u32 %v17777_v62, %v14976_v9  ;;  %7913 = vmatpush.bf16.msrb.mxu0 %v14723_v15 }
 0x71c   :  { %v15232_v44 = vld [vmem:[#allocation4 + $0x1df8] sm:$0xf0]  ;;  %7908 = vmatmul.bf16.vlgmr.msra.gmra.mxu3 %v18576_v27  ;;  %v7663_v27 = vadd.f32 %v7662_v59, %v18955_v37 }
 0x71d   :  { %v17905_v8 = vld [vmem:[#allocation4 + $0x1fdc] sm:$0xf]  ;;  %v15235_v18 = vor.u32 %v17841_v58, %v15232_v44  ;;  %7926 = vmatpush.bf16.msrb.mxu1 %v14979_v29 }
 0x71e   :  { %v15488_v12 = vld [vmem:[#allocation4 + $0x1ff8] sm:$0xf0]  ;;  %v7676_v1 = vadd.f32 %v7675_v10, %v7663_v27 }
 0x71f   :  { %v17705_v5 = vld [vmem:[#allocation4 + $0x199c] sm:$0xf]  ;;  %v15491_v31 = vor.u32 %v17905_v8, %v15488_v12  ;;  %7939 = vmatpush.bf16.msrb.mxu2 %v15235_v18 }
 0x720   :  { %v14688_v34 = vld [vmem:[#allocation4 + $0x19b8] sm:$0xf0] }
 0x721   :  { %v17769_v14 = vld [vmem:[#allocation4 + $0x1b9c] sm:$0xf]  ;;  %v14691_v40 = vor.u32 %v17705_v5, %v14688_v34  ;;  %7952 = vmatpush.bf16.msrb.mxu3 %v15491_v31 }
 0x722   :  { %v14944_v32 = vld [vmem:[#allocation4 + $0x1bb8] sm:$0xf0] }
 0x723   :  { %v17833_v38 = vld [vmem:[#allocation4 + $0x1d9c] sm:$0xf]  ;;  %v14947_v42 = vor.u32 %v17769_v14, %v14944_v32  ;;  %7914 = vmatpush.bf16.msrb.mxu0 %v14691_v40 }
 0x724   :  { %v15200_v30 = vld [vmem:[#allocation4 + $0x1db8] sm:$0xf0] }
 0x725   :  { %v17897_v35 = vld [vmem:[#allocation4 + $0x1f9c] sm:$0xf]  ;;  %v15203_v46 = vor.u32 %v17833_v38, %v15200_v30  ;;  %7927 = vmatpush.bf16.msrb.mxu1 %v14947_v42  ;;  %v7688_v38 = vpop.f32.mrf.mxu2  ;;  %v7701_v42 = vpop.f32.mrf.mxu3 }
 0x726   :  { %v15456_v16 = vld [vmem:[#allocation4 + $0x1fb8] sm:$0xf0]  ;;  %v7689_v40 = vadd.f32 %v7688_v38, %v7676_v1 }
 0x727   :  { %v17697_v7 = vld [vmem:[#allocation4 + $0x195c] sm:$0xf]  ;;  %v15459_v17 = vor.u32 %v17897_v35, %v15456_v16  ;;  %7940 = vmatpush.bf16.msrb.mxu2 %v15203_v46 }
 0x728   :  { %v14656_v22 = vld [vmem:[#allocation4 + $0x1978] sm:$0xf0] }
 0x729   :  { %v17761_v50 = vld [vmem:[#allocation4 + $0x1b5c] sm:$0xf]  ;;  %v14659_v48 = vor.u32 %v17697_v7, %v14656_v22  ;;  %7953 = vmatpush.bf16.msrb.mxu3 %v15459_v17  ;;  %v7664_v22 = vpop.f32.mrf.mxu0  ;;  %v7677_v17 = vpop.f32.mrf.mxu1 }
 0x72a   :  { %v14912_v11 = vld [vmem:[#allocation4 + $0x1b78] sm:$0xf0] }
 0x72b   :  { %v17825_v53 = vld [vmem:[#allocation4 + $0x1d5c] sm:$0xf]  ;;  %v14915_v57 = vor.u32 %v17761_v50, %v14912_v11  ;;  %7915 = vmatpush.bf16.msrb.mxu0 %v14659_v48  ;;  %v7702_v11 = vadd.f32 %v7701_v42, %v7689_v40 }
 0x72c   :  { %v15168_v43 = vld [vmem:[#allocation4 + $0x1d78] sm:$0xf0] }
 0x72d   :  { %v17889_v52 = vld [vmem:[#allocation4 + $0x1f5c] sm:$0xf]  ;;  %v15171_v54 = vor.u32 %v17825_v53, %v15168_v43  ;;  %7928 = vmatpush.bf16.msrb.mxu1 %v14915_v57 }
 0x72e   :  { %v15424_v63 = vld [vmem:[#allocation4 + $0x1f78] sm:$0xf0] }
 0x72f   :  { %v17689_v0 = vld [vmem:[#allocation4 + $0x191c] sm:$0xf]  ;;  %v15427_v60 = vor.u32 %v17889_v52, %v15424_v63  ;;  %7941 = vmatpush.bf16.msrb.mxu2 %v15171_v54 }
 0x730   :  { %v14624_v19 = vld [vmem:[#allocation4 + $0x1938] sm:$0xf0] }
 0x731   :  { %v17753_v28 = vld [vmem:[#allocation4 + $0x1b1c] sm:$0xf]  ;;  %v14627_v33 = vor.u32 %v17689_v0, %v14624_v19  ;;  %7954 = vmatpush.bf16.msrb.mxu3 %v15427_v60 }
 0x732   :  { %v14880_v61 = vld [vmem:[#allocation4 + $0x1b38] sm:$0xf0] }
 0x733   :  { %v17817_v49 = vld [vmem:[#allocation4 + $0x1d1c] sm:$0xf]  ;;  %v14883_v62 = vor.u32 %v17753_v28, %v14880_v61  ;;  %7916 = vmatpush.bf16.msrb.mxu0 %v14627_v33 }
 0x734   :  { %v15136_v23 = vld [vmem:[#allocation4 + $0x1d38] sm:$0xf0] }
 0x735   :  { %v17881_v24 = vld [vmem:[#allocation4 + $0x1f1c] sm:$0xf]  ;;  %v15139_v2 = vor.u32 %v17817_v49, %v15136_v23  ;;  %7929 = vmatpush.bf16.msrb.mxu1 %v14883_v62 }
 0x736   :  { %v15392_v25 = vld [vmem:[#allocation4 + $0x1f38] sm:$0xf0] }
 0x737   :  { %v17681_v9 = vld [vmem:[#allocation4 + $0x18dc] sm:$0xf]  ;;  %v15395_v51 = vor.u32 %v17881_v24, %v15392_v25  ;;  %7942 = vmatpush.bf16.msrb.mxu2 %v15139_v2  ;;  %v7690_v2 = vpop.f32.mrf.mxu2 }
 0x738   :  { %v14592_v58 = vld [vmem:[#allocation4 + $0x18f8] sm:$0xf0] }
 0x739   :  { %v17745_v44 = vld [vmem:[#allocation4 + $0x1adc] sm:$0xf]  ;;  %v14595_v18 = vor.u32 %v17681_v9, %v14592_v58  ;;  %7955 = vmatpush.bf16.msrb.mxu3 %v15395_v51 }
 0x73a   :  { %v14848_v8 = vld [vmem:[#allocation4 + $0x1af8] sm:$0xf0] }
 0x73b   :  { %v17809_v12 = vld [vmem:[#allocation4 + $0x1cdc] sm:$0xf]  ;;  %v14851_v37 = vor.u32 %v17745_v44, %v14848_v8  ;;  %7917 = vmatpush.bf16.msrb.mxu0 %v14595_v18  ;;  %v7703_v44 = vpop.f32.mrf.mxu3 }
 0x73c   :  { %v15104_v4 = vld [vmem:[#allocation4 + $0x1cf8] sm:$0xf0]  ;;  %v15606_v44 = vld [vmem:[#allocation6 + $0xe0] sm:$0xf] }
 0x73d   :  { %v17873_v15 = vld [vmem:[#allocation4 + $0x1edc] sm:$0xf]  ;;  %v15107_v5 = vor.u32 %v17809_v12, %v15104_v4  ;;  %7930 = vmatpush.bf16.msrb.mxu1 %v14851_v37  ;;  %v7714_v4 = vpop.f32.mrf.mxu0 }
 0x73e   :  { %v15360_v29 = vld [vmem:[#allocation4 + $0x1ef8] sm:$0xf0] }
 0x73f   :  { %v17673_v34 = vld [vmem:[#allocation4 + $0x189c] sm:$0xf]  ;;  %v15363_v32 = vor.u32 %v17873_v15, %v15360_v29  ;;  %7943 = vmatpush.bf16.msrb.mxu2 %v15107_v5  ;;  %v7715_v15 = vadd.f32 %v7714_v4, %v7702_v11  ;;  %v7727_v29 = vpop.f32.mrf.mxu1  ;;  %v7740_v37 = vpop.f32.mrf.mxu2  ;;  %v17972_v4 = vld [vmem:[#allocation6 + $0x1ec] sm:$0xf0] }
 0x740   :  { %v14560_v14 = vld [vmem:[#allocation4 + $0x18b8] sm:$0xf0] }
 0x741   :  { %v17737_v31 = vld [vmem:[#allocation4 + $0x1a9c] sm:$0xf]  ;;  %v14563_v50 = vor.u32 %v17673_v34, %v14560_v14  ;;  %7956 = vmatpush.bf16.msrb.mxu3 %v15363_v32  ;;  %v7728_v18 = vadd.f32 %v7727_v29, %v7715_v15  ;;  %v15862_v15 = vld [vmem:[#allocation6 + $0x2e0] sm:$0xf]  ;;  %v18004_v29 = vld [vmem:[#allocation6 + $0x2ec] sm:$0xf0] }
 0x742   :  { %v14816_v30 = vld [vmem:[#allocation4 + $0x1ab8] sm:$0xf0] }
 0x743   :  { %v17801_v35 = vld [vmem:[#allocation4 + $0x1c9c] sm:$0xf]  ;;  %v14819_v53 = vor.u32 %v17737_v31, %v14816_v30  ;;  %7918 = vmatpush.bf16.msrb.mxu0 %v14563_v50  ;;  %v7741_v5 = vadd.f32 %v7740_v37, %v7728_v18  ;;  %v7753_v34 = vpop.f32.mrf.mxu3  ;;  %v15863_v37 = vor.u32 %v18004_v29, %v15862_v15  ;;  %v15670_v15 = vld [vmem:[#allocation6 + $0x160] sm:$0xf] }
 0x744   :  { %v15072_v16 = vld [vmem:[#allocation4 + $0x1cb8] sm:$0xf0] }
 0x745   :  { %v17865_v46 = vld [vmem:[#allocation4 + $0x1e9c] sm:$0xf]  ;;  %v15075_v43 = vor.u32 %v17801_v35, %v15072_v16  ;;  %7931 = vmatpush.bf16.msrb.mxu1 %v14819_v53  ;;  %v7716_v14 = vpop.f32.mrf.mxu0  ;;  %v7754_v32 = vadd.f32 %v7753_v34, %v7741_v5  ;;  %v15990_v5 = vld [vmem:[#allocation6 + $0x3e0] sm:$0xf]  ;;  %v18036_v34 = vld [vmem:[#allocation6 + $0x3ec] sm:$0xf0] }
 0x746   :  { %v15328_v7 = vld [vmem:[#allocation4 + $0x1eb8] sm:$0xf0] }
 0x747   :  { %v17665_v52 = vld [vmem:[#allocation4 + $0x185c] sm:$0xf]  ;;  %v15331_v57 = vor.u32 %v17865_v46, %v15328_v7  ;;  %7944 = vmatpush.bf16.msrb.mxu2 %v15075_v43  ;;  %v7729_v31 = vpop.f32.mrf.mxu1  ;;  %v7742_v38 = vpop.f32.mrf.mxu2 }
 0x748   :  { %v14528_v63 = vld [vmem:[#allocation4 + $0x1878] sm:$0xf0]  ;;  %v15991_v31 = vor.u32 %v18036_v34, %v15990_v5  ;;  %v15590_v38 = vld [vmem:[#allocation6 + $0xc0] sm:$0xf]  ;;  %v17988_v34 = vld [vmem:[#allocation6 + $0x26c] sm:$0xf0] }
 0x749   :  { %v17729_v48 = vld [vmem:[#allocation4 + $0x1a5c] sm:$0xf]  ;;  %v14531_v61 = vor.u32 %v17665_v52, %v14528_v63  ;;  %7957 = vmatpush.bf16.msrb.mxu3 %v15331_v57  ;;  %v8001_v57 = vrot.slane %v7754_v32, 4  ;;  %v15798_v5 = vld [vmem:[#allocation6 + $0x260] sm:$0xf] }
 0x74a   :  { %v14784_v54 = vld [vmem:[#allocation4 + $0x1a78] sm:$0xf0] }
 0x74b   :  { %v17793_v0 = vld [vmem:[#allocation4 + $0x1c5c] sm:$0xf]  ;;  %v14787_v49 = vor.u32 %v17729_v48, %v14784_v54  ;;  %7919 = vmatpush.bf16.msrb.mxu0 %v14531_v61  ;;  %v7755_v30 = vpop.f32.mrf.mxu3  ;;  %v8002_v54 = vadd.f32 %v8001_v57, %v7754_v32 }
 0x74c   :  { %v15040_v19 = vld [vmem:[#allocation4 + $0x1c78] sm:$0xf0]  ;;  %v17936_v30 = vld [vmem:[#allocation6 + $0xcc] sm:$0xf0] }
 0x74d   :  { %v17857_v28 = vld [vmem:[#allocation4 + $0x1e5c] sm:$0xf]  ;;  %v15043_v23 = vor.u32 %v17793_v0, %v15040_v19  ;;  %7932 = vmatpush.bf16.msrb.mxu1 %v14787_v49  ;;  %v7766_v35 = vpop.f32.mrf.mxu0  ;;  %v8003_v19 = vrot.slane %v8002_v54, 2 }
 0x74e   :  { %v15296_v60 = vld [vmem:[#allocation4 + $0x1e78] sm:$0xf0] }
 0x74f   :  { %v17657_v59 = vld [vmem:[#allocation4 + $0x181c] sm:$0xf]  ;;  %v15299_v27 = vor.u32 %v17857_v28, %v15296_v60  ;;  %7945 = vmatpush.bf16.msrb.mxu2 %v15043_v23  ;;  %v8004_v60 = vadd.f32 %v8003_v19, %v8002_v54  ;;  %v18028_v19 = vld [vmem:[#allocation6 + $0x3ac] sm:$0xf0] }
 0x750   :  { %v14496_v24 = vld [vmem:[#allocation4 + $0x1838] sm:$0xf0] }
 0x751   :  { %v17721_v25 = vld [vmem:[#allocation4 + $0x1a1c] sm:$0xf]  ;;  %v14499_v51 = vor.u32 %v17657_v59, %v14496_v24  ;;  %7958 = vmatpush.bf16.msrb.mxu3 %v15299_v27  ;;  %v8005_v24 = vrot.slane %v8004_v60, 1 }
 0x752   :  { %v14752_v33 = vld [vmem:[#allocation4 + $0x1a38] sm:$0xf0] }
 0x753   :  { %v17785_v10 = vld [vmem:[#allocation4 + $0x1c1c] sm:$0xf]  ;;  %v14755_v1 = vor.u32 %v17721_v25, %v14752_v33  ;;  %7920 = vmatpush.bf16.msrb.mxu0 %v14499_v51  ;;  %v8006_v33 = vadd.f32 %v8005_v24, %v8004_v60  ;;  %v17940_v51 = vld [vmem:[#allocation6 + $0xec] sm:$0xf0]  ;;  %v15558_v24 = vld [vmem:[#allocation6 + $0x80] sm:$0xf] }
 0x754   :  { %v15008_v62 = vld [vmem:[#allocation4 + $0x1c38] sm:$0xf0] }
 0x755   :  { %v17849_v9 = vld [vmem:[#allocation4 + $0x1e1c] sm:$0xf]  ;;  %v15011_v8 = vor.u32 %v17785_v10, %v15008_v62  ;;  %7933 = vmatpush.bf16.msrb.mxu1 %v14755_v1  ;;  %v15734_v1 = vld [vmem:[#allocation6 + $0x1e0] sm:$0xf] }
 0x756   :  { %v15264_v58 = vld [vmem:[#allocation4 + $0x1e38] sm:$0xf0]  ;;  %7921 = vmatmul.bf16.vlgmr.msrb.gmra.mxu0 %v18582_v13  ;;  %v7779_v13 = vpop.f32.mrf.mxu1  ;;  %v15735_v18 = vor.u32 %v17972_v4, %v15734_v1  ;;  %v18024_v1 = vld [vmem:[#allocation6 + $0x38c] sm:$0xf0] }
 0x757   :  { %v15267_v12 = vor.u32 %v17849_v9, %v15264_v58  ;;  %7946 = vmatpush.bf16.msrb.mxu2 %v15011_v8  ;;  %v7780_v16 = vadd.f32 %v7779_v13, %v7766_v35  ;;  %v8026_v9 = vmul.f32 %v18652_v3, %v8006_v33  ;;  %v15718_v35 = vld [vmem:[#allocation6 + $0x1c0] sm:$0xf]  ;;  %v17924_v4 = vld [vmem:[#allocation6 + $0x6c] sm:$0xf0] }
 0x758   :  { %7934 = vmatmul.bf16.vlgmr.msrb.gmra.mxu1 %v18586_v21  ;;  %v7792_v21 = vpop.f32.mrf.mxu2 }
 0x759   :  { %7959 = vmatpush.bf16.msrb.mxu3 %v15267_v12  ;;  %v7793_v40 = vadd.f32 %v7792_v21, %v7780_v16  ;;  %v15607_v12 = vor.u32 %v17940_v51, %v15606_v44  ;;  %v18967_v14 = vsub.f32 %v7754_v32, %v8026_v9  ;;  %9841 = vmatpush.bf16.msra.mxu1 %v15735_v18  ;;  %v17968_v21 = vld [vmem:[#allocation6 + $0x1cc] sm:$0xf0]  ;;  %v15942_v51 = vld [vmem:[#allocation6 + $0x380] sm:$0xf] }
 0x75a   :  { %7947 = vmatmul.bf16.vlgmr.msrb.gmra.mxu2 %v18584_v20  ;;  %v7805_v20 = vpop.f32.mrf.mxu3  ;;  %v15591_v16 = vor.u32 %v17936_v30, %v15590_v38  ;;  %v17992_v9 = vld [vmem:[#allocation6 + $0x28c] sm:$0xf0]  ;;  %v15799_v30 = vor.u32 %v17988_v34, %v15798_v5  ;;  %v15878_v5 = vld [vmem:[#allocation6 + $0x300] sm:$0xf] }
 0x75b   :  { %v7806_v42 = vadd.f32 %v7805_v20, %v7793_v40  ;;  %9828 = vmatpush.bf16.msra.mxu0 %v15607_v12  ;;  %9854 = vmatpush.bf16.msra.mxu2 %v15863_v37  ;;  %v15846_v40 = vld [vmem:[#allocation6 + $0x2c0] sm:$0xf]  ;;  %v18000_v20 = vld [vmem:[#allocation6 + $0x2cc] sm:$0xf0]  ;;  %v8042_v32 = vmul.f32 %v18967_v14, %v18967_v14 }
 0x75c   :  { %7960 = vmatmul.bf16.vlgmr.msrb.gmra.mxu3 %v18588_v26  ;;  %v7768_v26 = vpop.f32.mrf.mxu0  ;;  %v15542_v12 = vld [vmem:[#allocation6 + $0x60] sm:$0xf]  ;;  %v17956_v37 = vld [vmem:[#allocation6 + $0x16c] sm:$0xf0] }
 0x75d   :  { %9867 = vmatpush.bf16.msra.mxu3 %v15991_v31  ;;  %v15847_v26 = vor.u32 %v18000_v20, %v15846_v40  ;;  %v15543_v18 = vor.u32 %v17924_v4, %v15542_v12  ;;  %v15671_v38 = vor.u32 %v17956_v37, %v15670_v15  ;;  %v17944_v15 = vld [vmem:[#allocation6 + $0x10c] sm:$0xf0] }
 0x75e   :  { %v7781_v46 = vpop.f32.mrf.mxu1  ;;  %v18008_v34 = vld [vmem:[#allocation6 + $0x30c] sm:$0xf0] }
 0x75f   :  { %v15974_v46 = vld [vmem:[#allocation6 + $0x3c0] sm:$0xf]  ;;  %9829 = vmatpush.bf16.msra.mxu0 %v15591_v16  ;;  %9855 = vmatpush.bf16.msra.mxu2 %v15847_v26 }
 0x760   :  { %v7794_v7 = vpop.f32.mrf.mxu2 }
 0x761   :  { %v18032_v7 = vld [vmem:[#allocation6 + $0x3cc] sm:$0xf0] }
 0x762   :  { %v7807_v22 = vpop.f32.mrf.mxu3 }
 0x764   :  { %v7818_v50 = vpop.f32.mrf.mxu0 }
 0x765   :  { %v7819_v61 = vadd.f32 %v7818_v50, %v7806_v42  ;;  %v15719_v42 = vor.u32 %v17968_v21, %v15718_v35  ;;  %v15975_v50 = vor.u32 %v18032_v7, %v15974_v46  ;;  %v15926_v35 = vld [vmem:[#allocation6 + $0x360] sm:$0xf]  ;;  %v17920_v7 = vld [vmem:[#allocation6 + $0x4c] sm:$0xf0] }
 0x766   :  { %v7831_v17 = vpop.f32.mrf.mxu1  ;;  %v15526_v46 = vld [vmem:[#allocation6 + $0x40] sm:$0xf] }
 0x767   :  { %v7832_v25 = vadd.f32 %v7831_v17, %v7819_v61  ;;  %9842 = vmatpush.bf16.msra.mxu1 %v15719_v42  ;;  %v15574_v17 = vld [vmem:[#allocation6 + $0xa0] sm:$0xf]  ;;  %9868 = vmatpush.bf16.msra.mxu3 %v15975_v50 }
 0x768   :  { %v7844_v11 = vpop.f32.mrf.mxu2  ;;  %v15654_v50 = vld [vmem:[#allocation6 + $0x140] sm:$0xf] }
 0x769   :  { %v7845_v10 = vadd.f32 %v7844_v11, %v7832_v25  ;;  %v17932_v11 = vld [vmem:[#allocation6 + $0xac] sm:$0xf0] }
 0x76a   :  { %v7857_v53 = vpop.f32.mrf.mxu3  ;;  %v17928_v25 = vld [vmem:[#allocation6 + $0x8c] sm:$0xf0] }
 0x76b   :  { %v7858_v58 = vadd.f32 %v7857_v53, %v7845_v10  ;;  %v15702_v53 = vld [vmem:[#allocation6 + $0x1a0] sm:$0xf]  ;;  %v15559_v10 = vor.u32 %v17928_v25, %v15558_v24  ;;  %v17948_v24 = vld [vmem:[#allocation6 + $0x12c] sm:$0xf0] }
 0x76c   :  { %v7820_v43 = vpop.f32.mrf.mxu0  ;;  %v15766_v25 = vld [vmem:[#allocation6 + $0x220] sm:$0xf] }
 0x76d   :  { %v15575_v43 = vor.u32 %v17932_v11, %v15574_v17 }
 0x76e   :  { %v7833_v52 = vpop.f32.mrf.mxu1 }
 0x76f   :  { %v17964_v52 = vld [vmem:[#allocation6 + $0x1ac] sm:$0xf0]  ;;  %9830 = vmatpush.bf16.msra.mxu0 %v15575_v43  ;;  %v15782_v43 = vld [vmem:[#allocation6 + $0x240] sm:$0xf] }
 0x770   :  { %v7846_v63 = vpop.f32.mrf.mxu2  ;;  %v15703_v57 = vor.u32 %v17964_v52, %v15702_v53  ;;  %v17952_v53 = vld [vmem:[#allocation6 + $0x14c] sm:$0xf0] }
 0x771   :  { %v15830_v63 = vld [vmem:[#allocation6 + $0x2a0] sm:$0xf]  ;;  %v15655_v52 = vor.u32 %v17952_v53, %v15654_v50 }
 0x772   :  { %v7859_v48 = vpop.f32.mrf.mxu3  ;;  %9843 = vmatpush.bf16.msra.mxu1 %v15703_v57  ;;  %v18016_v57 = vld [vmem:[#allocation6 + $0x34c] sm:$0xf0]  ;;  %v16502_v50 = vld [vmem:[#allocation6 + $0x7e0] sm:$0xf] }
 0x773   :  { %v17996_v48 = vld [vmem:[#allocation6 + $0x2ac] sm:$0xf0]  ;;  %9831 = vmatpush.bf16.msra.mxu0 %v15559_v10  ;;  %v16102_v53 = vld [vmem:[#allocation6 + $0x4c0] sm:$0xf] }
 0x774   :  { %v15831_v54 = vor.u32 %v17996_v48, %v15830_v63  ;;  %v17984_v63 = vld [vmem:[#allocation6 + $0x24c] sm:$0xf0]  ;;  %v15910_v48 = vld [vmem:[#allocation6 + $0x340] sm:$0xf] }
 0x776   :  { %9856 = vmatpush.bf16.msra.mxu2 %v15831_v54 }
 0x777   :  { %9832 = vmatpush.bf16.msra.mxu0 %v15543_v18  ;;  %v17976_v18 = vld [vmem:[#allocation6 + $0x20c] sm:$0xf0] }
 0x793   :  { %v7870_v0 = vpop.f32.mrf.mxu0 }
 0x794   :  { %v7871_v8 = vadd.f32 %v7870_v0, %v7858_v58  ;;  %v15958_v0 = vld [vmem:[#allocation6 + $0x3a0] sm:$0xf] }
 0x795   :  { %v7883_v28 = vpop.f32.mrf.mxu1 }
 0x796   :  { %v7884_v13 = vadd.f32 %v7883_v28, %v7871_v8  ;;  %v8080_v28 = vrot.slane %v8042_v32, 4  ;;  %v15943_v8 = vor.u32 %v18024_v1, %v15942_v51  ;;  %v15494_v1 = vld [vmem:[#allocation6] sm:$0xf] }
 0x79b   :  { %v7872_v59 = vpop.f32.mrf.mxu0 }
 0x79d   :  { %v7896_v49 = vpop.f32.mrf.mxu2  ;;  %v7885_v27 = vpop.f32.mrf.mxu1 }
 0x79e   :  { %v7897_v22 = vadd.f32 %v7896_v49, %v7884_v13  ;;  %v15959_v49 = vor.u32 %v18028_v19, %v15958_v0  ;;  %v15686_v27 = vld [vmem:[#allocation6 + $0x180] sm:$0xf]  ;;  %v18020_v13 = vld [vmem:[#allocation6 + $0x36c] sm:$0xf0]  ;;  %v15783_v0 = vor.u32 %v17984_v63, %v15782_v43  ;;  %v15911_v19 = vor.u32 %v18016_v57, %v15910_v48 }
 0x79f   :  { %v7909_v23 = vpop.f32.mrf.mxu3  ;;  %v15927_v42 = vor.u32 %v18020_v13, %v15926_v35  ;;  %v15879_v13 = vor.u32 %v18008_v34, %v15878_v5  ;;  %v18064_v43 = vld [vmem:[#allocation6 + $0x4cc] sm:$0xf0]  ;;  %v16326_v5 = vld [vmem:[#allocation6 + $0x680] sm:$0xf] }
 0x7a0   :  { %v7910_v60 = vadd.f32 %v7909_v23, %v7897_v22  ;;  %9869 = vmatpush.bf16.msra.mxu3 %v15959_v49  ;;  %v8081_v23 = vadd.f32 %v8080_v28, %v8042_v32  ;;  %v15527_v22 = vor.u32 %v17920_v7, %v15526_v46  ;;  %v15510_v28 = vld [vmem:[#allocation6 + $0x20] sm:$0xf]  ;;  %v18096_v63 = vld [vmem:[#allocation6 + $0x5cc] sm:$0xf0] }
 0x7a2   :  { %v8082_v16 = vrot.slane %v8081_v23, 2  ;;  %9833 = vmatpush.bf16.msra.mxu0 %v15527_v22 }
 0x7a4   :  { %9870 = vmatpush.bf16.msra.mxu3 %v15943_v8  ;;  %v8083_v17 = vadd.f32 %v8082_v16, %v8081_v23  ;;  %v17912_v23 = vld [vmem:[#allocation6 + $0xc] sm:$0xf0]  ;;  %v15622_v8 = vld [vmem:[#allocation6 + $0x100] sm:$0xf] }
 0x7a5   :  { %v7898_v62 = vpop.f32.mrf.mxu2  ;;  %v15495_v4 = vor.u32 %v17912_v23, %v15494_v1  ;;  %v15623_v37 = vor.u32 %v17944_v15, %v15622_v8  ;;  %v18068_v16 = vld [vmem:[#allocation6 + $0x4ec] sm:$0xf0] }
 0x7a6   :  { %v17960_v62 = vld [vmem:[#allocation6 + $0x18c] sm:$0xf0] }
 0x7a7   :  { %v7911_v2 = vpop.f32.mrf.mxu3  ;;  %v15687_v58 = vor.u32 %v17960_v62, %v15686_v27  ;;  %v17980_v27 = vld [vmem:[#allocation6 + $0x22c] sm:$0xf0] }
 0x7a8   :  { %v15814_v2 = vld [vmem:[#allocation6 + $0x280] sm:$0xf]  ;;  %9871 = vmatpush.bf16.msra.mxu3 %v15927_v42  ;;  %v18156_v1 = vld [vmem:[#allocation6 + $0x7ac] sm:$0xf0] }
 0x7a9   :  { %v15815_v44 = vor.u32 %v17992_v9, %v15814_v2  ;;  %9844 = vmatpush.bf16.msra.mxu1 %v15687_v58  ;;  %v15767_v9 = vor.u32 %v17980_v27, %v15766_v25  ;;  %v15894_v58 = vld [vmem:[#allocation6 + $0x320] sm:$0xf]  ;;  %v18060_v27 = vld [vmem:[#allocation6 + $0x4ac] sm:$0xf0] }
 0x7aa   :  { %v16374_v42 = vld [vmem:[#allocation6 + $0x6e0] sm:$0xf]  ;;  %v18056_v15 = vld [vmem:[#allocation6 + $0x48c] sm:$0xf0] }
 0x7ab   :  { %9857 = vmatpush.bf16.msra.mxu2 %v15815_v44  ;;  %v18012_v44 = vld [vmem:[#allocation6 + $0x32c] sm:$0xf0]  ;;  %v16086_v25 = vld [vmem:[#allocation6 + $0x4a0] sm:$0xf] }
 0x7ac   :  { %9872 = vmatpush.bf16.msra.mxu3 %v15911_v19  ;;  %v15895_v51 = vor.u32 %v18012_v44, %v15894_v58  ;;  %v18128_v19 = vld [vmem:[#allocation6 + $0x6cc] sm:$0xf0] }
 0x7ad   :  { %9845 = vmatpush.bf16.msra.mxu1 %v15671_v38 }
 0x7af   :  { %9858 = vmatpush.bf16.msra.mxu2 %v15799_v30 }
 0x7b0   :  { %9873 = vmatpush.bf16.msra.mxu3 %v15895_v51  ;;  %v16470_v51 = vld [vmem:[#allocation6 + $0x7a0] sm:$0xf] }
 0x7b1   :  { %9846 = vmatpush.bf16.msra.mxu1 %v15655_v52  ;;  %v16230_v52 = vld [vmem:[#allocation6 + $0x5c0] sm:$0xf] }
 0x7b3   :  { %9859 = vmatpush.bf16.msra.mxu2 %v15783_v0  ;;  %v16358_v0 = vld [vmem:[#allocation6 + $0x6c0] sm:$0xf] }
 0x7b4   :  { %9874 = vmatpush.bf16.msra.mxu3 %v15879_v13  ;;  %v18152_v13 = vld [vmem:[#allocation6 + $0x78c] sm:$0xf0] }
 0x7b7   :  { %9860 = vmatpush.bf16.msra.mxu2 %v15767_v9  ;;  %v18124_v9 = vld [vmem:[#allocation6 + $0x6ac] sm:$0xf0] }
 0x7d3   :  { %v7922_v61 = vpop.f32.mrf.mxu0 }
 0x7d4   :  { %v7923_v33 = vadd.f32 %v7922_v61, %v7910_v60  ;;  %v17916_v60 = vld [vmem:[#allocation6 + $0x2c] sm:$0xf0]  ;;  %v15638_v61 = vld [vmem:[#allocation6 + $0x120] sm:$0xf] }
 0x7d5   :  { %v7935_v59 = vpop.f32.mrf.mxu1  ;;  %v15639_v2 = vor.u32 %v17948_v24, %v15638_v61  ;;  %v16359_v61 = vor.u32 %v18128_v19, %v16358_v0  ;;  %v16166_v19 = vld [vmem:[#allocation6 + $0x540] sm:$0xf] }
 0x7d6   :  { %v7936_v29 = vadd.f32 %v7935_v59, %v7923_v33  ;;  %v15511_v59 = vor.u32 %v17916_v60, %v15510_v28  ;;  %v8084_v33 = vrot.slane %v8083_v17, 1  ;;  %v16486_v28 = vld [vmem:[#allocation6 + $0x7c0] sm:$0xf]  ;;  %v16231_v60 = vor.u32 %v18096_v63, %v16230_v52 }
 0x7d7   :  { %9847 = vmatpush.bf16.msra.mxu1 %v15639_v2  ;;  %v16342_v2 = vld [vmem:[#allocation6 + $0x6a0] sm:$0xf] }
 0x7d8   :  { %9834 = vmatpush.bf16.msra.mxu0 %v15511_v59  ;;  %v8085_v38 = vadd.f32 %v8084_v33, %v8083_v17  ;;  %v16214_v33 = vld [vmem:[#allocation6 + $0x5a0] sm:$0xf]  ;;  %v16343_v23 = vor.u32 %v18124_v9, %v16342_v2 }
 0x7d9   :  { %v16022_v9 = vld [vmem:[#allocation6 + $0x420] sm:$0xf] }
 0x7da   :  { %v8098_v48 = vmul.f32 %v8085_v38, %v18652_v3  ;;  %v16454_v38 = vld [vmem:[#allocation6 + $0x780] sm:$0xf] }
 0x7db   :  { %v7924_v20 = vpop.f32.mrf.mxu0  ;;  %9848 = vmatpush.bf16.msra.mxu1 %v15623_v37  ;;  %v18088_v37 = vld [vmem:[#allocation6 + $0x58c] sm:$0xf0] }
 0x7dc   :  { %9835 = vmatpush.bf16.msra.mxu0 %v15495_v4  ;;  %v18100_v20 = vld [vmem:[#allocation6 + $0x5ec] sm:$0xf0]  ;;  %v18980_v58 = vadd.f32 1e-05, %v8098_v48  ;;  %v16070_v4 = vld [vmem:[#allocation6 + $0x480] sm:$0xf] }
 0x7dd   :  { %v7948_v31 = vpop.f32.mrf.mxu2  ;;  %v7937_v26 = vpop.f32.mrf.mxu1 }
 0x7de   :  { %v7949_v21 = vadd.f32 %v7948_v31, %v7936_v29  ;;  %v15750_v29 = vld [vmem:[#allocation6 + $0x200] sm:$0xf]  ;;  %v18132_v26 = vld [vmem:[#allocation6 + $0x6ec] sm:$0xf0]  ;;  %18288 = vrsqrt.f32 %v18980_v58  ;;  %vm8181_vm9 = vweird.f32 %v18980_v58 }
 0x7df   :  { %v7961_v40 = vpop.f32.mrf.mxu3  ;;  %v16118_v31 = vld [vmem:[#allocation6 + $0x4e0] sm:$0xf]  ;;  %v15751_v35 = vor.u32 %v17976_v18, %v15750_v29  ;;  %v16375_v22 = vor.u32 %v18132_v26, %v16374_v42  ;;  %v16071_v29 = vor.u32 %v18056_v15, %v16070_v4  ;;  %v18140_v15 = vld [vmem:[#allocation6 + $0x72c] sm:$0xf0] }
 0x7e0   :  { %v18971_v32 = vadd.f32 %v7961_v40, %v7949_v21  ;;  %v16246_v21 = vld [vmem:[#allocation6 + $0x5e0] sm:$0xf]  ;;  %v16119_v40 = vor.u32 %v18068_v16, %v16118_v31  ;;  %v18120_v31 = vld [vmem:[#allocation6 + $0x68c] sm:$0xf0] }
 0x7e1   :  { %v16247_v7 = vor.u32 %v18100_v20, %v16246_v21  ;;  %9861 = vmatpush.bf16.msra.mxu2 %v15751_v35  ;;  %v16198_v18 = vld [vmem:[#allocation6 + $0x580] sm:$0xf]  ;;  %v16327_v35 = vor.u32 %v18120_v31, %v16326_v5  ;;  %v16455_v21 = vor.u32 %v18152_v13, %v16454_v38  ;;  %v18052_v20 = vld [vmem:[#allocation6 + $0x46c] sm:$0xf0] }
 0x7e2   :  { %v8007_v11 = vrot.slane %v18971_v32, 4  ;;  %9880 = vmatpush.bf16.msrb.mxu0 %v16119_v40  ;;  %v16054_v40 = vld [vmem:[#allocation6 + $0x460] sm:$0xf]  ;;  %v18040_v31 = vld [vmem:[#allocation6 + $0x40c] sm:$0xf0] }
 0x7e3   :  { %9893 = vmatpush.bf16.msrb.mxu1 %v16247_v7  ;;  %v16055_v42 = vor.u32 %v18052_v20, %v16054_v40  ;;  %v16182_v26 = vld [vmem:[#allocation6 + $0x560] sm:$0xf]  ;;  %v18136_v40 = vld [vmem:[#allocation6 + $0x70c] sm:$0xf0] }
 0x7e4   :  { %v8008_v54 = vadd.f32 %v8007_v11, %v18971_v32  ;;  %v18164_v11 = vld [vmem:[#allocation6 + $0x7ec] sm:$0xf0]  ;;  %v18985_v52 = vpop.eup %18288  ;;  %v16406_v4 = vld [vmem:[#allocation6 + $0x720] sm:$0xf] }
 0x7e5   :  { %v7950_v49 = vpop.f32.mrf.mxu2  ;;  %v16503_v17 = vor.u32 %v18164_v11, %v16502_v50  ;;  %9906 = vmatpush.bf16.msrb.mxu2 %v16375_v22  ;;  %v16310_v22 = vld [vmem:[#allocation6 + $0x660] sm:$0xf]  ;;  %v18116_v50 = vld [vmem:[#allocation6 + $0x66c] sm:$0xf0]  ;;  %v16407_v5 = vor.u32 %v18140_v15, %v16406_v4  ;;  %vm8182_vm8 = vweird.f32 %v18985_v52 }
 0x7e6   :  { %v8009_v10 = vrot.slane %v8008_v54, 2  ;;  %v18160_v49 = vld [vmem:[#allocation6 + $0x7cc] sm:$0xf0]  ;;  %v16438_v11 = vld [vmem:[#allocation6 + $0x760] sm:$0xf]  ;;  %vm8183_vm11 = vmor %vm8181_vm9, %vm8182_vm8 }
 0x7e7   :  { %v7963_v62 = vpop.f32.mrf.mxu3  ;;  %9919 = vmatpush.bf16.msrb.mxu3 %v16503_v17  ;;  %v16487_v24 = vor.u32 %v18160_v49, %v16486_v28  ;;  %9894 = vmatpush.bf16.msrb.mxu1 %v16231_v60  ;;  %v16311_v17 = vor.u32 %v18116_v50, %v16310_v22  ;;  %v18080_v28 = vld [vmem:[#allocation6 + $0x54c] sm:$0xf0]  ;;  %v16294_v60 = vld [vmem:[#allocation6 + $0x640] sm:$0xf] }
 0x7e8   :  { %v8010_v12 = vadd.f32 %v8009_v10, %v8008_v54  ;;  %v16103_v54 = vor.u32 %v18064_v43, %v16102_v53  ;;  %v16087_v10 = vor.u32 %v18060_v27, %v16086_v25  ;;  %v18092_v62 = vld [vmem:[#allocation6 + $0x5ac] sm:$0xf0]  ;;  %v8176_v27 = vmul.f32 %v18985_v52, %v18980_v58  ;;  %v16134_v38 = vld [vmem:[#allocation6 + $0x500] sm:$0xf] }
 0x7e9   :  { %9907 = vmatpush.bf16.msrb.mxu2 %v16359_v61  ;;  %v18148_v43 = vld [vmem:[#allocation6 + $0x76c] sm:$0xf0]  ;;  %v16262_v13 = vld [vmem:[#allocation6 + $0x600] sm:$0xf] }
 0x7ea   :  { %v8011_v30 = vrot.slane %v8010_v12, 1  ;;  %9881 = vmatpush.bf16.msrb.mxu0 %v16103_v54  ;;  %v16439_v48 = vor.u32 %v18148_v43, %v16438_v11  ;;  %v18048_v54 = vld [vmem:[#allocation6 + $0x44c] sm:$0xf0] }
 0x7eb   :  { %9920 = vmatpush.bf16.msrb.mxu3 %v16487_v24  ;;  %v18112_v49 = vld [vmem:[#allocation6 + $0x64c] sm:$0xf0]  ;;  %v16422_v24 = vld [vmem:[#allocation6 + $0x740] sm:$0xf] }
 0x7ec   :  { %v8012_v46 = vadd.f32 %v8011_v30, %v8010_v12  ;;  %v16471_v12 = vor.u32 %v18156_v1, %v16470_v51  ;;  %v16199_v30 = vor.u32 %v18088_v37, %v16198_v18  ;;  %v18144_v25 = vld [vmem:[#allocation6 + $0x74c] sm:$0xf0]  ;;  %v16150_v51 = vld [vmem:[#allocation6 + $0x520] sm:$0xf] }
 0x7ed   :  { %9908 = vmatpush.bf16.msrb.mxu2 %v16343_v23  ;;  %v16423_v2 = vor.u32 %v18144_v25, %v16422_v24  ;;  %v16278_v23 = vld [vmem:[#allocation6 + $0x620] sm:$0xf] }
 0x7ee   :  { %v8027_v57 = vmul.f32 %v18652_v3, %v8012_v46  ;;  %9882 = vmatpush.bf16.msrb.mxu0 %v16087_v10  ;;  %v18084_v46 = vld [vmem:[#allocation6 + $0x56c] sm:$0xf0]  ;;  %v16295_v10 = vor.u32 %v18112_v49, %v16294_v60 }
 0x7ef   :  { %9921 = vmatpush.bf16.msrb.mxu3 %v16471_v12  ;;  %v16183_v53 = vor.u32 %v18084_v46, %v16182_v26 }
 0x7f0   :  { %v18978_v59 = vsub.f32 %v18971_v32, %v8027_v57  ;;  %v16215_v32 = vor.u32 %v18092_v62, %v16214_v33  ;;  %v16038_v57 = vld [vmem:[#allocation6 + $0x440] sm:$0xf]  ;;  %v16167_v33 = vor.u32 %v18080_v28, %v16166_v19 }
 0x7f1   :  { %9909 = vmatpush.bf16.msrb.mxu2 %v16327_v35  ;;  %v16039_v0 = vor.u32 %v18048_v54, %v16038_v57  ;;  %v18072_v35 = vld [vmem:[#allocation6 + $0x50c] sm:$0xf0] }
 0x7f2   :  { %v8043_v44 = vmul.f32 %v18978_v59, %v18978_v59  ;;  %9895 = vmatpush.bf16.msrb.mxu1 %v16215_v32  ;;  %9883 = vmatpush.bf16.msrb.mxu0 %v16071_v29  ;;  %v18076_v32 = vld [vmem:[#allocation6 + $0x52c] sm:$0xf0]  ;;  %v8177_v29 = vmul.f32 %v18985_v52, %v8176_v27 }
 0x7f3   :  { %9922 = vmatpush.bf16.msrb.mxu3 %v16455_v21  ;;  %v16151_v18 = vor.u32 %v18076_v32, %v16150_v51  ;;  %v16390_v21 = vld [vmem:[#allocation6 + $0x700] sm:$0xf] }
 0x7f4   :  { %v8086_v8 = vrot.slane %v8043_v44, 4  ;;  %v8178_v20 = vmul.f32 0.5, %v8177_v29  ;;  %v16391_v46 = vor.u32 %v18136_v40, %v16390_v21  ;;  %v8101_v54 = vld [vmem:[#allocation10] ss:$8 sm:$0xf0] }
 0x7f5   :  { %9910 = vmatpush.bf16.msrb.mxu2 %v16311_v17  ;;  %v8105_v19 = vld [vmem:[#allocation10 + $0x1] ss:$8 sm:$0xf0]  ;;  %v15992_v40 = vld [vmem:[#allocation6 + $0x3f0] sm:$0xf0] }
 0x7f6   :  { %v8087_v34 = vadd.f32 %v8086_v8, %v8043_v44  ;;  %9896 = vmatpush.bf16.msrb.mxu1 %v16199_v30  ;;  %9884 = vmatpush.bf16.msrb.mxu0 %v16055_v42  ;;  %v18044_v44 = vld [vmem:[#allocation6 + $0x42c] sm:$0xf0]  ;;  %v16135_v42 = vor.u32 %v18072_v35, %v16134_v38  ;;  %v8179_v22 = vsub.f32 1.5, %v8178_v20 }
 0x7f7   :  { %9923 = vmatpush.bf16.msrb.mxu3 %v16439_v48  ;;  %v16023_v1 = vor.u32 %v18044_v44, %v16022_v9  ;;  %v18108_v8 = vld [vmem:[#allocation6 + $0x62c] sm:$0xf0] }
 0x7f8   :  { %v8088_v16 = vrot.slane %v8087_v34, 2  ;;  %v16279_v37 = vor.u32 %v18108_v8, %v16278_v23  ;;  %v8100_v48 = vld [vmem:[#allocation10] ss:$8 sm:$0xf] }
 0x7f9   :  { %9911 = vmatpush.bf16.msrb.mxu2 %v16295_v10  ;;  %v8102_v49 = vor.u32 %v8101_v54, %v8100_v48  ;;  %v15848_v48 = vld [vmem:[#allocation6 + $0x2d0] sm:$0xf0] }
 0x7fa   :  { %v8089_v7 = vadd.f32 %v8088_v16, %v8087_v34  ;;  %9897 = vmatpush.bf16.msrb.mxu1 %v16183_v53  ;;  %9885 = vmatpush.bf16.msrb.mxu0 %v16039_v0  ;;  %v16006_v34 = vld [vmem:[#allocation6 + $0x400] sm:$0xf]  ;;  %v18104_v16 = vld [vmem:[#allocation6 + $0x60c] sm:$0xf0]  ;;  %v8180_v53 = vmul.f32 %v18985_v52, %v8179_v22  ;;  %v15592_v22 = vld [vmem:[#allocation6 + $0xd0] sm:$0xf0] }
 0x7fb   :  { %9924 = vmatpush.bf16.msrb.mxu3 %v16423_v2  ;;  %v16007_v30 = vor.u32 %v18040_v31, %v16006_v34  ;;  %v16263_v26 = vor.u32 %v18104_v16, %v16262_v13  ;;  %v8104_v0 = vld [vmem:[#allocation10 + $0x1] ss:$8 sm:$0xf]  ;;  %v15864_v13 = vld [vmem:[#allocation6 + $0x2f0] sm:$0xf0] }
 0x7fc   :  { %v8090_v63 = vrot.slane %v8089_v7, 1  ;;  %v18995_v58 = vor.u32 %v8105_v19, %v8104_v0  ;;  %v15976_v54 = vld [vmem:[#allocation6 + $0x3d0] sm:$0xf0]  ;;  %v17930_v0 = vld [vmem:[#allocation6 + $0xa4] sm:$0xf] }
 0x7fd   :  { %9912 = vmatpush.bf16.msrb.mxu2 %v16279_v37 }
 0x7fe   :  { %v8091_v61 = vadd.f32 %v8090_v63, %v8089_v7  ;;  %9898 = vmatpush.bf16.msrb.mxu1 %v16167_v33  ;;  %9886 = vmatpush.bf16.msrb.mxu0 %v16023_v1  ;;  %v8184_v63 = vsel %vm8183_vm11, %v18985_v52, %v8180_v53  ;;  %v8252_v33 = vperm.slane %v18995_v58, 0  ;;  %v8253_v10 = vperm.slane %v18995_v58, 1 }
 0x7ff   :  { %9925 = vmatpush.bf16.msrb.mxu3 %v16407_v5  ;;  %v8208_v60 = vrot.slane %v8184_v63, 2  ;;  %v8255_v2 = vperm.slane %v18995_v58, 3  ;;  %v17998_v63 = vld [vmem:[#allocation6 + $0x2c4] sm:$0xf]  ;;  %v8256_v19 = vperm.slane %v18995_v58, 4 }
 0x800   :  { %v8099_v62 = vmul.f32 %v8091_v61, %v18652_v3 }
 0x801   :  { %9913 = vmatpush.bf16.msrb.mxu2 %v16263_v26 }
 0x802   :  { %v8114_v12 = vadd.f32 1e-05, %v8099_v62  ;;  %9899 = vmatpush.bf16.msrb.mxu1 %v16151_v18  ;;  %9887 = vmatpush.bf16.msrb.mxu0 %v16007_v30  ;;  %v8254_v62 = vperm.slane %v18995_v58, 2  ;;  %v17938_v18 = vld [vmem:[#allocation6 + $0xe4] sm:$0xf] }
 0x803   :  { %9926 = vmatpush.bf16.msrb.mxu3 %v16391_v46  ;;  %v17970_v30 = vld [vmem:[#allocation6 + $0x1e4] sm:$0xf] }
 0x804   :  { %18290 = vrsqrt.f32 %v8114_v12  ;;  %vm8191_vm12 = vweird.f32 %v8114_v12 }
 0x806   :  { %9900 = vmatpush.bf16.msrb.mxu1 %v16135_v42 }
 0x80a   :  { %v18291_v7 = vpop.eup %18290 }
 0x80b   :  { %v8186_v50 = vmul.f32 %v18291_v7, %v8114_v12  ;;  %vm8192_vm10 = vweird.f32 %v18291_v7 }
 0x80c   :  { %vm8193_vm13 = vmor %vm8191_vm12, %vm8192_vm10 }
 0x80d   :  { %v8187_v11 = vmul.f32 %v18291_v7, %v8186_v50 }
 0x80f   :  { %v8188_v17 = vmul.f32 0.5, %v8187_v11 }
 0x811   :  { %v8189_v43 = vsub.f32 1.5, %v8188_v17  ;;  %v17966_v17 = vld [vmem:[#allocation6 + $0x1c4] sm:$0xf] }
 0x813   :  { %v8190_v57 = vmul.f32 %v18291_v7, %v8189_v43  ;;  %v15720_v43 = vld [vmem:[#allocation6 + $0x1d0] sm:$0xf0] }
 0x815   :  { %v8194_v28 = vsel %vm8193_vm13, %v18291_v7, %v8190_v57  ;;  %v17934_v7 = vld [vmem:[#allocation6 + $0xc4] sm:$0xf] }
 0x816   :  { %v8209_v61 = vrot.slane %v8194_v28, 1  ;;  %v18030_v57 = vld [vmem:[#allocation6 + $0x3c4] sm:$0xf]  ;;  %v8257_v28 = vperm.slane %v18995_v58, 5 }
 0x818   :  { %v8219_v24 = vsel %vm8218_vm0, %v8208_v60, %v8209_v61  ;;  %v15595_v60 = vor.u32 %v17934_v7, %v15592_v22  ;;  %v15723_v61 = vor.u32 %v17966_v17, %v15720_v43  ;;  %v17918_v17 = vld [vmem:[#allocation6 + $0x44] sm:$0xf]  ;;  %v15528_v43 = vld [vmem:[#allocation6 + $0x50] sm:$0xf0] }
 0x819   :  { %v8221_v25 = vsel %vm8220_vm1, %v18953_v45, %v8219_v24  ;;  %v17962_v24 = vld [vmem:[#allocation6 + $0x1a4] sm:$0xf] }
 0x81a   :  { %v8223_v52 = vsel %vm8222_vm2, %v18838_v6, %v8221_v25  ;;  %v15704_v25 = vld [vmem:[#allocation6 + $0x1b0] sm:$0xf0] }
 0x81b   :  { %v8225_v27 = vmul.f32 %v8223_v52, %v8102_v49  ;;  %v15576_v49 = vld [vmem:[#allocation6 + $0xb0] sm:$0xf0]  ;;  %v8259_v52 = vperm.slane %v18995_v58, 7 }
 0x81d   :  { %v8234_v9 = vperm.slane %v8225_v27, 7  ;;  %v8227_v44 = vperm.slane %v8225_v27, 0  ;;  %v8228_v51 = vperm.slane %v8225_v27, 1  ;;  %v8229_v1 = vperm.slane %v8225_v27, 2 }
 0x81e   :  { %v8230_v32 = vperm.slane %v8225_v27, 3  ;;  %v8231_v23 = vperm.slane %v8225_v27, 4  ;;  %v8232_v8 = vperm.slane %v8225_v27, 5  ;;  %v8233_v12 = vperm.slane %v8225_v27, 6 }
 0x81f   :  { %v19004_v45 = vmul.f32 %v8234_v9, %v18978_v59  ;;  %v8243_v6 = vmul.f32 %v8227_v44, %v18656_v47  ;;  %v8244_v4 = vmul.f32 %v8228_v51, %v18672_v41  ;;  %v8245_v15 = vmul.f32 %v8229_v1, %v18765_v36  ;;  %v15608_v47 = vld [vmem:[#allocation6 + $0xf0] sm:$0xf0]  ;;  %v18002_v36 = vld [vmem:[#allocation6 + $0x2e4] sm:$0xf] }
 0x820   :  { %v8246_v29 = vmul.f32 %v8230_v32, %v18785_v56  ;;  %v19011_v37 = vmul.f32 %v8231_v23, %v18880_v39  ;;  %v19014_v5 = vmul.f32 %v8232_v8, %v18897_v55  ;;  %v19017_v34 = vmul.f32 %v8233_v12, %v18967_v14  ;;  %v15736_v41 = vld [vmem:[#allocation6 + $0x1f0] sm:$0xf0]  ;;  %v18034_v56 = vld [vmem:[#allocation6 + $0x3e4] sm:$0xf] }
 0x821   :  { %v8268_v59 = vadd.f32 %v8252_v33, %v8243_v6  ;;  %v8269_v31 = vadd.f32 %v8253_v10, %v8244_v4  ;;  %v8270_v38 = vadd.f32 %v8254_v62, %v8245_v15  ;;  %v15611_v55 = vor.u32 %v17938_v18, %v15608_v47  ;;  %v17994_v10 = vld [vmem:[#allocation6 + $0x2a4] sm:$0xf]  ;;  %v15832_v62 = vld [vmem:[#allocation6 + $0x2b0] sm:$0xf0] }
 0x822   :  { %v8271_v35 = vadd.f32 %v8255_v2, %v8246_v29  ;;  %v15739_v46 = vor.u32 %v17970_v30, %v15736_v41  ;;  %v15867_v11 = vor.u32 %v18002_v36, %v15864_v13  ;;  %v15995_v53 = vor.u32 %v18034_v56, %v15992_v40  ;;  %v18026_v9 = vld [vmem:[#allocation6 + $0x3a4] sm:$0xf]  ;;  %v15960_v44 = vld [vmem:[#allocation6 + $0x3b0] sm:$0xf0] }
 0x823   :  { %v8276_v16 = vmax.f32 %v8268_v59, 0.0  ;;  %v8277_v21 = vmax.f32 %v8269_v31, 0.0  ;;  %v8278_v39 = vmax.f32 %v8270_v38, 0.0  ;;  %v15851_v27 = vor.u32 %v17998_v63, %v15848_v48  ;;  %v17926_v23 = vld [vmem:[#allocation6 + $0x84] sm:$0xf] }
 0x824   :  { %v8279_v20 = vmax.f32 %v8271_v35, 0.0  ;;  %v15979_v33 = vor.u32 %v18030_v57, %v15976_v54  ;;  %v8258_v2 = vperm.slane %v18995_v58, 6  ;;  %v15579_v51 = vor.u32 %v17930_v0, %v15576_v49  ;;  %v15560_v8 = vld [vmem:[#allocation6 + $0x90] sm:$0xf0]  ;;  %v17958_v29 = vld [vmem:[#allocation6 + $0x184] sm:$0xf] }
 0x825   :  { %v19019_v42 = vpack.c.bf16 %v8276_v16, %v8276_v16  ;;  %v19021_v14 = vpack.c.bf16 %v8277_v21, %v8277_v21  ;;  %v19023_v26 = vpack.c.bf16 %v8278_v39, %v8278_v39  ;;  %v15707_v1 = vor.u32 %v17962_v24, %v15704_v25  ;;  %v15688_v58 = vld [vmem:[#allocation6 + $0x190] sm:$0xf0]  ;;  %v17990_v18 = vld [vmem:[#allocation6 + $0x284] sm:$0xf] }
 0x826   :  { %v19025_v50 = vpack.c.bf16 %v8279_v20, %v8279_v20  ;;  %v15835_v32 = vor.u32 %v17994_v10, %v15832_v62  ;;  %v8272_v12 = vadd.f32 %v8256_v19, %v19011_v37  ;;  %v8273_v6 = vadd.f32 %v8257_v28, %v19014_v5  ;;  %v15816_v31 = vld [vmem:[#allocation6 + $0x290] sm:$0xf0]  ;;  %v18022_v38 = vld [vmem:[#allocation6 + $0x384] sm:$0xf] }
 0x827   :  { %9836 = vmatmul.bf16.vlgmr.msra.gmra.mxu0 %v19019_v42  ;;  %9849 = vmatmul.bf16.vlgmr.msra.gmra.mxu1 %v19021_v14  ;;  %v8275_v4 = vadd.f32 %v8259_v52, %v19004_v45  ;;  %v15963_v15 = vor.u32 %v18026_v9, %v15960_v44  ;;  %v8274_v59 = vadd.f32 %v8258_v2, %v19017_v34  ;;  %v15944_v47 = vld [vmem:[#allocation6 + $0x390] sm:$0xf0]  ;;  %v17922_v30 = vld [vmem:[#allocation6 + $0x64] sm:$0xf] }
 0x828   :  { %9862 = vmatmul.bf16.vlgmr.msra.gmra.mxu2 %v19023_v26  ;;  %9875 = vmatmul.bf16.vlgmr.msra.gmra.mxu3 %v19025_v50  ;;  %v15544_v41 = vld [vmem:[#allocation6 + $0x70] sm:$0xf0]  ;;  %v15563_v37 = vor.u32 %v17926_v23, %v15560_v8  ;;  %v15691_v35 = vor.u32 %v17958_v29, %v15688_v58  ;;  %v8280_v5 = vmax.f32 %v8272_v12, 0.0  ;;  %v8281_v36 = vmax.f32 %v8273_v6, 0.0  ;;  %v17954_v45 = vld [vmem:[#allocation6 + $0x164] sm:$0xf] }
 0x829   :  { %9932 = vmatpush.bf16.msra.mxu0 %v15611_v55  ;;  %9945 = vmatpush.bf16.msra.mxu1 %v15739_v46  ;;  %v15672_v13 = vld [vmem:[#allocation6 + $0x170] sm:$0xf0]  ;;  %v8283_v56 = vmax.f32 %v8275_v4, 0.0  ;;  %v15819_v16 = vor.u32 %v17990_v18, %v15816_v31  ;;  %v15947_v21 = vor.u32 %v18022_v38, %v15944_v47  ;;  %v8282_v39 = vmax.f32 %v8274_v59, 0.0  ;;  %v17986_v34 = vld [vmem:[#allocation6 + $0x264] sm:$0xf] }
 0x82a   :  { %9958 = vmatpush.bf16.msra.mxu2 %v15867_v11  ;;  %9971 = vmatpush.bf16.msra.mxu3 %v15995_v53  ;;  %v15800_v40 = vld [vmem:[#allocation6 + $0x270] sm:$0xf0]  ;;  %v18018_v20 = vld [vmem:[#allocation6 + $0x364] sm:$0xf]  ;;  %v15547_v46 = vor.u32 %v17922_v30, %v15544_v41  ;;  %v15675_v7 = vor.u32 %v17954_v45, %v15672_v13  ;;  %v19039_v22 = vpack.c.bf16 %v8280_v5, %v8280_v5 }
 0x82b   :  { %v15928_v55 = vld [vmem:[#allocation6 + $0x370] sm:$0xf0]  ;;  %v19041_v11 = vpack.c.bf16 %v8281_v36, %v8281_v36  ;;  %v15803_v53 = vor.u32 %v17986_v34, %v15800_v40  ;;  %v19043_v63 = vpack.c.bf16 %v8283_v56, %v8283_v56  ;;  %v19045_v48 = vpack.c.bf16 %v8282_v39, %v8282_v39  ;;  %v17950_v54 = vld [vmem:[#allocation6 + $0x144] sm:$0xf] }
 0x82c   :  { %v15931_v57 = vor.u32 %v18018_v20, %v15928_v55  ;;  %v15656_v0 = vld [vmem:[#allocation6 + $0x150] sm:$0xf0]  ;;  %v17982_v19 = vld [vmem:[#allocation6 + $0x244] sm:$0xf]  ;;  %v15531_v49 = vor.u32 %v17918_v17, %v15528_v43 }
 0x82d   :  { %9933 = vmatpush.bf16.msra.mxu0 %v15595_v60  ;;  %9946 = vmatpush.bf16.msra.mxu1 %v15723_v61  ;;  %v15784_v28 = vld [vmem:[#allocation6 + $0x250] sm:$0xf0]  ;;  %v18014_v60 = vld [vmem:[#allocation6 + $0x344] sm:$0xf]  ;;  %v15659_v24 = vor.u32 %v17950_v54, %v15656_v0 }
 0x82e   :  { %9959 = vmatpush.bf16.msra.mxu2 %v15851_v27  ;;  %9972 = vmatpush.bf16.msra.mxu3 %v15979_v33  ;;  %v15912_v61 = vld [vmem:[#allocation6 + $0x350] sm:$0xf0]  ;;  %v17914_v25 = vld [vmem:[#allocation6 + $0x24] sm:$0xf]  ;;  %v15787_v27 = vor.u32 %v17982_v19, %v15784_v28 }
 0x82f   :  { %v15512_v52 = vld [vmem:[#allocation6 + $0x30] sm:$0xf0]  ;;  %v15915_v33 = vor.u32 %v18014_v60, %v15912_v61  ;;  %v17946_v10 = vld [vmem:[#allocation6 + $0x124] sm:$0xf] }
 0x830   :  { %v15640_v62 = vld [vmem:[#allocation6 + $0x130] sm:$0xf0]  ;;  %v17978_v2 = vld [vmem:[#allocation6 + $0x224] sm:$0xf] }
 0x831   :  { %9934 = vmatpush.bf16.msra.mxu0 %v15579_v51  ;;  %9947 = vmatpush.bf16.msra.mxu1 %v15707_v1  ;;  %v15768_v9 = vld [vmem:[#allocation6 + $0x230] sm:$0xf0]  ;;  %v18010_v44 = vld [vmem:[#allocation6 + $0x324] sm:$0xf]  ;;  %v15643_v23 = vor.u32 %v17946_v10, %v15640_v62 }
 0x832   :  { %9960 = vmatpush.bf16.msra.mxu2 %v15835_v32  ;;  %9973 = vmatpush.bf16.msra.mxu3 %v15963_v15  ;;  %v15896_v51 = vld [vmem:[#allocation6 + $0x330] sm:$0xf0]  ;;  %v17910_v1 = vld [vmem:[#allocation6 + $0x4] sm:$0xf]  ;;  %v15515_v32 = vor.u32 %v17914_v25, %v15512_v52  ;;  %v15771_v4 = vor.u32 %v17978_v2, %v15768_v9 }
 0x833   :  { %v15496_v8 = vld [vmem:[#allocation6 + $0x10] sm:$0xf0]  ;;  %v17942_v12 = vld [vmem:[#allocation6 + $0x104] sm:$0xf]  ;;  %v15899_v15 = vor.u32 %v18010_v44, %v15896_v51 }
 0x834   :  { %v15624_v6 = vld [vmem:[#allocation6 + $0x110] sm:$0xf0]  ;;  %v17974_v29 = vld [vmem:[#allocation6 + $0x204] sm:$0xf] }
 0x835   :  { %9935 = vmatpush.bf16.msra.mxu0 %v15563_v37  ;;  %9948 = vmatpush.bf16.msra.mxu1 %v15691_v35  ;;  %v15752_v58 = vld [vmem:[#allocation6 + $0x210] sm:$0xf0]  ;;  %v18006_v18 = vld [vmem:[#allocation6 + $0x304] sm:$0xf]  ;;  %v15499_v37 = vor.u32 %v17910_v1, %v15496_v8  ;;  %v15627_v35 = vor.u32 %v17942_v12, %v15624_v6 }
 0x836   :  { %9961 = vmatpush.bf16.msra.mxu2 %v15819_v16  ;;  %9974 = vmatpush.bf16.msra.mxu3 %v15947_v21  ;;  %v15880_v59 = vld [vmem:[#allocation6 + $0x310] sm:$0xf0]  ;;  %v18066_v31 = vld [vmem:[#allocation6 + $0x4e4] sm:$0xf]  ;;  %v15755_v13 = vor.u32 %v17974_v29, %v15752_v58 }
 0x837   :  { %9888 = vmatmul.bf16.vlgmr.msrb.gmra.mxu0 %v19039_v22  ;;  %9901 = vmatmul.bf16.vlgmr.msrb.gmra.mxu1 %v19041_v11  ;;  %v16120_v38 = vld [vmem:[#allocation6 + $0x4f0] sm:$0xf0]  ;;  %v18098_v47 = vld [vmem:[#allocation6 + $0x5e4] sm:$0xf]  ;;  %v15883_v56 = vor.u32 %v18006_v18, %v15880_v59 }
 0x838   :  { %9914 = vmatmul.bf16.vlgmr.msrb.gmra.mxu2 %v19045_v48  ;;  %9927 = vmatmul.bf16.vlgmr.msrb.gmra.mxu3 %v19043_v63  ;;  %v16248_v30 = vld [vmem:[#allocation6 + $0x5f0] sm:$0xf0]  ;;  %v18130_v41 = vld [vmem:[#allocation6 + $0x6e4] sm:$0xf]  ;;  %v16123_v16 = vor.u32 %v18066_v31, %v16120_v38 }
 0x839   :  { %9936 = vmatpush.bf16.msra.mxu0 %v15547_v46  ;;  %9949 = vmatpush.bf16.msra.mxu1 %v15675_v7  ;;  %v16376_v5 = vld [vmem:[#allocation6 + $0x6f0] sm:$0xf0]  ;;  %v18162_v36 = vld [vmem:[#allocation6 + $0x7e4] sm:$0xf]  ;;  %v16251_v21 = vor.u32 %v18098_v47, %v16248_v30 }
 0x83a   :  { %9962 = vmatpush.bf16.msra.mxu2 %v15803_v53  ;;  %9975 = vmatpush.bf16.msra.mxu3 %v15931_v57  ;;  %v16504_v45 = vld [vmem:[#allocation6 + $0x7f0] sm:$0xf0]  ;;  %v18062_v39 = vld [vmem:[#allocation6 + $0x4c4] sm:$0xf]  ;;  %v16379_v40 = vor.u32 %v18130_v41, %v16376_v5 }
 0x83b   :  { %v16104_v34 = vld [vmem:[#allocation6 + $0x4d0] sm:$0xf0]  ;;  %v16507_v20 = vor.u32 %v18162_v36, %v16504_v45  ;;  %v18094_v55 = vld [vmem:[#allocation6 + $0x5c4] sm:$0xf] }
 0x83c   :  { %v16232_v46 = vld [vmem:[#allocation6 + $0x5d0] sm:$0xf0]  ;;  %v18126_v7 = vld [vmem:[#allocation6 + $0x6c4] sm:$0xf]  ;;  %v16107_v57 = vor.u32 %v18062_v39, %v16104_v34 }
 0x83d   :  { %9937 = vmatpush.bf16.msra.mxu0 %v15531_v49  ;;  %9950 = vmatpush.bf16.msra.mxu1 %v15659_v24  ;;  %v16360_v53 = vld [vmem:[#allocation6 + $0x6d0] sm:$0xf0]  ;;  %v18158_v17 = vld [vmem:[#allocation6 + $0x7c4] sm:$0xf]  ;;  %v16235_v54 = vor.u32 %v18094_v55, %v16232_v46 }
 0x83e   :  { %9963 = vmatpush.bf16.msra.mxu2 %v15787_v27  ;;  %9976 = vmatpush.bf16.msra.mxu3 %v15915_v33  ;;  %v16488_v43 = vld [vmem:[#allocation6 + $0x7d0] sm:$0xf0]  ;;  %v18058_v0 = vld [vmem:[#allocation6 + $0x4a4] sm:$0xf]  ;;  %v16363_v28 = vor.u32 %v18126_v7, %v16360_v53 }
 0x83f   :  { %v16088_v19 = vld [vmem:[#allocation6 + $0x4b0] sm:$0xf0]  ;;  %v16491_v60 = vor.u32 %v18158_v17, %v16488_v43  ;;  %v18090_v61 = vld [vmem:[#allocation6 + $0x5a4] sm:$0xf] }
 0x840   :  { %v16216_v49 = vld [vmem:[#allocation6 + $0x5b0] sm:$0xf0]  ;;  %v18122_v24 = vld [vmem:[#allocation6 + $0x6a4] sm:$0xf]  ;;  %v16091_v33 = vor.u32 %v18058_v0, %v16088_v19 }
 0x841   :  { %9938 = vmatpush.bf16.msra.mxu0 %v15515_v32  ;;  %9951 = vmatpush.bf16.msra.mxu1 %v15643_v23  ;;  %v16344_v25 = vld [vmem:[#allocation6 + $0x6b0] sm:$0xf0]  ;;  %v18154_v52 = vld [vmem:[#allocation6 + $0x7a4] sm:$0xf]  ;;  %v16219_v10 = vor.u32 %v18090_v61, %v16216_v49 }
 0x842   :  { %9964 = vmatpush.bf16.msra.mxu2 %v15771_v4  ;;  %9977 = vmatpush.bf16.msra.mxu3 %v15899_v15  ;;  %v16472_v27 = vld [vmem:[#allocation6 + $0x7b0] sm:$0xf0]  ;;  %v18054_v62 = vld [vmem:[#allocation6 + $0x484] sm:$0xf]  ;;  %v16347_v9 = vor.u32 %v18122_v24, %v16344_v25 }
 0x843   :  { %v16072_v2 = vld [vmem:[#allocation6 + $0x490] sm:$0xf0]  ;;  %v16475_v44 = vor.u32 %v18154_v52, %v16472_v27  ;;  %v18086_v51 = vld [vmem:[#allocation6 + $0x584] sm:$0xf] }
 0x844   :  { %v16200_v1 = vld [vmem:[#allocation6 + $0x590] sm:$0xf0]  ;;  %v18118_v32 = vld [vmem:[#allocation6 + $0x684] sm:$0xf]  ;;  %v16075_v6 = vor.u32 %v18054_v62, %v16072_v2 }
 0x845   :  { %9939 = vmatpush.bf16.msra.mxu0 %v15499_v37  ;;  %9952 = vmatpush.bf16.msra.mxu1 %v15627_v35  ;;  %v16328_v23 = vld [vmem:[#allocation6 + $0x690] sm:$0xf0]  ;;  %v18150_v8 = vld [vmem:[#allocation6 + $0x784] sm:$0xf]  ;;  %v16203_v4 = vor.u32 %v18086_v51, %v16200_v1  ;;  %v17941_v51 = vld [vmem:[#allocation6 + $0xf4] sm:$0xf0] }
 0x846   :  { %9965 = vmatpush.bf16.msra.mxu2 %v15755_v13  ;;  %9978 = vmatpush.bf16.msra.mxu3 %v15883_v56  ;;  %v16456_v12 = vld [vmem:[#allocation6 + $0x790] sm:$0xf0]  ;;  %v18050_v15 = vld [vmem:[#allocation6 + $0x464] sm:$0xf]  ;;  %v16331_v58 = vor.u32 %v18118_v32, %v16328_v23  ;;  %v15742_v1 = vld [vmem:[#allocation6 + $0x1e8] sm:$0xf] }
 0x847   :  { %v16056_v29 = vld [vmem:[#allocation6 + $0x470] sm:$0xf0]  ;;  %v16459_v18 = vor.u32 %v18150_v8, %v16456_v12  ;;  %v18082_v59 = vld [vmem:[#allocation6 + $0x564] sm:$0xf]  ;;  %v17973_v32 = vld [vmem:[#allocation6 + $0x1f4] sm:$0xf0] }
 0x848   :  { %9940 = vmatmul.bf16.vlgmr.msra.gmra.mxu0 %v19019_v42  ;;  %9953 = vmatmul.bf16.vlgmr.msra.gmra.mxu1 %v19021_v14  ;;  %v16184_v31 = vld [vmem:[#allocation6 + $0x570] sm:$0xf0]  ;;  %v18114_v38 = vld [vmem:[#allocation6 + $0x664] sm:$0xf]  ;;  %v16059_v37 = vor.u32 %v18050_v15, %v16056_v29  ;;  %v15870_v23 = vld [vmem:[#allocation6 + $0x2e8] sm:$0xf] }
 0x849   :  { %9984 = vmatpush.bf16.msrb.mxu0 %v16123_v16  ;;  %9997 = vmatpush.bf16.msrb.mxu1 %v16251_v21  ;;  %v16312_v47 = vld [vmem:[#allocation6 + $0x670] sm:$0xf0]  ;;  %v18146_v30 = vld [vmem:[#allocation6 + $0x764] sm:$0xf]  ;;  %v16187_v35 = vor.u32 %v18082_v59, %v16184_v31  ;;  %v18037_v15 = vld [vmem:[#allocation6 + $0x3f4] sm:$0xf0]  ;;  %v15743_v59 = vor.u32 %v17973_v32, %v15742_v1 }
 0x84a   :  { %10010 = vmatpush.bf16.msrb.mxu2 %v16379_v40  ;;  %10023 = vmatpush.bf16.msrb.mxu3 %v16507_v20  ;;  %v16440_v41 = vld [vmem:[#allocation6 + $0x770] sm:$0xf0]  ;;  %v18046_v5 = vld [vmem:[#allocation6 + $0x444] sm:$0xf]  ;;  %v16315_v45 = vor.u32 %v18114_v38, %v16312_v47  ;;  %v15598_v31 = vld [vmem:[#allocation6 + $0xc8] sm:$0xf] }
 0x84b   :  { %9966 = vmatmul.bf16.vlgmr.msra.gmra.mxu2 %v19023_v26  ;;  %9979 = vmatmul.bf16.vlgmr.msra.gmra.mxu3 %v19025_v50  ;;  %v16040_v36 = vld [vmem:[#allocation6 + $0x450] sm:$0xf0]  ;;  %v16443_v13 = vor.u32 %v18146_v30, %v16440_v41  ;;  %v18078_v56 = vld [vmem:[#allocation6 + $0x544] sm:$0xf]  ;;  %v17937_v38 = vld [vmem:[#allocation6 + $0xd4] sm:$0xf0] }
 0x84c   :  { %v16168_v16 = vld [vmem:[#allocation6 + $0x550] sm:$0xf0]  ;;  %v18110_v21 = vld [vmem:[#allocation6 + $0x644] sm:$0xf]  ;;  %v16043_v20 = vor.u32 %v18046_v5, %v16040_v36  ;;  %v15726_v41 = vld [vmem:[#allocation6 + $0x1c8] sm:$0xf] }
 0x84d   :  { %9985 = vmatpush.bf16.msrb.mxu0 %v16107_v57  ;;  %9998 = vmatpush.bf16.msrb.mxu1 %v16235_v54  ;;  %v16296_v39 = vld [vmem:[#allocation6 + $0x650] sm:$0xf0]  ;;  %v18142_v34 = vld [vmem:[#allocation6 + $0x744] sm:$0xf]  ;;  %v16171_v55 = vor.u32 %v18078_v56, %v16168_v16  ;;  %v18001_v5 = vld [vmem:[#allocation6 + $0x2d4] sm:$0xf0] }
 0x84e   :  { %10011 = vmatpush.bf16.msrb.mxu2 %v16363_v28  ;;  %10024 = vmatpush.bf16.msrb.mxu3 %v16491_v60  ;;  %v16424_v40 = vld [vmem:[#allocation6 + $0x750] sm:$0xf0]  ;;  %v18042_v46 = vld [vmem:[#allocation6 + $0x424] sm:$0xf]  ;;  %v16299_v53 = vor.u32 %v18110_v21, %v16296_v39  ;;  %v15982_v36 = vld [vmem:[#allocation6 + $0x3c8] sm:$0xf] }
 0x84f   :  { %v16024_v7 = vld [vmem:[#allocation6 + $0x430] sm:$0xf0]  ;;  %v16427_v17 = vor.u32 %v18142_v34, %v16424_v40  ;;  %v18074_v43 = vld [vmem:[#allocation6 + $0x524] sm:$0xf]  ;;  %v15582_v16 = vld [vmem:[#allocation6 + $0xa8] sm:$0xf] }
 0x850   :  { %v16152_v57 = vld [vmem:[#allocation6 + $0x530] sm:$0xf0]  ;;  %v18106_v54 = vld [vmem:[#allocation6 + $0x624] sm:$0xf]  ;;  %v16027_v61 = vor.u32 %v18042_v46, %v16024_v7  ;;  %v17933_v21 = vld [vmem:[#allocation6 + $0xb4] sm:$0xf0] }
 0x851   :  { %9986 = vmatpush.bf16.msrb.mxu0 %v16091_v33  ;;  %9999 = vmatpush.bf16.msrb.mxu1 %v16219_v10  ;;  %v16280_v0 = vld [vmem:[#allocation6 + $0x630] sm:$0xf0]  ;;  %v18138_v19 = vld [vmem:[#allocation6 + $0x724] sm:$0xf]  ;;  %v16155_v49 = vor.u32 %v18074_v43, %v16152_v57  ;;  %v15710_v40 = vld [vmem:[#allocation6 + $0x1a8] sm:$0xf] }
 0x852   :  { %10012 = vmatpush.bf16.msrb.mxu2 %v16347_v9  ;;  %10025 = vmatpush.bf16.msrb.mxu3 %v16475_v44  ;;  %v16408_v28 = vld [vmem:[#allocation6 + $0x730] sm:$0xf0]  ;;  %v18038_v60 = vld [vmem:[#allocation6 + $0x404] sm:$0xf]  ;;  %v16283_v27 = vor.u32 %v18106_v54, %v16280_v0  ;;  %v15614_v44 = vld [vmem:[#allocation6 + $0xe8] sm:$0xf] }
 0x853   :  { %v16008_v24 = vld [vmem:[#allocation6 + $0x410] sm:$0xf0]  ;;  %v18070_v25 = vld [vmem:[#allocation6 + $0x504] sm:$0xf]  ;;  %v16411_v33 = vor.u32 %v18138_v19, %v16408_v28  ;;  %v17997_v46 = vld [vmem:[#allocation6 + $0x2b4] sm:$0xf0] }
 0x854   :  { %v16136_v52 = vld [vmem:[#allocation6 + $0x510] sm:$0xf0]  ;;  %v18102_v10 = vld [vmem:[#allocation6 + $0x604] sm:$0xf]  ;;  %v16011_v8 = vor.u32 %v18038_v60, %v16008_v24  ;;  %v15966_v7 = vld [vmem:[#allocation6 + $0x3a8] sm:$0xf] }
 0x855   :  { %9987 = vmatpush.bf16.msrb.mxu0 %v16075_v6  ;;  %10000 = vmatpush.bf16.msrb.mxu1 %v16203_v4  ;;  %v16264_v62 = vld [vmem:[#allocation6 + $0x610] sm:$0xf0]  ;;  %v18134_v2 = vld [vmem:[#allocation6 + $0x704] sm:$0xf]  ;;  %v16139_v12 = vor.u32 %v18070_v25, %v16136_v52  ;;  %v18005_v6 = vld [vmem:[#allocation6 + $0x2f4] sm:$0xf0] }
 0x856   :  { %10013 = vmatpush.bf16.msrb.mxu2 %v16331_v58  ;;  %10026 = vmatpush.bf16.msrb.mxu3 %v16459_v18  ;;  %v16392_v9 = vld [vmem:[#allocation6 + $0x710] sm:$0xf0]  ;;  %v15998_v4 = vld [vmem:[#allocation6 + $0x3e8] sm:$0xf]  ;;  %v16267_v29 = vor.u32 %v18102_v10, %v16264_v62  ;;  %v15615_v18 = vor.u32 %v17941_v51, %v15614_v44  ;;  %v15871_v47 = vor.u32 %v18005_v6, %v15870_v23  ;;  %v17929_v54 = vld [vmem:[#allocation6 + $0x94] sm:$0xf0] }
 0x857   :  { %v16395_v58 = vor.u32 %v18134_v2, %v16392_v9  ;;  %v15999_v30 = vor.u32 %v18037_v15, %v15998_v4  ;;  %v15566_v57 = vld [vmem:[#allocation6 + $0x88] sm:$0xf]  ;;  %v17961_v60 = vld [vmem:[#allocation6 + $0x194] sm:$0xf0] }
 0x858   :  { %v15694_v28 = vld [vmem:[#allocation6 + $0x188] sm:$0xf]  ;;  %v18025_v25 = vld [vmem:[#allocation6 + $0x394] sm:$0xf0]  ;;  %v15567_v52 = vor.u32 %v17929_v54, %v15566_v57 }
 0x859   :  { %9988 = vmatpush.bf16.msrb.mxu0 %v16059_v37  ;;  %10001 = vmatpush.bf16.msrb.mxu1 %v16187_v35  ;;  %v17969_v37 = vld [vmem:[#allocation6 + $0x1d4] sm:$0xf0]  ;;  %v15854_v35 = vld [vmem:[#allocation6 + $0x2c8] sm:$0xf] }
 0x85a   :  { %10014 = vmatpush.bf16.msrb.mxu2 %v16315_v45  ;;  %10027 = vmatpush.bf16.msrb.mxu3 %v16443_v13  ;;  %v18033_v45 = vld [vmem:[#allocation6 + $0x3d4] sm:$0xf0]  ;;  %v15599_v13 = vor.u32 %v17937_v38, %v15598_v31  ;;  %v15727_v56 = vor.u32 %v17969_v37, %v15726_v41  ;;  %v15855_v39 = vor.u32 %v18001_v5, %v15854_v35  ;;  %v15950_v24 = vld [vmem:[#allocation6 + $0x388] sm:$0xf] }
 0x85b   :  { %v15983_v34 = vor.u32 %v18033_v45, %v15982_v36  ;;  %v17925_v10 = vld [vmem:[#allocation6 + $0x74] sm:$0xf0]  ;;  %v15951_v2 = vor.u32 %v18025_v25, %v15950_v24  ;;  %v15678_v9 = vld [vmem:[#allocation6 + $0x168] sm:$0xf] }
 0x85c   :  { %v17957_v44 = vld [vmem:[#allocation6 + $0x174] sm:$0xf0]  ;;  %v15806_v51 = vld [vmem:[#allocation6 + $0x268] sm:$0xf] }
 0x85d   :  { %9989 = vmatpush.bf16.msrb.mxu0 %v16043_v20  ;;  %10002 = vmatpush.bf16.msrb.mxu1 %v16171_v55  ;;  %v17965_v20 = vld [vmem:[#allocation6 + $0x1b4] sm:$0xf0]  ;;  %v15838_v55 = vld [vmem:[#allocation6 + $0x2a8] sm:$0xf] }
 0x85e   :  { %10015 = vmatpush.bf16.msrb.mxu2 %v16299_v53  ;;  %10028 = vmatpush.bf16.msrb.mxu3 %v16427_v17  ;;  %v18029_v53 = vld [vmem:[#allocation6 + $0x3b4] sm:$0xf0]  ;;  %v15583_v17 = vor.u32 %v17933_v21, %v15582_v16  ;;  %v15711_v43 = vor.u32 %v17965_v20, %v15710_v40  ;;  %v15839_v0 = vor.u32 %v17997_v46, %v15838_v55  ;;  %v15934_v32 = vld [vmem:[#allocation6 + $0x368] sm:$0xf] }
 0x85f   :  { %v15967_v19 = vor.u32 %v18029_v53, %v15966_v7  ;;  %v17989_v1 = vld [vmem:[#allocation6 + $0x274] sm:$0xf0]  ;;  %v15534_v6 = vld [vmem:[#allocation6 + $0x48] sm:$0xf] }
 0x860   :  { %v18021_v23 = vld [vmem:[#allocation6 + $0x374] sm:$0xf0]  ;;  %v15807_v15 = vor.u32 %v17989_v1, %v15806_v51  ;;  %v15918_v38 = vld [vmem:[#allocation6 + $0x348] sm:$0xf] }
 0x861   :  { %9990 = vmatpush.bf16.msrb.mxu0 %v16027_v61  ;;  %10003 = vmatpush.bf16.msrb.mxu1 %v16155_v49  ;;  %v15822_v61 = vld [vmem:[#allocation6 + $0x288] sm:$0xf]  ;;  %v17993_v49 = vld [vmem:[#allocation6 + $0x294] sm:$0xf0] }
 0x862   :  { %10016 = vmatpush.bf16.msrb.mxu2 %v16283_v27  ;;  %10029 = vmatpush.bf16.msrb.mxu3 %v16411_v33  ;;  %v15695_v27 = vor.u32 %v17961_v60, %v15694_v28  ;;  %v15550_v33 = vld [vmem:[#allocation6 + $0x68] sm:$0xf]  ;;  %v15823_v62 = vor.u32 %v17993_v49, %v15822_v61  ;;  %v17921_v4 = vld [vmem:[#allocation6 + $0x54] sm:$0xf0] }
 0x863   :  { %v17985_v31 = vld [vmem:[#allocation6 + $0x254] sm:$0xf0]  ;;  %v15518_v37 = vld [vmem:[#allocation6 + $0x28] sm:$0xf] }
 0x864   :  { %v17917_v35 = vld [vmem:[#allocation6 + $0x34] sm:$0xf0]  ;;  %v15646_v45 = vld [vmem:[#allocation6 + $0x128] sm:$0xf] }
 0x865   :  { %9991 = vmatpush.bf16.msrb.mxu0 %v16011_v8  ;;  %10004 = vmatpush.bf16.msrb.mxu1 %v16139_v12  ;;  %v15551_v8 = vor.u32 %v17925_v10, %v15550_v33  ;;  %v15679_v12 = vor.u32 %v17957_v44, %v15678_v9  ;;  %v17981_v16 = vld [vmem:[#allocation6 + $0x234] sm:$0xf0]  ;;  %v15902_v21 = vld [vmem:[#allocation6 + $0x328] sm:$0xf]  ;;  %v15519_v40 = vor.u32 %v17917_v35, %v15518_v37 }
 0x866   :  { %10017 = vmatpush.bf16.msrb.mxu2 %v16267_v29  ;;  %10030 = vmatpush.bf16.msrb.mxu3 %v16395_v58  ;;  %v15935_v29 = vor.u32 %v18021_v23, %v15934_v32  ;;  %v15662_v58 = vld [vmem:[#allocation6 + $0x148] sm:$0xf]  ;;  %v17913_v55 = vld [vmem:[#allocation6 + $0x14] sm:$0xf0] }
 0x867   :  { %v15630_v46 = vld [vmem:[#allocation6 + $0x108] sm:$0xf]  ;;  %v17945_v7 = vld [vmem:[#allocation6 + $0x114] sm:$0xf0] }
 0x868   :  { %9992 = vmatmul.bf16.vlgmr.msrb.gmra.mxu0 %v19039_v22  ;;  %10005 = vmatmul.bf16.vlgmr.msrb.gmra.mxu1 %v19041_v11  ;;  %v17977_v57 = vld [vmem:[#allocation6 + $0x214] sm:$0xf0]  ;;  %v15886_v54 = vld [vmem:[#allocation6 + $0x308] sm:$0xf]  ;;  %v15631_v25 = vor.u32 %v17945_v7, %v15630_v46 }
 0x869   :  { %10036 = vmatpush.bf16.msra.mxu0 %v15615_v18  ;;  %10049 = vmatpush.bf16.msra.mxu1 %v15743_v59  ;;  %v17953_v18 = vld [vmem:[#allocation6 + $0x154] sm:$0xf0]  ;;  %v15790_v59 = vld [vmem:[#allocation6 + $0x248] sm:$0xf] }
 0x86a   :  { %10062 = vmatpush.bf16.msra.mxu2 %v15871_v47  ;;  %10075 = vmatpush.bf16.msra.mxu3 %v15999_v30  ;;  %v18017_v47 = vld [vmem:[#allocation6 + $0x354] sm:$0xf0]  ;;  %v15535_v30 = vor.u32 %v17921_v4, %v15534_v6  ;;  %v15663_v41 = vor.u32 %v17953_v18, %v15662_v58  ;;  %v15791_v5 = vor.u32 %v17985_v31, %v15790_v59  ;;  %v16254_v60 = vld [vmem:[#allocation6 + $0x5e8] sm:$0xf] }
 0x86b   :  { %10018 = vmatmul.bf16.vlgmr.msrb.gmra.mxu2 %v19045_v48  ;;  %10031 = vmatmul.bf16.vlgmr.msrb.gmra.mxu3 %v19043_v63  ;;  %v15919_v36 = vor.u32 %v18017_v47, %v15918_v38  ;;  %v18069_v28 = vld [vmem:[#allocation6 + $0x4f4] sm:$0xf0]  ;;  %v16382_v49 = vld [vmem:[#allocation6 + $0x6e8] sm:$0xf] }
 0x86c   :  { %v18101_v61 = vld [vmem:[#allocation6 + $0x5f4] sm:$0xf0]  ;;  %v16110_v44 = vld [vmem:[#allocation6 + $0x4c8] sm:$0xf] }
 0x86d   :  { %10037 = vmatpush.bf16.msra.mxu0 %v15599_v13  ;;  %10050 = vmatpush.bf16.msra.mxu1 %v15727_v56  ;;  %v17949_v13 = vld [vmem:[#allocation6 + $0x134] sm:$0xf0]  ;;  %v15774_v56 = vld [vmem:[#allocation6 + $0x228] sm:$0xf]  ;;  %v16255_v9 = vor.u32 %v18101_v61, %v16254_v60 }
 0x86e   :  { %10063 = vmatpush.bf16.msra.mxu2 %v15855_v39  ;;  %10076 = vmatpush.bf16.msra.mxu3 %v15983_v34  ;;  %v18013_v39 = vld [vmem:[#allocation6 + $0x334] sm:$0xf0]  ;;  %v15502_v34 = vld [vmem:[#allocation6 + $0x8] sm:$0xf]  ;;  %v15647_v20 = vor.u32 %v17949_v13, %v15646_v45  ;;  %v15775_v53 = vor.u32 %v17981_v16, %v15774_v56 }
 0x86f   :  { %v15503_v24 = vor.u32 %v17913_v55, %v15502_v34  ;;  %v18165_v33 = vld [vmem:[#allocation6 + $0x7f4] sm:$0xf0]  ;;  %v16238_v23 = vld [vmem:[#allocation6 + $0x5c8] sm:$0xf] }
 0x870   :  { %v18065_v51 = vld [vmem:[#allocation6 + $0x4d4] sm:$0xf0]  ;;  %v16494_v4 = vld [vmem:[#allocation6 + $0x7c8] sm:$0xf] }
 0x871   :  { %10038 = vmatpush.bf16.msra.mxu0 %v15583_v17  ;;  %10051 = vmatpush.bf16.msra.mxu1 %v15711_v43  ;;  %v15903_v17 = vor.u32 %v18013_v39, %v15902_v21  ;;  %v15758_v43 = vld [vmem:[#allocation6 + $0x208] sm:$0xf]  ;;  %v18129_v6 = vld [vmem:[#allocation6 + $0x6d4] sm:$0xf0] }
 0x872   :  { %10064 = vmatpush.bf16.msra.mxu2 %v15839_v0  ;;  %10077 = vmatpush.bf16.msra.mxu3 %v15967_v19  ;;  %v18009_v0 = vld [vmem:[#allocation6 + $0x314] sm:$0xf0]  ;;  %v16126_v19 = vld [vmem:[#allocation6 + $0x4e8] sm:$0xf]  ;;  %v15759_v10 = vor.u32 %v17977_v57, %v15758_v43 }
 0x873   :  { %v16094_v18 = vld [vmem:[#allocation6 + $0x4a8] sm:$0xf]  ;;  %v18061_v59 = vld [vmem:[#allocation6 + $0x4b4] sm:$0xf0] }
 0x874   :  { %v16222_v47 = vld [vmem:[#allocation6 + $0x5a8] sm:$0xf]  ;;  %v18125_v37 = vld [vmem:[#allocation6 + $0x6b4] sm:$0xf0] }
 0x875   :  { %10039 = vmatpush.bf16.msra.mxu0 %v15567_v52  ;;  %10052 = vmatpush.bf16.msra.mxu1 %v15695_v27  ;;  %v18133_v52 = vld [vmem:[#allocation6 + $0x6f4] sm:$0xf0]  ;;  %v16510_v27 = vld [vmem:[#allocation6 + $0x7e8] sm:$0xf] }
 0x876   :  { %10065 = vmatpush.bf16.msra.mxu2 %v15823_v62  ;;  %10078 = vmatpush.bf16.msra.mxu3 %v15951_v2  ;;  %v15887_v62 = vor.u32 %v18009_v0, %v15886_v54  ;;  %v16127_v2 = vor.u32 %v18069_v28, %v16126_v19  ;;  %v16383_v1 = vor.u32 %v18133_v52, %v16382_v49  ;;  %v16478_v35 = vld [vmem:[#allocation6 + $0x7a8] sm:$0xf]  ;;  %v18057_v56 = vld [vmem:[#allocation6 + $0x494] sm:$0xf0] }
 0x877   :  { %v16511_v32 = vor.u32 %v18165_v33, %v16510_v27  ;;  %v16078_v13 = vld [vmem:[#allocation6 + $0x488] sm:$0xf]  ;;  %v18089_v34 = vld [vmem:[#allocation6 + $0x594] sm:$0xf0] }
 0x878   :  { %v16206_v39 = vld [vmem:[#allocation6 + $0x588] sm:$0xf]  ;;  %v18153_v46 = vld [vmem:[#allocation6 + $0x794] sm:$0xf0]  ;;  %v16079_v7 = vor.u32 %v18057_v56, %v16078_v13 }
 0x879   :  { %10040 = vmatpush.bf16.msra.mxu0 %v15551_v8  ;;  %10053 = vmatpush.bf16.msra.mxu1 %v15679_v12  ;;  %v18097_v8 = vld [vmem:[#allocation6 + $0x5d4] sm:$0xf0]  ;;  %v16366_v12 = vld [vmem:[#allocation6 + $0x6c8] sm:$0xf] }
 0x87a   :  { %10066 = vmatpush.bf16.msra.mxu2 %v15807_v15  ;;  %10079 = vmatpush.bf16.msra.mxu3 %v15935_v29  ;;  %v18161_v15 = vld [vmem:[#allocation6 + $0x7d4] sm:$0xf0]  ;;  %v16111_v29 = vor.u32 %v18065_v51, %v16110_v44  ;;  %v16239_v58 = vor.u32 %v18097_v8, %v16238_v23  ;;  %v16367_v31 = vor.u32 %v18129_v6, %v16366_v12  ;;  %v16462_v55 = vld [vmem:[#allocation6 + $0x788] sm:$0xf] }
 0x87b   :  { %v16495_v38 = vor.u32 %v18161_v15, %v16494_v4  ;;  %v18053_v43 = vld [vmem:[#allocation6 + $0x474] sm:$0xf0]  ;;  %v16463_v54 = vor.u32 %v18153_v46, %v16462_v55  ;;  %v16190_v0 = vld [vmem:[#allocation6 + $0x568] sm:$0xf] }
 0x87c   :  { %v18085_v19 = vld [vmem:[#allocation6 + $0x574] sm:$0xf0]  ;;  %v16318_v28 = vld [vmem:[#allocation6 + $0x668] sm:$0xf] }
 0x87d   :  { %10041 = vmatpush.bf16.msra.mxu0 %v15535_v30  ;;  %10054 = vmatpush.bf16.msra.mxu1 %v15663_v41  ;;  %v18093_v30 = vld [vmem:[#allocation6 + $0x5b4] sm:$0xf0]  ;;  %v16350_v41 = vld [vmem:[#allocation6 + $0x6a8] sm:$0xf] }
 0x87e   :  { %10067 = vmatpush.bf16.msra.mxu2 %v15791_v5  ;;  %10080 = vmatpush.bf16.msra.mxu3 %v15919_v36  ;;  %v18157_v5 = vld [vmem:[#allocation6 + $0x7b4] sm:$0xf0]  ;;  %v16095_v36 = vor.u32 %v18061_v59, %v16094_v18  ;;  %v16223_v45 = vor.u32 %v18093_v30, %v16222_v47  ;;  %v16351_v16 = vor.u32 %v18125_v37, %v16350_v41  ;;  %v16446_v61 = vld [vmem:[#allocation6 + $0x768] sm:$0xf] }
 0x87f   :  { %v16479_v21 = vor.u32 %v18157_v5, %v16478_v35  ;;  %v18117_v60 = vld [vmem:[#allocation6 + $0x674] sm:$0xf0]  ;;  %v16046_v52 = vld [vmem:[#allocation6 + $0x448] sm:$0xf] }
 0x880   :  { %v18149_v49 = vld [vmem:[#allocation6 + $0x774] sm:$0xf0]  ;;  %v16319_v33 = vor.u32 %v18117_v60, %v16318_v28  ;;  %v16430_v51 = vld [vmem:[#allocation6 + $0x748] sm:$0xf]  ;;  %v15600_v28 = vld [vmem:[#allocation6 + $0xd8] sm:$0xf0] }
 0x881   :  { %10042 = vmatpush.bf16.msra.mxu0 %v15519_v40  ;;  %10055 = vmatpush.bf16.msra.mxu1 %v15647_v20  ;;  %v16334_v40 = vld [vmem:[#allocation6 + $0x688] sm:$0xf]  ;;  %v18121_v20 = vld [vmem:[#allocation6 + $0x694] sm:$0xf0] }
 0x882   :  { %10068 = vmatpush.bf16.msra.mxu2 %v15775_v53  ;;  %10081 = vmatpush.bf16.msra.mxu3 %v15903_v17  ;;  %v16207_v53 = vor.u32 %v18089_v34, %v16206_v39  ;;  %v16062_v17 = vld [vmem:[#allocation6 + $0x468] sm:$0xf]  ;;  %v16335_v57 = vor.u32 %v18121_v20, %v16334_v40  ;;  %v18049_v27 = vld [vmem:[#allocation6 + $0x454] sm:$0xf0]  ;;  %v15616_v39 = vld [vmem:[#allocation6 + $0xf8] sm:$0xf0] }
 0x883   :  { %v18113_v44 = vld [vmem:[#allocation6 + $0x654] sm:$0xf0]  ;;  %v16030_v8 = vld [vmem:[#allocation6 + $0x428] sm:$0xf]  ;;  %v17971_v34 = vld [vmem:[#allocation6 + $0x1ec] sm:$0xf] }
 0x884   :  { %v18045_v12 = vld [vmem:[#allocation6 + $0x434] sm:$0xf0]  ;;  %v16158_v15 = vld [vmem:[#allocation6 + $0x528] sm:$0xf]  ;;  %v15744_v40 = vld [vmem:[#allocation6 + $0x1f8] sm:$0xf0] }
 0x885   :  { %10043 = vmatpush.bf16.msra.mxu0 %v15503_v24  ;;  %10056 = vmatpush.bf16.msra.mxu1 %v15631_v25  ;;  %v16063_v24 = vor.u32 %v18053_v43, %v16062_v17  ;;  %v16191_v25 = vor.u32 %v18085_v19, %v16190_v0  ;;  %v18109_v18 = vld [vmem:[#allocation6 + $0x634] sm:$0xf0]  ;;  %v16414_v59 = vld [vmem:[#allocation6 + $0x728] sm:$0xf]  ;;  %v16031_v47 = vor.u32 %v18045_v12, %v16030_v8  ;;  %v18003_v20 = vld [vmem:[#allocation6 + $0x2ec] sm:$0xf] }
 0x886   :  { %10069 = vmatpush.bf16.msra.mxu2 %v15759_v10  ;;  %10082 = vmatpush.bf16.msra.mxu3 %v15887_v62  ;;  %v16447_v10 = vor.u32 %v18149_v49, %v16446_v61  ;;  %v16174_v62 = vld [vmem:[#allocation6 + $0x548] sm:$0xf]  ;;  %v18041_v41 = vld [vmem:[#allocation6 + $0x414] sm:$0xf0]  ;;  %v16000_v17 = vld [vmem:[#allocation6 + $0x3f8] sm:$0xf0]  ;;  %v15747_v0 = vor.u32 %v17971_v34, %v15744_v40 }
 0x887   :  { %v16142_v37 = vld [vmem:[#allocation6 + $0x508] sm:$0xf]  ;;  %v18073_v35 = vld [vmem:[#allocation6 + $0x514] sm:$0xf0]  ;;  %v17935_v19 = vld [vmem:[#allocation6 + $0xcc] sm:$0xf] }
 0x888   :  { %10044 = vmatmul.bf16.vlgmr.msra.gmra.mxu0 %v19019_v42  ;;  %10057 = vmatmul.bf16.vlgmr.msra.gmra.mxu1 %v19021_v14  ;;  %v18105_v13 = vld [vmem:[#allocation6 + $0x614] sm:$0xf0]  ;;  %v16398_v56 = vld [vmem:[#allocation6 + $0x708] sm:$0xf]  ;;  %v16143_v46 = vor.u32 %v18073_v35, %v16142_v37  ;;  %v17967_v49 = vld [vmem:[#allocation6 + $0x1cc] sm:$0xf] }
 0x889   :  { %10088 = vmatpush.bf16.msrb.mxu0 %v16127_v2  ;;  %10101 = vmatpush.bf16.msrb.mxu1 %v16255_v9  ;;  %v18081_v2 = vld [vmem:[#allocation6 + $0x554] sm:$0xf0]  ;;  %v16302_v9 = vld [vmem:[#allocation6 + $0x648] sm:$0xf]  ;;  %v15840_v8 = vld [vmem:[#allocation6 + $0x2b8] sm:$0xf0] }
 0x88a   :  { %10114 = vmatpush.bf16.msrb.mxu2 %v16383_v1  ;;  %10127 = vmatpush.bf16.msrb.mxu3 %v16511_v32  ;;  %v18145_v1 = vld [vmem:[#allocation6 + $0x754] sm:$0xf0]  ;;  %v16047_v32 = vor.u32 %v18049_v27, %v16046_v52  ;;  %v16175_v23 = vor.u32 %v18081_v2, %v16174_v62  ;;  %v16303_v6 = vor.u32 %v18113_v44, %v16302_v9  ;;  %v15856_v52 = vld [vmem:[#allocation6 + $0x2d8] sm:$0xf0]  ;;  %v18031_v27 = vld [vmem:[#allocation6 + $0x3cc] sm:$0xf] }
 0x88b   :  { %10070 = vmatmul.bf16.vlgmr.msra.gmra.mxu2 %v19023_v26  ;;  %10083 = vmatmul.bf16.vlgmr.msra.gmra.mxu3 %v19025_v50  ;;  %v16431_v4 = vor.u32 %v18145_v1, %v16430_v51  ;;  %v17931_v2 = vld [vmem:[#allocation6 + $0xac] sm:$0xf]  ;;  %v15584_v9 = vld [vmem:[#allocation6 + $0xb8] sm:$0xf0] }
 0x88c   :  { %v17963_v1 = vld [vmem:[#allocation6 + $0x1ac] sm:$0xf]  ;;  %v15824_v35 = vld [vmem:[#allocation6 + $0x298] sm:$0xf0] }
 0x88d   :  { %10089 = vmatpush.bf16.msrb.mxu0 %v16111_v29  ;;  %10102 = vmatpush.bf16.msrb.mxu1 %v16239_v58  ;;  %v18077_v29 = vld [vmem:[#allocation6 + $0x534] sm:$0xf0]  ;;  %v16286_v58 = vld [vmem:[#allocation6 + $0x628] sm:$0xf]  ;;  %v18027_v12 = vld [vmem:[#allocation6 + $0x3ac] sm:$0xf] }
 0x88e   :  { %10115 = vmatpush.bf16.msrb.mxu2 %v16367_v31  ;;  %10128 = vmatpush.bf16.msrb.mxu3 %v16495_v38  ;;  %v18141_v31 = vld [vmem:[#allocation6 + $0x734] sm:$0xf0]  ;;  %v16014_v38 = vld [vmem:[#allocation6 + $0x408] sm:$0xf]  ;;  %v16159_v30 = vor.u32 %v18077_v29, %v16158_v15  ;;  %v16287_v5 = vor.u32 %v18109_v18, %v16286_v58  ;;  %v15587_v29 = vor.u32 %v17931_v2, %v15584_v9  ;;  %v17991_v37 = vld [vmem:[#allocation6 + $0x28c] sm:$0xf] }
 0x88f   :  { %v16015_v55 = vor.u32 %v18041_v41, %v16014_v38  ;;  %v15696_v41 = vld [vmem:[#allocation6 + $0x198] sm:$0xf0]  ;;  %v17955_v34 = vld [vmem:[#allocation6 + $0x16c] sm:$0xf] }
 0x890   :  { %v15680_v40 = vld [vmem:[#allocation6 + $0x178] sm:$0xf0] }
 0x891   :  { %10090 = vmatpush.bf16.msrb.mxu0 %v16095_v36  ;;  %10103 = vmatpush.bf16.msrb.mxu1 %v16223_v45  ;;  %v16415_v36 = vor.u32 %v18141_v31, %v16414_v59  ;;  %v16270_v45 = vld [vmem:[#allocation6 + $0x608] sm:$0xf]  ;;  %v17927_v59 = vld [vmem:[#allocation6 + $0x8c] sm:$0xf]  ;;  %v15568_v31 = vld [vmem:[#allocation6 + $0x98] sm:$0xf0] }
 0x892   :  { %10116 = vmatpush.bf16.msrb.mxu2 %v16351_v16  ;;  %10129 = vmatpush.bf16.msrb.mxu3 %v16479_v21  ;;  %v18137_v16 = vld [vmem:[#allocation6 + $0x714] sm:$0xf0]  ;;  %v17939_v21 = vld [vmem:[#allocation6 + $0xec] sm:$0xf]  ;;  %v16271_v43 = vor.u32 %v18105_v13, %v16270_v45  ;;  %v15571_v45 = vor.u32 %v17927_v59, %v15568_v31 }
 0x893   :  { %v17911_v31 = vld [vmem:[#allocation6 + $0xc] sm:$0xf] }
 0x895   :  { %10091 = vmatpush.bf16.msrb.mxu0 %v16079_v7  ;;  %10104 = vmatpush.bf16.msrb.mxu1 %v16207_v53  ;;  %v15872_v7 = vld [vmem:[#allocation6 + $0x2f8] sm:$0xf0]  ;;  %v18035_v53 = vld [vmem:[#allocation6 + $0x3ec] sm:$0xf] }
 0x896   :  { %10117 = vmatpush.bf16.msrb.mxu2 %v16335_v57  ;;  %10130 = vmatpush.bf16.msrb.mxu3 %v16463_v54  ;;  %v16399_v57 = vor.u32 %v18137_v16, %v16398_v56  ;;  %v15619_v54 = vor.u32 %v17939_v21, %v15616_v39  ;;  %v15875_v60 = vor.u32 %v18003_v20, %v15872_v7  ;;  %v17923_v56 = vld [vmem:[#allocation6 + $0x6c] sm:$0xf]  ;;  %v15552_v16 = vld [vmem:[#allocation6 + $0x78] sm:$0xf0] }
 0x897   :  { %v16003_v61 = vor.u32 %v18035_v53, %v16000_v17  ;;  %v15827_v21 = vor.u32 %v17991_v37, %v15824_v35  ;;  %v17987_v20 = vld [vmem:[#allocation6 + $0x26c] sm:$0xf]  ;;  %v15808_v7 = vld [vmem:[#allocation6 + $0x278] sm:$0xf0] }
 0x898   :  { %v18019_v53 = vld [vmem:[#allocation6 + $0x36c] sm:$0xf]  ;;  %v15936_v17 = vld [vmem:[#allocation6 + $0x378] sm:$0xf0] }
 0x899   :  { %10092 = vmatpush.bf16.msrb.mxu0 %v16063_v24  ;;  %10105 = vmatpush.bf16.msrb.mxu1 %v16191_v25  ;;  %v15728_v24 = vld [vmem:[#allocation6 + $0x1d8] sm:$0xf0]  ;;  %v17999_v25 = vld [vmem:[#allocation6 + $0x2cc] sm:$0xf] }
 0x89a   :  { %10118 = vmatpush.bf16.msrb.mxu2 %v16319_v33  ;;  %10131 = vmatpush.bf16.msrb.mxu3 %v16447_v10  ;;  %v15984_v33 = vld [vmem:[#allocation6 + $0x3d8] sm:$0xf0]  ;;  %v15603_v10 = vor.u32 %v17935_v19, %v15600_v28  ;;  %v15731_v62 = vor.u32 %v17967_v49, %v15728_v24  ;;  %v15859_v44 = vor.u32 %v17999_v25, %v15856_v52  ;;  %v17919_v28 = vld [vmem:[#allocation6 + $0x4c] sm:$0xf] }
 0x89b   :  { %v15987_v51 = vor.u32 %v18031_v27, %v15984_v33  ;;  %v15683_v19 = vor.u32 %v17955_v34, %v15680_v40  ;;  %v15811_v49 = vor.u32 %v17987_v20, %v15808_v7  ;;  %v15939_v24 = vor.u32 %v18019_v53, %v15936_v17  ;;  %v17951_v25 = vld [vmem:[#allocation6 + $0x14c] sm:$0xf]  ;;  %v15664_v52 = vld [vmem:[#allocation6 + $0x158] sm:$0xf0] }
 0x89c   :  { %v17983_v27 = vld [vmem:[#allocation6 + $0x24c] sm:$0xf]  ;;  %v15792_v33 = vld [vmem:[#allocation6 + $0x258] sm:$0xf0]  ;;  %v15667_v9 = vor.u32 %v17951_v25, %v15664_v52 }
 0x89d   :  { %10093 = vmatpush.bf16.msrb.mxu0 %v16047_v32  ;;  %10106 = vmatpush.bf16.msrb.mxu1 %v16175_v23  ;;  %v15712_v32 = vld [vmem:[#allocation6 + $0x1b8] sm:$0xf0]  ;;  %v17995_v23 = vld [vmem:[#allocation6 + $0x2ac] sm:$0xf] }
 0x89e   :  { %10119 = vmatpush.bf16.msrb.mxu2 %v16303_v6  ;;  %10132 = vmatpush.bf16.msrb.mxu3 %v16431_v4  ;;  %v15968_v6 = vld [vmem:[#allocation6 + $0x3b8] sm:$0xf0]  ;;  %v15715_v58 = vor.u32 %v17963_v1, %v15712_v32  ;;  %v15843_v38 = vor.u32 %v17995_v23, %v15840_v8  ;;  %v15795_v1 = vor.u32 %v17983_v27, %v15792_v33  ;;  %v17947_v23 = vld [vmem:[#allocation6 + $0x12c] sm:$0xf] }
 0x89f   :  { %v15648_v8 = vld [vmem:[#allocation6 + $0x138] sm:$0xf0]  ;;  %v17943_v37 = vld [vmem:[#allocation6 + $0x10c] sm:$0xf] }
 0x8a0   :  { %v15632_v35 = vld [vmem:[#allocation6 + $0x118] sm:$0xf0]  ;;  %v18099_v40 = vld [vmem:[#allocation6 + $0x5ec] sm:$0xf] }
 0x8a1   :  { %10094 = vmatpush.bf16.msrb.mxu0 %v16031_v47  ;;  %10107 = vmatpush.bf16.msrb.mxu1 %v16159_v30  ;;  %v15971_v47 = vor.u32 %v18027_v12, %v15968_v6  ;;  %v17959_v30 = vld [vmem:[#allocation6 + $0x18c] sm:$0xf]  ;;  %v16128_v34 = vld [vmem:[#allocation6 + $0x4f8] sm:$0xf0]  ;;  %v15635_v7 = vor.u32 %v17943_v37, %v15632_v35 }
 0x8a2   :  { %10120 = vmatpush.bf16.msrb.mxu2 %v16287_v5  ;;  %10133 = vmatpush.bf16.msrb.mxu3 %v16415_v36  ;;  %v18023_v5 = vld [vmem:[#allocation6 + $0x38c] sm:$0xf]  ;;  %v15952_v36 = vld [vmem:[#allocation6 + $0x398] sm:$0xf0]  ;;  %v15699_v13 = vor.u32 %v17959_v30, %v15696_v41 }
 0x8a3   :  { %v15955_v39 = vor.u32 %v18023_v5, %v15952_v36  ;;  %v17979_v12 = vld [vmem:[#allocation6 + $0x22c] sm:$0xf]  ;;  %v15504_v41 = vld [vmem:[#allocation6 + $0x18] sm:$0xf0] }
 0x8a4   :  { %v9837_v4 = vpop.f32.mrf.mxu0  ;;  %v9850_v15 = vpop.f32.mrf.mxu1  ;;  %v16256_v20 = vld [vmem:[#allocation6 + $0x5f8] sm:$0xf0]  ;;  %v18163_v17 = vld [vmem:[#allocation6 + $0x7ec] sm:$0xf] }
 0x8a5   :  { %10095 = vmatpush.bf16.msrb.mxu0 %v16015_v55  ;;  %10108 = vmatpush.bf16.msrb.mxu1 %v16143_v46  ;;  %v9851_v18 = vadd.f32 %v9850_v15, %v9837_v4  ;;  %v15776_v15 = vld [vmem:[#allocation6 + $0x238] sm:$0xf0]  ;;  %v18055_v37 = vld [vmem:[#allocation6 + $0x48c] sm:$0xf] }
 0x8a6   :  { %10121 = vmatpush.bf16.msrb.mxu2 %v16271_v43  ;;  %10134 = vmatpush.bf16.msrb.mxu3 %v16399_v57  ;;  %v15779_v5 = vor.u32 %v17979_v12, %v15776_v15  ;;  %v16384_v53 = vld [vmem:[#allocation6 + $0x6f8] sm:$0xf0]  ;;  %v18091_v15 = vld [vmem:[#allocation6 + $0x5ac] sm:$0xf] }
 0x8a7   :  { %v16096_v12 = vld [vmem:[#allocation6 + $0x4b8] sm:$0xf0] }
 0x8a8   :  { %10096 = vmatmul.bf16.vlgmr.msrb.gmra.mxu0 %v19039_v22  ;;  %10109 = vmatmul.bf16.vlgmr.msrb.gmra.mxu1 %v19041_v11  ;;  %v16080_v35 = vld [vmem:[#allocation6 + $0x498] sm:$0xf0] }
 0x8a9   :  { %10140 = vmatpush.bf16.msra.mxu0 %v15619_v54  ;;  %10153 = vmatpush.bf16.msra.mxu1 %v15747_v0  ;;  %v15555_v0 = vor.u32 %v17923_v56, %v15552_v16  ;;  %v18007_v56 = vld [vmem:[#allocation6 + $0x30c] sm:$0xf] }
 0x8aa   :  { %10166 = vmatpush.bf16.msra.mxu2 %v15875_v60  ;;  %10179 = vmatpush.bf16.msra.mxu3 %v16003_v61  ;;  %v15536_v60 = vld [vmem:[#allocation6 + $0x58] sm:$0xf0] }
 0x8ab   :  { %10122 = vmatmul.bf16.vlgmr.msrb.gmra.mxu2 %v19045_v48  ;;  %10135 = vmatmul.bf16.vlgmr.msrb.gmra.mxu3 %v19043_v63  ;;  %v9863_v55 = vpop.f32.mrf.mxu2  ;;  %v9876_v46 = vpop.f32.mrf.mxu3  ;;  %v15539_v2 = vor.u32 %v17919_v28, %v15536_v60 }
 0x8ac   :  { %v9864_v43 = vadd.f32 %v9863_v55, %v9851_v18  ;;  %v9839_v57 = vpop.f32.mrf.mxu0  ;;  %v9852_v54 = vpop.f32.mrf.mxu1  ;;  %v18131_v55 = vld [vmem:[#allocation6 + $0x6ec] sm:$0xf] }
 0x8ad   :  { %10141 = vmatpush.bf16.msra.mxu0 %v15603_v10  ;;  %10154 = vmatpush.bf16.msra.mxu1 %v15731_v62  ;;  %v18015_v10 = vld [vmem:[#allocation6 + $0x34c] sm:$0xf]  ;;  %v15920_v62 = vld [vmem:[#allocation6 + $0x358] sm:$0xf0] }
 0x8ae   :  { %10167 = vmatpush.bf16.msra.mxu2 %v15859_v44  ;;  %10180 = vmatpush.bf16.msra.mxu3 %v15987_v51  ;;  %v9877_v61 = vadd.f32 %v9876_v46, %v9864_v43  ;;  %v17915_v44 = vld [vmem:[#allocation6 + $0x2c] sm:$0xf]  ;;  %v15520_v51 = vld [vmem:[#allocation6 + $0x38] sm:$0xf0]  ;;  %v15923_v32 = vor.u32 %v18015_v10, %v15920_v62  ;;  %v15507_v46 = vor.u32 %v17911_v31, %v15504_v41 }
 0x8af   :  { %v16512_v43 = vld [vmem:[#allocation6 + $0x7f8] sm:$0xf0]  ;;  %v18095_v10 = vld [vmem:[#allocation6 + $0x5cc] sm:$0xf] }
 0x8b0   :  { %v16515_v25 = vor.u32 %v18163_v17, %v16512_v43  ;;  %v16240_v62 = vld [vmem:[#allocation6 + $0x5d8] sm:$0xf0]  ;;  %v18083_v17 = vld [vmem:[#allocation6 + $0x56c] sm:$0xf] }
 0x8b1   :  { %10142 = vmatpush.bf16.msra.mxu0 %v15587_v29  ;;  %10155 = vmatpush.bf16.msra.mxu1 %v15715_v58  ;;  %v18011_v29 = vld [vmem:[#allocation6 + $0x32c] sm:$0xf]  ;;  %v15904_v58 = vld [vmem:[#allocation6 + $0x338] sm:$0xf0] }
 0x8b2   :  { %10168 = vmatpush.bf16.msra.mxu2 %v15843_v38  ;;  %10181 = vmatpush.bf16.msra.mxu3 %v15971_v47  ;;  %v15523_v38 = vor.u32 %v17915_v44, %v15520_v51  ;;  %v15651_v47 = vor.u32 %v17947_v23, %v15648_v8  ;;  %v15907_v36 = vor.u32 %v18011_v29, %v15904_v58  ;;  %v18159_v44 = vld [vmem:[#allocation6 + $0x7cc] sm:$0xf]  ;;  %v16496_v51 = vld [vmem:[#allocation6 + $0x7d8] sm:$0xf0] }
 0x8b3   :  { %v9865_v6 = vpop.f32.mrf.mxu2  ;;  %v9878_v4 = vpop.f32.mrf.mxu3  ;;  %v16243_v23 = vor.u32 %v18095_v10, %v16240_v62  ;;  %v18059_v8 = vld [vmem:[#allocation6 + $0x4ac] sm:$0xf]  ;;  %v16224_v29 = vld [vmem:[#allocation6 + $0x5b8] sm:$0xf0] }
 0x8b4   :  { %v9889_v18 = vpop.f32.mrf.mxu0  ;;  %v9902_v59 = vpop.f32.mrf.mxu1  ;;  %v16499_v4 = vor.u32 %v18159_v44, %v16496_v51  ;;  %v18123_v58 = vld [vmem:[#allocation6 + $0x6ac] sm:$0xf]  ;;  %v16480_v31 = vld [vmem:[#allocation6 + $0x7b8] sm:$0xf0] }
 0x8b5   :  { %10143 = vmatpush.bf16.msra.mxu0 %v15571_v45  ;;  %10156 = vmatpush.bf16.msra.mxu1 %v15699_v13  ;;  %v9890_v30 = vadd.f32 %v9889_v18, %v9877_v61  ;;  %v17975_v45 = vld [vmem:[#allocation6 + $0x20c] sm:$0xf]  ;;  %v15760_v13 = vld [vmem:[#allocation6 + $0x218] sm:$0xf0] }
 0x8b6   :  { %10169 = vmatpush.bf16.msra.mxu2 %v15827_v21  ;;  %10182 = vmatpush.bf16.msra.mxu3 %v15955_v39  ;;  %v15888_v21 = vld [vmem:[#allocation6 + $0x318] sm:$0xf0]  ;;  %v18067_v39 = vld [vmem:[#allocation6 + $0x4ec] sm:$0xf]  ;;  %v15763_v57 = vor.u32 %v17975_v45, %v15760_v13 }
 0x8b7   :  { %v9903_v16 = vadd.f32 %v9902_v59, %v9890_v30  ;;  %v15891_v54 = vor.u32 %v18007_v56, %v15888_v21  ;;  %v18063_v61 = vld [vmem:[#allocation6 + $0x4cc] sm:$0xf]  ;;  %v16352_v18 = vld [vmem:[#allocation6 + $0x6b8] sm:$0xf0] }
 0x8b8   :  { %v18155_v59 = vld [vmem:[#allocation6 + $0x7ac] sm:$0xf]  ;;  %v16208_v45 = vld [vmem:[#allocation6 + $0x598] sm:$0xf0] }
 0x8b9   :  { %10144 = vmatpush.bf16.msra.mxu0 %v15555_v0  ;;  %10157 = vmatpush.bf16.msra.mxu1 %v15683_v19  ;;  %v16131_v0 = vor.u32 %v18067_v39, %v16128_v34  ;;  %v16259_v19 = vor.u32 %v18099_v40, %v16256_v20  ;;  %v18119_v13 = vld [vmem:[#allocation6 + $0x68c] sm:$0xf]  ;;  %v16083_v34 = vor.u32 %v18055_v37, %v16080_v35  ;;  %v16192_v43 = vld [vmem:[#allocation6 + $0x578] sm:$0xf0] }
 0x8ba   :  { %10170 = vmatpush.bf16.msra.mxu2 %v15811_v49  ;;  %10183 = vmatpush.bf16.msra.mxu3 %v15939_v24  ;;  %v16112_v49 = vld [vmem:[#allocation6 + $0x4d8] sm:$0xf0]  ;;  %v16387_v24 = vor.u32 %v18131_v55, %v16384_v53  ;;  %v18151_v56 = vld [vmem:[#allocation6 + $0x78c] sm:$0xf] }
 0x8bb   :  { %v9915_v28 = vpop.f32.mrf.mxu2  ;;  %v9928_v60 = vpop.f32.mrf.mxu3  ;;  %v18051_v20 = vld [vmem:[#allocation6 + $0x46c] sm:$0xf]  ;;  %v16064_v55 = vld [vmem:[#allocation6 + $0x478] sm:$0xf0] }
 0x8bc   :  { %v9916_v52 = vadd.f32 %v9915_v28, %v9903_v16  ;;  %v9891_v27 = vpop.f32.mrf.mxu0  ;;  %v9904_v33 = vpop.f32.mrf.mxu1  ;;  %v18047_v28 = vld [vmem:[#allocation6 + $0x44c] sm:$0xf]  ;;  %v16304_v62 = vld [vmem:[#allocation6 + $0x658] sm:$0xf0] }
 0x8bd   :  { %10145 = vmatpush.bf16.msra.mxu0 %v15539_v2  ;;  %10158 = vmatpush.bf16.msra.mxu1 %v15667_v9  ;;  %v18127_v2 = vld [vmem:[#allocation6 + $0x6cc] sm:$0xf]  ;;  %v16368_v9 = vld [vmem:[#allocation6 + $0x6d8] sm:$0xf0] }
 0x8be   :  { %10171 = vmatpush.bf16.msra.mxu2 %v15795_v1  ;;  %10184 = vmatpush.bf16.msra.mxu3 %v15923_v32  ;;  %v19067_v1 = vadd.f32 %v9928_v60, %v9916_v52  ;;  %v16115_v32 = vor.u32 %v18063_v61, %v16112_v49  ;;  %v16371_v6 = vor.u32 %v18127_v2, %v16368_v9  ;;  %v16048_v49 = vld [vmem:[#allocation6 + $0x458] sm:$0xf0]  ;;  %v18111_v10 = vld [vmem:[#allocation6 + $0x64c] sm:$0xf] }
 0x8bf   :  { %v16067_v60 = vor.u32 %v18051_v20, %v16064_v55  ;;  %v16195_v61 = vor.u32 %v18083_v17, %v16192_v43  ;;  %v18143_v44 = vld [vmem:[#allocation6 + $0x74c] sm:$0xf]  ;;  %v16432_v51 = vld [vmem:[#allocation6 + $0x758] sm:$0xf0] }
 0x8c0   :  { %v16416_v37 = vld [vmem:[#allocation6 + $0x738] sm:$0xf0] }
 0x8c1   :  { %10146 = vmatpush.bf16.msra.mxu0 %v15523_v38  ;;  %10159 = vmatpush.bf16.msra.mxu1 %v15651_v47  ;;  %v16099_v38 = vor.u32 %v18059_v8, %v16096_v12  ;;  %v16227_v47 = vor.u32 %v18091_v15, %v16224_v29  ;;  %v16051_v12 = vor.u32 %v18047_v28, %v16048_v49  ;;  %v18043_v15 = vld [vmem:[#allocation6 + $0x42c] sm:$0xf]  ;;  %v16032_v29 = vld [vmem:[#allocation6 + $0x438] sm:$0xf0] }
 0x8c2   :  { %10172 = vmatpush.bf16.msra.mxu2 %v15779_v5  ;;  %10185 = vmatpush.bf16.msra.mxu3 %v15907_v36  ;;  %v18087_v5 = vld [vmem:[#allocation6 + $0x58c] sm:$0xf]  ;;  %v16483_v36 = vor.u32 %v18155_v59, %v16480_v31  ;;  %v16435_v59 = vor.u32 %v18143_v44, %v16432_v51  ;;  %v16035_v35 = vor.u32 %v18043_v15, %v16032_v29 }
 0x8c3   :  { %v9917_v30 = vpop.f32.mrf.mxu2  ;;  %v9930_v41 = vpop.f32.mrf.mxu3  ;;  %v16211_v40 = vor.u32 %v18087_v5, %v16208_v45  ;;  %v18075_v31 = vld [vmem:[#allocation6 + $0x52c] sm:$0xf] }
 0x8c4   :  { %v16288_v30 = vld [vmem:[#allocation6 + $0x638] sm:$0xf0]  ;;  %v18139_v41 = vld [vmem:[#allocation6 + $0x72c] sm:$0xf] }
 0x8c5   :  { %10147 = vmatpush.bf16.msra.mxu0 %v15507_v46  ;;  %10160 = vmatpush.bf16.msra.mxu1 %v15635_v7  ;;  %v9941_v16 = vpop.f32.mrf.mxu0  ;;  %v9954_v21 = vpop.f32.mrf.mxu1 }
 0x8c6   :  { %10173 = vmatpush.bf16.msra.mxu2 %v15763_v57  ;;  %10186 = vmatpush.bf16.msra.mxu3 %v15891_v54  ;;  %v9955_v39 = vadd.f32 %v9954_v21, %v9941_v16  ;;  %v18115_v57 = vld [vmem:[#allocation6 + $0x66c] sm:$0xf]  ;;  %v16320_v54 = vld [vmem:[#allocation6 + $0x678] sm:$0xf0] }
 0x8c7   :  { %v16323_v27 = vor.u32 %v18115_v57, %v16320_v54 }
 0x8c8   :  { %10148 = vmatmul.bf16.vlgmr.msra.gmra.mxu0 %v19019_v42  ;;  %10161 = vmatmul.bf16.vlgmr.msra.gmra.mxu1 %v19021_v14  ;;  %v10244_v42 = vrot.slane %v19067_v1, 4  ;;  %v16355_v14 = vor.u32 %v18123_v58, %v16352_v18 }
 0x8c9   :  { %10192 = vmatpush.bf16.msrb.mxu0 %v16131_v0  ;;  %10205 = vmatpush.bf16.msrb.mxu1 %v16259_v19  ;;  %v18147_v0 = vld [vmem:[#allocation6 + $0x76c] sm:$0xf]  ;;  %v16448_v19 = vld [vmem:[#allocation6 + $0x778] sm:$0xf0] }
 0x8ca   :  { %10218 = vmatpush.bf16.msrb.mxu2 %v16387_v24  ;;  %10231 = vmatpush.bf16.msrb.mxu3 %v16515_v25  ;;  %v10245_v46 = vadd.f32 %v10244_v42, %v19067_v1  ;;  %v18079_v24 = vld [vmem:[#allocation6 + $0x54c] sm:$0xf]  ;;  %v16176_v25 = vld [vmem:[#allocation6 + $0x558] sm:$0xf0]  ;;  %v16451_v33 = vor.u32 %v18147_v0, %v16448_v19 }
 0x8cb   :  { %10174 = vmatmul.bf16.vlgmr.msra.gmra.mxu2 %v19023_v26  ;;  %10187 = vmatmul.bf16.vlgmr.msra.gmra.mxu3 %v19025_v50  ;;  %v16336_v26 = vld [vmem:[#allocation6 + $0x698] sm:$0xf0]  ;;  %v18039_v42 = vld [vmem:[#allocation6 + $0x40c] sm:$0xf] }
 0x8cc   :  { %v16464_v50 = vld [vmem:[#allocation6 + $0x798] sm:$0xf0]  ;;  %v16339_v7 = vor.u32 %v18119_v13, %v16336_v26  ;;  %v10246_v52 = vrot.slane %v10245_v46, 2  ;;  %v16419_v26 = vor.u32 %v18139_v41, %v16416_v37 }
 0x8cd   :  { %10193 = vmatpush.bf16.msrb.mxu0 %v16115_v32  ;;  %10206 = vmatpush.bf16.msrb.mxu1 %v16243_v23  ;;  %v16467_v53 = vor.u32 %v18151_v56, %v16464_v50  ;;  %v9943_v23 = vpop.f32.mrf.mxu0  ;;  %v9956_v8 = vpop.f32.mrf.mxu1  ;;  %v16144_v56 = vld [vmem:[#allocation6 + $0x518] sm:$0xf0]  ;;  %v18103_v50 = vld [vmem:[#allocation6 + $0x60c] sm:$0xf] }
 0x8ce   :  { %10219 = vmatpush.bf16.msrb.mxu2 %v16371_v6  ;;  %10232 = vmatpush.bf16.msrb.mxu3 %v16499_v4  ;;  %v9967_v2 = vpop.f32.mrf.mxu2  ;;  %v9980_v9 = vpop.f32.mrf.mxu3  ;;  %v16179_v6 = vor.u32 %v18079_v24, %v16176_v25  ;;  %v16307_v4 = vor.u32 %v18111_v10, %v16304_v62  ;;  %v10247_v58 = vadd.f32 %v10246_v52, %v10245_v46 }
 0x8cf   :  { %v9968_v32 = vadd.f32 %v9967_v2, %v9955_v39  ;;  %v16272_v39 = vld [vmem:[#allocation6 + $0x618] sm:$0xf0] }
 0x8d0   :  { %v10248_v45 = vrot.slane %v10247_v58, 1 }
 0x8d1   :  { %10194 = vmatpush.bf16.msrb.mxu0 %v16099_v38  ;;  %10207 = vmatpush.bf16.msrb.mxu1 %v16227_v47  ;;  %v9981_v18 = vadd.f32 %v9980_v9, %v9968_v32  ;;  %v16160_v38 = vld [vmem:[#allocation6 + $0x538] sm:$0xf0]  ;;  %v18107_v47 = vld [vmem:[#allocation6 + $0x62c] sm:$0xf] }
 0x8d2   :  { %10220 = vmatpush.bf16.msrb.mxu2 %v16355_v14  ;;  %10233 = vmatpush.bf16.msrb.mxu3 %v16483_v36  ;;  %v16163_v5 = vor.u32 %v18075_v31, %v16160_v38  ;;  %v16016_v14 = vld [vmem:[#allocation6 + $0x418] sm:$0xf0]  ;;  %v18071_v36 = vld [vmem:[#allocation6 + $0x50c] sm:$0xf]  ;;  %v16291_v13 = vor.u32 %v18107_v47, %v16288_v30  ;;  %v10249_v46 = vadd.f32 %v10248_v45, %v10247_v58 }
 0x8d3   :  { %v16019_v20 = vor.u32 %v18039_v42, %v16016_v14  ;;  %v16147_v55 = vor.u32 %v18071_v36, %v16144_v56 }
 0x8d4   :  { %v10268_v17 = vmul.f32 %v10249_v46, %v18652_v3 }
 0x8d5   :  { %10195 = vmatpush.bf16.msrb.mxu0 %v16083_v34  ;;  %10208 = vmatpush.bf16.msrb.mxu1 %v16211_v40  ;;  %v18135_v34 = vld [vmem:[#allocation6 + $0x70c] sm:$0xf]  ;;  %v16400_v40 = vld [vmem:[#allocation6 + $0x718] sm:$0xf0] }
 0x8d6   :  { %10221 = vmatpush.bf16.msrb.mxu2 %v16339_v7  ;;  %10234 = vmatpush.bf16.msrb.mxu3 %v16467_v53  ;;  %v9969_v16 = vpop.f32.mrf.mxu2  ;;  %v9982_v21 = vpop.f32.mrf.mxu3  ;;  %v16275_v7 = vor.u32 %v18103_v50, %v16272_v39  ;;  %v16403_v53 = vor.u32 %v18135_v34, %v16400_v40  ;;  %v19081_v43 = vsub.f32 %v19067_v1, %v10268_v17 }
 0x8d8   :  { %v10276_v57 = vmul.f32 %v19081_v43, %v19081_v43 }
 0x8d9   :  { %10196 = vmatpush.bf16.msrb.mxu0 %v16067_v60  ;;  %10209 = vmatpush.bf16.msrb.mxu1 %v16195_v61 }
 0x8da   :  { %10222 = vmatpush.bf16.msrb.mxu2 %v16323_v27  ;;  %10235 = vmatpush.bf16.msrb.mxu3 %v16451_v33  ;;  %v10280_v60 = vrot.slane %v10276_v57, 4 }
 0x8dd   :  { %10197 = vmatpush.bf16.msrb.mxu0 %v16051_v12  ;;  %10210 = vmatpush.bf16.msrb.mxu1 %v16179_v6 }
 0x8de   :  { %10223 = vmatpush.bf16.msrb.mxu2 %v16307_v4  ;;  %10236 = vmatpush.bf16.msrb.mxu3 %v16435_v59 }
 0x8e1   :  { %10198 = vmatpush.bf16.msrb.mxu0 %v16035_v35  ;;  %10211 = vmatpush.bf16.msrb.mxu1 %v16163_v5 }
 0x8e2   :  { %10224 = vmatpush.bf16.msrb.mxu2 %v16291_v13  ;;  %10237 = vmatpush.bf16.msrb.mxu3 %v16419_v26 }
 0x8e5   :  { %10199 = vmatpush.bf16.msrb.mxu0 %v16019_v20  ;;  %10212 = vmatpush.bf16.msrb.mxu1 %v16147_v55  ;;  %v9993_v54 = vpop.f32.mrf.mxu0  ;;  %v10006_v0 = vpop.f32.mrf.mxu1 }
 0x8e6   :  { %10225 = vmatpush.bf16.msrb.mxu2 %v16275_v7  ;;  %10238 = vmatpush.bf16.msrb.mxu3 %v16403_v53  ;;  %v9994_v19 = vadd.f32 %v9993_v54, %v9981_v18 }
 0x8e8   :  { %10200 = vmatmul.bf16.vlgmr.msrb.gmra.mxu0 %v19039_v22  ;;  %10213 = vmatmul.bf16.vlgmr.msrb.gmra.mxu1 %v19041_v11  ;;  %v10007_v28 = vadd.f32 %v10006_v0, %v9994_v19  ;;  %v10281_v22 = vadd.f32 %v10280_v60, %v10276_v57 }
 0x8e9   :  { %10226 = vmatmul.bf16.vlgmr.msrb.gmra.mxu2 %v19045_v48  ;;  %10239 = vmatmul.bf16.vlgmr.msrb.gmra.mxu3 %v19043_v63 }
 0x8ea   :  { %v10282_v52 = vrot.slane %v10281_v22, 2 }
 0x8ec   :  { %v10283_v10 = vadd.f32 %v10282_v52, %v10281_v22 }
 0x8ed   :  { %v9995_v11 = vpop.f32.mrf.mxu0  ;;  %v10008_v25 = vpop.f32.mrf.mxu1 }
 0x8ee   :  { %v10019_v61 = vpop.f32.mrf.mxu2  ;;  %v10032_v49 = vpop.f32.mrf.mxu3  ;;  %v10284_v9 = vrot.slane %v10283_v10, 1 }
 0x8ef   :  { %v10020_v24 = vadd.f32 %v10019_v61, %v10007_v28 }
 0x8f0   :  { %v10285_v32 = vadd.f32 %v10284_v9, %v10283_v10 }
 0x8f1   :  { %v10033_v48 = vadd.f32 %v10032_v49, %v10020_v24 }
 0x8f2   :  { %v10304_v12 = vmul.f32 %v10285_v32, %v18652_v3 }
 0x8f3   :  { %v10250_v63 = vrot.slane %v10033_v48, 4 }
 0x8f4   :  { %v10312_v18 = vadd.f32 1e-05, %v10304_v12 }
 0x8f5   :  { %v10251_v27 = vadd.f32 %v10250_v63, %v10033_v48 }
 0x8f6   :  { %v10021_v1 = vpop.f32.mrf.mxu2  ;;  %v10034_v33 = vpop.f32.mrf.mxu3  ;;  %18292 = vrsqrt.f32 %v10312_v18  ;;  %vm10322_vm8 = vweird.f32 %v10312_v18 }
 0x8f7   :  { %v10252_v62 = vrot.slane %v10251_v27, 2 }
 0x8f9   :  { %v10253_v2 = vadd.f32 %v10252_v62, %v10251_v27 }
 0x8fb   :  { %v10254_v44 = vrot.slane %v10253_v2, 1 }
 0x8fc   :  { %v18293_v36 = vpop.eup %18292 }
 0x8fd   :  { %v10255_v51 = vadd.f32 %v10254_v44, %v10253_v2  ;;  %v10317_v26 = vmul.f32 %v18293_v36, %v10312_v18  ;;  %vm10323_vm4 = vweird.f32 %v18293_v36 }
 0x8fe   :  { %vm10324_vm9 = vmor %vm10322_vm8, %vm10323_vm4 }
 0x8ff   :  { %v10269_v23 = vmul.f32 %v10255_v51, %v18652_v3  ;;  %v10318_v16 = vmul.f32 %v18293_v36, %v10317_v26  ;;  %v18213_v26 = vld [vmem:[#allocation7 + $0x174] sm:$0xf0] }
 0x901   :  { %v19086_v8 = vsub.f32 %v10033_v48, %v10269_v23  ;;  %v10319_v39 = vmul.f32 0.5, %v10318_v16  ;;  %v16766_v16 = vld [vmem:[#allocation7 + $0x1f0] sm:$0xf] }
 0x903   :  { %v10277_v6 = vmul.f32 %v19086_v8, %v19086_v8  ;;  %v10320_v20 = vsub.f32 1.5, %v10319_v39 }
 0x905   :  { %v10286_v4 = vrot.slane %v10277_v6, 4  ;;  %v10045_v15 = vpop.f32.mrf.mxu0  ;;  %v10058_v29 = vpop.f32.mrf.mxu1  ;;  %v10321_v17 = vmul.f32 %v18293_v36, %v10320_v20  ;;  %v18179_v20 = vld [vmem:[#allocation7 + $0x64] sm:$0xf0] }
 0x906   :  { %v10059_v58 = vadd.f32 %v10058_v29, %v10045_v15 }
 0x907   :  { %v10287_v59 = vadd.f32 %v10286_v4, %v10277_v6  ;;  %v10325_v60 = vsel %vm10324_vm9, %v18293_v36, %v10321_v17  ;;  %v16694_v17 = vld [vmem:[#allocation7 + $0x160] sm:$0xf]  ;;  %vm11237_vm9 = vcmask 523264  }
 0x909   :  { %v10288_v31 = vrot.slane %v10287_v59, 2 }
 0x90b   :  { %v10289_v38 = vadd.f32 %v10288_v31, %v10287_v59 }
 0x90d   :  { %v10290_v41 = vrot.slane %v10289_v38, 1  ;;  %v10047_v35 = vpop.f32.mrf.mxu0  ;;  %v10060_v5 = vpop.f32.mrf.mxu1 }
 0x90e   :  { %v10071_v47 = vpop.f32.mrf.mxu2  ;;  %v10084_v30 = vpop.f32.mrf.mxu3  ;;  %v16574_v35 = vld [vmem:[#allocation7 + $0x70] sm:$0xf]  ;;  %v18181_v5 = vld [vmem:[#allocation7 + $0x74] sm:$0xf0] }
 0x90f   :  { %v10072_v37 = vadd.f32 %v10071_v47, %v10059_v58  ;;  %v10291_v42 = vadd.f32 %v10290_v41, %v10289_v38  ;;  %v16575_v36 = vor.u32 %v18181_v5, %v16574_v35  ;;  %v16742_v5 = vld [vmem:[#allocation7 + $0x1c0] sm:$0xf] }
 0x911   :  { %v10085_v14 = vadd.f32 %v10084_v30, %v10072_v37  ;;  %v10305_v45 = vmul.f32 %v10291_v42, %v18652_v3  ;;  %v16638_v42 = vld [vmem:[#allocation7 + $0xf0] sm:$0xf]  ;;  %10786 = vmatpush.bf16.msra.mxu0 %v16575_v36 }
 0x913   :  { %v10313_v13 = vadd.f32 1e-05, %v10305_v45  ;;  %v18197_v45 = vld [vmem:[#allocation7 + $0xf4] sm:$0xf0] }
 0x915   :  { %18294 = vrsqrt.f32 %v10313_v13  ;;  %vm10332_vm6 = vweird.f32 %v10313_v13 }
 0x916   :  { %v10073_v56 = vpop.f32.mrf.mxu2  ;;  %v10086_v50 = vpop.f32.mrf.mxu3 }
 0x917   :  { %v16639_v56 = vor.u32 %v18197_v45, %v16638_v42  ;;  %v18223_v42 = vld [vmem:[#allocation7 + $0x1c4] sm:$0xf0] }
 0x918   :  { %v16743_v45 = vor.u32 %v18223_v42, %v16742_v5  ;;  %v18215_v5 = vld [vmem:[#allocation7 + $0x184] sm:$0xf0] }
 0x919   :  { %10799 = vmatpush.bf16.msra.mxu1 %v16639_v56  ;;  %v16606_v56 = vld [vmem:[#allocation7 + $0xb0] sm:$0xf] }
 0x91b   :  { %v18295_v21 = vpop.eup %18294 }
 0x91c   :  { %v10327_v34 = vmul.f32 %v18295_v21, %v10313_v13  ;;  %vm10333_vm3 = vweird.f32 %v18295_v21  ;;  %v16702_v13 = vld [vmem:[#allocation7 + $0x170] sm:$0xf] }
 0x91d   :  { %vm10334_vm7 = vmor %vm10332_vm6, %vm10333_vm3  ;;  %v16703_v50 = vor.u32 %v18213_v26, %v16702_v13  ;;  %v16542_v13 = vld [vmem:[#allocation7 + $0x30] sm:$0xf]  ;;  %v18173_v26 = vld [vmem:[#allocation7 + $0x34] sm:$0xf0] }
 0x91e   :  { %v10328_v40 = vmul.f32 %v18295_v21, %v10327_v34 }
 0x91f   :  { %10812 = vmatpush.bf16.msra.mxu2 %v16703_v50 }
 0x920   :  { %v10329_v55 = vmul.f32 0.5, %v10328_v40  ;;  %v16566_v40 = vld [vmem:[#allocation7 + $0x60] sm:$0xf] }
 0x922   :  { %v10330_v46 = vsub.f32 1.5, %v10329_v55 }
 0x924   :  { %v10331_v57 = vmul.f32 %v18295_v21, %v10330_v46  ;;  %v16567_v46 = vor.u32 %v18179_v20, %v16566_v40 }
 0x925   :  { %v10097_v7 = vpop.f32.mrf.mxu0  ;;  %v10110_v53 = vpop.f32.mrf.mxu1 }
 0x926   :  { %v10098_v54 = vadd.f32 %v10097_v7, %v10085_v14  ;;  %v10335_v0 = vsel %vm10334_vm7, %v18295_v21, %v10331_v57  ;;  %v18229_v21 = vld [vmem:[#allocation7 + $0x1f4] sm:$0xf0]  ;;  %v16630_v7 = vld [vmem:[#allocation7 + $0xe0] sm:$0xf]  ;;  %10787 = vmatpush.bf16.msra.mxu0 %v16567_v46 }
 0x927   :  { %v10360_v28 = vrot.slane %v10335_v0, 7  ;;  %v16767_v34 = vor.u32 %v18229_v21, %v16766_v16  ;;  %v16543_v16 = vor.u32 %v18173_v26, %v16542_v13  ;;  %v18189_v21 = vld [vmem:[#allocation7 + $0xb4] sm:$0xf0]  ;;  %v16576_v13 = vld [vmem:[#allocation7 + $0x78] sm:$0xf0] }
 0x928   :  { %v10111_v19 = vadd.f32 %v10110_v53, %v10098_v54  ;;  %v18195_v53 = vld [vmem:[#allocation7 + $0xe4] sm:$0xf0]  ;;  %v16607_v40 = vor.u32 %v18189_v21, %v16606_v56  ;;  %v18221_v46 = vld [vmem:[#allocation7 + $0x1b4] sm:$0xf0]  ;;  %v18196_v26 = vld [vmem:[#allocation7 + $0xf4] sm:$0xf] }
 0x929   :  { %v19093_v61 = vsel %vm8210_vm5, %v10325_v60, %v10360_v28  ;;  %10825 = vmatpush.bf16.msra.mxu3 %v16767_v34  ;;  %v16631_v0 = vor.u32 %v18195_v53, %v16630_v7  ;;  %v16758_v28 = vld [vmem:[#allocation7 + $0x1e0] sm:$0xf]  ;;  %v18227_v60 = vld [vmem:[#allocation7 + $0x1e4] sm:$0xf0]  ;;  %v18205_v34 = vld [vmem:[#allocation7 + $0x134] sm:$0xf0] }
 0x92a   :  { %v18212_v21 = vld [vmem:[#allocation7 + $0x174] sm:$0xf] }
 0x92b   :  { %10800 = vmatpush.bf16.msra.mxu1 %v16631_v0  ;;  %v16598_v0 = vld [vmem:[#allocation7 + $0xa0] sm:$0xf] }
 0x92d   :  { %v10099_v11 = vpop.f32.mrf.mxu0  ;;  %v10112_v25 = vpop.f32.mrf.mxu1 }
 0x92e   :  { %v10123_v49 = vpop.f32.mrf.mxu2  ;;  %v10136_v22 = vpop.f32.mrf.mxu3 }
 0x92f   :  { %v10124_v24 = vadd.f32 %v10123_v49, %v10111_v19  ;;  %v18211_v19 = vld [vmem:[#allocation7 + $0x164] sm:$0xf0] }
 0x930   :  { %v16695_v25 = vor.u32 %v18211_v19, %v16694_v17 }
 0x931   :  { %v10137_v48 = vadd.f32 %v10136_v22, %v10124_v24 }
 0x932   :  { %10813 = vmatpush.bf16.msra.mxu2 %v16695_v25  ;;  %v16726_v25 = vld [vmem:[#allocation7 + $0x1a0] sm:$0xf] }
 0x933   :  { %v10256_v52 = vrot.slane %v10137_v48, 4 }
 0x935   :  { %v10257_v1 = vadd.f32 %v10256_v52, %v10137_v48  ;;  %v16558_v52 = vld [vmem:[#allocation7 + $0x50] sm:$0xf] }
 0x936   :  { %v10125_v63 = vpop.f32.mrf.mxu2  ;;  %v10138_v27 = vpop.f32.mrf.mxu3 }
 0x937   :  { %v10258_v33 = vrot.slane %v10257_v1, 2  ;;  %v18177_v63 = vld [vmem:[#allocation7 + $0x54] sm:$0xf0]  ;;  %v16622_v27 = vld [vmem:[#allocation7 + $0xd0] sm:$0xf] }
 0x939   :  { %v10259_v10 = vadd.f32 %v10258_v33, %v10257_v1  ;;  %v16559_v33 = vor.u32 %v18177_v63, %v16558_v52 }
 0x93b   :  { %v10260_v9 = vrot.slane %v10259_v10, 1  ;;  %10788 = vmatpush.bf16.msra.mxu0 %v16559_v33  ;;  %v18169_v33 = vld [vmem:[#allocation7 + $0x14] sm:$0xf0] }
 0x93d   :  { %v10261_v44 = vadd.f32 %v10260_v9, %v10259_v10  ;;  %v18193_v10 = vld [vmem:[#allocation7 + $0xd4] sm:$0xf0] }
 0x93f   :  { %v10270_v6 = vmul.f32 %v10261_v44, %v18652_v3 }
 0x941   :  { %v19096_v4 = vsub.f32 %v10137_v48, %v10270_v6  ;;  %v16759_v48 = vor.u32 %v18227_v60, %v16758_v28  ;;  %v18187_v60 = vld [vmem:[#allocation7 + $0xa4] sm:$0xf0] }
 0x943   :  { %v10278_v58 = vmul.f32 %v19096_v4, %v19096_v4  ;;  %10826 = vmatpush.bf16.msra.mxu3 %v16759_v48  ;;  %v18219_v48 = vld [vmem:[#allocation7 + $0x1a4] sm:$0xf0] }
 0x944   :  { %v16727_v63 = vor.u32 %v18219_v48, %v16726_v25  ;;  %v18226_v25 = vld [vmem:[#allocation7 + $0x1e4] sm:$0xf]  ;;  %v16760_v48 = vld [vmem:[#allocation7 + $0x1e8] sm:$0xf0] }
 0x945   :  { %v10149_v62 = vpop.f32.mrf.mxu0  ;;  %v10162_v2 = vpop.f32.mrf.mxu1  ;;  %v10292_v18 = vrot.slane %v10278_v58, 4 }
 0x946   :  { %v10163_v59 = vadd.f32 %v10162_v2, %v10149_v62  ;;  %v16686_v62 = vld [vmem:[#allocation7 + $0x150] sm:$0xf]  ;;  %v18209_v2 = vld [vmem:[#allocation7 + $0x154] sm:$0xf0] }
 0x947   :  { %v10293_v31 = vadd.f32 %v10292_v18, %v10278_v58  ;;  %v16614_v58 = vld [vmem:[#allocation7 + $0xc0] sm:$0xf] }
 0x949   :  { %v10294_v47 = vrot.slane %v10293_v31, 2 }
 0x94b   :  { %v10295_v39 = vadd.f32 %v10294_v47, %v10293_v31  ;;  %v18191_v31 = vld [vmem:[#allocation7 + $0xc4] sm:$0xf0] }
 0x94c   :  { %v18207_v47 = vld [vmem:[#allocation7 + $0x144] sm:$0xf0] }
 0x94d   :  { %v10151_v23 = vpop.f32.mrf.mxu0  ;;  %v10164_v12 = vpop.f32.mrf.mxu1  ;;  %v10296_v49 = vrot.slane %v10295_v39, 1 }
 0x94e   :  { %v10175_v51 = vpop.f32.mrf.mxu2  ;;  %v10188_v32 = vpop.f32.mrf.mxu3  ;;  %v16750_v23 = vld [vmem:[#allocation7 + $0x1d0] sm:$0xf]  ;;  %v18225_v12 = vld [vmem:[#allocation7 + $0x1d4] sm:$0xf0] }
 0x94f   :  { %v10176_v38 = vadd.f32 %v10175_v51, %v10163_v59  ;;  %v10297_v9 = vadd.f32 %v10296_v49, %v10295_v39  ;;  %v16623_v51 = vor.u32 %v18193_v10, %v16622_v27  ;;  %v16751_v6 = vor.u32 %v18225_v12, %v16750_v23  ;;  %v16670_v39 = vld [vmem:[#allocation7 + $0x130] sm:$0xf]  ;;  %v16662_v49 = vld [vmem:[#allocation7 + $0x120] sm:$0xf] }
 0x950   :  { %v16671_v20 = vor.u32 %v18205_v34, %v16670_v39  ;;  %v16526_v27 = vld [vmem:[#allocation7 + $0x10] sm:$0xf]  ;;  %v16704_v39 = vld [vmem:[#allocation7 + $0x178] sm:$0xf0] }
 0x951   :  { %v10189_v30 = vadd.f32 %v10188_v32, %v10176_v38  ;;  %v16687_v32 = vor.u32 %v18209_v2, %v16686_v62  ;;  %10801 = vmatpush.bf16.msra.mxu1 %v16623_v51  ;;  %v16678_v38 = vld [vmem:[#allocation7 + $0x140] sm:$0xf]  ;;  %10827 = vmatpush.bf16.msra.mxu3 %v16751_v6  ;;  %v16590_v10 = vld [vmem:[#allocation7 + $0x90] sm:$0xf]  ;;  %v16527_v2 = vor.u32 %v18169_v33, %v16526_v27  ;;  %v18201_v51 = vld [vmem:[#allocation7 + $0x114] sm:$0xf0] }
 0x952   :  { %v16679_v35 = vor.u32 %v18207_v47, %v16678_v38  ;;  %v16718_v12 = vld [vmem:[#allocation7 + $0x190] sm:$0xf]  ;;  %v18217_v6 = vld [vmem:[#allocation7 + $0x194] sm:$0xf0]  ;;  %v18183_v47 = vld [vmem:[#allocation7 + $0x84] sm:$0xf0] }
 0x953   :  { %10814 = vmatpush.bf16.msra.mxu2 %v16687_v32  ;;  %v18176_v27 = vld [vmem:[#allocation7 + $0x54] sm:$0xf]  ;;  %v16560_v33 = vld [vmem:[#allocation7 + $0x58] sm:$0xf0] }
 0x955   :  { %10828 = vmatpush.bf16.msra.mxu3 %v16743_v45  ;;  %v18180_v45 = vld [vmem:[#allocation7 + $0x74] sm:$0xf] }
 0x956   :  { %v10177_v15 = vpop.f32.mrf.mxu2  ;;  %v10190_v29 = vpop.f32.mrf.mxu3 }
 0x957   :  { %v16550_v15 = vld [vmem:[#allocation7 + $0x40] sm:$0xf]  ;;  %v18175_v29 = vld [vmem:[#allocation7 + $0x44] sm:$0xf0]  ;;  %10815 = vmatpush.bf16.msra.mxu2 %v16679_v35 }
 0x958   :  { %v16551_v59 = vor.u32 %v18175_v29, %v16550_v15  ;;  %v16719_v29 = vor.u32 %v18217_v6, %v16718_v12  ;;  %v16710_v35 = vld [vmem:[#allocation7 + $0x180] sm:$0xf]  ;;  %v18224_v12 = vld [vmem:[#allocation7 + $0x1d4] sm:$0xf] }
 0x95a   :  { %10789 = vmatpush.bf16.msra.mxu0 %v16551_v59 }
 0x95b   :  { %10816 = vmatpush.bf16.msra.mxu2 %v16671_v20  ;;  %v16707_v20 = vor.u32 %v18212_v21, %v16704_v39  ;;  %v16608_v21 = vld [vmem:[#allocation7 + $0xb8] sm:$0xf0]  ;;  %v18204_v39 = vld [vmem:[#allocation7 + $0x134] sm:$0xf] }
 0x95e   :  { %10790 = vmatpush.bf16.msra.mxu0 %v16543_v16  ;;  %v16640_v16 = vld [vmem:[#allocation7 + $0xf8] sm:$0xf0] }
 0x965   :  { %v10201_v41 = vpop.f32.mrf.mxu0  ;;  %v10214_v37 = vpop.f32.mrf.mxu1 }
 0x966   :  { %v10202_v14 = vadd.f32 %v10201_v41, %v10189_v30 }
 0x968   :  { %v10215_v55 = vadd.f32 %v10214_v37, %v10202_v14  ;;  %v16615_v37 = vor.u32 %v18191_v31, %v16614_v58  ;;  %v10306_v14 = vmul.f32 %v10297_v9, %v18652_v3  ;;  %v18185_v9 = vld [vmem:[#allocation7 + $0x94] sm:$0xf0]  ;;  %v16518_v58 = vld [vmem:[#allocation7] sm:$0xf] }
 0x969   :  { %v16591_v32 = vor.u32 %v18185_v9, %v16590_v10  ;;  %v16563_v10 = vor.u32 %v18176_v27, %v16560_v33  ;;  %v16624_v9 = vld [vmem:[#allocation7 + $0xd8] sm:$0xf0]  ;;  %v18184_v33 = vld [vmem:[#allocation7 + $0x94] sm:$0xf] }
 0x96a   :  { %10802 = vmatpush.bf16.msra.mxu1 %v16615_v37  ;;  %v19105_v7 = vadd.f32 1e-05, %v10306_v14  ;;  %v18199_v37 = vld [vmem:[#allocation7 + $0x104] sm:$0xf0] }
 0x96c   :  { %v10227_v57 = vpop.f32.mrf.mxu2  ;;  %v10240_v54 = vpop.f32.mrf.mxu3  ;;  %18296 = vrsqrt.f32 %v19105_v7  ;;  %vm10342_vm11 = vweird.f32 %v19105_v7 }
 0x96d   :  { %v10228_v22 = vadd.f32 %v10227_v57, %v10215_v55  ;;  %v10203_v24 = vpop.f32.mrf.mxu0  ;;  %v10216_v11 = vpop.f32.mrf.mxu1  ;;  %v16734_v55 = vld [vmem:[#allocation7 + $0x1b0] sm:$0xf]  ;;  %v16534_v57 = vld [vmem:[#allocation7 + $0x20] sm:$0xf] }
 0x96e   :  { %v16735_v17 = vor.u32 %v18221_v46, %v16734_v55  ;;  %10803 = vmatpush.bf16.msra.mxu1 %v16607_v40  ;;  %v16599_v24 = vor.u32 %v18187_v60, %v16598_v0  ;;  %v16643_v40 = vor.u32 %v18196_v26, %v16640_v16  ;;  %v18228_v55 = vld [vmem:[#allocation7 + $0x1f4] sm:$0xf]  ;;  %v16768_v46 = vld [vmem:[#allocation7 + $0x1f8] sm:$0xf0]  ;;  %v18210_v60 = vld [vmem:[#allocation7 + $0x164] sm:$0xf] }
 0x96f   :  { %v19100_v1 = vadd.f32 %v10240_v54, %v10228_v22  ;;  %v18171_v54 = vld [vmem:[#allocation7 + $0x24] sm:$0xf0]  ;;  %v18172_v26 = vld [vmem:[#allocation7 + $0x34] sm:$0xf] }
 0x970   :  { %v16535_v28 = vor.u32 %v18171_v54, %v16534_v57  ;;  %v18203_v22 = vld [vmem:[#allocation7 + $0x124] sm:$0xf0]  ;;  %10829 = vmatpush.bf16.msra.mxu3 %v16735_v17  ;;  %v18178_v17 = vld [vmem:[#allocation7 + $0x64] sm:$0xf]  ;;  %v16568_v57 = vld [vmem:[#allocation7 + $0x68] sm:$0xf0] }
 0x971   :  { %v10262_v44 = vrot.slane %v19100_v1, 4  ;;  %v16663_v11 = vor.u32 %v18203_v22, %v16662_v49  ;;  %v18194_v54 = vld [vmem:[#allocation7 + $0xe4] sm:$0xf]  ;;  %v16696_v49 = vld [vmem:[#allocation7 + $0x168] sm:$0xf0] }
 0x972   :  { %10791 = vmatpush.bf16.msra.mxu0 %v16535_v28  ;;  %10804 = vmatpush.bf16.msra.mxu1 %v16599_v24  ;;  %v19114_v59 = vpop.eup %18296  ;;  %v16632_v28 = vld [vmem:[#allocation7 + $0xe8] sm:$0xf0] }
 0x973   :  { %v10263_v18 = vadd.f32 %v10262_v44, %v19100_v1  ;;  %10817 = vmatpush.bf16.msra.mxu2 %v16663_v11  ;;  %v16654_v44 = vld [vmem:[#allocation7 + $0x110] sm:$0xf]  ;;  %v10337_v56 = vmul.f32 %v19114_v59, %v19105_v7  ;;  %v16635_v24 = vor.u32 %v18194_v54, %v16632_v28  ;;  %v16699_v11 = vor.u32 %v18210_v60, %v16696_v49  ;;  %v18186_v54 = vld [vmem:[#allocation7 + $0xa4] sm:$0xf]  ;;  %v16664_v60 = vld [vmem:[#allocation7 + $0x128] sm:$0xf0] }
 0x974   :  { %v10229_v30 = vpop.f32.mrf.mxu2  ;;  %v10242_v41 = vpop.f32.mrf.mxu3  ;;  %10830 = vmatpush.bf16.msra.mxu3 %v16727_v63  ;;  %v16655_v23 = vor.u32 %v18201_v51, %v16654_v44  ;;  %v16763_v63 = vor.u32 %v18226_v25, %v16760_v48  ;;  %v18208_v44 = vld [vmem:[#allocation7 + $0x154] sm:$0xf]  ;;  %v18202_v28 = vld [vmem:[#allocation7 + $0x124] sm:$0xf]  ;;  %v16728_v25 = vld [vmem:[#allocation7 + $0x1a8] sm:$0xf0]  ;;  %vm10343_vm10 = vweird.f32 %v19114_v59 }
 0x975   :  { %v10264_v36 = vrot.slane %v10263_v18, 2  ;;  %v16646_v30 = vld [vmem:[#allocation7 + $0x100] sm:$0xf]  ;;  %v10338_v22 = vmul.f32 %v19114_v59, %v10337_v56  ;;  %v16544_v56 = vld [vmem:[#allocation7 + $0x38] sm:$0xf0]  ;;  %vm10344_vm13 = vmor %vm10342_vm11, %vm10343_vm10 }
 0x976   :  { %10792 = vmatpush.bf16.msra.mxu0 %v16527_v2  ;;  %10805 = vmatpush.bf16.msra.mxu1 %v16591_v32  ;;  %v16647_v14 = vor.u32 %v18199_v37, %v16646_v30  ;;  %v18192_v2 = vld [vmem:[#allocation7 + $0xd4] sm:$0xf]  ;;  %v16616_v30 = vld [vmem:[#allocation7 + $0xc8] sm:$0xf0]  ;;  %v16547_v16 = vor.u32 %v18172_v26, %v16544_v56  ;;  %v18218_v49 = vld [vmem:[#allocation7 + $0x1a4] sm:$0xf] }
 0x977   :  { %v10265_v50 = vadd.f32 %v10264_v36, %v10263_v18  ;;  %v18167_v18 = vld [vmem:[#allocation7 + $0x4] sm:$0xf0]  ;;  %10818 = vmatpush.bf16.msra.mxu2 %v16655_v23  ;;  %v16711_v36 = vor.u32 %v18215_v5, %v16710_v35  ;;  %v16627_v32 = vor.u32 %v18192_v2, %v16624_v9  ;;  %v16688_v23 = vld [vmem:[#allocation7 + $0x158] sm:$0xf0]  ;;  %v19119_v6 = vmul.f32 0.5, %v10338_v22 }
 0x978   :  { %v16519_v38 = vor.u32 %v18167_v18, %v16518_v58  ;;  %10831 = vmatpush.bf16.msra.mxu3 %v16719_v29  ;;  %v16752_v29 = vld [vmem:[#allocation7 + $0x1d8] sm:$0xf0]  ;;  %v16680_v37 = vld [vmem:[#allocation7 + $0x148] sm:$0xf0]  ;;  %v18168_v48 = vld [vmem:[#allocation7 + $0x14] sm:$0xf]  ;;  %v16731_v27 = vor.u32 %v18218_v49, %v16728_v25 }
 0x979   :  { %v10266_v53 = vrot.slane %v10265_v50, 1  ;;  %v16755_v18 = vor.u32 %v18224_v12, %v16752_v29  ;;  %v18200_v2 = vld [vmem:[#allocation7 + $0x114] sm:$0xf]  ;;  %v16656_v9 = vld [vmem:[#allocation7 + $0x118] sm:$0xf0] }
 0x97a   :  { %10793 = vmatpush.bf16.msra.mxu0 %v16519_v38  ;;  %v18190_v38 = vld [vmem:[#allocation7 + $0xc4] sm:$0xf]  ;;  %v16520_v29 = vld [vmem:[#allocation7 + $0x8] sm:$0xf0] }
 0x97b   :  { %v10267_v19 = vadd.f32 %v10266_v53, %v10265_v50  ;;  %v16579_v50 = vor.u32 %v18180_v45, %v16576_v13  ;;  %10819 = vmatpush.bf16.msra.mxu2 %v16647_v14  ;;  %v16771_v53 = vor.u32 %v18228_v55, %v16768_v46  ;;  %v16619_v5 = vor.u32 %v18190_v38, %v16616_v30  ;;  %v18222_v14 = vld [vmem:[#allocation7 + $0x1c4] sm:$0xf]  ;;  %v18220_v55 = vld [vmem:[#allocation7 + $0x1b4] sm:$0xf]  ;;  %v16736_v46 = vld [vmem:[#allocation7 + $0x1b8] sm:$0xf0] }
 0x97c   :  { %10832 = vmatpush.bf16.msra.mxu3 %v16711_v36  ;;  %v16744_v36 = vld [vmem:[#allocation7 + $0x1c8] sm:$0xf0]  ;;  %v10340_v13 = vsub.f32 1.5, %v19119_v6  ;;  %v18166_v12 = vld [vmem:[#allocation7 + $0x4] sm:$0xf] }
 0x97d   :  { %v10271_v52 = vmul.f32 %v10267_v19, %v18652_v3  ;;  %v16571_v19 = vor.u32 %v18178_v17, %v16568_v57  ;;  %v16747_v45 = vor.u32 %v18222_v14, %v16744_v36  ;;  %v16739_v17 = vor.u32 %v18220_v55, %v16736_v46  ;;  %v16536_v57 = vld [vmem:[#allocation7 + $0x28] sm:$0xf0] }
 0x97e   :  { %10838 = vmatpush.bf16.msrb.mxu0 %v16579_v50  ;;  %v18188_v50 = vld [vmem:[#allocation7 + $0xb4] sm:$0xf]  ;;  %v16648_v30 = vld [vmem:[#allocation7 + $0x108] sm:$0xf0] }
 0x97f   :  { %v19110_v62 = vsub.f32 %v19100_v1, %v10271_v52  ;;  %v16582_v1 = vld [vmem:[#allocation7 + $0x80] sm:$0xf]  ;;  %10864 = vmatpush.bf16.msrb.mxu2 %v16707_v20 }
 0x980   :  { %v16583_v41 = vor.u32 %v18183_v47, %v16582_v1  ;;  %10877 = vmatpush.bf16.msrb.mxu3 %v16771_v53  ;;  %v18174_v1 = vld [vmem:[#allocation7 + $0x44] sm:$0xf] }
 0x981   :  { %v10279_v15 = vmul.f32 %v19110_v62, %v19110_v62  ;;  %v18170_v53 = vld [vmem:[#allocation7 + $0x24] sm:$0xf] }
 0x982   :  { %10806 = vmatpush.bf16.msra.mxu1 %v16583_v41  ;;  %10839 = vmatpush.bf16.msrb.mxu0 %v16571_v19  ;;  %v18206_v41 = vld [vmem:[#allocation7 + $0x144] sm:$0xf]  ;;  %v16539_v19 = vor.u32 %v18170_v53, %v16536_v57 }
 0x983   :  { %v10298_v31 = vrot.slane %v10279_v15, 4  ;;  %10865 = vmatpush.bf16.msrb.mxu2 %v16699_v11  ;;  %v16667_v11 = vor.u32 %v18202_v28, %v16664_v60 }
 0x984   :  { %10878 = vmatpush.bf16.msrb.mxu3 %v16763_v63 }
 0x985   :  { %v10299_v42 = vadd.f32 %v10298_v31, %v10279_v15  ;;  %v16691_v15 = vor.u32 %v18208_v44, %v16688_v23  ;;  %v16552_v31 = vld [vmem:[#allocation7 + $0x48] sm:$0xf0]  ;;  %v18216_v44 = vld [vmem:[#allocation7 + $0x194] sm:$0xf]  ;;  %v16720_v23 = vld [vmem:[#allocation7 + $0x198] sm:$0xf0] }
 0x986   :  { %10851 = vmatpush.bf16.msrb.mxu1 %v16643_v40  ;;  %10840 = vmatpush.bf16.msrb.mxu0 %v16563_v10  ;;  %v16555_v47 = vor.u32 %v18174_v1, %v16552_v31  ;;  %v16611_v40 = vor.u32 %v18188_v50, %v16608_v21  ;;  %v16592_v10 = vld [vmem:[#allocation7 + $0x98] sm:$0xf0]  ;;  %v10341_v1 = vmul.f32 %v19114_v59, %v10340_v13  ;;  %v10311_v21 = vld [vmem:[#allocation10 + $0x3] ss:$8 sm:$0xf] }
 0x987   :  { %v10300_v34 = vrot.slane %v10299_v42, 2  ;;  %10866 = vmatpush.bf16.msrb.mxu2 %v16691_v15  ;;  %v16595_v6 = vor.u32 %v18184_v33, %v16592_v10  ;;  %v16659_v15 = vor.u32 %v18200_v2, %v16656_v9  ;;  %v16723_v38 = vor.u32 %v18216_v44, %v16720_v23 }
 0x988   :  { %10879 = vmatpush.bf16.msrb.mxu3 %v16755_v18  ;;  %v16584_v18 = vld [vmem:[#allocation7 + $0x88] sm:$0xf0]  ;;  %v10384_v55 = vperm.slane %v10311_v21, 2 }
 0x989   :  { %v10301_v0 = vadd.f32 %v10300_v34, %v10299_v42  ;;  %v16683_v42 = vor.u32 %v18206_v41, %v16680_v37  ;;  %v16672_v34 = vld [vmem:[#allocation7 + $0x138] sm:$0xf0]  ;;  %v18214_v41 = vld [vmem:[#allocation7 + $0x184] sm:$0xf]  ;;  %v16712_v37 = vld [vmem:[#allocation7 + $0x188] sm:$0xf0] }
 0x98a   :  { %10852 = vmatpush.bf16.msrb.mxu1 %v16635_v24  ;;  %10841 = vmatpush.bf16.msrb.mxu0 %v16555_v47  ;;  %v16675_v20 = vor.u32 %v18204_v39, %v16672_v34  ;;  %v18198_v47 = vld [vmem:[#allocation7 + $0x104] sm:$0xf]  ;;  %v16715_v26 = vor.u32 %v18214_v41, %v16712_v37 }
 0x98b   :  { %v10302_v52 = vrot.slane %v10301_v0, 1  ;;  %10867 = vmatpush.bf16.msrb.mxu2 %v16683_v42  ;;  %v16523_v42 = vor.u32 %v18166_v12, %v16520_v29  ;;  %v16651_v36 = vor.u32 %v18198_v47, %v16648_v30 }
 0x98c   :  { %10880 = vmatpush.bf16.msrb.mxu3 %v16747_v45  ;;  %v10345_v45 = vsel %vm10344_vm13, %v19114_v59, %v10341_v1  ;;  %vm11322_vm13 = vcmask 261120  }
 0x98d   :  { %v10303_v51 = vadd.f32 %v10302_v52, %v10301_v0  ;;  %v16600_v0 = vld [vmem:[#allocation7 + $0xa8] sm:$0xf0]  ;;  %v16528_v52 = vld [vmem:[#allocation7 + $0x18] sm:$0xf0]  ;;  %v10361_v7 = vrot.slane %v10345_v45, 6 }
 0x98e   :  { %10853 = vmatpush.bf16.msrb.mxu1 %v16627_v32  ;;  %10842 = vmatpush.bf16.msrb.mxu0 %v16547_v16  ;;  %v16603_v24 = vor.u32 %v18186_v54, %v16600_v0  ;;  %v16531_v32 = vor.u32 %v18168_v48, %v16528_v52  ;;  %v10309_v16 = vld [vmem:[#allocation10 + $0x2] ss:$8 sm:$0xf] }
 0x98f   :  { %v10307_v58 = vmul.f32 %v10303_v51, %v18652_v3  ;;  %10868 = vmatpush.bf16.msrb.mxu2 %v16675_v20  ;;  %v10383_v20 = vperm.slane %v10311_v21, 1 }
 0x990   :  { %10881 = vmatpush.bf16.msrb.mxu3 %v16739_v17 }
 0x991   :  { %v19122_v35 = vadd.f32 1e-05, %v10307_v58  ;;  %v18182_v58 = vld [vmem:[#allocation7 + $0x84] sm:$0xf] }
 0x992   :  { %10854 = vmatpush.bf16.msrb.mxu1 %v16619_v5  ;;  %10843 = vmatpush.bf16.msrb.mxu0 %v16539_v19  ;;  %v16587_v14 = vor.u32 %v18182_v58, %v16584_v18 }
 0x993   :  { %18298 = vrsqrt.f32 %v19122_v35  ;;  %10869 = vmatpush.bf16.msrb.mxu2 %v16667_v11  ;;  %vm10352_vm0 = vweird.f32 %v19122_v35 }
 0x994   :  { %10882 = vmatpush.bf16.msrb.mxu3 %v16731_v27 }
 0x996   :  { %10855 = vmatpush.bf16.msrb.mxu1 %v16611_v40  ;;  %10844 = vmatpush.bf16.msrb.mxu0 %v16531_v32  ;;  %v10385_v40 = vperm.slane %v10311_v21, 3 }
 0x997   :  { %10870 = vmatpush.bf16.msrb.mxu2 %v16659_v15 }
 0x998   :  { %10883 = vmatpush.bf16.msrb.mxu3 %v16723_v38 }
 0x999   :  { %v18299_v22 = vpop.eup %18298 }
 0x99a   :  { %v10347_v63 = vmul.f32 %v18299_v22, %v19122_v35  ;;  %10856 = vmatpush.bf16.msrb.mxu1 %v16603_v24  ;;  %vm10353_vm12 = vweird.f32 %v18299_v22  ;;  %10845 = vmatpush.bf16.msrb.mxu0 %v16523_v42  ;;  %v10382_v35 = vperm.slane %v10311_v21, 0 }
 0x99b   :  { %vm10354_vm1 = vmor %vm10352_vm0, %vm10353_vm12  ;;  %10871 = vmatpush.bf16.msrb.mxu2 %v16651_v36 }
 0x99c   :  { %v10348_v51 = vmul.f32 %v18299_v22, %v10347_v63  ;;  %10884 = vmatpush.bf16.msrb.mxu3 %v16715_v26 }
 0x99e   :  { %v10349_v31 = vmul.f32 0.5, %v10348_v51  ;;  %10857 = vmatpush.bf16.msrb.mxu1 %v16595_v6 }
 0x9a0   :  { %v10350_v5 = vsub.f32 1.5, %v10349_v31 }
 0x9a2   :  { %v10351_v13 = vmul.f32 %v18299_v22, %v10350_v5  ;;  %10858 = vmatpush.bf16.msrb.mxu1 %v16587_v14 }
 0x9a4   :  { %v10355_v56 = vsel %vm10354_vm1, %v18299_v22, %v10351_v13 }
 0x9a5   :  { %v10362_v50 = vrot.slane %v10355_v56, 5 }
 0x9a7   :  { %v10364_v39 = vsel %vm8212_vm14, %v10361_v7, %v10362_v50  ;;  %v18237_v7 = vld [vmem:[#allocation9 + $0x38] sm:$0xff] }
 0x9a8   :  { %v10365_v59 = vsel %vm8214_vm15, %v19093_v61, %v10364_v39  ;;  %v18245_v50 = vld [vmem:[#allocation9 + $0x78] sm:$0xff] }
 0x9a9   :  { %v10367_v34 = vmul.f32 %v10365_v59, %v10309_v16 }
 0x9ab   :  { %v10372_v46 = vperm.slane %v10367_v34, 3  ;;  %v10369_v53 = vperm.slane %v10367_v34, 0  ;;  %v10370_v17 = vperm.slane %v10367_v34, 1  ;;  %v10371_v57 = vperm.slane %v10367_v34, 2 }
 0x9ad   :  { %v10380_v54 = vmul.f32 %v10372_v46, %v19110_v62  ;;  %v10377_v0 = vmul.f32 %v10369_v53, %v19081_v43  ;;  %v10378_v19 = vmul.f32 %v10370_v17, %v19086_v8  ;;  %v10379_v28 = vmul.f32 %v10371_v57, %v19096_v4  ;;  %v18235_v57 = vld [vmem:[#allocation9 + $0x28] sm:$0xff] }
 0x9af   :  { %v10393_v60 = vadd.f32 %v10385_v40, %v10380_v54  ;;  %v10390_v49 = vadd.f32 %v10382_v35, %v10377_v0  ;;  %v10391_v61 = vadd.f32 %v10383_v20, %v10378_v19  ;;  %v10392_v22 = vadd.f32 %v10384_v55, %v10379_v28  ;;  %v18236_v35 = vld [vmem:[#allocation9 + $0x30] sm:$0xff]  ;;  %v18243_v54 = vld [vmem:[#allocation9 + $0x68] sm:$0xff] }
 0x9b0   :  { %v18244_v20 = vld [vmem:[#allocation9 + $0x70] sm:$0xff] }
 0x9b1   :  { %v10397_v24 = vmax.f32 %v10393_v60, 0.0  ;;  %v10394_v11 = vmax.f32 %v10390_v49, 0.0  ;;  %v10395_v25 = vmax.f32 %v10391_v61, 0.0  ;;  %v10396_v48 = vmax.f32 %v10392_v22, 0.0  ;;  %v18234_v60 = vld [vmem:[#allocation9 + $0x20] sm:$0xff] }
 0x9b2   :  { %v18242_v49 = vld [vmem:[#allocation9 + $0x60] sm:$0xff] }
 0x9b3   :  { %v10465_v52 = vpack.c.bf16 %v10397_v24, %v10397_v24  ;;  %v10462_v63 = vpack.c.bf16 %v10394_v11, %v10394_v11  ;;  %v10463_v27 = vpack.c.bf16 %v10395_v25, %v10395_v25  ;;  %v10464_v33 = vpack.c.bf16 %v10396_v48, %v10396_v48  ;;  %v18233_v11 = vld [vmem:[#allocation9 + $0x18] sm:$0xff] }
 0x9b4   :  { %v18241_v25 = vld [vmem:[#allocation9 + $0x58] sm:$0xff] }
 0x9b5   :  { %10794 = vmatmul.bf16.vlgmr.msra.gmra.mxu0 %v10462_v63  ;;  %10807 = vmatmul.bf16.vlgmr.msra.gmra.mxu1 %v10463_v27 }
 0x9b6   :  { %10820 = vmatmul.bf16.vlgmr.msra.gmra.mxu2 %v10464_v33  ;;  %10833 = vmatmul.bf16.vlgmr.msra.gmra.mxu3 %v10465_v52 }
 0x9b7   :  { %11100 = vmatpush.bf16.msra.mxu0 %v18237_v7  ;;  %11113 = vmatpush.bf16.msra.mxu1 %v18245_v50 }
 0x9bb   :  { %11101 = vmatpush.bf16.msra.mxu0 %v18236_v35  ;;  %11114 = vmatpush.bf16.msra.mxu1 %v18244_v20 }
 0x9bf   :  { %11102 = vmatpush.bf16.msra.mxu0 %v18235_v57  ;;  %11115 = vmatpush.bf16.msra.mxu1 %v18243_v54 }
 0x9c3   :  { %11103 = vmatpush.bf16.msra.mxu0 %v18234_v60  ;;  %11116 = vmatpush.bf16.msra.mxu1 %v18242_v49 }
 0x9c5   :  { %10846 = vmatmul.bf16.vlgmr.msrb.gmra.mxu0 %v10462_v63  ;;  %10859 = vmatmul.bf16.vlgmr.msrb.gmra.mxu1 %v10463_v27  ;;  %v18232_v27 = vld [vmem:[#allocation9 + $0x10] sm:$0xff] }
 0x9c6   :  { %10872 = vmatmul.bf16.vlgmr.msrb.gmra.mxu2 %v10464_v33  ;;  %10885 = vmatmul.bf16.vlgmr.msrb.gmra.mxu3 %v10465_v52  ;;  %v18240_v33 = vld [vmem:[#allocation9 + $0x50] sm:$0xff] }
 0x9c7   :  { %11104 = vmatpush.bf16.msra.mxu0 %v18233_v11  ;;  %11117 = vmatpush.bf16.msra.mxu1 %v18241_v25  ;;  %v18249_v11 = vld [vmem:[%s19222_s5 + $0x18] sm:$0xff] }
 0x9cb   :  { %11105 = vmatpush.bf16.msra.mxu0 %v18232_v27  ;;  %11118 = vmatpush.bf16.msra.mxu1 %v18240_v33  ;;  %v18247_v33 = vld [vmem:[%s19222_s5 + $0x8] sm:$0xff] }
 0xa32   :  { %v10795_v43 = vpop.f32.mrf.mxu0  ;;  %v10808_v8 = vpop.f32.mrf.mxu1 }
 0xa33   :  { %v10809_v4 = vadd.f32 %v10808_v8, %v10795_v43 }
 0xa39   :  { %v10821_v62 = vpop.f32.mrf.mxu2  ;;  %v10834_v10 = vpop.f32.mrf.mxu3 }
 0xa3a   :  { %v10822_v2 = vadd.f32 %v10821_v62, %v10809_v4  ;;  %v10797_v9 = vpop.f32.mrf.mxu0  ;;  %v10810_v44 = vpop.f32.mrf.mxu1  ;;  %v18231_v4 = vld [vmem:[#allocation9 + $0x8] sm:$0xff] }
 0xa3b   :  { %v18239_v62 = vld [vmem:[#allocation9 + $0x48] sm:$0xff]  ;;  %11106 = vmatpush.bf16.msra.mxu0 %v18231_v4  ;;  %v18230_v44 = vld [vmem:[#allocation9] sm:$0xff] }
 0xa3c   :  { %v10835_v51 = vadd.f32 %v10834_v10, %v10822_v2  ;;  %11119 = vmatpush.bf16.msra.mxu1 %v18239_v62  ;;  %v18246_v4 = vld [vmem:[%s19222_s5] sm:$0xff] }
 0xa3e   :  { %v10890_v32 = vrot.slane %v10835_v51, 4 }
 0xa3f   :  { %11107 = vmatpush.bf16.msra.mxu0 %v18230_v44 }
 0xa40   :  { %v10891_v23 = vadd.f32 %v10890_v32, %v10835_v51 }
 0xa41   :  { %v10823_v12 = vpop.f32.mrf.mxu2  ;;  %v10836_v6 = vpop.f32.mrf.mxu3 }
 0xa42   :  { %v10892_v15 = vrot.slane %v10891_v23, 2  ;;  %v10847_v29 = vpop.f32.mrf.mxu0  ;;  %v10860_v58 = vpop.f32.mrf.mxu1 }
 0xa43   :  { %v10861_v38 = vadd.f32 %v10860_v58, %v10847_v29 }
 0xa44   :  { %v10893_v18 = vadd.f32 %v10892_v15, %v10891_v23 }
 0xa46   :  { %v10894_v1 = vrot.slane %v10893_v18, 1 }
 0xa48   :  { %v10895_v31 = vadd.f32 %v10894_v1, %v10893_v18 }
 0xa49   :  { %v10873_v47 = vpop.f32.mrf.mxu2  ;;  %v10886_v30 = vpop.f32.mrf.mxu3 }
 0xa4a   :  { %v10902_v41 = vmul.f32 %v10895_v31, %v18652_v3  ;;  %v10874_v37 = vadd.f32 %v10873_v47, %v10861_v38  ;;  %v10849_v5 = vpop.f32.mrf.mxu0  ;;  %v10862_v42 = vpop.f32.mrf.mxu1 }
 0xa4b   :  { %v10925_v42 = vld [vmem:[#allocation10 + $0x5] ss:$8 sm:$0x3] }
 0xa4c   :  { %v19140_v14 = vsub.f32 %v10835_v51, %v10902_v41  ;;  %v10887_v36 = vadd.f32 %v10886_v30, %v10874_v37  ;;  %v18238_v51 = vld [vmem:[#allocation9 + $0x40] sm:$0xff]  ;;  %v10963_v7 = vperm.slane %v10925_v42, 1 }
 0xa4d   :  { %11120 = vmatpush.bf16.msra.mxu1 %v18238_v51  ;;  %v10923_v41 = vld [vmem:[#allocation10 + $0x4] ss:$8 sm:$0x3] }
 0xa4e   :  { %v10906_v45 = vmul.f32 %v19140_v14, %v19140_v14  ;;  %v10896_v13 = vrot.slane %v10887_v36, 4 }
 0xa50   :  { %v10908_v26 = vrot.slane %v10906_v45, 4  ;;  %v10897_v56 = vadd.f32 %v10896_v13, %v10887_v36 }
 0xa51   :  { %v10875_v16 = vpop.f32.mrf.mxu2  ;;  %v10888_v21 = vpop.f32.mrf.mxu3 }
 0xa52   :  { %v10909_v39 = vadd.f32 %v10908_v26, %v10906_v45  ;;  %v10898_v59 = vrot.slane %v10897_v56, 2 }
 0xa54   :  { %v10910_v34 = vrot.slane %v10909_v39, 2  ;;  %v10899_v40 = vadd.f32 %v10898_v59, %v10897_v56  ;;  %v10962_v56 = vperm.slane %v10925_v42, 0 }
 0xa56   :  { %v10911_v55 = vadd.f32 %v10910_v34, %v10909_v39  ;;  %v10900_v46 = vrot.slane %v10899_v40, 1 }
 0xa58   :  { %v10912_v53 = vrot.slane %v10911_v55, 1  ;;  %v10901_v17 = vadd.f32 %v10900_v46, %v10899_v40  ;;  %v18253_v46 = vld [vmem:[%s19222_s5 + $0x38] sm:$0xff] }
 0xa59   :  { %11224 = vmatpush.bf16.msra.mxu2 %v18253_v46 }
 0xa5a   :  { %v10913_v0 = vadd.f32 %v10912_v53, %v10911_v55  ;;  %v10903_v19 = vmul.f32 %v10901_v17, %v18652_v3 }
 0xa5c   :  { %v19145_v28 = vsub.f32 %v10887_v36, %v10903_v19  ;;  %v10920_v61 = vmul.f32 %v10913_v0, %v18652_v3 }
 0xa5e   :  { %v10907_v22 = vmul.f32 %v19145_v28, %v19145_v28  ;;  %v10926_v48 = vadd.f32 1e-05, %v10920_v61  ;;  %v18250_v61 = vld [vmem:[%s19222_s5 + $0x20] sm:$0xff] }
 0xa60   :  { %v10914_v24 = vrot.slane %v10907_v22, 4  ;;  %18300 = vrsqrt.f32 %v10926_v48  ;;  %vm10934_vm4 = vweird.f32 %v10926_v48 }
 0xa62   :  { %v10915_v52 = vadd.f32 %v10914_v24, %v10907_v22 }
 0xa64   :  { %v10916_v63 = vrot.slane %v10915_v52, 2 }
 0xa66   :  { %v10917_v43 = vadd.f32 %v10916_v63, %v10915_v52  ;;  %v18301_v2 = vpop.eup %18300  ;;  %v18248_v52 = vld [vmem:[%s19222_s5 + $0x10] sm:$0xff] }
 0xa67   :  { %v10929_v23 = vmul.f32 %v18301_v2, %v10926_v48  ;;  %vm10935_vm15 = vweird.f32 %v18301_v2 }
 0xa68   :  { %v10918_v8 = vrot.slane %v10917_v43, 1  ;;  %vm10936_vm6 = vmor %vm10934_vm4, %vm10935_vm15  ;;  %vm11386_vm15 = vcmask 31744  }
 0xa69   :  { %v10930_v12 = vmul.f32 %v18301_v2, %v10929_v23 }
 0xa6a   :  { %v10919_v10 = vadd.f32 %v10918_v8, %v10917_v43 }
 0xa6b   :  { %v10931_v15 = vmul.f32 0.5, %v10930_v12 }
 0xa6c   :  { %v10921_v9 = vmul.f32 %v10919_v10, %v18652_v3 }
 0xa6d   :  { %v10932_v18 = vsub.f32 1.5, %v10931_v15 }
 0xa6e   :  { %v10927_v32 = vadd.f32 1e-05, %v10921_v9 }
 0xa6f   :  { %v10933_v38 = vmul.f32 %v18301_v2, %v10932_v18  ;;  %v11143_v18 = vld [vmem:[#allocation10 + $0x7] ss:$0 sm:$0xff] }
 0xa70   :  { %18302 = vrsqrt.f32 %v10927_v32  ;;  %vm10944_vm2 = vweird.f32 %v10927_v32 }
 0xa71   :  { %v10937_v5 = vsel %vm10936_vm6, %v18301_v2, %v10933_v38 }
 0xa76   :  { %v18303_v6 = vpop.eup %18302 }
 0xa77   :  { %v10939_v29 = vmul.f32 %v18303_v6, %v10927_v32  ;;  %vm10945_vm14 = vweird.f32 %v18303_v6 }
 0xa78   :  { %vm10946_vm3 = vmor %vm10944_vm2, %vm10945_vm14 }
 0xa79   :  { %v10940_v58 = vmul.f32 %v18303_v6, %v10939_v29 }
 0xa7b   :  { %v10941_v1 = vmul.f32 0.5, %v10940_v58 }
 0xa7d   :  { %v10942_v31 = vsub.f32 1.5, %v10941_v1 }
 0xa7f   :  { %v10943_v47 = vmul.f32 %v18303_v6, %v10942_v31 }
 0xa81   :  { %v10947_v30 = vsel %vm10946_vm3, %v18303_v6, %v10943_v47  ;;  %v11142_v6 = vld [vmem:[#allocation10 + $0x6] ss:$0 sm:$0xff] }
 0xa82   :  { %v10950_v37 = vrot.slane %v10947_v30, 7 }
 0xa84   :  { %v10951_v36 = vsel %vm8210_vm5, %v10937_v5, %v10950_v37 }
 0xa85   :  { %v10953_v45 = vmul.f32 %v10951_v36, %v10923_v41 }
 0xa87   :  { %v10955_v13 = vperm.slane %v10953_v45, 0  ;;  %v10956_v26 = vperm.slane %v10953_v45, 1 }
 0xa89   :  { %v10960_v50 = vmul.f32 %v10956_v26, %v19145_v28  ;;  %v10959_v16 = vmul.f32 %v10955_v13, %v19140_v14  ;;  %v18252_v14 = vld [vmem:[%s19222_s5 + $0x30] sm:$0xff]  ;;  %v18251_v28 = vld [vmem:[%s19222_s5 + $0x28] sm:$0xff] }
 0xa8a   :  { %11225 = vmatpush.bf16.msra.mxu2 %v18252_v14 }
 0xa8b   :  { %v10967_v21 = vadd.f32 %v10963_v7, %v10960_v50  ;;  %v10966_v39 = vadd.f32 %v10962_v56, %v10959_v16  ;;  %v18257_v50 = vld [vmem:[%s19223_s6 + $0x18] sm:$0xff] }
 0xa8c   :  { %11313 = vmatpush.bf16.msra.mxu3 %v18257_v50 }
 0xa8d   :  { %v10969_v59 = vmax.f32 %v10967_v21, 0.0  ;;  %v10968_v34 = vmax.f32 %v10966_v39, 0.0  ;;  %v18256_v39 = vld [vmem:[%s19223_s6 + $0x10] sm:$0xff] }
 0xa8e   :  { %11226 = vmatpush.bf16.msra.mxu2 %v18251_v28 }
 0xa8f   :  { %v11003_v40 = vpack.c.bf16 %v10969_v59, %v10969_v59  ;;  %v11002_v35 = vpack.c.bf16 %v10968_v34, %v10968_v34 }
 0xa90   :  { %11314 = vmatpush.bf16.msra.mxu3 %v18256_v39 }
 0xa91   :  { %11108 = vmatmul.bf16.vlgmr.msra.gmra.mxu0 %v11002_v35  ;;  %11121 = vmatmul.bf16.vlgmr.msra.gmra.mxu1 %v11003_v40  ;;  %v18255_v40 = vld [vmem:[%s19223_s6 + $0x8] sm:$0xff] }
 0xa92   :  { %11227 = vmatpush.bf16.msra.mxu2 %v18250_v61 }
 0xa94   :  { %11315 = vmatpush.bf16.msra.mxu3 %v18255_v40 }
 0xa96   :  { %11228 = vmatpush.bf16.msra.mxu2 %v18249_v11 }
 0xa9a   :  { %11229 = vmatpush.bf16.msra.mxu2 %v18248_v52 }
 0xa9e   :  { %11230 = vmatpush.bf16.msra.mxu2 %v18247_v33 }
 0xaa2   :  { %11231 = vmatpush.bf16.msra.mxu2 %v18246_v4 }
 0xb0e   :  { %v11109_v20 = vpop.f32.mrf.mxu0  ;;  %v11122_v55 = vpop.f32.mrf.mxu1 }
 0xb0f   :  { %v11123_v53 = vadd.f32 %v11122_v55, %v11109_v20  ;;  %v18254_v55 = vld [vmem:[%s19223_s6] sm:$0xff] }
 0xb10   :  { %11316 = vmatpush.bf16.msra.mxu3 %v18254_v55 }
 0xb11   :  { %v11126_v17 = vrot.slane %v11123_v53, 4 }
 0xb13   :  { %v11127_v57 = vadd.f32 %v11126_v17, %v11123_v53 }
 0xb15   :  { %v11128_v54 = vrot.slane %v11127_v57, 2 }
 0xb16   :  { %v11111_v0 = vpop.f32.mrf.mxu0  ;;  %v11124_v19 = vpop.f32.mrf.mxu1 }
 0xb17   :  { %v11129_v60 = vadd.f32 %v11128_v54, %v11127_v57 }
 0xb19   :  { %v11130_v49 = vrot.slane %v11129_v60, 1 }
 0xb1b   :  { %v11131_v22 = vadd.f32 %v11130_v49, %v11129_v60  ;;  %v11256_v60 = vld [vmem:[#allocation10 + $0x40] ss:$0 sm:$0xff] }
 0xb1d   :  { %v11132_v24 = vmul.f32 %v11131_v22, %v18652_v3 }
 0xb1f   :  { %v11133_v25 = vsub.f32 %v11123_v53, %v11132_v24  ;;  %v11257_v24 = vld [vmem:[#allocation10 + $0x41] ss:$0 sm:$0xff] }
 0xb21   :  { %v11134_v48 = vmul.f32 %v11133_v25, %v11133_v25 }
 0xb23   :  { %v11135_v63 = vrot.slane %v11134_v48, 4 }
 0xb25   :  { %v11136_v27 = vadd.f32 %v11135_v63, %v11134_v48 }
 0xb27   :  { %v11137_v43 = vrot.slane %v11136_v27, 2 }
 0xb29   :  { %v11138_v8 = vadd.f32 %v11137_v43, %v11136_v27 }
 0xb2b   :  { %v11139_v62 = vrot.slane %v11138_v8, 1 }
 0xb2d   :  { %v11140_v10 = vadd.f32 %v11139_v62, %v11138_v8 }
 0xb2f   :  { %v11141_v2 = vmul.f32 %v11140_v10, %v18652_v3 }
 0xb31   :  { %v11144_v9 = vadd.f32 1e-05, %v11141_v2 }
 0xb33   :  { %18304 = vrsqrt.f32 %v11144_v9  ;;  %vm11151_vm7 = vweird.f32 %v11144_v9 }
 0xb39   :  { %v18305_v44 = vpop.eup %18304 }
 0xb3a   :  { %v11146_v51 = vmul.f32 %v18305_v44, %v11144_v9  ;;  %vm11152_vm5 = vweird.f32 %v18305_v44 }
 0xb3b   :  { %vm11153_vm8 = vmor %vm11151_vm7, %vm11152_vm5 }
 0xb3c   :  { %v11147_v32 = vmul.f32 %v18305_v44, %v11146_v51 }
 0xb3e   :  { %v11148_v23 = vmul.f32 0.5, %v11147_v32 }
 0xb40   :  { %v11149_v12 = vsub.f32 1.5, %v11148_v23 }
 0xb42   :  { %v11150_v15 = vmul.f32 %v18305_v44, %v11149_v12 }
 0xb44   :  { %v11154_v29 = vsel %vm11153_vm8, %v18305_v44, %v11150_v15 }
 0xb45   :  { %v11155_v58 = vmul.f32 %v11154_v29, %v11142_v6  ;;  %v11361_v6 = vld [vmem:[%s19224_s7 + $0x18] sm:$0xff]  ;;  %v11360_v29 = vld [vmem:[%s19224_s7 + $0x10] sm:$0xff] }
 0xb46   :  { %11378 = vmatpush.msrb.mxu3 %v11361_v6 }
 0xb47   :  { %v11156_v1 = vmul.f32 %v11155_v58, %v11133_v25 }
 0xb48   :  { %11379 = vmatpush.msrb.mxu3 %v11360_v29 }
 0xb49   :  { %v11157_v31 = vadd.f32 %v11156_v1, %v11143_v18  ;;  %v11359_v18 = vld [vmem:[%s19224_s7 + $0x8] sm:$0xff] }
 0xb4a   :  { %11380 = vmatpush.msrb.mxu3 %v11359_v18 }
 0xb4b   :  { %v11158_v38 = vmax.f32 %v11157_v31, 0.0  ;;  %v11358_v31 = vld [vmem:[%s19224_s7] sm:$0xff] }
 0xb4c   :  { %11381 = vmatpush.msrb.mxu3 %v11358_v31 }
 0xb4d   :  { %v11175_v47 = vpack.c.bf16 %v11158_v38, %v11158_v38 }
 0xb4f   :  { %11232 = vmatmul.bf16.vlgmr.msra.gmra.mxu2 %v11175_v47 }
 0xbd2   :  { %v11233_v30 = vpop.f32.mrf.mxu2 }
 0xbd3   :  { %v11238_v41 = vsel %vm11237_vm9, %v11233_v30, 0.0 }
 0xbd4   :  { %v11239_v37 = vrot.slane %v11238_v41, 4 }
 0xbd6   :  { %v11240_v5 = vadd.f32 %v11239_v37, %v11238_v41 }
 0xbd8   :  { %v11241_v42 = vrot.slane %v11240_v5, 2 }
 0xbda   :  { %v11242_v36 = vadd.f32 %v11241_v42, %v11240_v5  ;;  %v11235_v45 = vpop.f32.mrf.mxu2 }
 0xbdb   :  { %v11341_v45 = vld [vmem:[#allocation10 + $0x42] ss:$0 sm:$0xff] }
 0xbdc   :  { %v11243_v13 = vrot.slane %v11242_v36, 1 }
 0xbde   :  { %v11244_v26 = vadd.f32 %v11243_v13, %v11242_v36 }
 0xbe0   :  { %v11245_v56 = vmul.f32 %v11244_v26, %v18652_v3 }
 0xbe2   :  { %v11246_v7 = vsub.f32 %v11233_v30, %v11245_v56 }
 0xbe4   :  { %v11247_v16 = vmul.f32 %v11246_v7, %v11246_v7 }
 0xbe6   :  { %v11248_v21 = vsel %vm11237_vm9, %v11247_v16, 0.0 }
 0xbe7   :  { %v11249_v59 = vrot.slane %v11248_v21, 4 }
 0xbe9   :  { %v11250_v34 = vadd.f32 %v11249_v59, %v11248_v21 }
 0xbeb   :  { %v11251_v35 = vrot.slane %v11250_v34, 2 }
 0xbed   :  { %v11252_v20 = vadd.f32 %v11251_v35, %v11250_v34 }
 0xbef   :  { %v11253_v46 = vrot.slane %v11252_v20, 1 }
 0xbf1   :  { %v11254_v53 = vadd.f32 %v11253_v46, %v11252_v20 }
 0xbf3   :  { %v11255_v17 = vmul.f32 %v11254_v53, %v18652_v3 }
 0xbf5   :  { %v11258_v14 = vadd.f32 1e-05, %v11255_v17 }
 0xbf7   :  { %18306 = vrsqrt.f32 %v11258_v14  ;;  %vm11265_vm11 = vweird.f32 %v11258_v14 }
 0xbfd   :  { %v18307_v57 = vpop.eup %18306 }
 0xbfe   :  { %v11260_v54 = vmul.f32 %v18307_v57, %v11258_v14  ;;  %vm11266_vm10 = vweird.f32 %v18307_v57 }
 0xbff   :  { %vm11267_vm12 = vmor %vm11265_vm11, %vm11266_vm10 }
 0xc00   :  { %v11261_v0 = vmul.f32 %v18307_v57, %v11260_v54 }
 0xc02   :  { %v11262_v19 = vmul.f32 0.5, %v11261_v0 }
 0xc04   :  { %v11263_v28 = vsub.f32 1.5, %v11262_v19 }
 0xc06   :  { %v11264_v49 = vmul.f32 %v18307_v57, %v11263_v28 }
 0xc08   :  { %v11268_v61 = vsel %vm11267_vm12, %v18307_v57, %v11264_v49 }
 0xc09   :  { %v11269_v22 = vmul.f32 %v11268_v61, %v11256_v60 }
 0xc0b   :  { %v11270_v11 = vmul.f32 %v11269_v22, %v11246_v7  ;;  %v11342_v7 = vld [vmem:[#allocation10 + $0x43] ss:$0 sm:$0xff] }
 0xc0d   :  { %v11271_v25 = vadd.f32 %v11270_v11, %v11257_v24 }
 0xc0f   :  { %v11272_v48 = vmax.f32 %v11271_v25, 0.0 }
 0xc11   :  { %v11281_v52 = vpack.c.bf16 %v11272_v48, %v11272_v48 }
 0xc13   :  { %16884 = vmatmul.msk.bf16.vlgmr.msra.gmra.mxu3 %vm11237_vm9, %v11281_v52 }
 0xc96   :  { %v11318_v63 = vpop.f32.mrf.mxu3 }
 0xc97   :  { %v11323_v27 = vsel %vm11322_vm13, %v11318_v63, 0.0 }
 0xc98   :  { %v11324_v33 = vrot.slane %v11323_v27, 4 }
 0xc9a   :  { %v11325_v43 = vadd.f32 %v11324_v33, %v11323_v27 }
 0xc9c   :  { %v11326_v8 = vrot.slane %v11325_v43, 2 }
 0xc9e   :  { %v11327_v4 = vadd.f32 %v11326_v8, %v11325_v43  ;;  %v11320_v62 = vpop.f32.mrf.mxu3 }
 0xca0   :  { %v11328_v10 = vrot.slane %v11327_v4, 1 }
 0xca2   :  { %v11329_v2 = vadd.f32 %v11328_v10, %v11327_v4 }
 0xca4   :  { %v11330_v9 = vmul.f32 %v11329_v2, %v18652_v3 }
 0xca6   :  { %v11331_v44 = vsub.f32 %v11318_v63, %v11330_v9 }
 0xca8   :  { %v11332_v51 = vmul.f32 %v11331_v44, %v11331_v44 }
 0xcaa   :  { %v11333_v32 = vsel %vm11322_vm13, %v11332_v51, 0.0 }
 0xcab   :  { %v11334_v23 = vrot.slane %v11333_v32, 4 }
 0xcad   :  { %v11335_v12 = vadd.f32 %v11334_v23, %v11333_v32 }
 0xcaf   :  { %v11336_v15 = vrot.slane %v11335_v12, 2 }
 0xcb1   :  { %v11337_v58 = vadd.f32 %v11336_v15, %v11335_v12 }
 0xcb3   :  { %v11338_v1 = vrot.slane %v11337_v58, 1 }
 0xcb5   :  { %v11339_v38 = vadd.f32 %v11338_v1, %v11337_v58 }
 0xcb7   :  { %v11340_v47 = vmul.f32 %v11339_v38, %v18652_v3  ;;  %v11362_v3 = vld [vmem:[#allocation10 + $0x44] ss:$0 sm:$0xff] }
 0xcb9   :  { %v11343_v30 = vadd.f32 1e-05, %v11340_v47 }
 0xcbb   :  { %18308 = vrsqrt.f32 %v11343_v30  ;;  %vm11350_vm1 = vweird.f32 %v11343_v30 }
 0xcc1   :  { %v18309_v41 = vpop.eup %18308 }
 0xcc2   :  { %v11345_v37 = vmul.f32 %v18309_v41, %v11343_v30  ;;  %vm11351_vm0 = vweird.f32 %v18309_v41 }
 0xcc3   :  { %vm11352_vm14 = vmor %vm11350_vm1, %vm11351_vm0 }
 0xcc4   :  { %v11346_v5 = vmul.f32 %v18309_v41, %v11345_v37 }
 0xcc6   :  { %v11347_v42 = vmul.f32 0.5, %v11346_v5 }
 0xcc8   :  { %v11348_v36 = vsub.f32 1.5, %v11347_v42 }
 0xcca   :  { %v11349_v13 = vmul.f32 %v18309_v41, %v11348_v36 }
 0xccc   :  { %v11353_v26 = vsel %vm11352_vm14, %v18309_v41, %v11349_v13 }
 0xccd   :  { %v11354_v56 = vmul.f32 %v11353_v26, %v11341_v45 }
 0xccf   :  { %v11355_v50 = vmul.f32 %v11354_v56, %v11331_v44 }
 0xcd1   :  { %v11356_v16 = vadd.f32 %v11355_v50, %v11342_v7 }
 0xcd3   :  { %v11357_v21 = vmax.f32 %v11356_v16, 0.0 }
 0xcd5   :  { %16885 = vmatmul.msk.f32.vlgmr.msrb.gmra.mxu3 %vm11322_vm13, %v11357_v21 }
 0xd58   :  { %v11383_v39 = vpop.f32.mrf.mxu3 }
 0xd59   :  { %v11384_v59 = vadd.f32 %v11383_v39, %v11362_v3 }
 0xd5b   :  { %11387 = vst.msk [vmem:[%s19226_s9] sm:$0xff] %vm11386_vm15, %v11384_v59 }
 0xd5c   :  { %11392 = vsyncpa [#allocation3], 1 }
 0xd5d   :  { %11393 = vsyncpa [#allocation5], 1 }
 0xd5e   :  { %11394 = vsyncpa [#allocation8], 1 }
 0xd5f   :  { %11395 = vsyncpa [#allocation11], 1 }

</bundles_post_ra>
